<compile_context>
chip_gen: v5e
topology: v5e:2x2
jax: 0.10.0
libtpu: 0.0.40
codegen_flags: <defaults>
</compile_context>

<pallas_src>
import functools

import jax
import jax.numpy as jnp
from jax.experimental import pallas as pl
from jax.experimental.pallas import tpu as pltpu

H_DIM = 400


def discriminator_kernel(x_ref,
                         w1_ref, b1_ref,
                         w2_ref, b2_ref,
                         w3_ref, b3_ref,
                         w4t_ref, b4_ref,
                         out_ref):
    x = x_ref[...]                       # (T, 2) f32
    w1 = w1_ref[...]                     # (2, 400) f32

    # Layer 1 (K=2): two broadcast FMAs on the VPU instead of a 99%-padded
    # MXU contraction.
    h = x[:, 0:1] * w1[0:1, :] + x[:, 1:2] * w1[1:2, :] + b1_ref[...]
    h = jnp.maximum(h, 0.0)

    # Layers 2 & 3: bf16 MXU matmuls, f32 accumulate, f32 bias/ReLU on the VPU.
    h = jnp.dot(h.astype(jnp.bfloat16), w2_ref[...],
                preferred_element_type=jnp.float32)
    h = jnp.maximum(h + b2_ref[...], 0.0)

    h = jnp.dot(h.astype(jnp.bfloat16), w3_ref[...],
                preferred_element_type=jnp.float32)
    h = jnp.maximum(h + b3_ref[...], 0.0)

    # Layer 4 (400 -> 1): f32 VPU multiply + lane reduction (an N=1 MXU matmul
    # would waste >99% of the MXU and pay a full result-FIFO drain), then a
    # cheap (T,1)->(1,T) XLU transpose so the store is one lane-dense row.
    logit = jnp.sum(h * w4t_ref[...], axis=-1, keepdims=True)   # (T, 1) f32
    row = logit.T + b4_ref[...]                                 # (1, T)
    out_ref[...] = jax.nn.sigmoid(row).astype(out_ref.dtype)


@functools.partial(jax.jit, static_argnames=("batch_tile",))
def discriminator_forward(x, params, batch_tile=None):
    """x: (B, 2) float32.  Returns sigmoid probabilities of shape (B,)."""
    B, in_dim = x.shape
    assert in_dim == 2

    if batch_tile is None:
        if B <= 1024:
            # Single grid step: no per-step overhead, and on v7x no duplicate
            # weight DMA from sharding a weight-bandwidth-bound kernel.
            batch_tile = max(128, ((B + 127) // 128) * 128)
        else:
            # Large batches: 512-row tiles run near the HBM roofline.
            batch_tile = 512
    # Multiple of 128: lane-dense output row; also >= bf16 (16,128) sublane pack.
    assert batch_tile % 128 == 0, "batch_tile must be a multiple of 128"

    # Pad the batch up to a multiple of batch_tile; padded rows are discarded.
    b_pad = ((B + batch_tile - 1) // batch_tile) * batch_tile
    if b_pad != B:
        x = jnp.pad(x, ((0, b_pad - B), (0, 0)))
    num_tiles = b_pad // batch_tile

    # Layer-1 weights / all biases stay f32 (tiny; layer 1 runs on the VPU).
    w1 = params["w1"].astype(jnp.float32)          # (2, 400)
    b1 = params["b1"].astype(jnp.float32)          # (1, 400)
    # MXU-layer weights go in as bf16 (halves weight DMA, native MXU dtype).
    w2 = params["w2"].astype(jnp.bfloat16)         # (400, 400)
    b2 = params["b2"].astype(jnp.float32)
    w3 = params["w3"].astype(jnp.bfloat16)
    b3 = params["b3"].astype(jnp.float32)
    # Final layer stays f32 and is pre-transposed to a (1, 400) row for the
    # in-kernel VPU multiply + lane reduction.
    w4t = params["w4"].astype(jnp.float32).T       # (1, 400)
    b4 = params["b4"].astype(jnp.float32)          # (1, 1)

    def rep(i):  # replicated (grid-invariant) 2-D operand
        return (0, 0)

    in_specs = [
        pl.BlockSpec((batch_tile, 2), lambda i: (i, 0)),          # x tile
        pl.BlockSpec(w1.shape, rep), pl.BlockSpec(b1.shape, rep),
        pl.BlockSpec(w2.shape, rep), pl.BlockSpec(b2.shape, rep),
        pl.BlockSpec(w3.shape, rep), pl.BlockSpec(b3.shape, rep),
        pl.BlockSpec(w4t.shape, rep), pl.BlockSpec(b4.shape, rep),
    ]
    # Lane-dense output: one (1, batch_tile) row per grid step.
    out_spec = pl.BlockSpec((1, batch_tile), lambda i: (i, 0))

    compiler_kwargs = dict(dimension_semantics=("parallel",))
    if batch_tile > 512:
        # Only very large tiles need more scoped VMEM; cap generation-aware
        # (64 MiB would be the *entire* physical VMEM of a v7x TensorCore).
        try:
            vmem_cap = int(pltpu.get_tpu_info().vmem_capacity_bytes)
        except Exception:
            vmem_cap = 128 * 1024 * 1024
        compiler_kwargs["vmem_limit_bytes"] = min(64 * 1024 * 1024,
                                                  (vmem_cap * 3) // 4)

    out = pl.pallas_call(
        discriminator_kernel,
        out_shape=jax.ShapeDtypeStruct((num_tiles, batch_tile), jnp.float32),
        grid_spec=pltpu.PrefetchScalarGridSpec(
            num_scalar_prefetch=0,
            grid=(num_tiles,),
            in_specs=in_specs,
            out_specs=out_spec,
        ),
        compiler_params=pltpu.CompilerParams(**compiler_kwargs),
    )(x, w1, b1, w2, b2, w3, b3, w4t, b4)

    return out.reshape(-1)[:B]   # matches torch `output.view(-1)`


def init_params(key):
    """PyTorch nn.Linear default init. Weights stored transposed as
    (in_features, out_features); biases as (1, out_features). All float32."""
    dims = [(2, H_DIM), (H_DIM, H_DIM), (H_DIM, H_DIM), (H_DIM, 1)]
    params = {}
    for idx, (fan_in, fan_out) in enumerate(dims, start=1):
        key, kw, kb = jax.random.split(key, 3)
        bound = 1.0 / jnp.sqrt(jnp.float32(fan_in))
        params[f"w{idx}"] = jax.random.uniform(
            kw, (fan_in, fan_out), jnp.float32, -bound, bound)
        params[f"b{idx}"] = jax.random.uniform(
            kb, (1, fan_out), jnp.float32, -bound, bound)
    return params


def discriminator_reference(x, params):
    """Pure-JAX f32 reference for correctness checking."""
    h = jnp.maximum(x @ params["w1"] + params["b1"], 0.0)
    h = jnp.maximum(h @ params["w2"] + params["b2"], 0.0)
    h = jnp.maximum(h @ params["w3"] + params["b3"], 0.0)
    logits = h @ params["w4"] + params["b4"]
    return jax.nn.sigmoid(logits).reshape(-1)


if __name__ == "__main__":
    key = jax.random.PRNGKey(0)
    key, kx = jax.random.split(key)

    # B=256 -> default batch_tile=256 -> a single grid step (no duplicated
    # weight DMA on v7x, no second pipeline prologue on v5e/v6e).
    B = 256
    x = jax.random.normal(kx, (B, 2), jnp.float32)

    params = init_params(key)

    out = discriminator_forward(x, params)
    out = jax.block_until_ready(out)

    ref = discriminator_reference(x, params)
    assert out.shape == (B,), out.shape
    max_err = jnp.max(jnp.abs(out - ref))
    # Layers 2-3 use bf16 weights/activations on the MXU (f32 accumulate);
    # layer 4 is f32, so sigmoid output error vs. the f32 reference stays
    # well below this tolerance.
    assert jnp.allclose(out, ref, atol=2e-2), f"max abs err {max_err}"

    print("KERNEL_OK")
</pallas_src>

<mosaic_0001>
module attributes {stable_mosaic.version = 11 : i64} {
  func.func @discriminator_kernel(%arg0: i32, %arg1: memref<256x2xf32, #tpu.memory_space<vmem>>, %arg2: memref<2x400xf32, #tpu.memory_space<vmem>>, %arg3: memref<1x400xf32, #tpu.memory_space<vmem>>, %arg4: memref<400x400xbf16, #tpu.memory_space<vmem>>, %arg5: memref<1x400xf32, #tpu.memory_space<vmem>>, %arg6: memref<400x400xbf16, #tpu.memory_space<vmem>>, %arg7: memref<1x400xf32, #tpu.memory_space<vmem>>, %arg8: memref<1x400xf32, #tpu.memory_space<vmem>>, %arg9: memref<1x1xf32, #tpu.memory_space<vmem>>, %arg10: memref<1x256xf32, #tpu.memory_space<vmem>>) attributes {dimension_semantics = [#tpu.dimension_semantics<parallel>], iteration_bounds = array<i64: 1>, scalar_prefetch = 0 : i64, scratch_operands = 0 : i64, tpu.core_type = #tpu.core_type<tc>, window_params = [{transform_indices = @transform_0, window_bounds = array<i64: 256, 2>}, {pipeline_mode = #tpu.pipeline_mode<synchronous>, transform_indices = @transform_1, window_bounds = array<i64: 2, 400>}, {pipeline_mode = #tpu.pipeline_mode<synchronous>, transform_indices = @transform_2, window_bounds = array<i64: 1, 400>}, {pipeline_mode = #tpu.pipeline_mode<synchronous>, transform_indices = @transform_3, window_bounds = array<i64: 400, 400>}, {pipeline_mode = #tpu.pipeline_mode<synchronous>, transform_indices = @transform_4, window_bounds = array<i64: 1, 400>}, {pipeline_mode = #tpu.pipeline_mode<synchronous>, transform_indices = @transform_5, window_bounds = array<i64: 400, 400>}, {pipeline_mode = #tpu.pipeline_mode<synchronous>, transform_indices = @transform_6, window_bounds = array<i64: 1, 400>}, {pipeline_mode = #tpu.pipeline_mode<synchronous>, transform_indices = @transform_7, window_bounds = array<i64: 1, 400>}, {pipeline_mode = #tpu.pipeline_mode<synchronous>, transform_indices = @transform_8, window_bounds = array<i64: 1, 1>}, {transform_indices = @transform_9, window_bounds = array<i64: 1, 256>}]} {
    %c0 = arith.constant 0 : index
    %c0_0 = arith.constant 0 : index
    %0 = vector.load %arg1[%c0, %c0_0] : memref<256x2xf32, #tpu.memory_space<vmem>>, vector<256x2xf32>
    %c0_1 = arith.constant 0 : index
    %c0_2 = arith.constant 0 : index
    %1 = vector.load %arg2[%c0_1, %c0_2] : memref<2x400xf32, #tpu.memory_space<vmem>>, vector<2x400xf32>
    %2 = vector.extract_strided_slice %0 {offsets = [0, 0], sizes = [256, 1], strides = [1, 1]} : vector<256x2xf32> to vector<256x1xf32>
    %3 = vector.extract_strided_slice %1 {offsets = [0, 0], sizes = [1, 400], strides = [1, 1]} : vector<2x400xf32> to vector<1x400xf32>
    %4 = vector.broadcast %2 : vector<256x1xf32> to vector<256x400xf32>
    %5 = vector.broadcast %3 : vector<1x400xf32> to vector<256x400xf32>
    %6 = arith.mulf %4, %5 : vector<256x400xf32>
    %7 = vector.extract_strided_slice %0 {offsets = [0, 1], sizes = [256, 1], strides = [1, 1]} : vector<256x2xf32> to vector<256x1xf32>
    %8 = vector.extract_strided_slice %1 {offsets = [1, 0], sizes = [1, 400], strides = [1, 1]} : vector<2x400xf32> to vector<1x400xf32>
    %9 = vector.broadcast %7 : vector<256x1xf32> to vector<256x400xf32>
    %10 = vector.broadcast %8 : vector<1x400xf32> to vector<256x400xf32>
    %11 = arith.mulf %9, %10 : vector<256x400xf32>
    %12 = arith.addf %6, %11 : vector<256x400xf32>
    %c0_3 = arith.constant 0 : index
    %c0_4 = arith.constant 0 : index
    %13 = vector.load %arg3[%c0_3, %c0_4] : memref<1x400xf32, #tpu.memory_space<vmem>>, vector<1x400xf32>
    %14 = vector.broadcast %13 : vector<1x400xf32> to vector<256x400xf32>
    %15 = arith.addf %12, %14 : vector<256x400xf32>
    %cst = arith.constant 0.000000e+00 : f32
    %16 = vector.broadcast %cst : f32 to vector<256x400xf32>
    %17 = arith.maximumf %15, %16 : vector<256x400xf32>
    %18 = arith.truncf %17 : vector<256x400xf32> to vector<256x400xbf16>
    %c0_5 = arith.constant 0 : index
    %c0_6 = arith.constant 0 : index
    %19 = vector.load %arg4[%c0_5, %c0_6] : memref<400x400xbf16, #tpu.memory_space<vmem>>, vector<400x400xbf16>
    %cst_7 = arith.constant dense<0.000000e+00> : vector<256x400xf32>
    %20 = tpu.matmul %18, %19, %cst_7 {dimension_numbers = #tpu.dot_dimension_numbers<[1], [0], [0], [1], [0, 0, 1, 1], [], []>} : vector<256x400xbf16>, vector<400x400xbf16>, vector<256x400xf32> -> vector<256x400xf32>
    %c0_8 = arith.constant 0 : index
    %c0_9 = arith.constant 0 : index
    %21 = vector.load %arg5[%c0_8, %c0_9] : memref<1x400xf32, #tpu.memory_space<vmem>>, vector<1x400xf32>
    %22 = vector.broadcast %21 : vector<1x400xf32> to vector<256x400xf32>
    %23 = arith.addf %20, %22 : vector<256x400xf32>
    %cst_10 = arith.constant 0.000000e+00 : f32
    %24 = vector.broadcast %cst_10 : f32 to vector<256x400xf32>
    %25 = arith.maximumf %23, %24 : vector<256x400xf32>
    %26 = arith.truncf %25 : vector<256x400xf32> to vector<256x400xbf16>
    %c0_11 = arith.constant 0 : index
    %c0_12 = arith.constant 0 : index
    %27 = vector.load %arg6[%c0_11, %c0_12] : memref<400x400xbf16, #tpu.memory_space<vmem>>, vector<400x400xbf16>
    %cst_13 = arith.constant dense<0.000000e+00> : vector<256x400xf32>
    %28 = tpu.matmul %26, %27, %cst_13 {dimension_numbers = #tpu.dot_dimension_numbers<[1], [0], [0], [1], [0, 0, 1, 1], [], []>} : vector<256x400xbf16>, vector<400x400xbf16>, vector<256x400xf32> -> vector<256x400xf32>
    %c0_14 = arith.constant 0 : index
    %c0_15 = arith.constant 0 : index
    %29 = vector.load %arg7[%c0_14, %c0_15] : memref<1x400xf32, #tpu.memory_space<vmem>>, vector<1x400xf32>
    %30 = vector.broadcast %29 : vector<1x400xf32> to vector<256x400xf32>
    %31 = arith.addf %28, %30 : vector<256x400xf32>
    %cst_16 = arith.constant 0.000000e+00 : f32
    %32 = vector.broadcast %cst_16 : f32 to vector<256x400xf32>
    %33 = arith.maximumf %31, %32 : vector<256x400xf32>
    %c0_17 = arith.constant 0 : index
    %c0_18 = arith.constant 0 : index
    %34 = vector.load %arg8[%c0_17, %c0_18] : memref<1x400xf32, #tpu.memory_space<vmem>>, vector<1x400xf32>
    %35 = vector.broadcast %34 : vector<1x400xf32> to vector<256x400xf32>
    %36 = arith.mulf %33, %35 : vector<256x400xf32>
    %cst_19 = arith.constant dense<0.000000e+00> : vector<256xf32>
    %37 = vector.multi_reduction <add>, %36, %cst_19 [1] : vector<256x400xf32> to vector<256xf32>
    %38 = vector.shape_cast %37 : vector<256xf32> to vector<256x1xf32>
    %39 = tpu.transpose %38, [1, 0] : vector<256x1xf32> -> vector<1x256xf32>
    %c0_20 = arith.constant 0 : index
    %c0_21 = arith.constant 0 : index
    %40 = vector.load %arg9[%c0_20, %c0_21] : memref<1x1xf32, #tpu.memory_space<vmem>>, vector<1x1xf32>
    %41 = vector.broadcast %40 : vector<1x1xf32> to vector<1x256xf32>
    %42 = arith.addf %39, %41 : vector<1x256xf32>
    %43 = arith.negf %42 : vector<1x256xf32>
    %44 = math.exp %43 : vector<1x256xf32>
    %cst_22 = arith.constant 1.000000e+00 : f32
    %45 = vector.broadcast %cst_22 : f32 to vector<1x256xf32>
    %46 = arith.addf %45, %44 : vector<1x256xf32>
    %47 = arith.divf %45, %46 : vector<1x256xf32>
    %c0_23 = arith.constant 0 : index
    %c0_24 = arith.constant 0 : index
    %48 = vector.load %arg10[%c0_23, %c0_24] : memref<1x256xf32, #tpu.memory_space<vmem>>, vector<1x256xf32>
    tpu.vector_store %arg10[%c0_23, %c0_24], %47 {strides = array<i32>} : memref<1x256xf32, #tpu.memory_space<vmem>>, vector<1x256xf32>,
    return
  }
  func.func @transform_0(%arg0: i32) -> (i32, i32) {
    %c0_i32 = arith.constant 0 : i32
    %c0_i32_0 = arith.constant 0 : i32
    return %arg0, %c0_i32 : i32, i32
  }
  func.func @transform_1(%arg0: i32) -> (i32, i32) {
    %c0_i32 = arith.constant 0 : i32
    %c0_i32_0 = arith.constant 0 : i32
    %c0_i32_1 = arith.constant 0 : i32
    return %c0_i32, %c0_i32_0 : i32, i32
  }
  func.func @transform_2(%arg0: i32) -> (i32, i32) {
    %c0_i32 = arith.constant 0 : i32
    %c0_i32_0 = arith.constant 0 : i32
    %c0_i32_1 = arith.constant 0 : i32
    return %c0_i32, %c0_i32_0 : i32, i32
  }
  func.func @transform_3(%arg0: i32) -> (i32, i32) {
    %c0_i32 = arith.constant 0 : i32
    %c0_i32_0 = arith.constant 0 : i32
    %c0_i32_1 = arith.constant 0 : i32
    return %c0_i32, %c0_i32_0 : i32, i32
  }
  func.func @transform_4(%arg0: i32) -> (i32, i32) {
    %c0_i32 = arith.constant 0 : i32
    %c0_i32_0 = arith.constant 0 : i32
    %c0_i32_1 = arith.constant 0 : i32
    return %c0_i32, %c0_i32_0 : i32, i32
  }
  func.func @transform_5(%arg0: i32) -> (i32, i32) {
    %c0_i32 = arith.constant 0 : i32
    %c0_i32_0 = arith.constant 0 : i32
    %c0_i32_1 = arith.constant 0 : i32
    return %c0_i32, %c0_i32_0 : i32, i32
  }
  func.func @transform_6(%arg0: i32) -> (i32, i32) {
    %c0_i32 = arith.constant 0 : i32
    %c0_i32_0 = arith.constant 0 : i32
    %c0_i32_1 = arith.constant 0 : i32
    return %c0_i32, %c0_i32_0 : i32, i32
  }
  func.func @transform_7(%arg0: i32) -> (i32, i32) {
    %c0_i32 = arith.constant 0 : i32
    %c0_i32_0 = arith.constant 0 : i32
    %c0_i32_1 = arith.constant 0 : i32
    return %c0_i32, %c0_i32_0 : i32, i32
  }
  func.func @transform_8(%arg0: i32) -> (i32, i32) {
    %c0_i32 = arith.constant 0 : i32
    %c0_i32_0 = arith.constant 0 : i32
    %c0_i32_1 = arith.constant 0 : i32
    return %c0_i32, %c0_i32_0 : i32, i32
  }
  func.func @transform_9(%arg0: i32) -> (i32, i32) {
    %c0_i32 = arith.constant 0 : i32
    %c0_i32_0 = arith.constant 0 : i32
    return %arg0, %c0_i32 : i32, i32
  }
}

</mosaic_0001>

<bundles_post_ra>
// kernel: discriminator_forward.1
= control target key start
LH: loop header
LB: loop body
LE: loop exit
PB: predicated region body
PF: predicated region fallthrough
CT: control target
= control target key end

     0   :  { %s10790_s0 = inlined_call_operand.vmem [shape: f32[256,2], index: 0, kind: input, shape index: {}]   ;;  %s10791_s1 = inlined_call_operand.vmem [shape: f32[2,400], index: 1, kind: input, shape index: {}]   ;;  %s10792_s2 = inlined_call_operand.vmem [shape: f32[1,400], index: 2, kind: input, shape index: {}]   ;;  %s10793_s3 = inlined_call_operand.vmem [shape: bf16[400,400], index: 3, kind: input, shape index: {}]   ;;  %s10794_s4 = inlined_call_operand.vmem [shape: f32[1,400], index: 4, kind: input, shape index: {}]   ;;  %s10795_s5 = inlined_call_operand.vmem [shape: bf16[400,400], index: 5, kind: input, shape index: {}]   ;;  %s10796_s6 = inlined_call_operand.vmem [shape: f32[1,400], index: 6, kind: input, shape index: {}]   ;;  %s10797_s7 = inlined_call_operand.vmem [shape: f32[1,400], index: 7, kind: input, shape index: {}]   ;;  %s10798_s8 = inlined_call_operand.<no memory space> [shape: f32[1,1], index: 8, kind: input, shape index: {}]   ;;  %s10799_s9 = inlined_call_operand.hbm [shape: f32[1,256], index: 9, kind: output, shape index: {}]  }
   0x1   :  { %v14_v0 = vstv %s10798_s8 }
   0x2   :  { %15 = vst [vmem:[#allocation2] sm:$0x1] %v14_v0 }
   0x3   :  { %v36_v1 = vld [vmem:[%s10790_s0] sm:$0xff]  ;;  %v7259_v2 = vmov 1   ;;  %v10800_v3 = vmov 0   ;;  %v38_v4 = vld [vmem:[%s10790_s0 + $0x10] sm:$0xff] }
   0x4   :  { %7183 = vset.pattern.permute.xlu1 %v7259_v2  ;;  %7182 = vset.pattern.permute.xlu0 %v10800_v3 }
   0x5   :  { %371 = vperm.xlu1 %7183, %v36_v1   ;;  %71 = vperm.xlu0 %7182, %v36_v1  }
   0x6   :  { %16 = vsyncpa [#allocation4], 0  ;;  %7184 = vset.pattern.permute.xlu2 %v10800_v3  ;;  %v37_v5 = vld [vmem:[%s10790_s0 + $0x8] sm:$0xff]  ;;  %v39_v6 = vld [vmem:[%s10790_s0 + $0x18] sm:$0xff]  ;;  %vm1706_vm0 = vcmask 130048   ;;  %s6040_s10 = sshll.u32 %s10799_s9, 4  ;;  %s6041_s10 = int_to_ptr.hbm [resolvable:$true] %s6040_s10 }
   0x7   :  { %81 = vperm.xlu2 %7184, %v38_v4   ;;  %v40_v7 = vld [vmem:[%s10790_s0 + $0x20] sm:$0xff]  ;;  %v41_v8 = vld [vmem:[%s10790_s0 + $0x28] sm:$0xff]  ;;  %v42_v9 = vld [vmem:[%s10790_s0 + $0x30] sm:$0xff]  ;;  %vm6025_vm8 = vcmask 1040384  }
   0x8   :  { %v43_v10 = vld [vmem:[%s10790_s0 + $0x38] sm:$0xff]  ;;  %v45_v11 = vld [vmem:[%s10790_s0 + $0x48] sm:$0xff]  ;;  %v44_v12 = vld [vmem:[%s10790_s0 + $0x40] sm:$0xff] }
   0x9   :  { %v46_v13 = vld [vmem:[%s10790_s0 + $0x50] sm:$0xff]  ;;  %v49_v14 = vld [vmem:[%s10790_s0 + $0x68] sm:$0xff]  ;;  %v47_v15 = vld [vmem:[%s10790_s0 + $0x58] sm:$0xff] }
   0xa   :  { %v6163_v16 = vld [vmem:[%s10793_s3 + $0xe0] sm:$0xf]  ;;  %v7009_v17 = vld [vmem:[%s10793_s3 + $0xec] sm:$0xf0]  ;;  %v51_v61 = vld [vmem:[%s10790_s0 + $0x78] sm:$0xff] }
   0xb   :  { %v6164_v18 = vor.u32 %v7009_v17, %v6163_v16  ;;  %v6291_v19 = vld [vmem:[%s10793_s3 + $0x1e0] sm:$0xf]  ;;  %v7041_v20 = vld [vmem:[%s10793_s3 + $0x1ec] sm:$0xf0]  ;;  %v53_v0 = vld [vmem:[%s10790_s0 + $0x88] sm:$0xff] }
   0xc   :  { %v6419_v21 = vld [vmem:[%s10793_s3 + $0x2e0] sm:$0xf]  ;;  %v6292_v22 = vor.u32 %v7041_v20, %v6291_v19  ;;  %v7073_v23 = vld [vmem:[%s10793_s3 + $0x2ec] sm:$0xf0] }
   0xd   :  { %375 = vperm.xlu1 %7183, %v37_v5   ;;  %76 = vperm.xlu0 %7182, %v37_v5   ;;  %v6147_v24 = vld [vmem:[%s10793_s3 + $0xc0] sm:$0xf]  ;;  %v6420_v25 = vor.u32 %v7073_v23, %v6419_v21  ;;  %v7005_v26 = vld [vmem:[%s10793_s3 + $0xcc] sm:$0xf0] }
   0xe   :  { %1755 = vmatpush.bf16.msra.mxu0 %v6164_v18  ;;  %v50_v27 = vld [vmem:[%s10790_s0 + $0x70] sm:$0xff]  ;;  %1844 = vmatpush.bf16.msra.mxu1 %v6292_v22  ;;  %v6148_v28 = vor.u32 %v7005_v26, %v6147_v24  ;;  %v6275_v29 = vld [vmem:[%s10793_s3 + $0x1c0] sm:$0xf] }
   0xf   :  { %86 = vperm.xlu2 %7184, %v39_v6   ;;  %v7037_v30 = vld [vmem:[%s10793_s3 + $0x1cc] sm:$0xf0]  ;;  %v48_v31 = vld [vmem:[%s10790_s0 + $0x60] sm:$0xff]  ;;  %1933 = vmatpush.bf16.msra.mxu2 %v6420_v25 }
  0x10   :  { %v6276_v32 = vor.u32 %v7037_v30, %v6275_v29  ;;  %v6403_v33 = vld [vmem:[%s10793_s3 + $0x2c0] sm:$0xf]  ;;  %v7069_v34 = vld [vmem:[%s10793_s3 + $0x2cc] sm:$0xf0] }
  0x11   :  { %v6404_v35 = vor.u32 %v7069_v34, %v6403_v33  ;;  %v6131_v36 = vld [vmem:[%s10793_s3 + $0xa0] sm:$0xf]  ;;  %v7001_v37 = vld [vmem:[%s10793_s3 + $0xac] sm:$0xf0] }
  0x12   :  { %1756 = vmatpush.bf16.msra.mxu0 %v6148_v28  ;;  %1845 = vmatpush.bf16.msra.mxu1 %v6276_v32  ;;  %v6259_v38 = vld [vmem:[%s10793_s3 + $0x1a0] sm:$0xf]  ;;  %v6132_v39 = vor.u32 %v7001_v37, %v6131_v36  ;;  %v7033_v40 = vld [vmem:[%s10793_s3 + $0x1ac] sm:$0xf0]  ;;  %v6165_v36 = vld [vmem:[%s10793_s3 + $0xf0] sm:$0xf0] }
  0x13   :  { %v6387_v41 = vld [vmem:[%s10793_s3 + $0x2a0] sm:$0xf]  ;;  %v7065_v42 = vld [vmem:[%s10793_s3 + $0x2ac] sm:$0xf0]  ;;  %1934 = vmatpush.bf16.msra.mxu2 %v6404_v35  ;;  %v6260_v43 = vor.u32 %v7033_v40, %v6259_v38  ;;  %v7007_v35 = vld [vmem:[%s10793_s3 + $0xe4] sm:$0xf] }
  0x14   :  { %v6388_v44 = vor.u32 %v7065_v42, %v6387_v41  ;;  %v6115_v45 = vld [vmem:[%s10793_s3 + $0x80] sm:$0xf]  ;;  %v6997_v46 = vld [vmem:[%s10793_s3 + $0x8c] sm:$0xf0]  ;;  %v7552_v37 = vld [vmem:[%s10790_s0 + $0xa8] sm:$0xff]  ;;  %v6168_v41 = vor.u32 %v7007_v35, %v6165_v36 }
  0x15   :  { %383 = vperm.xlu1 %7183, %v39_v6   ;;  %7185 = vset.pattern.permute.xlu0 %v7259_v2  ;;  %v6243_v47 = vld [vmem:[%s10793_s3 + $0x180] sm:$0xf]  ;;  %v6116_v48 = vor.u32 %v6997_v46, %v6115_v45  ;;  %v7029_v49 = vld [vmem:[%s10793_s3 + $0x18c] sm:$0xf0]  ;;  %v6437_v40 = vld [vmem:[%s10793_s3 + $0x310] sm:$0xf0] }
  0x16   :  { %379 = vperm.xlu0 %7185, %v38_v4   ;;  %1757 = vmatpush.bf16.msra.mxu0 %v6132_v39  ;;  %v6371_v50 = vld [vmem:[%s10793_s3 + $0x280] sm:$0xf]  ;;  %v7061_v51 = vld [vmem:[%s10793_s3 + $0x28c] sm:$0xf0]  ;;  %v6244_v52 = vor.u32 %v7029_v49, %v6243_v47  ;;  %v7075_v39 = vld [vmem:[%s10793_s3 + $0x304] sm:$0xf] }
  0x17   :  { %91 = vperm.xlu2 %7184, %v40_v7   ;;  %1846 = vmatpush.bf16.msra.mxu1 %v6260_v43  ;;  %v6372_v53 = vor.u32 %v7061_v51, %v6371_v50  ;;  %v6099_v54 = vld [vmem:[%s10793_s3 + $0x60] sm:$0xf]  ;;  %v6993_v55 = vld [vmem:[%s10793_s3 + $0x6c] sm:$0xf0]  ;;  %v6440_v42 = vor.u32 %v7075_v39, %v6437_v40  ;;  %v55_v49 = vld [vmem:[%s10790_s0 + $0x98] sm:$0xff] }
  0x18   :  { %1935 = vmatpush.bf16.msra.mxu2 %v6388_v44  ;;  %v6227_v56 = vld [vmem:[%s10793_s3 + $0x160] sm:$0xf]  ;;  %v6100_v57 = vor.u32 %v6993_v55, %v6099_v54  ;;  %v7025_v58 = vld [vmem:[%s10793_s3 + $0x16c] sm:$0xf0]  ;;  %v7039_v54 = vld [vmem:[%s10793_s3 + $0x1e4] sm:$0xf] }
  0x19   :  { %v6355_v59 = vld [vmem:[%s10793_s3 + $0x260] sm:$0xf]  ;;  %v7057_v60 = vld [vmem:[%s10793_s3 + $0x26c] sm:$0xf0]  ;;  %v6228_v62 = vor.u32 %v7025_v58, %v6227_v56  ;;  %v6293_v55 = vld [vmem:[%s10793_s3 + $0x1f0] sm:$0xf0] }
  0x1a   :  { %1758 = vmatpush.bf16.msra.mxu0 %v6116_v48  ;;  %v6356_v63 = vor.u32 %v7057_v60, %v6355_v59  ;;  %v6083_v1 = vld [vmem:[%s10793_s3 + $0x40] sm:$0xf]  ;;  %v6989_v4 = vld [vmem:[%s10793_s3 + $0x4c] sm:$0xf0]  ;;  %v7071_v56 = vld [vmem:[%s10793_s3 + $0x2e4] sm:$0xf] }
  0x1b   :  { %1847 = vmatpush.bf16.msra.mxu1 %v6244_v52  ;;  %v6211_v5 = vld [vmem:[%s10793_s3 + $0x140] sm:$0xf]  ;;  %v6084_v6 = vor.u32 %v6989_v4, %v6083_v1  ;;  %v7049_v17 = vld [vmem:[%s10793_s3 + $0x22c] sm:$0xf0] }
  0x1c   :  { %1936 = vmatpush.bf16.msra.mxu2 %v6372_v53  ;;  %v6323_v16 = vld [vmem:[%s10793_s3 + $0x220] sm:$0xf]  ;;  %v6981_v23 = vld [vmem:[%s10793_s3 + $0xc] sm:$0xf0] }
  0x1d   :  { %7186 = vset.pattern.permute.xlu1 %v10800_v3  ;;  %v52_v20 = vld [vmem:[%s10790_s0 + $0x80] sm:$0xff]  ;;  %v6324_v21 = vor.u32 %v7049_v17, %v6323_v16  ;;  %v7013_v26 = vld [vmem:[%s10793_s3 + $0x10c] sm:$0xf0] }
  0x1e   :  { %96 = vperm.xlu1 %7186, %v41_v8   ;;  %391 = vperm.xlu0 %7185, %v41_v8   ;;  %v6339_v8 = vld [vmem:[%s10793_s3 + $0x240] sm:$0xf]  ;;  %v7045_v28 = vld [vmem:[%s10793_s3 + $0x20c] sm:$0xf0] }
  0x1f   :  { %7187 = vset.pattern.permute.xlu2 %v7259_v2  ;;  %1759 = vmatpush.bf16.msra.mxu0 %v6100_v57  ;;  %v6051_v22 = vld [vmem:[%s10793_s3] sm:$0xf]  ;;  %v54_v29 = vld [vmem:[%s10790_s0 + $0x90] sm:$0xff] }
  0x20   :  { %387 = vperm.xlu2 %7187, %v40_v7   ;;  %1848 = vmatpush.bf16.msra.mxu1 %v6228_v62  ;;  %v7021_v7 = vld [vmem:[%s10793_s3 + $0x14c] sm:$0xf0]  ;;  %v6179_v24 = vld [vmem:[%s10793_s3 + $0x100] sm:$0xf]  ;;  %v6052_v25 = vor.u32 %v6981_v23, %v6051_v22  ;;  %v6421_v57 = vld [vmem:[%s10793_s3 + $0x2f0] sm:$0xf0] }
  0x21   :  { %1937 = vmatpush.bf16.msra.mxu2 %v6356_v63  ;;  %v6180_v30 = vor.u32 %v7013_v26, %v6179_v24  ;;  %v7077_v32 = vld [vmem:[%s10793_s3 + $0x30c] sm:$0xf0]  ;;  %v68_v38 = vld [vmem:[%s10791_s1] sm:$0xff] }
  0x22   :  { %v230_v43 = vperm.slane %v68_v38, 0  ;;  %v231_v44 = vperm.slane %v68_v38, 2  ;;  %v232_v45 = vperm.slane %v68_v38, 4  ;;  %v233_v46 = vperm.slane %v68_v38, 6  ;;  %v7588_v60 = vld [vmem:[%s10790_s0 + $0xb0] sm:$0xff] }
  0x23   :  { %1760 = vmatpush.bf16.msra.mxu0 %v6084_v6  ;;  %v498_v47 = vperm.slane %v68_v38, 1  ;;  %v499_v48 = vperm.slane %v68_v38, 3  ;;  %v500_v50 = vperm.slane %v68_v38, 5  ;;  %v501_v51 = vperm.slane %v68_v38, 7 }
  0x24   :  { %v7581_v58 = vperm.slane %v230_v43, 0  ;;  %v7583_v59 = vperm.slane %v231_v44, 0  ;;  %v7597_v1 = vperm.slane %v233_v46, 0  ;;  %v6424_v6 = vor.u32 %v7071_v56, %v6421_v57  ;;  %v56_v44 = vld [vmem:[%s10790_s0 + $0xa0] sm:$0xff] }
  0x25   :  { %v7592_v62 = vperm.slane %v498_v47, 1  ;;  %v7594_v63 = vperm.slane %v499_v48, 1  ;;  %v7599_v4 = vperm.slane %v500_v50, 1 }
  0x26   :  { %101 = vperm.xlu1 %7186, %v42_v9   ;;  %395 = vperm.xlu0 %7185, %v42_v9   ;;  %v7053_v9 = vld [vmem:[%s10793_s3 + $0x24c] sm:$0xf0] }
  0x28   :  { %7188 = vset.pattern.permute.xlu2 %v10800_v3 }
  0x29   :  { %106 = vperm.xlu2 %7188, %v43_v10  }
  0x2e   :  { %7189 = vset.pattern.permute.xlu1 %v7259_v2  ;;  %7190 = vset.pattern.permute.xlu0 %v10800_v3 }
  0x2f   :  { %399 = vperm.xlu1 %7189, %v43_v10   ;;  %116 = vperm.xlu0 %7190, %v45_v11   ;;  %v6212_v10 = vor.u32 %v7021_v7, %v6211_v5  ;;  %v7601_v5 = vperm.slane %v501_v51, 1 }
  0x31   :  { %111 = vperm.xlu2 %7188, %v44_v12   ;;  %1849 = vmatpush.bf16.msra.mxu1 %v6212_v10 }
  0x37   :  { %403 = vperm.xlu1 %7189, %v44_v12   ;;  %7194 = vset.pattern.permute.xlu0 %v7259_v2  ;;  %v6067_v12 = vld [vmem:[%s10793_s3 + $0x20] sm:$0xf] }
  0x38   :  { %411 = vperm.xlu0 %7194, %v46_v13  }
  0x39   :  { %7191 = vset.pattern.permute.xlu2 %v7259_v2 }
  0x3a   :  { %407 = vperm.xlu2 %7191, %v45_v11   ;;  %v6340_v11 = vor.u32 %v7053_v9, %v6339_v8 }
  0x3c   :  { %1938 = vmatpush.bf16.msra.mxu2 %v6340_v11 }
  0x3f   :  { %7192 = vset.pattern.permute.xlu1 %v10800_v3 }
  0x40   :  { %121 = vperm.xlu1 %7192, %v46_v13   ;;  %423 = vperm.xlu0 %7194, %v49_v14   ;;  %v6985_v13 = vld [vmem:[%s10793_s3 + $0x2c] sm:$0xf0] }
  0x41   :  { %v6068_v18 = vor.u32 %v6985_v13, %v6067_v12  ;;  %1939 = vmatpush.bf16.msra.mxu2 %v6324_v21 }
  0x42   :  { %7193 = vset.pattern.permute.xlu2 %v10800_v3 }
  0x43   :  { %126 = vperm.xlu2 %7193, %v47_v15   ;;  %1761 = vmatpush.bf16.msra.mxu0 %v6068_v18 }
  0x47   :  { %1762 = vmatpush.bf16.msra.mxu0 %v6052_v25 }
  0x48   :  { %7195 = vset.pattern.permute.xlu1 %v7259_v2  ;;  %427 = vperm.xlu0 %7194, %v50_v27  }
  0x49   :  { %415 = vperm.xlu1 %7195, %v47_v15   ;;  %v7017_v15 = vld [vmem:[%s10793_s3 + $0x12c] sm:$0xf0] }
  0x4b   :  { %131 = vperm.xlu2 %7193, %v48_v31  }
  0x50   :  { %7200 = vset.pattern.permute.xlu0 %v10800_v3 }
  0x51   :  { %7196 = vset.pattern.permute.xlu1 %v10800_v3  ;;  %156 = vperm.xlu0 %7200, %v53_v0  }
  0x52   :  { %136 = vperm.xlu1 %7196, %v49_v14   ;;  %v6195_v14 = vld [vmem:[%s10793_s3 + $0x120] sm:$0xf] }
  0x53   :  { %7197 = vset.pattern.permute.xlu2 %v7259_v2  ;;  %v6196_v19 = vor.u32 %v7017_v15, %v6195_v14  ;;  %v766_v14 = vld [vmem:[%s10792_s2] sm:$0xf] }
  0x54   :  { %419 = vperm.xlu2 %7197, %v48_v31   ;;  %v6435_v31 = vld [vmem:[%s10793_s3 + $0x300] sm:$0xf]  ;;  %v7630_v35 = vperm.slane %v766_v14, 2  ;;  %v7632_v36 = vperm.slane %v766_v14, 3 }
  0x55   :  { %1850 = vmatpush.bf16.msra.mxu1 %v6196_v19  ;;  %v6436_v34 = vor.u32 %v7077_v32, %v6435_v31 }
  0x57   :  { %2029 = vmatpush.bf16.msra.mxu3 %v6436_v34 }
  0x59   :  { %7204 = vset.pattern.permute.xlu0 %v7259_v2  ;;  %1851 = vmatpush.bf16.msra.mxu1 %v6180_v30 }
  0x5a   :  { %141 = vperm.xlu1 %7196, %v50_v27   ;;  %v6307_v27 = vld [vmem:[%s10793_s3 + $0x200] sm:$0xf]  ;;  %443 = vperm.xlu0 %7204, %v54_v29  }
  0x5b   :  { %v6308_v33 = vor.u32 %v7045_v28, %v6307_v27  ;;  %2111 = vmatpush.bf16.msrb.mxu3 %v6168_v41  ;;  %v7625_v27 = vperm.slane %v766_v14, 0  ;;  %v7627_v28 = vperm.slane %v766_v14, 1 }
  0x5c   :  { %7198 = vset.pattern.permute.xlu2 %v10800_v3 }
  0x5d   :  { %146 = vperm.xlu2 %7198, %v51_v61   ;;  %1940 = vmatpush.bf16.msra.mxu2 %v6308_v33 }
  0x5e   :  { %2289 = vmatpush.bf16.msrb.mxu1 %v6424_v6 }
  0x61   :  { %2385 = vmatpush.bf16.msrb.mxu2 %v6440_v42  ;;  %v7604_v7 = vpop.permute.xlu2 %81 }
  0x62   :  { %7199 = vset.pattern.permute.xlu1 %v7259_v2  ;;  %455 = vperm.xlu0 %7204, %v7552_v37   ;;  %v250_v50 = vmul.f32 %v7581_v58, %v7604_v7 }
  0x63   :  { %431 = vperm.xlu1 %7199, %v51_v61   ;;  %v7590_v61 = vperm.slane %v232_v45, 0 }
  0x65   :  { %151 = vperm.xlu2 %7198, %v52_v20  }
  0x69   :  { %v87_v45 = vpop.permute.xlu2 %86 }
  0x6a   :  { %459 = vperm.xlu0 %7204, %v7588_v60   ;;  %v254_v51 = vmul.f32 %v7581_v58, %v87_v45 }
  0x6b   :  { %435 = vperm.xlu1 %7199, %v52_v20  }
  0x6d   :  { %7201 = vset.pattern.permute.xlu2 %v7259_v2 }
  0x6e   :  { %439 = vperm.xlu2 %7201, %v53_v0   ;;  %v6296_v0 = vor.u32 %v7039_v54, %v6293_v55 }
  0x70   :  { %2200 = vmatpush.bf16.msrb.mxu0 %v6296_v0  ;;  %v256_v0 = vmul.f32 %v7590_v61, %v87_v45 }
  0x72   :  { %7210 = vset.pattern.permute.xlu0 %v10800_v3 }
  0x73   :  { %7202 = vset.pattern.permute.xlu1 %v10800_v3 }
  0x74   :  { %161 = vperm.xlu1 %7202, %v54_v29  }
  0x76   :  { %7203 = vset.pattern.permute.xlu2 %v10800_v3 }
  0x77   :  { %v372_v52 = vpop.permute.xlu1 %371  ;;  %v72_v53 = vpop.permute.xlu0 %71  ;;  %166 = vperm.xlu2 %7203, %v55_v49  }
  0x78   :  { %v510_v8 = vmul.f32 %v7592_v62, %v372_v52  ;;  %v511_v9 = vmul.f32 %v7594_v63, %v372_v52  ;;  %v242_v10 = vmul.f32 %v7581_v58, %v72_v53  ;;  %v243_v11 = vmul.f32 %v7583_v59, %v72_v53 }
  0x79   :  { %v512_v12 = vmul.f32 %v7599_v4, %v372_v52  ;;  %v513_v13 = vmul.f32 %v7601_v5, %v372_v52  ;;  %v244_v15 = vmul.f32 %v7590_v61, %v72_v53  ;;  %v245_v16 = vmul.f32 %v7597_v1, %v72_v53 }
  0x7a   :  { %v638_v29 = vadd.f32 %v510_v8, %v242_v10  ;;  %v639_v30 = vadd.f32 %v511_v9, %v243_v11 }
  0x7b   :  { %v640_v38 = vadd.f32 %v512_v12, %v244_v15  ;;  %v641_v39 = vadd.f32 %v513_v13, %v245_v16 }
  0x7c   :  { %7205 = vset.pattern.permute.xlu1 %v7259_v2  ;;  %v776_v46 = vadd.f32 %v7625_v27, %v638_v29  ;;  %v777_v47 = vadd.f32 %v7627_v28, %v639_v30 }
  0x7d   :  { %447 = vperm.xlu1 %7205, %v55_v49   ;;  %v778_v48 = vadd.f32 %v7630_v35, %v640_v38  ;;  %v779_v49 = vadd.f32 %v7632_v36, %v641_v39  ;;  %v59_v39 = vld [vmem:[%s10790_s0 + $0xb8] sm:$0xff] }
  0x7e   :  { %v904_v6 = vmax.f32 %v776_v46, 0.0  ;;  %v905_v8 = vmax.f32 %v777_v47, 0.0 }
  0x7f   :  { %v376_v17 = vpop.permute.xlu1 %375  ;;  %v77_v18 = vpop.permute.xlu0 %76  ;;  %171 = vperm.xlu2 %7203, %v56_v44   ;;  %v906_v11 = vmax.f32 %v778_v48, 0.0  ;;  %v907_v12 = vmax.f32 %v779_v49, 0.0 }
  0x80   :  { %v514_v19 = vmul.f32 %v7592_v62, %v376_v17  ;;  %v515_v20 = vmul.f32 %v7594_v63, %v376_v17  ;;  %v516_v21 = vmul.f32 %v7599_v4, %v376_v17  ;;  %v517_v22 = vmul.f32 %v7601_v5, %v376_v17 }
  0x81   :  { %v246_v23 = vmul.f32 %v7581_v58, %v77_v18  ;;  %v247_v24 = vmul.f32 %v7583_v59, %v77_v18  ;;  %v248_v25 = vmul.f32 %v7590_v61, %v77_v18  ;;  %v249_v26 = vmul.f32 %v7597_v1, %v77_v18 }
  0x83   :  { %v642_v31 = vadd.f32 %v514_v19, %v246_v23  ;;  %v643_v32 = vadd.f32 %v515_v20, %v247_v24  ;;  %v644_v33 = vadd.f32 %v516_v21, %v248_v25  ;;  %v645_v34 = vadd.f32 %v517_v22, %v249_v26 }
  0x84   :  { %v251_v21 = vmul.f32 %v7583_v59, %v7604_v7  ;;  %v257_v22 = vmul.f32 %v7597_v1, %v87_v45  ;;  %v252_v25 = vmul.f32 %v7590_v61, %v7604_v7  ;;  %v253_v26 = vmul.f32 %v7597_v1, %v7604_v7 }
  0x85   :  { %7206 = vset.pattern.permute.xlu1 %v10800_v3  ;;  %v780_v40 = vadd.f32 %v7625_v27, %v642_v31  ;;  %v781_v41 = vadd.f32 %v7627_v28, %v643_v32  ;;  %v782_v42 = vadd.f32 %v7630_v35, %v644_v33  ;;  %v783_v43 = vadd.f32 %v7632_v36, %v645_v34 }
  0x86   :  { %176 = vperm.xlu1 %7206, %v7552_v37   ;;  %v255_v37 = vmul.f32 %v7583_v59, %v87_v45 }
  0x87   :  { %v384_v52 = vpop.permute.xlu1 %383  ;;  %v908_v54 = vmax.f32 %v780_v40, 0.0  ;;  %v909_v55 = vmax.f32 %v781_v41, 0.0  ;;  %v910_v56 = vmax.f32 %v782_v42, 0.0  ;;  %v911_v57 = vmax.f32 %v783_v43, 0.0  ;;  %7207 = vset.pattern.permute.xlu2 %v7259_v2  ;;  %v7003_v40 = vld [vmem:[%s10793_s3 + $0xc4] sm:$0xf] }
  0x88   :  { %v380_v53 = vpop.permute.xlu0 %379  ;;  %v522_v9 = vmul.f32 %v7592_v62, %v384_v52  ;;  %v523_v10 = vmul.f32 %v7594_v63, %v384_v52  ;;  %v524_v13 = vmul.f32 %v7599_v4, %v384_v52  ;;  %v525_v23 = vmul.f32 %v7601_v5, %v384_v52  ;;  %451 = vperm.xlu2 %7207, %v56_v44   ;;  %v6149_v41 = vld [vmem:[%s10793_s3 + $0xd0] sm:$0xf0] }
  0x89   :  { %v518_v14 = vmul.f32 %v7592_v62, %v380_v53  ;;  %v519_v15 = vmul.f32 %v7594_v63, %v380_v53  ;;  %v520_v16 = vmul.f32 %v7599_v4, %v380_v53  ;;  %v7658_v17 = vpack.c.bf16 %v908_v54, %v904_v6  ;;  %v6277_v6 = vld [vmem:[%s10793_s3 + $0x1d0] sm:$0xf0] }
  0x8a   :  { %v7660_v18 = vpack.c.bf16 %v909_v55, %v905_v8  ;;  %v7662_v19 = vpack.c.bf16 %v910_v56, %v906_v11  ;;  %v7664_v20 = vpack.c.bf16 %v911_v57, %v907_v12  ;;  %v521_v24 = vmul.f32 %v7601_v5, %v380_v53 }
  0x8b   :  { %v650_v29 = vadd.f32 %v522_v9, %v254_v51  ;;  %1763 = vmatmul.bf16.vlgmr.msra.gmra.mxu0 %v7658_v17  ;;  %v651_v30 = vadd.f32 %v523_v10, %v255_v37  ;;  %v646_v31 = vadd.f32 %v518_v14, %v250_v50  ;;  %v647_v32 = vadd.f32 %v519_v15, %v251_v21  ;;  %v6405_v14 = vld [vmem:[%s10793_s3 + $0x2d0] sm:$0xf0] }
  0x8c   :  { %1852 = vmatmul.bf16.vlgmr.msra.gmra.mxu1 %v7660_v18  ;;  %1941 = vmatmul.bf16.vlgmr.msra.gmra.mxu2 %v7662_v19  ;;  %v652_v33 = vadd.f32 %v524_v13, %v256_v0  ;;  %v648_v34 = vadd.f32 %v520_v16, %v252_v25  ;;  %v653_v38 = vadd.f32 %v525_v23, %v257_v22  ;;  %v7035_v0 = vld [vmem:[%s10793_s3 + $0x1c4] sm:$0xf] }
  0x8d   :  { %6449 = vmatmul.msk.bf16.vlgmr.msra.gmra.mxu3 %vm1706_vm0, %v7664_v20  ;;  %v649_v7 = vadd.f32 %v521_v24, %v253_v26  ;;  %v788_v42 = vadd.f32 %v7625_v27, %v650_v29  ;;  %v789_v43 = vadd.f32 %v7627_v28, %v651_v30  ;;  %v784_v44 = vadd.f32 %v7625_v27, %v646_v31  ;;  %v7067_v13 = vld [vmem:[%s10793_s3 + $0x2c4] sm:$0xf] }
  0x8e   :  { %181 = vperm.xlu1 %7206, %v7588_v60   ;;  %v7679_v60 = vpop.permute.xlu2 %91  ;;  %v785_v45 = vadd.f32 %v7627_v28, %v647_v32  ;;  %v790_v46 = vadd.f32 %v7630_v35, %v652_v33  ;;  %v786_v47 = vadd.f32 %v7630_v35, %v648_v34  ;;  %v791_v48 = vadd.f32 %v7632_v36, %v653_v38  ;;  %v60_v23 = vld [vmem:[%s10790_s0 + $0xc0] sm:$0xff] }
  0x8f   :  { %v787_v49 = vadd.f32 %v7632_v36, %v649_v7  ;;  %v6152_v51 = vor.u32 %v7003_v40, %v6149_v41  ;;  %v912_v37 = vmax.f32 %v784_v44, 0.0  ;;  %v916_v52 = vmax.f32 %v788_v42, 0.0 }
  0x90   :  { %v97_v50 = vpop.permute.xlu1 %96  ;;  %v913_v53 = vmax.f32 %v785_v45, 0.0  ;;  %v917_v54 = vmax.f32 %v789_v43, 0.0  ;;  %v392_v55 = vpop.permute.xlu0 %391  ;;  %v914_v56 = vmax.f32 %v786_v47, 0.0  ;;  %v918_v57 = vmax.f32 %v790_v46, 0.0  ;;  %7208 = vset.pattern.permute.xlu2 %v10800_v3  ;;  %v61_v45 = vld [vmem:[%s10790_s0 + $0xc8] sm:$0xff] }
  0x91   :  { %2112 = vmatpush.bf16.msrb.mxu3 %v6152_v51  ;;  %v258_v8 = vmul.f32 %v7581_v58, %v7679_v60  ;;  %v259_v9 = vmul.f32 %v7583_v59, %v7679_v60  ;;  %v915_v11 = vmax.f32 %v787_v49, 0.0  ;;  %v919_v12 = vmax.f32 %v791_v48, 0.0  ;;  %186 = vperm.xlu2 %7208, %v59_v39  }
  0x92   :  { %v260_v15 = vmul.f32 %v7590_v61, %v7679_v60  ;;  %v262_v16 = vmul.f32 %v7581_v58, %v97_v50  ;;  %v263_v21 = vmul.f32 %v7583_v59, %v97_v50  ;;  %v264_v22 = vmul.f32 %v7590_v61, %v97_v50  ;;  %196 = vperm.xlu0 %7210, %v61_v45  }
  0x93   :  { %v265_v24 = vmul.f32 %v7597_v1, %v97_v50  ;;  %v530_v25 = vmul.f32 %v7592_v62, %v392_v55  ;;  %v531_v26 = vmul.f32 %v7594_v63, %v392_v55  ;;  %v6280_v29 = vor.u32 %v7035_v0, %v6277_v6 }
  0x94   :  { %v532_v30 = vmul.f32 %v7599_v4, %v392_v55  ;;  %v7731_v31 = vpack.c.bf16 %v916_v52, %v912_v37  ;;  %v7733_v32 = vpack.c.bf16 %v917_v54, %v913_v53  ;;  %v6408_v33 = vor.u32 %v7067_v13, %v6405_v14  ;;  %v62_v53 = vld [vmem:[%s10790_s0 + $0xd0] sm:$0xff] }
  0x95   :  { %v533_v34 = vmul.f32 %v7601_v5, %v392_v55  ;;  %v7736_v38 = vpack.c.bf16 %v918_v57, %v914_v56  ;;  %v7738_v7 = vpack.c.bf16 %v919_v12, %v915_v11  ;;  %2201 = vmatpush.bf16.msrb.mxu0 %v6280_v29  ;;  %v261_v42 = vmul.f32 %v7597_v1, %v7679_v60 }
  0x96   :  { %7209 = vset.pattern.permute.xlu1 %v7259_v2  ;;  %v388_v10 = vpop.permute.xlu2 %387  ;;  %v658_v46 = vadd.f32 %v530_v25, %v262_v16  ;;  %v659_v47 = vadd.f32 %v531_v26, %v263_v21  ;;  %2290 = vmatpush.bf16.msrb.mxu1 %v6408_v33  ;;  %v660_v48 = vadd.f32 %v532_v30, %v264_v22 }
  0x97   :  { %463 = vperm.xlu1 %7209, %v59_v39   ;;  %v526_v39 = vmul.f32 %v7592_v62, %v388_v10  ;;  %v527_v40 = vmul.f32 %v7594_v63, %v388_v10  ;;  %v528_v41 = vmul.f32 %v7599_v4, %v388_v10  ;;  %v529_v43 = vmul.f32 %v7601_v5, %v388_v10 }
  0x98   :  { %v7748_v44 = vpop.permute.xlu1 %101  ;;  %v661_v49 = vadd.f32 %v533_v34, %v265_v24  ;;  %v796_v54 = vadd.f32 %v7625_v27, %v658_v46  ;;  %v797_v55 = vadd.f32 %v7627_v28, %v659_v47  ;;  %v798_v56 = vadd.f32 %v7630_v35, %v660_v48  ;;  %v396_v33 = vpop.permute.xlu0 %395 }
  0x99   :  { %v654_v60 = vadd.f32 %v526_v39, %v258_v8  ;;  %v655_v51 = vadd.f32 %v527_v40, %v259_v9  ;;  %v656_v37 = vadd.f32 %v528_v41, %v260_v15  ;;  %191 = vperm.xlu2 %7208, %v60_v23   ;;  %v657_v52 = vadd.f32 %v529_v43, %v261_v42 }
  0x9a   :  { %v799_v57 = vadd.f32 %v7632_v36, %v661_v49  ;;  %v924_v11 = vmax.f32 %v796_v54, 0.0  ;;  %v925_v12 = vmax.f32 %v797_v55, 0.0  ;;  %v926_v16 = vmax.f32 %v798_v56, 0.0  ;;  %7214 = vset.pattern.permute.xlu0 %v7259_v2 }
  0x9b   :  { %1768 = vmatmul.bf16.gmra.mxu0 %v7731_v31  ;;  %v792_v0 = vadd.f32 %v7625_v27, %v654_v60  ;;  %v793_v6 = vadd.f32 %v7627_v28, %v655_v51  ;;  %v794_v8 = vadd.f32 %v7630_v35, %v656_v37  ;;  %v795_v9 = vadd.f32 %v7632_v36, %v657_v52 }
  0x9c   :  { %1857 = vmatmul.bf16.gmra.mxu1 %v7733_v32  ;;  %1946 = vmatmul.bf16.gmra.mxu2 %v7736_v38  ;;  %v927_v21 = vmax.f32 %v799_v57, 0.0  ;;  %v266_v26 = vmul.f32 %v7581_v58, %v7748_v44  ;;  %v267_v29 = vmul.f32 %v7583_v59, %v7748_v44  ;;  %v268_v30 = vmul.f32 %v7590_v61, %v7748_v44  ;;  %v6999_v57 = vld [vmem:[%s10793_s3 + $0xa4] sm:$0xf] }
  0x9d   :  { %6450 = vmatmul.msk.bf16.gmra.mxu3 %vm1706_vm0, %v7738_v7  ;;  %v921_v24 = vmax.f32 %v793_v6, 0.0  ;;  %v922_v25 = vmax.f32 %v794_v8, 0.0  ;;  %475 = vperm.xlu0 %7214, %v62_v53   ;;  %v923_v39 = vmax.f32 %v795_v9, 0.0  ;;  %v535_v60 = vmul.f32 %v7594_v63, %v396_v33 }
  0x9e   :  { %v107_v50 = vpop.permute.xlu2 %106  ;;  %v536_v51 = vmul.f32 %v7599_v4, %v396_v33  ;;  %v269_v37 = vmul.f32 %v7597_v1, %v7748_v44  ;;  %v537_v52 = vmul.f32 %v7601_v5, %v396_v33  ;;  %v6133_v44 = vld [vmem:[%s10793_s3 + $0xb0] sm:$0xf0] }
  0x9f   :  { %467 = vperm.xlu1 %7209, %v60_v23   ;;  %v270_v10 = vmul.f32 %v7581_v58, %v107_v50  ;;  %v271_v13 = vmul.f32 %v7583_v59, %v107_v50  ;;  %v272_v14 = vmul.f32 %v7590_v61, %v107_v50  ;;  %v273_v22 = vmul.f32 %v7597_v1, %v107_v50 }
  0xa0   :  { %v920_v23 = vmax.f32 %v792_v0, 0.0  ;;  %v7784_v43 = vpack.c.bf16 %v925_v12, %v921_v24  ;;  %v7788_v48 = vpack.c.bf16 %v926_v16, %v922_v25  ;;  %v7790_v49 = vpack.c.bf16 %v927_v21, %v923_v39  ;;  %v65_v0 = vld [vmem:[%s10790_s0 + $0xe8] sm:$0xff]  ;;  %v7063_v16 = vld [vmem:[%s10793_s3 + $0x2a4] sm:$0xf]  ;;  %v6389_v21 = vld [vmem:[%s10793_s3 + $0x2b0] sm:$0xf0] }
  0xa1   :  { %v400_v15 = vpop.permute.xlu1 %399  ;;  %7211 = vset.pattern.permute.xlu2 %v7259_v2  ;;  %v534_v50 = vmul.f32 %v7592_v62, %v396_v33  ;;  %v663_v8 = vadd.f32 %v535_v60, %v267_v29  ;;  %v664_v9 = vadd.f32 %v536_v51, %v268_v30  ;;  %v6392_v60 = vor.u32 %v7063_v16, %v6389_v21 }
  0xa2   :  { %v538_v40 = vmul.f32 %v7592_v62, %v400_v15  ;;  %v539_v41 = vmul.f32 %v7594_v63, %v400_v15  ;;  %v7782_v42 = vpack.c.bf16 %v924_v11, %v920_v23  ;;  %10998 = vst [vmem:[#allocation7_spill] sm:$0xff] %v7784_v43  ;;  %471 = vperm.xlu2 %7211, %v61_v45   ;;  %v63_v45 = vld [vmem:[%s10790_s0 + $0xd8] sm:$0xff]  ;;  %v7031_v11 = vld [vmem:[%s10793_s3 + $0x1a4] sm:$0xf] }
  0xa3   :  { %v540_v46 = vmul.f32 %v7599_v4, %v400_v15  ;;  %v541_v47 = vmul.f32 %v7601_v5, %v400_v15  ;;  %10999 = vst [vmem:[#allocation8_spill] sm:$0xff] %v7788_v48  ;;  %v662_v6 = vadd.f32 %v534_v50, %v266_v26  ;;  %v6261_v15 = vld [vmem:[%s10793_s3 + $0x1b0] sm:$0xf0]  ;;  %v801_v33 = vadd.f32 %v7627_v28, %v663_v8 }
  0xa4   :  { %10997 = vst [vmem:[#allocation6_spill] sm:$0xff] %v7782_v42  ;;  %v667_v54 = vadd.f32 %v539_v41, %v271_v13  ;;  %v802_v39 = vadd.f32 %v7630_v35, %v664_v9  ;;  %v6264_v50 = vor.u32 %v7031_v11, %v6261_v15  ;;  %2291 = vmatpush.bf16.msrb.mxu1 %v6392_v60 }
  0xa5   :  { %11000 = vst [vmem:[#allocation9_spill] sm:$0xff] %v7790_v49  ;;  %v668_v55 = vadd.f32 %v540_v46, %v272_v14  ;;  %v669_v56 = vadd.f32 %v541_v47, %v273_v22  ;;  %487 = vperm.xlu0 %7214, %v65_v0   ;;  %v6136_v14 = vor.u32 %v6999_v57, %v6133_v44  ;;  %v117_v47 = vpop.permute.xlu0 %116  ;;  %v929_v44 = vmax.f32 %v801_v33, 0.0 }
  0xa6   :  { %v112_v34 = vpop.permute.xlu2 %111  ;;  %v805_v13 = vadd.f32 %v7627_v28, %v667_v54  ;;  %v800_v30 = vadd.f32 %v7625_v27, %v662_v6  ;;  %v278_v57 = vmul.f32 %v7581_v58, %v117_v47  ;;  %v930_v6 = vmax.f32 %v802_v39, 0.0  ;;  %2202 = vmatpush.bf16.msrb.mxu0 %v6264_v50 }
  0xa7   :  { %7212 = vset.pattern.permute.xlu1 %v10800_v3  ;;  %v806_v22 = vadd.f32 %v7630_v35, %v668_v55  ;;  %v807_v23 = vadd.f32 %v7632_v36, %v669_v56  ;;  %v274_v24 = vmul.f32 %v7581_v58, %v112_v34  ;;  %v275_v25 = vmul.f32 %v7583_v59, %v112_v34 }
  0xa8   :  { %201 = vperm.xlu1 %7212, %v62_v53   ;;  %v666_v53 = vadd.f32 %v538_v40, %v270_v10  ;;  %v665_v10 = vadd.f32 %v537_v52, %v269_v37  ;;  %v276_v40 = vmul.f32 %v7590_v61, %v112_v34  ;;  %2113 = vmatpush.bf16.msrb.mxu3 %v6136_v14  ;;  %v933_v52 = vmax.f32 %v805_v13, 0.0 }
  0xa9   :  { %v404_v26 = vpop.permute.xlu1 %403  ;;  %v277_v46 = vmul.f32 %v7597_v1, %v112_v34  ;;  %v934_v55 = vmax.f32 %v806_v22, 0.0  ;;  %v935_v56 = vmax.f32 %v807_v23, 0.0  ;;  %v928_v34 = vmax.f32 %v800_v30, 0.0 }
  0xaa   :  { %v804_v12 = vadd.f32 %v7625_v27, %v666_v53  ;;  %7213 = vset.pattern.permute.xlu2 %v10800_v3  ;;  %v803_v41 = vadd.f32 %v7632_v36, %v665_v10  ;;  %v542_v8 = vmul.f32 %v7592_v62, %v404_v26  ;;  %v543_v9 = vmul.f32 %v7594_v63, %v404_v26 }
  0xab   :  { %1773 = vmatmul.bf16.gmra.mxu0 %v7782_v42  ;;  %206 = vperm.xlu2 %7213, %v63_v45   ;;  %v279_v10 = vmul.f32 %v7583_v59, %v117_v47  ;;  %v280_v13 = vmul.f32 %v7590_v61, %v117_v47  ;;  %v281_v14 = vmul.f32 %v7597_v1, %v117_v47 }
  0xac   :  { %1862 = vmatmul.bf16.gmra.mxu1 %v7784_v43  ;;  %1951 = vmatmul.bf16.gmra.mxu2 %v7788_v48  ;;  %v932_v37 = vmax.f32 %v804_v12, 0.0  ;;  %v931_v11 = vmax.f32 %v803_v41, 0.0  ;;  %v66_v12 = vld [vmem:[%s10790_s0 + $0xf0] sm:$0xff]  ;;  %v544_v16 = vmul.f32 %v7599_v4, %v404_v26  ;;  %v545_v21 = vmul.f32 %v7601_v5, %v404_v26  ;;  %v64_v26 = vld [vmem:[%s10790_s0 + $0xe0] sm:$0xff] }
  0xad   :  { %6451 = vmatmul.msk.bf16.gmra.mxu3 %vm1706_vm0, %v7790_v49  ;;  %491 = vperm.xlu0 %7214, %v66_v12   ;;  %v7861_v22 = vpack.c.bf16 %v934_v55, %v930_v6  ;;  %v670_v30 = vadd.f32 %v542_v8, %v274_v24  ;;  %v671_v33 = vadd.f32 %v543_v9, %v275_v25 }
  0xae   :  { %v408_v29 = vpop.permute.xlu2 %407  ;;  %v7855_v15 = vpack.c.bf16 %v932_v37, %v928_v34  ;;  %v7863_v23 = vpack.c.bf16 %v935_v56, %v931_v11  ;;  %v672_v47 = vadd.f32 %v544_v16, %v276_v40  ;;  %v673_v50 = vadd.f32 %v545_v21, %v277_v46 }
  0xaf   :  { %v546_v51 = vmul.f32 %v7592_v62, %v408_v29  ;;  %v548_v53 = vmul.f32 %v7599_v4, %v408_v29  ;;  %v549_v54 = vmul.f32 %v7601_v5, %v408_v29  ;;  %11003 = vst [vmem:[#allocation12_spill] sm:$0xff] %v7861_v22  ;;  %v808_v24 = vadd.f32 %v7625_v27, %v670_v30 }
  0xb0   :  { %7215 = vset.pattern.permute.xlu1 %v7259_v2  ;;  %11001 = vst [vmem:[#allocation10_spill] sm:$0xff] %v7855_v15  ;;  %v809_v25 = vadd.f32 %v7627_v28, %v671_v33  ;;  %v810_v55 = vadd.f32 %v7630_v35, %v672_v47  ;;  %v811_v56 = vadd.f32 %v7632_v36, %v673_v50 }
  0xb1   :  { %479 = vperm.xlu1 %7215, %v63_v45   ;;  %v547_v45 = vmul.f32 %v7594_v63, %v408_v29  ;;  %11004 = vst [vmem:[#allocation13_spill] sm:$0xff] %v7863_v23  ;;  %v674_v29 = vadd.f32 %v546_v51, %v278_v57  ;;  %v676_v60 = vadd.f32 %v548_v53, %v280_v13  ;;  %v936_v46 = vmax.f32 %v808_v24, 0.0 }
  0xb2   :  { %v122_v41 = vpop.permute.xlu1 %121  ;;  %v677_v51 = vadd.f32 %v549_v54, %v281_v14  ;;  %v937_v54 = vmax.f32 %v809_v25, 0.0  ;;  %v938_v13 = vmax.f32 %v810_v55, 0.0  ;;  %v939_v16 = vmax.f32 %v811_v56, 0.0 }
  0xb3   :  { %v675_v39 = vadd.f32 %v547_v45, %v279_v10  ;;  %211 = vperm.xlu2 %7213, %v64_v26   ;;  %v812_v45 = vadd.f32 %v7625_v27, %v674_v29  ;;  %v814_v57 = vadd.f32 %v7630_v35, %v676_v60  ;;  %v67_v10 = vld [vmem:[%s10790_s0 + $0xf8] sm:$0xff]  ;;  %v282_v47 = vmul.f32 %v7581_v58, %v122_v41 }
  0xb4   :  { %v815_v40 = vadd.f32 %v7632_v36, %v677_v51  ;;  %v283_v50 = vmul.f32 %v7583_v59, %v122_v41  ;;  %v285_v24 = vmul.f32 %v7597_v1, %v122_v41 }
  0xb5   :  { %v813_v37 = vadd.f32 %v7627_v28, %v675_v39  ;;  %v940_v53 = vmax.f32 %v812_v45, 0.0  ;;  %v942_v14 = vmax.f32 %v814_v57, 0.0 }
  0xb6   :  { %v943_v21 = vmax.f32 %v815_v40, 0.0  ;;  %v6117_v40 = vld [vmem:[%s10793_s3 + $0x90] sm:$0xf0] }
  0xb7   :  { %v941_v34 = vmax.f32 %v813_v37, 0.0  ;;  %v7896_v60 = vpack.c.bf16 %v940_v53, %v936_v46  ;;  %v7906_v55 = vpack.c.bf16 %v942_v14, %v938_v13  ;;  %v7027_v46 = vld [vmem:[%s10793_s3 + $0x184] sm:$0xf]  ;;  %v6373_v14 = vld [vmem:[%s10793_s3 + $0x290] sm:$0xf0] }
  0xb8   :  { %v7908_v56 = vpack.c.bf16 %v943_v21, %v939_v16  ;;  %v7059_v13 = vld [vmem:[%s10793_s3 + $0x284] sm:$0xf] }
  0xb9   :  { %7216 = vset.pattern.permute.xlu1 %v10800_v3  ;;  %11005 = vst [vmem:[#allocation14_spill] sm:$0xff] %v7896_v60  ;;  %v7898_v51 = vpack.c.bf16 %v941_v34, %v937_v54 }
  0xba   :  { %216 = vperm.xlu1 %7216, %v65_v0   ;;  %v7857_v0 = vpack.c.bf16 %v933_v52, %v929_v44  ;;  %v127_v52 = vpop.permute.xlu2 %126  ;;  %11007 = vst [vmem:[#allocation16_spill] sm:$0xff] %v7906_v55 }
  0xbb   :  { %1778 = vmatmul.bf16.gmra.mxu0 %v7855_v15  ;;  %v286_v44 = vmul.f32 %v7581_v58, %v127_v52  ;;  %v287_v6 = vmul.f32 %v7583_v59, %v127_v52  ;;  %v288_v8 = vmul.f32 %v7590_v61, %v127_v52  ;;  %v289_v9 = vmul.f32 %v7597_v1, %v127_v52  ;;  %v416_v11 = vpop.permute.xlu1 %415 }
  0xbc   :  { %11002 = vst [vmem:[#allocation11_spill] sm:$0xff] %v7857_v0  ;;  %1867 = vmatmul.bf16.gmra.mxu1 %v7857_v0  ;;  %1956 = vmatmul.bf16.gmra.mxu2 %v7861_v22  ;;  %v554_v25 = vmul.f32 %v7592_v62, %v416_v11  ;;  %v555_v45 = vmul.f32 %v7594_v63, %v416_v11 }
  0xbd   :  { %6452 = vmatmul.msk.bf16.gmra.mxu3 %vm1706_vm0, %v7863_v23  ;;  %7217 = vset.pattern.permute.xlu2 %v7259_v2  ;;  %11006 = vst [vmem:[#allocation15_spill] sm:$0xff] %v7898_v51  ;;  %v556_v37 = vmul.f32 %v7599_v4, %v416_v11 }
  0xbe   :  { %483 = vperm.xlu2 %7217, %v64_v26   ;;  %v284_v26 = vmul.f32 %v7590_v61, %v122_v41  ;;  %11008 = vst [vmem:[#allocation17_spill] sm:$0xff] %v7908_v56  ;;  %v6995_v41 = vld [vmem:[%s10793_s3 + $0x84] sm:$0xf]  ;;  %v682_v53 = vadd.f32 %v554_v25, %v286_v44  ;;  %v683_v54 = vadd.f32 %v555_v45, %v287_v6 }
  0xbf   :  { %v684_v16 = vadd.f32 %v556_v37, %v288_v8  ;;  %v6376_v6 = vor.u32 %v7059_v13, %v6373_v14 }
  0xc0   :  { %v821_v25 = vadd.f32 %v7627_v28, %v683_v54 }
  0xc1   :  { %v822_v8 = vadd.f32 %v7630_v35, %v684_v16  ;;  %2292 = vmatpush.bf16.msrb.mxu1 %v6376_v6 }
  0xc2   :  { %221 = vperm.xlu1 %7216, %v66_v12   ;;  %v412_v12 = vpop.permute.xlu0 %411  ;;  %v132_v52 = vpop.permute.xlu2 %131 }
  0xc3   :  { %v550_v29 = vmul.f32 %v7592_v62, %v412_v12  ;;  %v551_v30 = vmul.f32 %v7594_v63, %v412_v12  ;;  %v552_v33 = vmul.f32 %v7599_v4, %v412_v12  ;;  %v553_v39 = vmul.f32 %v7601_v5, %v412_v12  ;;  %v6245_v12 = vld [vmem:[%s10793_s3 + $0x190] sm:$0xf0] }
  0xc4   :  { %v6248_v44 = vor.u32 %v7027_v46, %v6245_v12  ;;  %v293_v37 = vmul.f32 %v7597_v1, %v132_v52 }
  0xc5   :  { %v678_v57 = vadd.f32 %v550_v29, %v282_v47  ;;  %v679_v34 = vadd.f32 %v551_v30, %v283_v50  ;;  %v680_v29 = vadd.f32 %v552_v33, %v284_v26  ;;  %v681_v47 = vadd.f32 %v553_v39, %v285_v24  ;;  %v137_v30 = vpop.permute.xlu1 %136 }
  0xc6   :  { %7218 = vset.pattern.permute.xlu2 %v10800_v3  ;;  %v820_v50 = vadd.f32 %v7625_v27, %v682_v53  ;;  %2203 = vmatpush.bf16.msrb.mxu0 %v6248_v44  ;;  %v291_v26 = vmul.f32 %v7583_v59, %v132_v52  ;;  %v292_v24 = vmul.f32 %v7590_v61, %v132_v52  ;;  %v949_v53 = vmax.f32 %v821_v25, 0.0 }
  0xc7   :  { %226 = vperm.xlu2 %7218, %v67_v10   ;;  %v816_v45 = vadd.f32 %v7625_v27, %v678_v57  ;;  %v818_v33 = vadd.f32 %v7630_v35, %v680_v29  ;;  %v819_v39 = vadd.f32 %v7632_v36, %v681_v47  ;;  %v295_v25 = vmul.f32 %v7583_v59, %v137_v30 }
  0xc9   :  { %v944_v57 = vmax.f32 %v816_v45, 0.0  ;;  %v947_v12 = vmax.f32 %v819_v39, 0.0 }
  0xca   :  { %7219 = vset.pattern.permute.xlu1 %v7259_v2  ;;  %v557_v2 = vmul.f32 %v7601_v5, %v416_v11  ;;  %v6120_v11 = vor.u32 %v6995_v41, %v6117_v40  ;;  %v817_v41 = vadd.f32 %v7627_v28, %v679_v34  ;;  %v948_v40 = vmax.f32 %v820_v50, 0.0  ;;  %v424_v54 = vpop.permute.xlu0 %423 }
  0xcb   :  { %495 = vperm.xlu1 %7219, %v67_v10   ;;  %1783 = vmatmul.bf16.gmra.mxu0 %v7896_v60  ;;  %v290_v10 = vmul.f32 %v7581_v58, %v132_v52  ;;  %v946_v34 = vmax.f32 %v818_v33, 0.0  ;;  %v562_v14 = vmul.f32 %v7592_v62, %v424_v54  ;;  %v563_v16 = vmul.f32 %v7594_v63, %v424_v54 }
  0xcc   :  { %1872 = vmatmul.bf16.gmra.mxu1 %v7898_v51  ;;  %1961 = vmatmul.bf16.gmra.mxu2 %v7906_v55  ;;  %v685_v21 = vadd.f32 %v557_v2, %v289_v9  ;;  %v420_v2 = vpop.permute.xlu2 %419  ;;  %v945_v46 = vmax.f32 %v817_v41, 0.0  ;;  %v565_v29 = vmul.f32 %v7601_v5, %v424_v54  ;;  %v294_v50 = vmul.f32 %v7581_v58, %v137_v30 }
  0xcd   :  { %6453 = vmatmul.msk.bf16.gmra.mxu3 %vm1706_vm0, %v7908_v56  ;;  %v558_v52 = vmul.f32 %v7592_v62, %v420_v2  ;;  %v559_v47 = vmul.f32 %v7594_v63, %v420_v2  ;;  %v560_v44 = vmul.f32 %v7599_v4, %v420_v2  ;;  %v561_v6 = vmul.f32 %v7601_v5, %v420_v2  ;;  %v142_v33 = vpop.permute.xlu1 %141 }
  0xce   :  { %2114 = vmatpush.bf16.msrb.mxu3 %v6120_v11  ;;  %v823_v9 = vadd.f32 %v7632_v36, %v685_v21  ;;  %v950_v11 = vmax.f32 %v822_v8, 0.0  ;;  %v564_v21 = vmul.f32 %v7599_v4, %v424_v54  ;;  %v7956_v45 = vpack.c.bf16 %v948_v40, %v944_v57 }
  0xcf   :  { %v7958_v41 = vpack.c.bf16 %v949_v53, %v945_v46  ;;  %v296_v8 = vmul.f32 %v7590_v61, %v137_v30  ;;  %v690_v2 = vadd.f32 %v562_v14, %v294_v50  ;;  %v691_v57 = vadd.f32 %v563_v16, %v295_v25 }
  0xd0   :  { %v951_v13 = vmax.f32 %v823_v9, 0.0  ;;  %11009 = vst [vmem:[#allocation18_spill] sm:$0xff] %v7956_v45  ;;  %v297_v9 = vmul.f32 %v7597_v1, %v137_v30  ;;  %v7962_v39 = vpack.c.bf16 %v950_v11, %v946_v34  ;;  %v686_v40 = vadd.f32 %v558_v52, %v290_v10 }
  0xd1   :  { %11010 = vst [vmem:[#allocation19_spill] sm:$0xff] %v7958_v41  ;;  %v687_v46 = vadd.f32 %v559_v47, %v291_v26  ;;  %v692_v53 = vadd.f32 %v564_v21, %v296_v8  ;;  %v688_v3 = vadd.f32 %v560_v44, %v292_v24  ;;  %v689_v34 = vadd.f32 %v561_v6, %v293_v37 }
  0xd2   :  { %11011 = vst [vmem:[#allocation20_spill] sm:$0xff] %v7962_v39  ;;  %v7964_v54 = vpack.c.bf16 %v951_v13, %v947_v12  ;;  %v693_v30 = vadd.f32 %v565_v29, %v297_v9  ;;  %v828_v12 = vadd.f32 %v7625_v27, %v690_v2  ;;  %v829_v13 = vadd.f32 %v7627_v28, %v691_v57  ;;  %v428_v16 = vpop.permute.xlu0 %427 }
  0xd3   :  { %v826_v10 = vadd.f32 %v7630_v35, %v688_v3  ;;  %v827_v26 = vadd.f32 %v7632_v36, %v689_v34  ;;  %v566_v8 = vmul.f32 %v7592_v62, %v428_v16  ;;  %v567_v9 = vmul.f32 %v7594_v63, %v428_v16 }
  0xd4   :  { %11012 = vst [vmem:[#allocation21_spill] sm:$0xff] %v7964_v54  ;;  %v147_v11 = vpop.permute.xlu2 %146  ;;  %v831_v14 = vadd.f32 %v7632_v36, %v693_v30  ;;  %v956_v21 = vmax.f32 %v828_v12, 0.0  ;;  %v957_v52 = vmax.f32 %v829_v13, 0.0  ;;  %v298_v13 = vmul.f32 %v7581_v58, %v142_v33 }
  0xd5   :  { %v432_v24 = vpop.permute.xlu1 %431  ;;  %v954_v44 = vmax.f32 %v826_v10, 0.0  ;;  %v955_v50 = vmax.f32 %v827_v26, 0.0  ;;  %v302_v2 = vmul.f32 %v7581_v58, %v147_v11  ;;  %v303_v3 = vmul.f32 %v7583_v59, %v147_v11 }
  0xd6   :  { %v959_v25 = vmax.f32 %v831_v14, 0.0  ;;  %v304_v57 = vmul.f32 %v7590_v61, %v147_v11  ;;  %v573_v30 = vmul.f32 %v7601_v5, %v432_v24  ;;  %v568_v14 = vmul.f32 %v7599_v4, %v428_v16 }
  0xd7   :  { %v300_v10 = vmul.f32 %v7590_v61, %v142_v33  ;;  %v301_v26 = vmul.f32 %v7597_v1, %v142_v33 }
  0xd8   :  { %v7995_v12 = vpack.c.bf16 %v959_v25, %v955_v50  ;;  %v694_v50 = vadd.f32 %v566_v8, %v298_v13 }
  0xd9   :  { %v696_v25 = vadd.f32 %v568_v14, %v300_v10  ;;  %v6229_v10 = vld [vmem:[%s10793_s3 + $0x170] sm:$0xf0] }
  0xda   :  { %11016 = vst [vmem:[#allocation25_spill] sm:$0xff] %v7995_v12  ;;  %v832_v8 = vadd.f32 %v7625_v27, %v694_v50 }
  0xdb   :  { %1788 = vmatmul.bf16.gmra.mxu0 %v7956_v45  ;;  %v824_v45 = vadd.f32 %v7625_v27, %v686_v40  ;;  %v571_v40 = vmul.f32 %v7594_v63, %v432_v24 }
  0xdc   :  { %1877 = vmatmul.bf16.gmra.mxu1 %v7958_v41  ;;  %1966 = vmatmul.bf16.gmra.mxu2 %v7962_v39  ;;  %v825_v39 = vadd.f32 %v7627_v28, %v687_v46  ;;  %v830_v41 = vadd.f32 %v7630_v35, %v692_v53  ;;  %v152_v47 = vpop.permute.xlu2 %151  ;;  %v572_v53 = vmul.f32 %v7599_v4, %v432_v24 }
  0xdd   :  { %6454 = vmatmul.msk.bf16.gmra.mxu3 %vm1706_vm0, %v7964_v54  ;;  %v952_v37 = vmax.f32 %v824_v45, 0.0  ;;  %v305_v45 = vmul.f32 %v7597_v1, %v147_v11  ;;  %v299_v11 = vmul.f32 %v7583_v59, %v142_v33  ;;  %v307_v54 = vmul.f32 %v7583_v59, %v152_v47 }
  0xde   :  { %v953_v29 = vmax.f32 %v825_v39, 0.0  ;;  %v958_v6 = vmax.f32 %v830_v41, 0.0  ;;  %v570_v39 = vmul.f32 %v7592_v62, %v432_v24  ;;  %v569_v24 = vmul.f32 %v7601_v5, %v428_v16 }
  0xdf   :  { %v7987_v46 = vpack.c.bf16 %v956_v21, %v952_v37  ;;  %v436_v37 = vpop.permute.xlu1 %435  ;;  %v701_v33 = vadd.f32 %v573_v30, %v305_v45  ;;  %v695_v16 = vadd.f32 %v567_v9, %v299_v11  ;;  %v309_v45 = vmul.f32 %v7597_v1, %v152_v47 }
  0xe0   :  { %v7989_v41 = vpack.c.bf16 %v957_v52, %v953_v29  ;;  %v7993_v34 = vpack.c.bf16 %v958_v6, %v954_v44  ;;  %v698_v21 = vadd.f32 %v570_v39, %v302_v2  ;;  %v699_v29 = vadd.f32 %v571_v40, %v303_v3  ;;  %v6991_v52 = vld [vmem:[%s10793_s3 + $0x64] sm:$0xf]  ;;  %v6101_v44 = vld [vmem:[%s10793_s3 + $0x70] sm:$0xf0] }
  0xe1   :  { %11013 = vst [vmem:[#allocation22_spill] sm:$0xff] %v7987_v46  ;;  %v700_v6 = vadd.f32 %v572_v53, %v304_v57  ;;  %v839_v39 = vadd.f32 %v7632_v36, %v701_v33  ;;  %v306_v40 = vmul.f32 %v7581_v58, %v152_v47  ;;  %v833_v9 = vadd.f32 %v7627_v28, %v695_v16  ;;  %v157_v53 = vpop.permute.xlu0 %156 }
  0xe2   :  { %11014 = vst [vmem:[#allocation23_spill] sm:$0xff] %v7989_v41  ;;  %v837_v2 = vadd.f32 %v7627_v28, %v699_v29  ;;  %v308_v57 = vmul.f32 %v7590_v61, %v152_v47  ;;  %v834_v30 = vadd.f32 %v7630_v35, %v696_v25  ;;  %v7055_v47 = vld [vmem:[%s10793_s3 + $0x264] sm:$0xf]  ;;  %v6357_v29 = vld [vmem:[%s10793_s3 + $0x270] sm:$0xf0]  ;;  %v311_v16 = vmul.f32 %v7583_v59, %v157_v53 }
  0xe3   :  { %11015 = vst [vmem:[#allocation24_spill] sm:$0xff] %v7993_v34  ;;  %v838_v3 = vadd.f32 %v7630_v35, %v700_v6  ;;  %v967_v50 = vmax.f32 %v839_v39, 0.0  ;;  %v960_v25 = vmax.f32 %v832_v8, 0.0  ;;  %v961_v56 = vmax.f32 %v833_v9, 0.0 }
  0xe4   :  { %v575_v55 = vmul.f32 %v7594_v63, %v436_v37  ;;  %v576_v39 = vmul.f32 %v7599_v4, %v436_v37  ;;  %v577_v8 = vmul.f32 %v7601_v5, %v436_v37 }
  0xe5   :  { %v966_v33 = vmax.f32 %v838_v3, 0.0 }
  0xe7   :  { %v8043_v6 = vpop.permute.xlu1 %161 }
  0xeb   :  { %1793 = vmatmul.bf16.gmra.mxu0 %v7987_v46  ;;  %v697_v46 = vadd.f32 %v569_v24, %v301_v26 }
  0xec   :  { %1882 = vmatmul.bf16.gmra.mxu1 %v7989_v41  ;;  %1971 = vmatmul.bf16.gmra.mxu2 %v7993_v34  ;;  %v440_v34 = vpop.permute.xlu2 %439  ;;  %v6104_v41 = vor.u32 %v6991_v52, %v6101_v44  ;;  %v310_v44 = vmul.f32 %v7581_v58, %v157_v53 }
  0xed   :  { %6455 = vmatmul.msk.bf16.gmra.mxu3 %vm1706_vm0, %v7995_v12  ;;  %v836_v12 = vadd.f32 %v7625_v27, %v698_v21  ;;  %v835_v13 = vadd.f32 %v7632_v36, %v697_v46  ;;  %v578_v11 = vmul.f32 %v7592_v62, %v440_v34  ;;  %v579_v14 = vmul.f32 %v7594_v63, %v440_v34 }
  0xee   :  { %2115 = vmatpush.bf16.msrb.mxu3 %v6104_v41  ;;  %v7023_v41 = vld [vmem:[%s10793_s3 + $0x164] sm:$0xf]  ;;  %v580_v26 = vmul.f32 %v7599_v4, %v440_v34  ;;  %v965_v46 = vmax.f32 %v837_v2, 0.0  ;;  %v581_v52 = vmul.f32 %v7601_v5, %v440_v34  ;;  %v312_v2 = vmul.f32 %v7590_v61, %v157_v53 }
  0xef   :  { %v964_v24 = vmax.f32 %v836_v12, 0.0  ;;  %v6232_v21 = vor.u32 %v7023_v41, %v6229_v10  ;;  %v6360_v12 = vor.u32 %v7055_v47, %v6357_v29  ;;  %v313_v41 = vmul.f32 %v7597_v1, %v157_v53 }
  0xf0   :  { %v962_v10 = vmax.f32 %v834_v30, 0.0  ;;  %v963_v60 = vmax.f32 %v835_v13, 0.0  ;;  %v574_v34 = vmul.f32 %v7592_v62, %v436_v37  ;;  %v8052_v3 = vpack.c.bf16 %v965_v46, %v961_v56 }
  0xf1   :  { %2204 = vmatpush.bf16.msrb.mxu0 %v6232_v21  ;;  %v8050_v51 = vpack.c.bf16 %v964_v24, %v960_v25  ;;  %2293 = vmatpush.bf16.msrb.mxu1 %v6360_v12  ;;  %v706_v53 = vadd.f32 %v578_v11, %v310_v44  ;;  %v707_v30 = vadd.f32 %v579_v14, %v311_v16 }
  0xf2   :  { %11018 = vst [vmem:[#allocation27_spill] sm:$0xff] %v8052_v3  ;;  %v8056_v47 = vpack.c.bf16 %v966_v33, %v962_v10  ;;  %v8058_v21 = vpack.c.bf16 %v967_v50, %v963_v60  ;;  %v702_v56 = vadd.f32 %v574_v34, %v306_v40  ;;  %v703_v13 = vadd.f32 %v575_v55, %v307_v54  ;;  %v448_v50 = vpop.permute.xlu1 %447  ;;  %v1196_v54 = vld [vmem:[%s10794_s4] sm:$0xf] }
  0xf3   :  { %11017 = vst [vmem:[#allocation26_spill] sm:$0xff] %v8050_v51  ;;  %v708_v24 = vadd.f32 %v580_v26, %v312_v2  ;;  %v704_v37 = vadd.f32 %v576_v39, %v308_v57  ;;  %v705_v46 = vadd.f32 %v577_v8, %v309_v45  ;;  %v709_v29 = vadd.f32 %v581_v52, %v313_v41  ;;  %v444_v41 = vpop.permute.xlu0 %443 }
  0xf4   :  { %v167_v9 = vpop.permute.xlu2 %166  ;;  %11019 = vst [vmem:[#allocation28_spill] sm:$0xff] %v8056_v47  ;;  %v844_v60 = vadd.f32 %v7625_v27, %v706_v53  ;;  %v845_v33 = vadd.f32 %v7627_v28, %v707_v30  ;;  %v840_v25 = vadd.f32 %v7625_v27, %v702_v56  ;;  %v841_v11 = vadd.f32 %v7627_v28, %v703_v13 }
  0xf5   :  { %11020 = vst [vmem:[#allocation29_spill] sm:$0xff] %v8058_v21  ;;  %v846_v14 = vadd.f32 %v7630_v35, %v708_v24  ;;  %v842_v44 = vadd.f32 %v7630_v35, %v704_v37  ;;  %v843_v40 = vadd.f32 %v7632_v36, %v705_v46  ;;  %v847_v55 = vadd.f32 %v7632_v36, %v709_v29 }
  0xf6   :  { %v318_v57 = vmul.f32 %v7581_v58, %v167_v9  ;;  %v319_v45 = vmul.f32 %v7583_v59, %v167_v9  ;;  %v320_v26 = vmul.f32 %v7590_v61, %v167_v9  ;;  %v321_v52 = vmul.f32 %v7597_v1, %v167_v9 }
  0xf7   :  { %v972_v12 = vmax.f32 %v844_v60, 0.0  ;;  %v973_v2 = vmax.f32 %v845_v33, 0.0  ;;  %v8080_v10 = vperm.slane %v1196_v54, 0  ;;  %v968_v34 = vmax.f32 %v840_v25, 0.0 }
  0xf8   :  { %v969_v39 = vmax.f32 %v841_v11, 0.0  ;;  %v974_v8 = vmax.f32 %v846_v14, 0.0  ;;  %v582_v53 = vmul.f32 %v7592_v62, %v444_v41  ;;  %v970_v30 = vmax.f32 %v842_v44, 0.0 }
  0xf9   :  { %v971_v56 = vmax.f32 %v843_v40, 0.0  ;;  %v975_v13 = vmax.f32 %v847_v55, 0.0  ;;  %v314_v24 = vmul.f32 %v7581_v58, %v8043_v6  ;;  %v315_v9 = vmul.f32 %v7583_v59, %v8043_v6 }
  0xfa   :  { %v583_v37 = vmul.f32 %v7594_v63, %v444_v41  ;;  %v584_v46 = vmul.f32 %v7599_v4, %v444_v41  ;;  %v316_v29 = vmul.f32 %v7590_v61, %v8043_v6  ;;  %v586_v60 = vmul.f32 %v7592_v62, %v448_v50 }
  0xfb   :  { %1798 = vmatmul.bf16.gmra.mxu0 %v8050_v51  ;;  %v587_v33 = vmul.f32 %v7594_v63, %v448_v50  ;;  %v585_v25 = vmul.f32 %v7601_v5, %v444_v41  ;;  %v317_v44 = vmul.f32 %v7597_v1, %v8043_v6  ;;  %v8097_v55 = vpack.c.bf16 %v972_v12, %v968_v34 }
  0xfc   :  { %1887 = vmatmul.bf16.gmra.mxu1 %v8052_v3  ;;  %1976 = vmatmul.bf16.gmra.mxu2 %v8056_v47  ;;  %v172_v16 = vpop.permute.xlu2 %171  ;;  %v8099_v54 = vpack.c.bf16 %v973_v2, %v969_v39  ;;  %v589_v51 = vmul.f32 %v7601_v5, %v448_v50  ;;  %v8103_v47 = vpop.permute.xlu1 %176  ;;  %v8105_v3 = vpack.c.bf16 %v974_v8, %v970_v30 }
  0xfd   :  { %6456 = vmatmul.msk.bf16.gmra.mxu3 %vm1706_vm0, %v8058_v21  ;;  %11021 = vst [vmem:[#allocation30_spill] sm:$0xff] %v8097_v55  ;;  %v588_v21 = vmul.f32 %v7599_v4, %v448_v50  ;;  %v8107_v41 = vpack.c.bf16 %v975_v13, %v971_v56  ;;  %v710_v23 = vadd.f32 %v582_v53, %v314_v24 }
  0xfe   :  { %11022 = vst [vmem:[#allocation31_spill] sm:$0xff] %v8099_v54  ;;  %v711_v15 = vadd.f32 %v583_v37, %v315_v9  ;;  %v714_v6 = vadd.f32 %v586_v60, %v318_v57  ;;  %v715_v12 = vadd.f32 %v587_v33, %v319_v45  ;;  %v322_v50 = vmul.f32 %v7581_v58, %v172_v16  ;;  %v6987_v57 = vld [vmem:[%s10793_s3 + $0x44] sm:$0xf]  ;;  %v6085_v45 = vld [vmem:[%s10793_s3 + $0x50] sm:$0xf0] }
  0xff   :  { %11023 = vst [vmem:[#allocation32_spill] sm:$0xff] %v8105_v3  ;;  %v323_v2 = vmul.f32 %v7583_v59, %v172_v16  ;;  %v324_v34 = vmul.f32 %v7590_v61, %v172_v16  ;;  %v712_v39 = vadd.f32 %v584_v46, %v316_v29  ;;  %v716_v8 = vadd.f32 %v588_v21, %v320_v26 }
 0x100   :  { %11024 = vst [vmem:[#allocation33_spill] sm:$0xff] %v8107_v41  ;;  %v717_v53 = vadd.f32 %v589_v51, %v321_v52  ;;  %v325_v30 = vmul.f32 %v7597_v1, %v172_v16  ;;  %v713_v56 = vadd.f32 %v585_v25, %v317_v44  ;;  %v848_v24 = vadd.f32 %v7625_v27, %v710_v23 }
 0x101   :  { %v849_v9 = vadd.f32 %v7627_v28, %v711_v15  ;;  %v852_v52 = vadd.f32 %v7625_v27, %v714_v6  ;;  %v853_v16 = vadd.f32 %v7627_v28, %v715_v12  ;;  %v6088_v33 = vor.u32 %v6987_v57, %v6085_v45  ;;  %v456_v6 = vpop.permute.xlu0 %455 }
 0x102   :  { %v850_v25 = vadd.f32 %v7630_v35, %v712_v39  ;;  %v855_v44 = vadd.f32 %v7632_v36, %v717_v53 }
 0x103   :  { %2116 = vmatpush.bf16.msrb.mxu3 %v6088_v33 }
 0x104   :  { %v452_v13 = vpop.permute.xlu2 %451  ;;  %v8139_v39 = vpop.permute.xlu1 %181 }
 0x105   :  { %v590_v37 = vmul.f32 %v7592_v62, %v452_v13  ;;  %v591_v51 = vmul.f32 %v7594_v63, %v452_v13  ;;  %v592_v23 = vmul.f32 %v7599_v4, %v452_v13  ;;  %v593_v15 = vmul.f32 %v7601_v5, %v452_v13 }
 0x106   :  { %v977_v13 = vmax.f32 %v849_v9, 0.0  ;;  %v978_v9 = vmax.f32 %v850_v25, 0.0 }
 0x107   :  { %v719_v57 = vadd.f32 %v591_v51, %v323_v2  ;;  %v720_v53 = vadd.f32 %v592_v23, %v324_v34  ;;  %v7051_v2 = vld [vmem:[%s10793_s3 + $0x244] sm:$0xf]  ;;  %v326_v51 = vmul.f32 %v7581_v58, %v8103_v47  ;;  %v328_v23 = vmul.f32 %v7590_v61, %v8103_v47 }
 0x108   :  { %v1764_v11 = vpop.f32.mrf.mxu0 }
 0x109   :  { %v1853_v14 = vpop.f32.mrf.mxu1  ;;  %v1765_v40 = vadd.f32 %v1764_v11, %v8080_v10 }
 0x10b   :  { %v1854_v22 = vadd.f32 %v1853_v14, %v1765_v40  ;;  %1803 = vmatmul.bf16.gmra.mxu0 %v8097_v55  ;;  %v854_v14 = vadd.f32 %v7630_v35, %v716_v8  ;;  %v851_v40 = vadd.f32 %v7632_v36, %v713_v56  ;;  %v981_v55 = vmax.f32 %v853_v16, 0.0  ;;  %v7019_v8 = vld [vmem:[%s10793_s3 + $0x144] sm:$0xf] }
 0x10c   :  { %1892 = vmatmul.bf16.gmra.mxu1 %v8099_v54  ;;  %1981 = vmatmul.bf16.gmra.mxu2 %v8105_v3  ;;  %v594_v56 = vmul.f32 %v7592_v62, %v456_v6  ;;  %v596_v16 = vmul.f32 %v7599_v4, %v456_v6 }
 0x10d   :  { %6457 = vmatmul.msk.bf16.gmra.mxu3 %vm1706_vm0, %v8107_v41  ;;  %v980_v41 = vmax.f32 %v852_v52, 0.0  ;;  %v979_v34 = vmax.f32 %v851_v40, 0.0  ;;  %v327_v52 = vmul.f32 %v7583_v59, %v8103_v47  ;;  %v329_v40 = vmul.f32 %v7597_v1, %v8103_v47 }
 0x10e   :  { %v8168_v0 = vpack.c.bf16 %v981_v55, %v977_v13  ;;  %v460_v55 = vpop.permute.xlu0 %459 }
 0x10f   :  { %v1942_v21 = vpop.f32.mrf.mxu2 }
 0x110   :  { %v2031_v26 = vpop.f32.mrf.mxu3  ;;  %v1943_v46 = vadd.f32 %v1942_v21, %v1854_v22  ;;  %v1766_v29 = vpop.f32.mrf.mxu0  ;;  %v718_v22 = vadd.f32 %v590_v37, %v322_v50  ;;  %v976_v21 = vmax.f32 %v848_v24, 0.0  ;;  %v6213_v50 = vld [vmem:[%s10793_s3 + $0x150] sm:$0xf0]  ;;  %v982_v37 = vmax.f32 %v854_v14, 0.0  ;;  %11026 = vst [vmem:[#allocation35_spill] sm:$0xff] %v8168_v0 }
 0x111   :  { %v1855_v60 = vpop.f32.mrf.mxu1  ;;  %v1767_v11 = vadd.f32 %v1766_v29, %v8080_v10  ;;  %v721_v29 = vadd.f32 %v593_v15, %v325_v30  ;;  %v6341_v24 = vld [vmem:[%s10793_s3 + $0x250] sm:$0xf0]  ;;  %v983_v30 = vmax.f32 %v855_v44, 0.0  ;;  %v6216_v14 = vor.u32 %v7019_v8, %v6213_v50 }
 0x112   :  { %v8137_v12 = vadd.f32 %v2031_v26, %v1943_v46  ;;  %v595_v26 = vmul.f32 %v7594_v63, %v456_v6  ;;  %v597_v46 = vmul.f32 %v7601_v5, %v456_v6  ;;  %v6344_v44 = vor.u32 %v7051_v2, %v6341_v24 }
 0x113   :  { %v1856_v45 = vadd.f32 %v1855_v60, %v1767_v11  ;;  %v8166_v54 = vpack.c.bf16 %v980_v41, %v976_v21  ;;  %v8170_v49 = vpack.c.bf16 %v982_v37, %v978_v9  ;;  %v8172_v42 = vpack.c.bf16 %v983_v30, %v979_v34  ;;  %2205 = vmatpush.bf16.msrb.mxu0 %v6216_v14  ;;  %v464_v9 = vpop.permute.xlu1 %463 }
 0x114   :  { %2294 = vmatpush.bf16.msrb.mxu1 %v6344_v44  ;;  %v723_v47 = vadd.f32 %v595_v26, %v327_v52  ;;  %v724_v50 = vadd.f32 %v596_v16, %v328_v23  ;;  %v3179_v41 = vmax.f32 %v8137_v12, 0.0  ;;  %v856_v13 = vadd.f32 %v7625_v27, %v718_v22 }
 0x115   :  { %11025 = vst [vmem:[#allocation34_spill] sm:$0xff] %v8166_v54  ;;  %v725_v2 = vadd.f32 %v597_v46, %v329_v40  ;;  %v859_v24 = vadd.f32 %v7632_v36, %v721_v29  ;;  %v598_v22 = vmul.f32 %v7592_v62, %v460_v55  ;;  %v600_v16 = vmul.f32 %v7599_v4, %v460_v55 }
 0x116   :  { %11027 = vst [vmem:[#allocation36_spill] sm:$0xff] %v8170_v49  ;;  %v861_v52 = vadd.f32 %v7627_v28, %v723_v47  ;;  %v862_v29 = vadd.f32 %v7630_v35, %v724_v50  ;;  %v984_v14 = vmax.f32 %v856_v13, 0.0  ;;  %v330_v44 = vmul.f32 %v7581_v58, %v8139_v39 }
 0x117   :  { %v1944_v60 = vpop.f32.mrf.mxu2  ;;  %11028 = vst [vmem:[#allocation37_spill] sm:$0xff] %v8172_v42  ;;  %v602_v40 = vmul.f32 %v7592_v62, %v464_v9  ;;  %v331_v47 = vmul.f32 %v7583_v59, %v8139_v39 }
 0x118   :  { %v2033_v33 = vpop.f32.mrf.mxu3  ;;  %v1945_v15 = vadd.f32 %v1944_v60, %v1856_v45  ;;  %v1769_v25 = vpop.f32.mrf.mxu0  ;;  %v722_v45 = vadd.f32 %v594_v56, %v326_v51  ;;  %v857_v56 = vadd.f32 %v7627_v28, %v719_v57  ;;  %v599_v57 = vmul.f32 %v7594_v63, %v460_v55 }
 0x119   :  { %v1858_v11 = vpop.f32.mrf.mxu1  ;;  %v1770_v3 = vadd.f32 %v1769_v25, %v8080_v10  ;;  %v187_v60 = vpop.permute.xlu2 %186  ;;  %v601_v25 = vmul.f32 %v7601_v5, %v460_v55  ;;  %v332_v55 = vmul.f32 %v7590_v61, %v8139_v39  ;;  %v990_v13 = vmax.f32 %v862_v29, 0.0 }
 0x11a   :  { %v2034_v6 = vadd.f32 %v2033_v33, %v1945_v15  ;;  %v334_v26 = vmul.f32 %v7581_v58, %v187_v60  ;;  %v335_v12 = vmul.f32 %v7583_v59, %v187_v60  ;;  %v860_v34 = vadd.f32 %v7625_v27, %v722_v45 }
 0x11b   :  { %v1859_v8 = vadd.f32 %v1858_v11, %v1770_v3  ;;  %1808 = vmatmul.bf16.gmra.mxu0 %v8166_v54  ;;  %v858_v3 = vadd.f32 %v7630_v35, %v720_v53  ;;  %v336_v30 = vmul.f32 %v7590_v61, %v187_v60  ;;  %v863_v15 = vadd.f32 %v7632_v36, %v725_v2 }
 0x11c   :  { %1897 = vmatmul.bf16.gmra.mxu1 %v8168_v0  ;;  %v3183_v21 = vmax.f32 %v2034_v6, 0.0  ;;  %1986 = vmatmul.bf16.gmra.mxu2 %v8170_v49  ;;  %v985_v45 = vmax.f32 %v857_v56, 0.0  ;;  %v727_v54 = vadd.f32 %v599_v57, %v331_v47  ;;  %v728_v49 = vadd.f32 %v600_v16, %v332_v55  ;;  %v468_v47 = vpop.permute.xlu1 %467 }
 0x11d   :  { %6458 = vmatmul.msk.bf16.gmra.mxu3 %vm1706_vm0, %v8172_v42  ;;  %v986_v2 = vmax.f32 %v858_v3, 0.0  ;;  %v991_v56 = vmax.f32 %v863_v15, 0.0  ;;  %v730_v42 = vadd.f32 %v602_v40, %v334_v26 }
 0x11e   :  { %v8186_v37 = vpack.c.bf16 %v3183_v21, %v3179_v41  ;;  %v988_v41 = vmax.f32 %v860_v34, 0.0  ;;  %v989_v21 = vmax.f32 %v861_v52, 0.0  ;;  %v865_v40 = vadd.f32 %v7627_v28, %v727_v54 }
 0x11f   :  { %v1947_v51 = vpop.f32.mrf.mxu2  ;;  %v8217_v15 = vpack.c.bf16 %v990_v13, %v986_v2  ;;  %v868_v57 = vadd.f32 %v7625_v27, %v730_v42 }
 0x120   :  { %11029 = vst [vmem:[#allocation38_spill] sm:$0xff] %v8186_v37  ;;  %v2036_v53 = vpop.f32.mrf.mxu3  ;;  %v1948_v46 = vadd.f32 %v1947_v51, %v1859_v8  ;;  %v1771_v33 = vpop.f32.mrf.mxu0  ;;  %v603_v8 = vmul.f32 %v7594_v63, %v464_v9  ;;  %v333_v51 = vmul.f32 %v7597_v1, %v8139_v39  ;;  %v605_v37 = vmul.f32 %v7601_v5, %v464_v9 }
 0x121   :  { %v1860_v23 = vpop.f32.mrf.mxu1  ;;  %v1772_v11 = vadd.f32 %v1771_v33, %v8080_v10  ;;  %v604_v33 = vmul.f32 %v7599_v4, %v464_v9  ;;  %v8211_v34 = vpop.permute.xlu2 %191  ;;  %v8213_v29 = vpack.c.bf16 %v988_v41, %v984_v14  ;;  %11032 = vst [vmem:[#allocation41_spill] sm:$0xff] %v8217_v15  ;;  %v993_v55 = vmax.f32 %v865_v40, 0.0 }
 0x122   :  { %v2037_v6 = vadd.f32 %v2036_v53, %v1948_v46  ;;  %v987_v53 = vmax.f32 %v859_v24, 0.0  ;;  %v337_v46 = vmul.f32 %v7597_v1, %v187_v60  ;;  %v8215_v24 = vpack.c.bf16 %v989_v21, %v985_v45 }
 0x123   :  { %v1861_v50 = vadd.f32 %v1860_v23, %v1772_v11  ;;  %v726_v23 = vadd.f32 %v598_v22, %v330_v44  ;;  %v731_v11 = vadd.f32 %v603_v8, %v335_v12  ;;  %11030 = vst [vmem:[#allocation39_spill] sm:$0xff] %v8213_v29  ;;  %v732_v60 = vadd.f32 %v604_v33, %v336_v30 }
 0x124   :  { %11031 = vst [vmem:[#allocation40_spill] sm:$0xff] %v8215_v24  ;;  %v729_v9 = vadd.f32 %v601_v25, %v333_v51  ;;  %v8220_v22 = vpack.c.bf16 %v991_v56, %v987_v53  ;;  %v733_v12 = vadd.f32 %v605_v37, %v337_v46  ;;  %v3187_v30 = vmax.f32 %v2037_v6, 0.0 }
 0x125   :  { %v864_v14 = vadd.f32 %v7625_v27, %v726_v23  ;;  %v869_v16 = vadd.f32 %v7627_v28, %v731_v11  ;;  %v870_v42 = vadd.f32 %v7630_v35, %v732_v60  ;;  %v197_v23 = vpop.permute.xlu0 %196  ;;  %v6069_v60 = vld [vmem:[%s10793_s3 + $0x30] sm:$0xf0]  ;;  %v608_v40 = vmul.f32 %v7599_v4, %v468_v47 }
 0x126   :  { %11033 = vst [vmem:[#allocation42_spill] sm:$0xff] %v8220_v22  ;;  %v867_v37 = vadd.f32 %v7632_v36, %v729_v9  ;;  %v871_v54 = vadd.f32 %v7632_v36, %v733_v12  ;;  %v338_v9 = vmul.f32 %v7581_v58, %v8211_v34 }
 0x127   :  { %v1949_v52 = vpop.f32.mrf.mxu2  ;;  %v992_v8 = vmax.f32 %v864_v14, 0.0  ;;  %v997_v21 = vmax.f32 %v869_v16, 0.0  ;;  %v339_v14 = vmul.f32 %v7583_v59, %v8211_v34  ;;  %v607_v16 = vmul.f32 %v7594_v63, %v468_v47 }
 0x128   :  { %v2038_v3 = vpop.f32.mrf.mxu3  ;;  %v1950_v39 = vadd.f32 %v1949_v52, %v1861_v50  ;;  %v1774_v0 = vpop.f32.mrf.mxu0  ;;  %v996_v50 = vmax.f32 %v868_v57, 0.0  ;;  %v995_v52 = vmax.f32 %v867_v37, 0.0 }
 0x129   :  { %v1863_v48 = vpop.f32.mrf.mxu1  ;;  %v1775_v26 = vadd.f32 %v1774_v0, %v8080_v10  ;;  %v866_v0 = vadd.f32 %v7630_v35, %v728_v49  ;;  %v998_v49 = vmax.f32 %v870_v42, 0.0  ;;  %v472_v46 = vpop.permute.xlu2 %471  ;;  %v8251_v57 = vpack.c.bf16 %v997_v21, %v993_v55 }
 0x12a   :  { %v2039_v44 = vadd.f32 %v2038_v3, %v1950_v39  ;;  %v8240_v11 = vpack.c.bf16 %v996_v50, %v992_v8  ;;  %v999_v3 = vmax.f32 %v871_v54, 0.0  ;;  %v6983_v39 = vld [vmem:[%s10793_s3 + $0x24] sm:$0xf]  ;;  %v612_v37 = vmul.f32 %v7599_v4, %v472_v46 }
 0x12b   :  { %v1864_v45 = vadd.f32 %v1863_v48, %v1775_v26  ;;  %1813 = vmatmul.bf16.gmra.mxu0 %v8213_v29  ;;  %v994_v53 = vmax.f32 %v866_v0, 0.0  ;;  %v606_v26 = vmul.f32 %v7592_v62, %v468_v47  ;;  %11036 = vst [vmem:[#allocation45_spill] sm:$0xff] %v8251_v57  ;;  %v6072_v42 = vor.u32 %v6983_v39, %v6069_v60  ;;  %v7015_v50 = vld [vmem:[%s10793_s3 + $0x124] sm:$0xf]  ;;  %v202_v29 = vpop.permute.xlu1 %201 }
 0x12c   :  { %1902 = vmatmul.bf16.gmra.mxu1 %v8215_v24  ;;  %v3191_v25 = vmax.f32 %v2039_v44, 0.0  ;;  %1991 = vmatmul.bf16.gmra.mxu2 %v8217_v15  ;;  %11035 = vst [vmem:[#allocation44_spill] sm:$0xff] %v8240_v11  ;;  %v340_v44 = vmul.f32 %v7590_v61, %v8211_v34  ;;  %v611_v0 = vmul.f32 %v7594_v63, %v472_v46 }
 0x12d   :  { %6459 = vmatmul.msk.bf16.gmra.mxu3 %vm1706_vm0, %v8220_v22  ;;  %v343_v54 = vmul.f32 %v7583_v59, %v197_v23  ;;  %v344_v8 = vmul.f32 %v7590_v61, %v197_v23  ;;  %v609_v55 = vmul.f32 %v7601_v5, %v468_v47  ;;  %v734_v21 = vadd.f32 %v606_v26, %v338_v9 }
 0x12e   :  { %v8235_v48 = vpack.c.bf16 %v3191_v25, %v3187_v30  ;;  %v342_v30 = vmul.f32 %v7581_v58, %v197_v23  ;;  %v8261_v25 = vpack.c.bf16 %v998_v49, %v994_v53  ;;  %2117 = vmatpush.bf16.msrb.mxu3 %v6072_v42  ;;  %v6325_v53 = vld [vmem:[%s10793_s3 + $0x230] sm:$0xf0]  ;;  %v735_v49 = vadd.f32 %v607_v16, %v339_v14 }
 0x12f   :  { %v1952_v6 = vpop.f32.mrf.mxu2  ;;  %v736_v39 = vadd.f32 %v608_v40, %v340_v44  ;;  %v345_v26 = vmul.f32 %v7597_v1, %v197_v23  ;;  %v740_v22 = vadd.f32 %v612_v37, %v344_v8 }
 0x130   :  { %11034 = vst [vmem:[#allocation43_spill] sm:$0xff] %v8235_v48  ;;  %v2041_v41 = vpop.f32.mrf.mxu3  ;;  %v1953_v2 = vadd.f32 %v1952_v6, %v1864_v45  ;;  %v1776_v13 = vpop.f32.mrf.mxu0  ;;  %v610_v45 = vmul.f32 %v7592_v62, %v472_v46  ;;  %v6197_v6 = vld [vmem:[%s10793_s3 + $0x130] sm:$0xf0]  ;;  %v739_v48 = vadd.f32 %v611_v0, %v343_v54  ;;  %v873_v44 = vadd.f32 %v7627_v28, %v735_v49 }
 0x131   :  { %v1865_v51 = vpop.f32.mrf.mxu1  ;;  %v1777_v33 = vadd.f32 %v1776_v13, %v8080_v10  ;;  %11037 = vst [vmem:[#allocation46_spill] sm:$0xff] %v8261_v25  ;;  %v6200_v42 = vor.u32 %v7015_v50, %v6197_v6  ;;  %v874_v16 = vadd.f32 %v7630_v35, %v736_v39  ;;  %v878_v0 = vadd.f32 %v7630_v35, %v740_v22 }
 0x132   :  { %v8238_v56 = vadd.f32 %v2041_v41, %v1953_v2  ;;  %v341_v41 = vmul.f32 %v7597_v1, %v8211_v34  ;;  %v613_v34 = vmul.f32 %v7601_v5, %v472_v46  ;;  %v346_v39 = vmul.f32 %v7581_v58, %v202_v29 }
 0x133   :  { %v1866_v12 = vadd.f32 %v1865_v51, %v1777_v33  ;;  %v8276_v51 = vpack.c.bf16 %v999_v3, %v995_v52  ;;  %v7047_v33 = vld [vmem:[%s10793_s3 + $0x224] sm:$0xf]  ;;  %v738_v52 = vadd.f32 %v610_v45, %v342_v30  ;;  %2206 = vmatpush.bf16.msrb.mxu0 %v6200_v42  ;;  %v877_v30 = vadd.f32 %v7627_v28, %v739_v48  ;;  %v207_v48 = vpop.permute.xlu2 %206 }
 0x134   :  { %v6328_v24 = vor.u32 %v7047_v33, %v6325_v53  ;;  %v737_v46 = vadd.f32 %v609_v55, %v341_v41  ;;  %v3195_v14 = vmax.f32 %v8238_v56, 0.0  ;;  %v741_v40 = vadd.f32 %v613_v34, %v345_v26  ;;  %v480_v34 = vpop.permute.xlu1 %479 }
 0x135   :  { %11038 = vst [vmem:[#allocation47_spill] sm:$0xff] %v8276_v51  ;;  %v876_v45 = vadd.f32 %v7625_v27, %v738_v52  ;;  %v1005_v53 = vmax.f32 %v877_v30, 0.0  ;;  %v1006_v49 = vmax.f32 %v878_v0, 0.0  ;;  %v349_v26 = vmul.f32 %v7597_v1, %v202_v29  ;;  %v476_v52 = vpop.permute.xlu0 %475 }
 0x136   :  { %2295 = vmatpush.bf16.msrb.mxu1 %v6328_v24  ;;  %v875_v54 = vadd.f32 %v7632_v36, %v737_v46  ;;  %v879_v55 = vadd.f32 %v7632_v36, %v741_v40  ;;  %v615_v30 = vmul.f32 %v7594_v63, %v476_v52 }
 0x137   :  { %v1954_v2 = vpop.f32.mrf.mxu2  ;;  %v1004_v22 = vmax.f32 %v876_v45, 0.0  ;;  %v353_v45 = vmul.f32 %v7597_v1, %v207_v48 }
 0x138   :  { %v2043_v13 = vpop.f32.mrf.mxu3  ;;  %v1955_v60 = vadd.f32 %v1954_v2, %v1866_v12  ;;  %v1779_v47 = vpop.f32.mrf.mxu0  ;;  %v872_v12 = vadd.f32 %v7625_v27, %v734_v21  ;;  %v1001_v2 = vmax.f32 %v873_v44, 0.0  ;;  %v614_v44 = vmul.f32 %v7592_v62, %v476_v52 }
 0x139   :  { %v1868_v9 = vpop.f32.mrf.mxu1  ;;  %v1780_v3 = vadd.f32 %v1779_v47, %v8080_v10  ;;  %v1003_v47 = vmax.f32 %v875_v54, 0.0  ;;  %v619_v54 = vmul.f32 %v7594_v63, %v480_v34 }
 0x13a   :  { %v2044_v15 = vadd.f32 %v2043_v13, %v1955_v60  ;;  %v1000_v41 = vmax.f32 %v872_v12, 0.0  ;;  %v1002_v13 = vmax.f32 %v874_v16, 0.0  ;;  %v348_v60 = vmul.f32 %v7590_v61, %v202_v29 }
 0x13b   :  { %v1869_v43 = vadd.f32 %v1868_v9, %v1780_v3  ;;  %1818 = vmatmul.bf16.gmra.mxu0 %v8240_v11  ;;  %v1007_v9 = vmax.f32 %v879_v55, 0.0  ;;  %v8310_v42 = vpack.c.bf16 %v1005_v53, %v1001_v2  ;;  %v350_v12 = vmul.f32 %v7581_v58, %v207_v48 }
 0x13c   :  { %1907 = vmatmul.bf16.gmra.mxu1 %v8251_v57  ;;  %v3199_v23 = vmax.f32 %v2044_v15, 0.0  ;;  %1996 = vmatmul.bf16.gmra.mxu2 %v8261_v25  ;;  %v8308_v3 = vpack.c.bf16 %v1004_v22, %v1000_v41  ;;  %v8312_v46 = vpack.c.bf16 %v1006_v49, %v1002_v13  ;;  %v620_v41 = vmul.f32 %v7599_v4, %v480_v34  ;;  %v212_v49 = vpop.permute.xlu2 %211 }
 0x13d   :  { %6460 = vmatmul.msk.bf16.gmra.mxu3 %vm1706_vm0, %v8276_v51  ;;  %11041 = vst [vmem:[#allocation50_spill] sm:$0xff] %v8310_v42  ;;  %v621_v55 = vmul.f32 %v7601_v5, %v480_v34  ;;  %v742_v13 = vadd.f32 %v614_v44, %v346_v39  ;;  %v217_v39 = vpop.permute.xlu1 %216 }
 0x13e   :  { %v8299_v37 = vpack.c.bf16 %v3199_v23, %v3195_v14  ;;  %11040 = vst [vmem:[#allocation49_spill] sm:$0xff] %v8308_v3  ;;  %v351_v14 = vmul.f32 %v7583_v59, %v207_v48  ;;  %v352_v23 = vmul.f32 %v7590_v61, %v207_v48 }
 0x13f   :  { %v1957_v15 = vpop.f32.mrf.mxu2  ;;  %11042 = vst [vmem:[#allocation51_spill] sm:$0xff] %v8312_v46 }
 0x140   :  { %11039 = vst [vmem:[#allocation48_spill] sm:$0xff] %v8299_v37  ;;  %v2046_v56 = vpop.f32.mrf.mxu3  ;;  %v1958_v8 = vadd.f32 %v1957_v15, %v1869_v43  ;;  %v1781_v50 = vpop.f32.mrf.mxu0  ;;  %v347_v43 = vmul.f32 %v7583_v59, %v202_v29  ;;  %v618_v29 = vmul.f32 %v7592_v62, %v480_v34  ;;  %v747_v34 = vadd.f32 %v619_v54, %v351_v14 }
 0x141   :  { %v1870_v6 = vpop.f32.mrf.mxu1  ;;  %v1782_v21 = vadd.f32 %v1781_v50, %v8080_v10  ;;  %v355_v54 = vmul.f32 %v7583_v59, %v212_v49 }
 0x142   :  { %v2047_v33 = vadd.f32 %v2046_v56, %v1958_v8  ;;  %v616_v8 = vmul.f32 %v7599_v4, %v476_v52  ;;  %v746_v22 = vadd.f32 %v618_v29, %v350_v12  ;;  %v880_v12 = vadd.f32 %v7625_v27, %v742_v13 }
 0x143   :  { %v1871_v24 = vadd.f32 %v1870_v6, %v1782_v21  ;;  %v8324_v6 = vpack.c.bf16 %v1007_v9, %v1003_v47  ;;  %v617_v21 = vmul.f32 %v7601_v5, %v476_v52  ;;  %v748_v9 = vadd.f32 %v620_v41, %v352_v23 }
 0x144   :  { %v3203_v53 = vmax.f32 %v2047_v33, 0.0  ;;  %v744_v47 = vadd.f32 %v616_v8, %v348_v60  ;;  %v749_v52 = vadd.f32 %v621_v55, %v353_v45  ;;  %v6979_v33 = vld [vmem:[%s10793_s3 + $0x4] sm:$0xf]  ;;  %v884_v60 = vadd.f32 %v7625_v27, %v746_v22 }
 0x145   :  { %11043 = vst [vmem:[#allocation52_spill] sm:$0xff] %v8324_v6  ;;  %v745_v44 = vadd.f32 %v617_v21, %v349_v26  ;;  %v354_v23 = vmul.f32 %v7581_v58, %v212_v49  ;;  %v886_v41 = vadd.f32 %v7630_v35, %v748_v9  ;;  %v356_v13 = vmul.f32 %v7590_v61, %v212_v49  ;;  %v7011_v9 = vld [vmem:[%s10793_s3 + $0x104] sm:$0xf] }
 0x146   :  { %v882_v8 = vadd.f32 %v7630_v35, %v744_v47  ;;  %v887_v55 = vadd.f32 %v7632_v36, %v749_v52  ;;  %v6181_v52 = vld [vmem:[%s10793_s3 + $0x110] sm:$0xf0] }
 0x147   :  { %v1959_v16 = vpop.f32.mrf.mxu2  ;;  %v883_v21 = vadd.f32 %v7632_v36, %v745_v44  ;;  %v360_v44 = vmul.f32 %v7590_v61, %v217_v39 }
 0x148   :  { %v2048_v40 = vpop.f32.mrf.mxu3  ;;  %v1960_v0 = vadd.f32 %v1959_v16, %v1871_v24  ;;  %v1784_v15 = vpop.f32.mrf.mxu0  ;;  %v743_v24 = vadd.f32 %v615_v30, %v347_v43  ;;  %v6053_v43 = vld [vmem:[%s10793_s3 + $0x10] sm:$0xf0] }
 0x149   :  { %v1873_v56 = vpop.f32.mrf.mxu1  ;;  %v1785_v50 = vadd.f32 %v1784_v15, %v8080_v10  ;;  %v6056_v14 = vor.u32 %v6979_v33, %v6053_v43  ;;  %v6184_v43 = vor.u32 %v7011_v9, %v6181_v52 }
 0x14a   :  { %v2049_v2 = vadd.f32 %v2048_v40, %v1960_v0  ;;  %v881_v26 = vadd.f32 %v7627_v28, %v743_v24  ;;  %v358_v24 = vmul.f32 %v7581_v58, %v217_v39 }
 0x14b   :  { %v1874_v48 = vadd.f32 %v1873_v56, %v1785_v50  ;;  %1823 = vmatmul.bf16.gmra.mxu0 %v8308_v3  ;;  %v885_v56 = vadd.f32 %v7627_v28, %v747_v34  ;;  %2118 = vmatpush.bf16.msrb.mxu3 %v6056_v14  ;;  %v1012_v34 = vmax.f32 %v884_v60, 0.0  ;;  %v488_v14 = vpop.permute.xlu0 %487  ;;  %v1014_v60 = vmax.f32 %v886_v41, 0.0 }
 0x14c   :  { %1912 = vmatmul.bf16.gmra.mxu1 %v8310_v42  ;;  %v3207_v16 = vmax.f32 %v2049_v2, 0.0  ;;  %2001 = vmatmul.bf16.gmra.mxu2 %v8312_v46  ;;  %v1009_v47 = vmax.f32 %v881_v26, 0.0  ;;  %v1011_v26 = vmax.f32 %v883_v21, 0.0  ;;  %v626_v37 = vmul.f32 %v7592_v62, %v488_v14  ;;  %v222_v46 = vpop.permute.xlu1 %221 }
 0x14d   :  { %6461 = vmatmul.msk.bf16.gmra.mxu3 %vm1706_vm0, %v8324_v6  ;;  %v1013_v33 = vmax.f32 %v885_v56, 0.0  ;;  %2207 = vmatpush.bf16.msrb.mxu0 %v6184_v43  ;;  %v627_v41 = vmul.f32 %v7594_v63, %v488_v14  ;;  %v629_v43 = vmul.f32 %v7601_v5, %v488_v14 }
 0x14e   :  { %v8334_v40 = vpack.c.bf16 %v3207_v16, %v3203_v53  ;;  %v1008_v53 = vmax.f32 %v880_v12, 0.0  ;;  %v359_v16 = vmul.f32 %v7583_v59, %v217_v39  ;;  %v7043_v12 = vld [vmem:[%s10793_s3 + $0x204] sm:$0xf] }
 0x14f   :  { %v1962_v29 = vpop.f32.mrf.mxu2  ;;  %v8381_v3 = vpack.c.bf16 %v1013_v33, %v1009_v47  ;;  %v754_v33 = vadd.f32 %v626_v37, %v358_v24 }
 0x150   :  { %11044 = vst [vmem:[#allocation53_spill] sm:$0xff] %v8334_v40  ;;  %v2051_v30 = vpop.f32.mrf.mxu3  ;;  %v1963_v45 = vadd.f32 %v1962_v29, %v1874_v48  ;;  %v1786_v0 = vpop.f32.mrf.mxu0  ;;  %v357_v48 = vmul.f32 %v7597_v1, %v212_v49  ;;  %v1010_v49 = vmax.f32 %v882_v8, 0.0  ;;  %v6309_v29 = vld [vmem:[%s10793_s3 + $0x210] sm:$0xf0]  ;;  %v8379_v6 = vpack.c.bf16 %v1012_v34, %v1008_v53 }
 0x151   :  { %v1875_v15 = vpop.f32.mrf.mxu1  ;;  %v1787_v50 = vadd.f32 %v1786_v0, %v8080_v10  ;;  %v6312_v0 = vor.u32 %v7043_v12, %v6309_v29  ;;  %v892_v37 = vadd.f32 %v7625_v27, %v754_v33 }
 0x152   :  { %v2052_v2 = vadd.f32 %v2051_v30, %v1963_v45  ;;  %v484_v30 = vpop.permute.xlu2 %483  ;;  %v1015_v45 = vmax.f32 %v887_v55, 0.0  ;;  %11045 = vst [vmem:[#allocation54_spill] sm:$0xff] %v8379_v6  ;;  %v8384_v42 = vpack.c.bf16 %v1014_v60, %v1010_v49  ;;  %v755_v49 = vadd.f32 %v627_v41, %v359_v16 }
 0x153   :  { %v1876_v22 = vadd.f32 %v1875_v15, %v1787_v50  ;;  %v361_v15 = vmul.f32 %v7597_v1, %v217_v39  ;;  %v622_v56 = vmul.f32 %v7592_v62, %v484_v30  ;;  %v623_v8 = vmul.f32 %v7594_v63, %v484_v30  ;;  %2296 = vmatpush.bf16.msrb.mxu1 %v6312_v0  ;;  %v492_v24 = vpop.permute.xlu0 %491 }
 0x154   :  { %v624_v50 = vmul.f32 %v7599_v4, %v484_v30  ;;  %v625_v40 = vmul.f32 %v7601_v5, %v484_v30  ;;  %v628_v39 = vmul.f32 %v7599_v4, %v488_v14  ;;  %11046 = vst [vmem:[#allocation55_spill] sm:$0xff] %v8384_v42  ;;  %v8386_v51 = vpack.c.bf16 %v1015_v45, %v1011_v26 }
 0x155   :  { %v751_v0 = vadd.f32 %v623_v8, %v355_v54  ;;  %v3211_v53 = vmax.f32 %v2052_v2, 0.0  ;;  %v757_v60 = vadd.f32 %v629_v43, %v361_v15 }
 0x156   :  { %11047 = vst [vmem:[#allocation56_spill] sm:$0xff] %v8386_v51  ;;  %v753_v47 = vadd.f32 %v625_v40, %v357_v48  ;;  %v756_v14 = vadd.f32 %v628_v39, %v360_v44  ;;  %v893_v40 = vadd.f32 %v7627_v28, %v755_v49  ;;  %v362_v44 = vmul.f32 %v7581_v58, %v222_v46 }
 0x157   :  { %v1964_v9 = vpop.f32.mrf.mxu2  ;;  %v889_v54 = vadd.f32 %v7627_v28, %v751_v0  ;;  %v895_v41 = vadd.f32 %v7632_v36, %v757_v60  ;;  %v364_v39 = vmul.f32 %v7590_v61, %v222_v46  ;;  %v496_v0 = vpop.permute.xlu1 %495 }
 0x158   :  { %v2053_v52 = vpop.f32.mrf.mxu3  ;;  %v1965_v21 = vadd.f32 %v1964_v9, %v1876_v22  ;;  %v1789_v55 = vpop.f32.mrf.mxu0  ;;  %v750_v22 = vadd.f32 %v622_v56, %v354_v23  ;;  %v894_v15 = vadd.f32 %v7630_v35, %v756_v14  ;;  %v1021_v33 = vmax.f32 %v893_v40, 0.0 }
 0x159   :  { %v1878_v12 = vpop.f32.mrf.mxu1  ;;  %v1790_v29 = vadd.f32 %v1789_v55, %v8080_v10  ;;  %v752_v55 = vadd.f32 %v624_v50, %v356_v13 }
 0x15a   :  { %v2054_v30 = vadd.f32 %v2053_v52, %v1965_v21  ;;  %v888_v56 = vadd.f32 %v7625_v27, %v750_v22  ;;  %v891_v52 = vadd.f32 %v7632_v36, %v753_v47  ;;  %v227_v48 = vpop.permute.xlu2 %226  ;;  %v1017_v47 = vmax.f32 %v889_v54, 0.0 }
 0x15b   :  { %v1879_v9 = vadd.f32 %v1878_v12, %v1790_v29  ;;  %1828 = vmatmul.bf16.gmra.mxu0 %v8379_v6  ;;  %v890_v2 = vadd.f32 %v7630_v35, %v752_v55  ;;  %v363_v12 = vmul.f32 %v7583_v59, %v222_v46  ;;  %v365_v29 = vmul.f32 %v7597_v1, %v222_v46 }
 0x15c   :  { %1917 = vmatmul.bf16.gmra.mxu1 %v8381_v3  ;;  %v3215_v34 = vmax.f32 %v2054_v30, 0.0  ;;  %2006 = vmatmul.bf16.gmra.mxu2 %v8384_v42  ;;  %v366_v30 = vmul.f32 %v7581_v58, %v227_v48  ;;  %v367_v22 = vmul.f32 %v7583_v59, %v227_v48  ;;  %v630_v55 = vmul.f32 %v7592_v62, %v492_v24 }
 0x15d   :  { %6462 = vmatmul.msk.bf16.gmra.mxu3 %vm1706_vm0, %v8386_v51  ;;  %v1018_v49 = vmax.f32 %v890_v2, 0.0  ;;  %v1022_v14 = vmax.f32 %v894_v15, 0.0  ;;  %v1019_v60 = vmax.f32 %v891_v52, 0.0  ;;  %v369_v46 = vmul.f32 %v7597_v1, %v227_v48 }
 0x15e   :  { %v8393_v23 = vpack.c.bf16 %v3215_v34, %v3211_v53  ;;  %v1016_v53 = vmax.f32 %v888_v56, 0.0  ;;  %v1020_v34 = vmax.f32 %v892_v37, 0.0  ;;  %v631_v58 = vmul.f32 %v7594_v63, %v492_v24 }
 0x15f   :  { %v1967_v26 = vpop.f32.mrf.mxu2  ;;  %v632_v59 = vmul.f32 %v7599_v4, %v492_v24  ;;  %v633_v56 = vmul.f32 %v7601_v5, %v492_v24  ;;  %v758_v54 = vadd.f32 %v630_v55, %v362_v44  ;;  %v636_v52 = vmul.f32 %v7599_v4, %v496_v0 }
 0x160   :  { %11048 = vst [vmem:[#allocation57_spill] sm:$0xff] %v8393_v23  ;;  %v2056_v45 = vpop.f32.mrf.mxu3  ;;  %v1968_v13 = vadd.f32 %v1967_v26, %v1879_v9  ;;  %v1791_v8 = vpop.f32.mrf.mxu0  ;;  %v368_v9 = vmul.f32 %v7590_v61, %v227_v48  ;;  %v1023_v26 = vmax.f32 %v895_v41, 0.0  ;;  %v8420_v40 = vpack.c.bf16 %v1020_v34, %v1016_v53  ;;  %v11081_v23 = vld [vmem:[#allocation29_spill] sm:$0xff] }
 0x161   :  { %v1880_v50 = vpop.f32.mrf.mxu1  ;;  %v1792_v16 = vadd.f32 %v1791_v8, %v8080_v10  ;;  %v635_v8 = vmul.f32 %v7594_v63, %v496_v0  ;;  %v637_v48 = vmul.f32 %v7601_v5, %v496_v0  ;;  %v8425_v15 = vpack.c.bf16 %v1022_v14, %v1018_v49 }
 0x162   :  { %v2057_v21 = vadd.f32 %v2056_v45, %v1968_v13  ;;  %v634_v45 = vmul.f32 %v7592_v62, %v496_v0  ;;  %v8422_v62 = vpack.c.bf16 %v1021_v33, %v1017_v47  ;;  %v8427_v63 = vpack.c.bf16 %v1023_v26, %v1019_v60 }
 0x163   :  { %v1881_v43 = vadd.f32 %v1880_v50, %v1792_v16  ;;  %v759_v44 = vadd.f32 %v631_v58, %v363_v12  ;;  %v763_v4 = vadd.f32 %v635_v8, %v367_v22  ;;  %v764_v5 = vadd.f32 %v636_v52, %v368_v9  ;;  %v6171_v12 = vld [vmem:[%s10793_s3 + $0xe8] sm:$0xf]  ;;  %v7042_v52 = vld [vmem:[%s10793_s3 + $0x1f4] sm:$0xf0] }
 0x164   :  { %v762_v24 = vadd.f32 %v634_v45, %v366_v30  ;;  %v3219_v55 = vmax.f32 %v2057_v21, 0.0  ;;  %v765_v0 = vadd.f32 %v637_v48, %v369_v46  ;;  %v761_v34 = vadd.f32 %v633_v56, %v365_v29 }
 0x165   :  { %v896_v30 = vadd.f32 %v7625_v27, %v758_v54  ;;  %v897_v22 = vadd.f32 %v7627_v28, %v759_v44  ;;  %v901_v29 = vadd.f32 %v7627_v28, %v763_v4  ;;  %v902_v58 = vadd.f32 %v7630_v35, %v764_v5 }
 0x166   :  { %v900_v21 = vadd.f32 %v7625_v27, %v762_v24  ;;  %v899_v27 = vadd.f32 %v7632_v36, %v761_v34 }
 0x167   :  { %v1969_v61 = vpop.f32.mrf.mxu2  ;;  %v1024_v8 = vmax.f32 %v896_v30, 0.0  ;;  %v1025_v54 = vmax.f32 %v897_v22, 0.0  ;;  %v1029_v28 = vmax.f32 %v901_v29, 0.0  ;;  %v1030_v48 = vmax.f32 %v902_v58, 0.0 }
 0x168   :  { %v2058_v13 = vpop.f32.mrf.mxu3  ;;  %v1970_v50 = vadd.f32 %v1969_v61, %v1881_v43  ;;  %v1794_v2 = vpop.f32.mrf.mxu0  ;;  %v760_v43 = vadd.f32 %v632_v59, %v364_v39  ;;  %v7010_v39 = vld [vmem:[%s10793_s3 + $0xf4] sm:$0xf0]  ;;  %v903_v59 = vadd.f32 %v7632_v36, %v765_v0  ;;  %v1028_v56 = vmax.f32 %v900_v21, 0.0  ;;  %v6299_v36 = vld [vmem:[%s10793_s3 + $0x1e8] sm:$0xf] }
 0x169   :  { %v1883_v37 = vpop.f32.mrf.mxu1  ;;  %v1795_v1 = vadd.f32 %v1794_v2, %v8080_v10  ;;  %v6172_v49 = vor.u32 %v7010_v39, %v6171_v12  ;;  %v6443_v2 = vld [vmem:[%s10793_s3 + $0x308] sm:$0xf]  ;;  %v6300_v44 = vor.u32 %v7042_v52, %v6299_v36  ;;  %v8472_v39 = vpack.c.bf16 %v1029_v28, %v1025_v54 }
 0x16a   :  { %v2059_v16 = vadd.f32 %v2058_v13, %v1970_v50  ;;  %v898_v14 = vadd.f32 %v7630_v35, %v760_v43  ;;  %v1031_v24 = vmax.f32 %v903_v59, 0.0  ;;  %v8470_v12 = vpack.c.bf16 %v1028_v56, %v1024_v8  ;;  %v6155_v52 = vld [vmem:[%s10793_s3 + $0xc8] sm:$0xf] }
 0x16b   :  { %v1884_v41 = vadd.f32 %v1883_v37, %v1795_v1  ;;  %1833 = vmatmul.bf16.gmra.mxu0 %v8420_v40  ;;  %2467 = vmatpush.bf16.msra.mxu3 %v6172_v49  ;;  %v7078_v37 = vld [vmem:[%s10793_s3 + $0x314] sm:$0xf0]  ;;  %v6427_v1 = vld [vmem:[%s10793_s3 + $0x2e8] sm:$0xf] }
 0x16c   :  { %1922 = vmatmul.bf16.gmra.mxu1 %v8422_v62  ;;  %v3223_v53 = vmax.f32 %v2059_v16, 0.0  ;;  %2011 = vmatmul.bf16.gmra.mxu2 %v8425_v15  ;;  %v1026_v50 = vmax.f32 %v898_v14, 0.0  ;;  %v6444_v35 = vor.u32 %v7078_v37, %v6443_v2  ;;  %v1027_v16 = vmax.f32 %v899_v27, 0.0 }
 0x16d   :  { %6463 = vmatmul.msk.bf16.gmra.mxu3 %vm1706_vm0, %v8427_v63  ;;  %2556 = vmatpush.bf16.msra.mxu0 %v6300_v44 }
 0x16e   :  { %v8434_v47 = vpack.c.bf16 %v3223_v53, %v3219_v55  ;;  %2741 = vmatpush.bf16.msra.mxu2 %v6444_v35  ;;  %v8474_v30 = vpack.c.bf16 %v1030_v48, %v1026_v50  ;;  %v8476_v22 = vpack.c.bf16 %v1031_v24, %v1027_v16 }
 0x16f   :  { %v1972_v33 = vpop.f32.mrf.mxu2 }
 0x170   :  { %11049 = vst [vmem:[#allocation58_spill] sm:$0xff] %v8434_v47  ;;  %v2061_v9 = vpop.f32.mrf.mxu3  ;;  %v1973_v60 = vadd.f32 %v1972_v33, %v1884_v41  ;;  %v1796_v26 = vpop.f32.mrf.mxu0  ;;  %v7074_v41 = vld [vmem:[%s10793_s3 + $0x2f4] sm:$0xf0]  ;;  %v11080_v47 = vld [vmem:[#allocation26_spill] sm:$0xff] }
 0x171   :  { %v1885_v46 = vpop.f32.mrf.mxu1  ;;  %v1797_v45 = vadd.f32 %v1796_v26, %v8080_v10  ;;  %v6428_v55 = vor.u32 %v7074_v41, %v6427_v1  ;;  %v7006_v1 = vld [vmem:[%s10793_s3 + $0xd4] sm:$0xf0] }
 0x172   :  { %v2062_v61 = vadd.f32 %v2061_v9, %v1973_v60  ;;  %v6156_v24 = vor.u32 %v7006_v1, %v6155_v52 }
 0x173   :  { %v1886_v13 = vadd.f32 %v1885_v46, %v1797_v45  ;;  %2645 = vmatpush.bf16.msra.mxu1 %v6428_v55 }
 0x174   :  { %v3227_v9 = vmax.f32 %v2062_v61, 0.0  ;;  %2468 = vmatpush.bf16.msra.mxu3 %v6156_v24 }
 0x177   :  { %v1974_v4 = vpop.f32.mrf.mxu2 }
 0x178   :  { %v2063_v43 = vpop.f32.mrf.mxu3  ;;  %v1975_v53 = vadd.f32 %v1974_v4, %v1886_v13  ;;  %v1799_v5 = vpop.f32.mrf.mxu0 }
 0x179   :  { %v1888_v0 = vpop.f32.mrf.mxu1  ;;  %v1800_v34 = vadd.f32 %v1799_v5, %v8080_v10  ;;  %v6283_v5 = vld [vmem:[%s10793_s3 + $0x1c8] sm:$0xf] }
 0x17a   :  { %v2064_v21 = vadd.f32 %v2063_v43, %v1975_v53 }
 0x17b   :  { %v1889_v33 = vadd.f32 %v1888_v0, %v1800_v34  ;;  %1838 = vmatmul.bf16.gmra.mxu0 %v8470_v12  ;;  %v7038_v0 = vld [vmem:[%s10793_s3 + $0x1d4] sm:$0xf0] }
 0x17c   :  { %1927 = vmatmul.bf16.gmra.mxu1 %v8472_v39  ;;  %v3231_v49 = vmax.f32 %v2064_v21, 0.0  ;;  %2016 = vmatmul.bf16.gmra.mxu2 %v8474_v30  ;;  %v6284_v34 = vor.u32 %v7038_v0, %v6283_v5  ;;  %v6411_v21 = vld [vmem:[%s10793_s3 + $0x2c8] sm:$0xf] }
 0x17d   :  { %6464 = vmatmul.msk.bf16.gmra.mxu3 %vm1706_vm0, %v8476_v22  ;;  %v11055_v0 = vld [vmem:[#allocation6_spill] sm:$0xff] }
 0x17e   :  { %v8483_v29 = vpack.c.bf16 %v3231_v49, %v3227_v9  ;;  %2557 = vmatpush.bf16.msra.mxu0 %v6284_v34  ;;  %v11056_v34 = vld [vmem:[#allocation9_spill] sm:$0xff] }
 0x17f   :  { %v1977_v14 = vpop.f32.mrf.mxu2 }
 0x180   :  { %11050 = vst [vmem:[#allocation59_spill] sm:$0xff] %v8483_v29  ;;  %v2066_v60 = vpop.f32.mrf.mxu3  ;;  %v1978_v26 = vadd.f32 %v1977_v14, %v1889_v33  ;;  %v1801_v46 = vpop.f32.mrf.mxu0  ;;  %v7070_v33 = vld [vmem:[%s10793_s3 + $0x2d4] sm:$0xf0]  ;;  %v6235_v29 = vld [vmem:[%s10793_s3 + $0x168] sm:$0xf] }
 0x181   :  { %v1890_v45 = vpop.f32.mrf.mxu1  ;;  %v1802_v58 = vadd.f32 %v1801_v46, %v8080_v10  ;;  %v6412_v9 = vor.u32 %v7070_v33, %v6411_v21  ;;  %v6139_v33 = vld [vmem:[%s10793_s3 + $0xa8] sm:$0xf] }
 0x182   :  { %v2067_v59 = vadd.f32 %v2066_v60, %v1978_v26 }
 0x183   :  { %v1891_v27 = vadd.f32 %v1890_v45, %v1802_v58  ;;  %2646 = vmatpush.bf16.msra.mxu1 %v6412_v9  ;;  %v7002_v9 = vld [vmem:[%s10793_s3 + $0xb4] sm:$0xf0] }
 0x184   :  { %v3235_v37 = vmax.f32 %v2067_v59, 0.0 }
 0x187   :  { %v1979_v13 = vpop.f32.mrf.mxu2 }
 0x188   :  { %v2068_v8 = vpop.f32.mrf.mxu3  ;;  %v1980_v61 = vadd.f32 %v1979_v13, %v1891_v27  ;;  %v1804_v56 = vpop.f32.mrf.mxu0 }
 0x189   :  { %v1893_v54 = vpop.f32.mrf.mxu1  ;;  %v1805_v28 = vadd.f32 %v1804_v56, %v8080_v10 }
 0x18a   :  { %v2069_v50 = vadd.f32 %v2068_v8, %v1980_v61 }
 0x18b   :  { %v1894_v2 = vadd.f32 %v1893_v54, %v1805_v28  ;;  %2208 = vmatmul.bf16.vlgmr.msrb.gmra.mxu0 %v7660_v18 }
 0x18c   :  { %2297 = vmatmul.bf16.vlgmr.msrb.gmra.mxu1 %v7662_v19  ;;  %v3239_v35 = vmax.f32 %v2069_v50, 0.0  ;;  %6465 = vmatmul.msk.bf16.vlgmr.msrb.gmra.mxu2 %vm1706_vm0, %v7664_v20 }
 0x18d   :  { %2119 = vmatmul.bf16.vlgmr.msrb.gmra.mxu3 %v7658_v17 }
 0x18e   :  { %v8492_v36 = vpack.c.bf16 %v3239_v35, %v3235_v37 }
 0x18f   :  { %v1982_v48 = vpop.f32.mrf.mxu2 }
 0x190   :  { %11051 = vst [vmem:[#allocation60_spill] sm:$0xff] %v8492_v36  ;;  %v2071_v16 = vpop.f32.mrf.mxu3  ;;  %v1983_v44 = vadd.f32 %v1982_v48, %v1894_v2  ;;  %v1806_v41 = vpop.f32.mrf.mxu0 }
 0x191   :  { %v1895_v4 = vpop.f32.mrf.mxu1  ;;  %v1807_v43 = vadd.f32 %v1806_v41, %v8080_v10 }
 0x192   :  { %v2072_v55 = vadd.f32 %v2071_v16, %v1983_v44 }
 0x193   :  { %v1896_v53 = vadd.f32 %v1895_v4, %v1807_v43  ;;  %v11053_v43 = vld [vmem:[#allocation7_spill] sm:$0xff] }
 0x194   :  { %v3243_v27 = vmax.f32 %v2072_v55, 0.0  ;;  %v11054_v55 = vld [vmem:[#allocation8_spill] sm:$0xff] }
 0x197   :  { %v1984_v49 = vpop.f32.mrf.mxu2 }
 0x198   :  { %v2073_v14 = vpop.f32.mrf.mxu3  ;;  %v1985_v60 = vadd.f32 %v1984_v49, %v1896_v53  ;;  %v1809_v26 = vpop.f32.mrf.mxu0 }
 0x199   :  { %v1898_v46 = vpop.f32.mrf.mxu1  ;;  %v1810_v45 = vadd.f32 %v1809_v26, %v8080_v10 }
 0x19a   :  { %v2074_v58 = vadd.f32 %v2073_v14, %v1985_v60  ;;  %v6140_v60 = vor.u32 %v7002_v9, %v6139_v33  ;;  %v11061_v33 = vld [vmem:[#allocation13_spill] sm:$0xff] }
 0x19b   :  { %v1899_v59 = vadd.f32 %v1898_v46, %v1810_v45  ;;  %2213 = vmatmul.bf16.gmra.mxu0 %v7733_v32 }
 0x19c   :  { %2302 = vmatmul.bf16.gmra.mxu1 %v7736_v38  ;;  %v3247_v13 = vmax.f32 %v2074_v58, 0.0  ;;  %6466 = vmatmul.msk.bf16.gmra.mxu2 %vm1706_vm0, %v7738_v7 }
 0x19d   :  { %2124 = vmatmul.bf16.gmra.mxu3 %v7731_v31 }
 0x19e   :  { %v8519_v8 = vpack.c.bf16 %v3247_v13, %v3243_v27  ;;  %2469 = vmatpush.bf16.msra.mxu3 %v6140_v60  ;;  %v6267_v13 = vld [vmem:[%s10793_s3 + $0x1a8] sm:$0xf] }
 0x19f   :  { %v1987_v61 = vpop.f32.mrf.mxu2 }
 0x1a0   :  { %11052 = vst [vmem:[#allocation61_spill] sm:$0xff] %v8519_v8  ;;  %v2076_v56 = vpop.f32.mrf.mxu3  ;;  %v1988_v54 = vadd.f32 %v1987_v61, %v1899_v59  ;;  %v1811_v28 = vpop.f32.mrf.mxu0  ;;  %v7034_v61 = vld [vmem:[%s10793_s3 + $0x1b4] sm:$0xf0] }
 0x1a1   :  { %v1900_v50 = vpop.f32.mrf.mxu1  ;;  %v1812_v2 = vadd.f32 %v1811_v28, %v8080_v10  ;;  %v7066_v28 = vld [vmem:[%s10793_s3 + $0x2b4] sm:$0xf0] }
 0x1a2   :  { %v2077_v37 = vadd.f32 %v2076_v56, %v1988_v54  ;;  %v6268_v56 = vor.u32 %v7034_v61, %v6267_v13  ;;  %v6395_v54 = vld [vmem:[%s10793_s3 + $0x2a8] sm:$0xf] }
 0x1a3   :  { %v1901_v35 = vadd.f32 %v1900_v50, %v1812_v2  ;;  %v6396_v50 = vor.u32 %v7066_v28, %v6395_v54 }
 0x1a4   :  { %v3251_v53 = vmax.f32 %v2077_v37, 0.0  ;;  %2558 = vmatpush.bf16.msra.mxu0 %v6268_v56 }
 0x1a5   :  { %2647 = vmatpush.bf16.msra.mxu1 %v6396_v50 }
 0x1a7   :  { %v1989_v52 = vpop.f32.mrf.mxu2 }
 0x1a8   :  { %v2078_v1 = vpop.f32.mrf.mxu3  ;;  %v1990_v48 = vadd.f32 %v1989_v52, %v1901_v35  ;;  %v1814_v16 = vpop.f32.mrf.mxu0 }
 0x1a9   :  { %v1903_v24 = vpop.f32.mrf.mxu1  ;;  %v1815_v44 = vadd.f32 %v1814_v16, %v8080_v10 }
 0x1aa   :  { %v2079_v41 = vadd.f32 %v2078_v1, %v1990_v48 }
 0x1ab   :  { %v1904_v4 = vadd.f32 %v1903_v24, %v1815_v44  ;;  %2218 = vmatmul.bf16.gmra.mxu0 %v11053_v43  ;;  %v11058_v44 = vld [vmem:[#allocation11_spill] sm:$0xff] }
 0x1ac   :  { %2307 = vmatmul.bf16.gmra.mxu1 %v11054_v55  ;;  %v3255_v5 = vmax.f32 %v2079_v41, 0.0  ;;  %6467 = vmatmul.msk.bf16.gmra.mxu2 %vm1706_vm0, %v11056_v34  ;;  %v11059_v41 = vld [vmem:[#allocation12_spill] sm:$0xff] }
 0x1ad   :  { %2129 = vmatmul.bf16.gmra.mxu3 %v11055_v0 }
 0x1ae   :  { %v8528_v21 = vpack.c.bf16 %v3255_v5, %v3251_v53  ;;  %v11060_v5 = vld [vmem:[#allocation10_spill] sm:$0xff] }
 0x1af   :  { %v1992_v49 = vpop.f32.mrf.mxu2 }
 0x1b0   :  { %11057 = vst [vmem:[#allocation7_spill] sm:$0xff] %v8528_v21  ;;  %v2081_v14 = vpop.f32.mrf.mxu3  ;;  %v1993_v26 = vadd.f32 %v1992_v49, %v1904_v4  ;;  %v1816_v46 = vpop.f32.mrf.mxu0 }
 0x1b1   :  { %v1905_v45 = vpop.f32.mrf.mxu1  ;;  %v1817_v58 = vadd.f32 %v1816_v46, %v8080_v10 }
 0x1b2   :  { %v2082_v59 = vadd.f32 %v2081_v14, %v1993_v26 }
 0x1b3   :  { %v1906_v27 = vadd.f32 %v1905_v45, %v1817_v58 }
 0x1b4   :  { %v3259_v4 = vmax.f32 %v2082_v59, 0.0 }
 0x1b7   :  { %v1994_v2 = vpop.f32.mrf.mxu2 }
 0x1b8   :  { %v2083_v37 = vpop.f32.mrf.mxu3  ;;  %v1995_v35 = vadd.f32 %v1994_v2, %v1906_v27  ;;  %v1819_v52 = vpop.f32.mrf.mxu0 }
 0x1b9   :  { %v1908_v1 = vpop.f32.mrf.mxu1  ;;  %v1820_v48 = vadd.f32 %v1819_v52, %v8080_v10 }
 0x1ba   :  { %v2084_v16 = vadd.f32 %v2083_v37, %v1995_v35  ;;  %v11063_v37 = vld [vmem:[#allocation15_spill] sm:$0xff]  ;;  %v11064_v35 = vld [vmem:[#allocation16_spill] sm:$0xff] }
 0x1bb   :  { %v1909_v24 = vadd.f32 %v1908_v1, %v1820_v48  ;;  %2223 = vmatmul.bf16.gmra.mxu0 %v11058_v44  ;;  %v11065_v48 = vld [vmem:[#allocation14_spill] sm:$0xff] }
 0x1bc   :  { %2312 = vmatmul.bf16.gmra.mxu1 %v11059_v41  ;;  %v3263_v53 = vmax.f32 %v2084_v16, 0.0  ;;  %6468 = vmatmul.msk.bf16.gmra.mxu2 %vm1706_vm0, %v11061_v33  ;;  %v11066_v16 = vld [vmem:[#allocation17_spill] sm:$0xff] }
 0x1bd   :  { %2134 = vmatmul.bf16.gmra.mxu3 %v11060_v5 }
 0x1be   :  { %v8555_v9 = vpack.c.bf16 %v3263_v53, %v3259_v4  ;;  %v6123_v4 = vld [vmem:[%s10793_s3 + $0x88] sm:$0xf]  ;;  %v6998_v53 = vld [vmem:[%s10793_s3 + $0x94] sm:$0xf0] }
 0x1bf   :  { %v1997_v49 = vpop.f32.mrf.mxu2 }
 0x1c0   :  { %11062 = vst [vmem:[#allocation8_spill] sm:$0xff] %v8555_v9  ;;  %v2086_v14 = vpop.f32.mrf.mxu3  ;;  %v1998_v60 = vadd.f32 %v1997_v49, %v1909_v24  ;;  %v1821_v26 = vpop.f32.mrf.mxu0 }
 0x1c1   :  { %v1910_v46 = vpop.f32.mrf.mxu1  ;;  %v1822_v45 = vadd.f32 %v1821_v26, %v8080_v10 }
 0x1c2   :  { %v2087_v58 = vadd.f32 %v2086_v14, %v1998_v60  ;;  %v6124_v60 = vor.u32 %v6998_v53, %v6123_v4 }
 0x1c3   :  { %v1911_v27 = vadd.f32 %v1910_v46, %v1822_v45 }
 0x1c4   :  { %v3267_v52 = vmax.f32 %v2087_v58, 0.0  ;;  %2470 = vmatpush.bf16.msra.mxu3 %v6124_v60 }
 0x1c7   :  { %v1999_v13 = vpop.f32.mrf.mxu2 }
 0x1c8   :  { %v2088_v61 = vpop.f32.mrf.mxu3  ;;  %v2000_v59 = vadd.f32 %v1999_v13, %v1911_v27  ;;  %v1824_v56 = vpop.f32.mrf.mxu0 }
 0x1c9   :  { %v1913_v54 = vpop.f32.mrf.mxu1  ;;  %v1825_v28 = vadd.f32 %v1824_v56, %v8080_v10 }
 0x1ca   :  { %v2089_v50 = vadd.f32 %v2088_v61, %v2000_v59  ;;  %v6251_v61 = vld [vmem:[%s10793_s3 + $0x188] sm:$0xf]  ;;  %v7030_v59 = vld [vmem:[%s10793_s3 + $0x194] sm:$0xf0] }
 0x1cb   :  { %v1914_v2 = vadd.f32 %v1913_v54, %v1825_v28  ;;  %2228 = vmatmul.bf16.gmra.mxu0 %v11063_v37  ;;  %v6252_v56 = vor.u32 %v7030_v59, %v6251_v61  ;;  %v6379_v54 = vld [vmem:[%s10793_s3 + $0x288] sm:$0xf]  ;;  %v7062_v28 = vld [vmem:[%s10793_s3 + $0x294] sm:$0xf0] }
 0x1cc   :  { %2317 = vmatmul.bf16.gmra.mxu1 %v11064_v35  ;;  %v3271_v1 = vmax.f32 %v2089_v50, 0.0  ;;  %6469 = vmatmul.msk.bf16.gmra.mxu2 %vm1706_vm0, %v11066_v16  ;;  %v6380_v50 = vor.u32 %v7062_v28, %v6379_v54  ;;  %v11070_v61 = vld [vmem:[#allocation18_spill] sm:$0xff]  ;;  %v11071_v59 = vld [vmem:[#allocation21_spill] sm:$0xff] }
 0x1cd   :  { %2139 = vmatmul.bf16.gmra.mxu3 %v11065_v48  ;;  %2559 = vmatpush.bf16.msra.mxu0 %v6252_v56 }
 0x1ce   :  { %v8564_v24 = vpack.c.bf16 %v3271_v1, %v3267_v52  ;;  %2648 = vmatpush.bf16.msra.mxu1 %v6380_v50 }
 0x1cf   :  { %v2002_v49 = vpop.f32.mrf.mxu2 }
 0x1d0   :  { %11067 = vst [vmem:[#allocation6_spill] sm:$0xff] %v8564_v24  ;;  %v2091_v14 = vpop.f32.mrf.mxu3  ;;  %v2003_v26 = vadd.f32 %v2002_v49, %v1914_v2  ;;  %v1826_v46 = vpop.f32.mrf.mxu0 }
 0x1d1   :  { %v1915_v45 = vpop.f32.mrf.mxu1  ;;  %v1827_v58 = vadd.f32 %v1826_v46, %v8080_v10  ;;  %v11069_v46 = vld [vmem:[#allocation20_spill] sm:$0xff] }
 0x1d2   :  { %v2092_v27 = vadd.f32 %v2091_v14, %v2003_v26  ;;  %v11068_v26 = vld [vmem:[#allocation19_spill] sm:$0xff] }
 0x1d3   :  { %v1916_v13 = vadd.f32 %v1915_v45, %v1827_v58 }
 0x1d4   :  { %v3275_v45 = vmax.f32 %v2092_v27, 0.0 }
 0x1d7   :  { %v2004_v2 = vpop.f32.mrf.mxu2 }
 0x1d8   :  { %v2093_v52 = vpop.f32.mrf.mxu3  ;;  %v2005_v1 = vadd.f32 %v2004_v2, %v1916_v13  ;;  %v1829_v4 = vpop.f32.mrf.mxu0 }
 0x1d9   :  { %v1918_v53 = vpop.f32.mrf.mxu1  ;;  %v1830_v49 = vadd.f32 %v1829_v4, %v8080_v10 }
 0x1da   :  { %v2094_v14 = vadd.f32 %v2093_v52, %v2005_v1 }
 0x1db   :  { %v1919_v60 = vadd.f32 %v1918_v53, %v1830_v49  ;;  %2233 = vmatmul.bf16.gmra.mxu0 %v11068_v26 }
 0x1dc   :  { %2322 = vmatmul.bf16.gmra.mxu1 %v11069_v46  ;;  %v3279_v58 = vmax.f32 %v2094_v14, 0.0  ;;  %6470 = vmatmul.msk.bf16.gmra.mxu2 %vm1706_vm0, %v11071_v59 }
 0x1dd   :  { %2144 = vmatmul.bf16.gmra.mxu3 %v11070_v61 }
 0x1de   :  { %v8591_v56 = vpack.c.bf16 %v3279_v58, %v3275_v45  ;;  %v11073_v45 = vld [vmem:[#allocation23_spill] sm:$0xff]  ;;  %v11074_v58 = vld [vmem:[#allocation24_spill] sm:$0xff] }
 0x1df   :  { %v2007_v13 = vpop.f32.mrf.mxu2 }
 0x1e0   :  { %11072 = vst [vmem:[#allocation9_spill] sm:$0xff] %v8591_v56  ;;  %v2096_v54 = vpop.f32.mrf.mxu3  ;;  %v2008_v28 = vadd.f32 %v2007_v13, %v1919_v60  ;;  %v1831_v50 = vpop.f32.mrf.mxu0  ;;  %v11075_v56 = vld [vmem:[#allocation22_spill] sm:$0xff] }
 0x1e1   :  { %v1920_v2 = vpop.f32.mrf.mxu1  ;;  %v1832_v52 = vadd.f32 %v1831_v50, %v8080_v10  ;;  %v11076_v50 = vld [vmem:[#allocation25_spill] sm:$0xff] }
 0x1e2   :  { %v2097_v1 = vadd.f32 %v2096_v54, %v2008_v28  ;;  %v6107_v28 = vld [vmem:[%s10793_s3 + $0x68] sm:$0xf] }
 0x1e3   :  { %v1921_v4 = vadd.f32 %v1920_v2, %v1832_v52 }
 0x1e4   :  { %v3283_v60 = vmax.f32 %v2097_v1, 0.0 }
 0x1e7   :  { %v2009_v53 = vpop.f32.mrf.mxu2 }
 0x1e8   :  { %v2098_v49 = vpop.f32.mrf.mxu3  ;;  %v2010_v27 = vadd.f32 %v2009_v53, %v1921_v4  ;;  %v1834_v14 = vpop.f32.mrf.mxu0 }
 0x1e9   :  { %v1923_v24 = vpop.f32.mrf.mxu1  ;;  %v1835_v9 = vadd.f32 %v1834_v14, %v8080_v10 }
 0x1ea   :  { %v2099_v21 = vadd.f32 %v2098_v49, %v2010_v27 }
 0x1eb   :  { %v1924_v8 = vadd.f32 %v1923_v24, %v1835_v9  ;;  %2238 = vmatmul.bf16.gmra.mxu0 %v11073_v45  ;;  %v6994_v9 = vld [vmem:[%s10793_s3 + $0x74] sm:$0xf0] }
 0x1ec   :  { %2327 = vmatmul.bf16.gmra.mxu1 %v11074_v58  ;;  %v3287_v13 = vmax.f32 %v2099_v21, 0.0  ;;  %6471 = vmatmul.msk.bf16.gmra.mxu2 %vm1706_vm0, %v11076_v50  ;;  %v6108_v52 = vor.u32 %v6994_v9, %v6107_v28  ;;  %v6363_v28 = vld [vmem:[%s10793_s3 + $0x268] sm:$0xf] }
 0x1ed   :  { %2149 = vmatmul.bf16.gmra.mxu3 %v11075_v56  ;;  %v11097_v58 = vld [vmem:[#allocation42_spill] sm:$0xff] }
 0x1ee   :  { %v8600_v54 = vpack.c.bf16 %v3287_v13, %v3283_v60  ;;  %2471 = vmatpush.bf16.msra.mxu3 %v6108_v52 }
 0x1ef   :  { %v2012_v24 = vpop.f32.mrf.mxu2 }
 0x1f0   :  { %11077 = vst [vmem:[#allocation11_spill] sm:$0xff] %v8600_v54  ;;  %v2101_v2 = vpop.f32.mrf.mxu3  ;;  %v2013_v1 = vadd.f32 %v2012_v24, %v1924_v8  ;;  %v1836_v21 = vpop.f32.mrf.mxu0  ;;  %v7026_v8 = vld [vmem:[%s10793_s3 + $0x174] sm:$0xf0] }
 0x1f1   :  { %v1925_v4 = vpop.f32.mrf.mxu1  ;;  %v1837_v53 = vadd.f32 %v1836_v21, %v8080_v10  ;;  %v6236_v24 = vor.u32 %v7026_v8, %v6235_v29 }
 0x1f2   :  { %v2102_v49 = vadd.f32 %v2101_v2, %v2013_v1  ;;  %v7058_v2 = vld [vmem:[%s10793_s3 + $0x274] sm:$0xf0] }
 0x1f3   :  { %v1926_v27 = vadd.f32 %v1925_v4, %v1837_v53  ;;  %v6364_v1 = vor.u32 %v7058_v2, %v6363_v28  ;;  %v11078_v4 = vld [vmem:[#allocation27_spill] sm:$0xff]  ;;  %v11079_v53 = vld [vmem:[#allocation28_spill] sm:$0xff]  ;;  %2560 = vmatpush.bf16.msra.mxu0 %v6236_v24 }
 0x1f4   :  { %v11084_v24 = vld [vmem:[#allocation32_spill] sm:$0xff] }
 0x1f5   :  { %2649 = vmatpush.bf16.msra.mxu1 %v6364_v1 }
 0x1f7   :  { %v2014_v14 = vpop.f32.mrf.mxu2 }
 0x1f8   :  { %v2103_v60 = vpop.f32.mrf.mxu3  ;;  %v2015_v13 = vadd.f32 %v2014_v14, %v1926_v27  ;;  %v1839_v54 = vpop.f32.mrf.mxu0  ;;  %v3291_v27 = vmax.f32 %v2102_v49, 0.0 }
 0x1f9   :  { %v1928_v36 = vpop.f32.mrf.mxu1  ;;  %v1840_v9 = vadd.f32 %v1839_v54, %v8080_v10 }
 0x1fa   :  { %v2104_v52 = vadd.f32 %v2103_v60, %v2015_v13 }
 0x1fb   :  { %v1929_v21 = vadd.f32 %v1928_v36, %v1840_v9  ;;  %2243 = vmatmul.bf16.gmra.mxu0 %v11078_v4 }
 0x1fc   :  { %2332 = vmatmul.bf16.gmra.mxu1 %v11079_v53  ;;  %v3295_v14 = vmax.f32 %v2104_v52, 0.0  ;;  %6472 = vmatmul.msk.bf16.gmra.mxu2 %vm1706_vm0, %v11081_v23  ;;  %v11083_v23 = vld [vmem:[#allocation31_spill] sm:$0xff] }
 0x1fd   :  { %2154 = vmatmul.bf16.gmra.mxu3 %v11080_v47 }
 0x1fe   :  { %v8627_v29 = vpack.c.bf16 %v3295_v14, %v3291_v27  ;;  %v11085_v14 = vld [vmem:[#allocation30_spill] sm:$0xff] }
 0x1ff   :  { %v2017_v54 = vpop.f32.mrf.mxu2 }
 0x200   :  { %11082 = vst [vmem:[#allocation12_spill] sm:$0xff] %v8627_v29  ;;  %v2106_v8 = vpop.f32.mrf.mxu3  ;;  %v2018_v60 = vadd.f32 %v2017_v54, %v1929_v21  ;;  %v1841_v13 = vpop.f32.mrf.mxu0  ;;  %v11086_v21 = vld [vmem:[#allocation33_spill] sm:$0xff] }
 0x201   :  { %v1930_v36 = vpop.f32.mrf.mxu1  ;;  %v1842_v28 = vadd.f32 %v1841_v13, %v8080_v10  ;;  %v8638_v10 = vld [vmem:[%s10794_s4] sm:$0xf] }
 0x202   :  { %v2107_v9 = vadd.f32 %v2106_v8, %v2018_v60  ;;  %11087 = vst [vmem:[#allocation10_spill] sm:$0xff] %v8638_v10  ;;  %v8641_v54 = vperm.slane %v8638_v10, 1 }
 0x203   :  { %v1931_v2 = vadd.f32 %v1930_v36, %v1842_v28 }
 0x204   :  { %v3299_v1 = vmax.f32 %v2107_v9, 0.0  ;;  %v6091_v9 = vld [vmem:[%s10793_s3 + $0x48] sm:$0xf] }
 0x207   :  { %v2019_v49 = vpop.f32.mrf.mxu2 }
 0x208   :  { %v2108_v52 = vpop.f32.mrf.mxu3  ;;  %v2020_v53 = vadd.f32 %v2019_v49, %v1931_v2  ;;  %v2209_v47 = vpop.f32.mrf.mxu0  ;;  %v6990_v2 = vld [vmem:[%s10793_s3 + $0x54] sm:$0xf0] }
 0x209   :  { %v2298_v4 = vpop.f32.mrf.mxu1  ;;  %v6092_v49 = vor.u32 %v6990_v2, %v6091_v9  ;;  %v11089_v2 = vld [vmem:[#allocation35_spill] sm:$0xff] }
 0x20a   :  { %v2109_v50 = vadd.f32 %v2108_v52, %v2020_v53 }
 0x20b   :  { %2248 = vmatmul.bf16.gmra.mxu0 %v11083_v23  ;;  %2472 = vmatpush.bf16.msra.mxu3 %v6092_v49  ;;  %v11090_v49 = vld [vmem:[#allocation36_spill] sm:$0xff] }
 0x20c   :  { %2337 = vmatmul.bf16.gmra.mxu1 %v11084_v24  ;;  %v3303_v27 = vmax.f32 %v2109_v50, 0.0  ;;  %6473 = vmatmul.msk.bf16.gmra.mxu2 %vm1706_vm0, %v11086_v21 }
 0x20d   :  { %2159 = vmatmul.bf16.gmra.mxu3 %v11085_v14  ;;  %v11092_v14 = vld [vmem:[#allocation37_spill] sm:$0xff] }
 0x20e   :  { %v8643_v53 = vpack.c.bf16 %v3303_v27, %v3299_v1 }
 0x20f   :  { %v2387_v60 = vpop.f32.mrf.mxu2 }
 0x210   :  { %11088 = vst [vmem:[#allocation13_spill] sm:$0xff] %v8643_v53  ;;  %v2120_v8 = vpop.f32.mrf.mxu3  ;;  %v2211_v50 = vpop.f32.mrf.mxu0 }
 0x211   :  { %v2121_v13 = vadd.f32 %v2120_v8, %v8641_v54  ;;  %v2300_v36 = vpop.f32.mrf.mxu1 }
 0x213   :  { %v2210_v28 = vadd.f32 %v2209_v47, %v2121_v13  ;;  %v6219_v47 = vld [vmem:[%s10793_s3 + $0x148] sm:$0xf]  ;;  %v7022_v13 = vld [vmem:[%s10793_s3 + $0x154] sm:$0xf0] }
 0x214   :  { %v6220_v21 = vor.u32 %v7022_v13, %v6219_v47 }
 0x215   :  { %v2299_v52 = vadd.f32 %v2298_v4, %v2210_v28  ;;  %v6347_v4 = vld [vmem:[%s10793_s3 + $0x248] sm:$0xf] }
 0x216   :  { %2561 = vmatpush.bf16.msra.mxu0 %v6220_v21 }
 0x217   :  { %v2388_v1 = vadd.f32 %v2387_v60, %v2299_v52  ;;  %v2389_v53 = vpop.f32.mrf.mxu2  ;;  %v7054_v60 = vld [vmem:[%s10793_s3 + $0x254] sm:$0xf0] }
 0x218   :  { %v2122_v27 = vpop.f32.mrf.mxu3  ;;  %v2214_v8 = vpop.f32.mrf.mxu0  ;;  %v6348_v9 = vor.u32 %v7054_v60, %v6347_v4 }
 0x219   :  { %v2123_v29 = vadd.f32 %v2122_v27, %v8641_v54  ;;  %v2303_v10 = vpop.f32.mrf.mxu1  ;;  %v11091_v27 = vld [vmem:[#allocation34_spill] sm:$0xff]  ;;  %v3180_v23 = vmax.f32 %v2388_v1, 0.0  ;;  %v11095_v1 = vld [vmem:[#allocation41_spill] sm:$0xff] }
 0x21a   :  { %2650 = vmatpush.bf16.msra.mxu1 %v6348_v9 }
 0x21b   :  { %v2212_v28 = vadd.f32 %v2211_v50, %v2123_v29  ;;  %2253 = vmatmul.bf16.gmra.mxu0 %v11089_v2 }
 0x21c   :  { %2342 = vmatmul.bf16.gmra.mxu1 %v11090_v49  ;;  %6474 = vmatmul.msk.bf16.gmra.mxu2 %vm1706_vm0, %v11092_v14 }
 0x21d   :  { %v2301_v52 = vadd.f32 %v2300_v36, %v2212_v28  ;;  %2164 = vmatmul.bf16.gmra.mxu3 %v11091_v27 }
 0x21f   :  { %v2390_v47 = vadd.f32 %v2389_v53, %v2301_v52  ;;  %v2392_v24 = vpop.f32.mrf.mxu2  ;;  %v11094_v52 = vld [vmem:[#allocation40_spill] sm:$0xff] }
 0x220   :  { %v2125_v13 = vpop.f32.mrf.mxu3  ;;  %v2216_v50 = vpop.f32.mrf.mxu0 }
 0x221   :  { %v3184_v56 = vmax.f32 %v2390_v47, 0.0  ;;  %v2126_v29 = vadd.f32 %v2125_v13, %v8641_v54  ;;  %v2305_v4 = vpop.f32.mrf.mxu1  ;;  %v11096_v13 = vld [vmem:[#allocation39_spill] sm:$0xff] }
 0x223   :  { %v8671_v60 = vpack.c.bf16 %v3184_v56, %v3180_v23  ;;  %v2215_v49 = vadd.f32 %v2214_v8, %v2126_v29 }
 0x225   :  { %11093 = vst [vmem:[#allocation15_spill] sm:$0xff] %v8671_v60  ;;  %v2304_v36 = vadd.f32 %v2303_v10, %v2215_v49 }
 0x227   :  { %v2393_v28 = vadd.f32 %v2392_v24, %v2304_v36  ;;  %v2394_v2 = vpop.f32.mrf.mxu2  ;;  %v6986_v36 = vld [vmem:[%s10793_s3 + $0x34] sm:$0xf0] }
 0x228   :  { %v2127_v27 = vpop.f32.mrf.mxu3  ;;  %v2219_v21 = vpop.f32.mrf.mxu0 }
 0x229   :  { %v2128_v14 = vadd.f32 %v2127_v27, %v8641_v54  ;;  %v2308_v9 = vpop.f32.mrf.mxu1  ;;  %v3188_v10 = vmax.f32 %v2393_v28, 0.0 }
 0x22b   :  { %v2217_v53 = vadd.f32 %v2216_v50, %v2128_v14  ;;  %2258 = vmatmul.bf16.gmra.mxu0 %v11094_v52 }
 0x22c   :  { %2347 = vmatmul.bf16.gmra.mxu1 %v11095_v1  ;;  %6475 = vmatmul.msk.bf16.gmra.mxu2 %vm1706_vm0, %v11097_v58  ;;  %v11104_v58 = vld [vmem:[#allocation52_spill] sm:$0xff] }
 0x22d   :  { %v2306_v47 = vadd.f32 %v2305_v4, %v2217_v53  ;;  %2169 = vmatmul.bf16.gmra.mxu3 %v11096_v13  ;;  %v6075_v4 = vld [vmem:[%s10793_s3 + $0x28] sm:$0xf] }
 0x22f   :  { %v2395_v23 = vadd.f32 %v2394_v2, %v2306_v47  ;;  %v2397_v24 = vpop.f32.mrf.mxu2  ;;  %v6076_v2 = vor.u32 %v6986_v36, %v6075_v4 }
 0x230   :  { %v2130_v56 = vpop.f32.mrf.mxu3  ;;  %v2221_v27 = vpop.f32.mrf.mxu0 }
 0x231   :  { %v3192_v8 = vmax.f32 %v2395_v23, 0.0  ;;  %v2131_v49 = vadd.f32 %v2130_v56, %v8641_v54  ;;  %v2310_v29 = vpop.f32.mrf.mxu1  ;;  %2473 = vmatpush.bf16.msra.mxu3 %v6076_v2  ;;  %v11099_v2 = vld [vmem:[#allocation47_spill] sm:$0xff] }
 0x233   :  { %v8680_v14 = vpack.c.bf16 %v3192_v8, %v3188_v10  ;;  %v2220_v50 = vadd.f32 %v2219_v21, %v2131_v49  ;;  %v6203_v21 = vld [vmem:[%s10793_s3 + $0x128] sm:$0xf]  ;;  %v7018_v8 = vld [vmem:[%s10793_s3 + $0x134] sm:$0xf0] }
 0x234   :  { %v6204_v49 = vor.u32 %v7018_v8, %v6203_v21 }
 0x235   :  { %11098 = vst [vmem:[#allocation16_spill] sm:$0xff] %v8680_v14  ;;  %v2309_v53 = vadd.f32 %v2308_v9, %v2220_v50  ;;  %v6331_v9 = vld [vmem:[%s10793_s3 + $0x228] sm:$0xf] }
 0x236   :  { %2562 = vmatpush.bf16.msra.mxu0 %v6204_v49 }
 0x237   :  { %v2398_v28 = vadd.f32 %v2397_v24, %v2309_v53  ;;  %v2399_v23 = vpop.f32.mrf.mxu2  ;;  %v7050_v24 = vld [vmem:[%s10793_s3 + $0x234] sm:$0xf0] }
 0x238   :  { %v2132_v47 = vpop.f32.mrf.mxu3  ;;  %v2224_v60 = vpop.f32.mrf.mxu0  ;;  %v6332_v4 = vor.u32 %v7050_v24, %v6331_v9 }
 0x239   :  { %v2133_v56 = vadd.f32 %v2132_v47, %v8641_v54  ;;  %v2313_v10 = vpop.f32.mrf.mxu1  ;;  %v3196_v8 = vmax.f32 %v2398_v28, 0.0  ;;  %v11102_v28 = vld [vmem:[#allocation51_spill] sm:$0xff] }
 0x23a   :  { %2651 = vmatpush.bf16.msra.mxu1 %v6332_v4 }
 0x23b   :  { %v2222_v50 = vadd.f32 %v2221_v27, %v2133_v56  ;;  %2263 = vmatmul.bf16.gmra.mxu0 %v8251_v57 }
 0x23c   :  { %2352 = vmatmul.bf16.gmra.mxu1 %v8261_v25  ;;  %6476 = vmatmul.msk.bf16.gmra.mxu2 %vm1706_vm0, %v11099_v2 }
 0x23d   :  { %v2311_v36 = vadd.f32 %v2310_v29, %v2222_v50  ;;  %2174 = vmatmul.bf16.gmra.mxu3 %v8240_v11 }
 0x23f   :  { %v2400_v53 = vadd.f32 %v2399_v23, %v2311_v36  ;;  %v2402_v21 = vpop.f32.mrf.mxu2  ;;  %v11101_v36 = vld [vmem:[#allocation50_spill] sm:$0xff] }
 0x240   :  { %v2135_v47 = vpop.f32.mrf.mxu3  ;;  %v2226_v56 = vpop.f32.mrf.mxu0 }
 0x241   :  { %v3200_v14 = vmax.f32 %v2400_v53, 0.0  ;;  %v2136_v27 = vadd.f32 %v2135_v47, %v8641_v54  ;;  %v2315_v9 = vpop.f32.mrf.mxu1  ;;  %v11103_v47 = vld [vmem:[#allocation49_spill] sm:$0xff] }
 0x243   :  { %v8707_v24 = vpack.c.bf16 %v3200_v14, %v3196_v8  ;;  %v2225_v25 = vadd.f32 %v2224_v60, %v2136_v27 }
 0x245   :  { %11100 = vst [vmem:[#allocation14_spill] sm:$0xff] %v8707_v24  ;;  %v2314_v29 = vadd.f32 %v2313_v10, %v2225_v25 }
 0x247   :  { %v2403_v50 = vadd.f32 %v2402_v21, %v2314_v29  ;;  %v2404_v57 = vpop.f32.mrf.mxu2  ;;  %v6982_v29 = vld [vmem:[%s10793_s3 + $0x14] sm:$0xf0] }
 0x248   :  { %v2137_v11 = vpop.f32.mrf.mxu3  ;;  %v2229_v49 = vpop.f32.mrf.mxu0 }
 0x249   :  { %v2138_v2 = vadd.f32 %v2137_v11, %v8641_v54  ;;  %v2318_v4 = vpop.f32.mrf.mxu1  ;;  %v3204_v10 = vmax.f32 %v2403_v50, 0.0 }
 0x24b   :  { %v2227_v23 = vadd.f32 %v2226_v56, %v2138_v2  ;;  %2268 = vmatmul.bf16.gmra.mxu0 %v11101_v36 }
 0x24c   :  { %2357 = vmatmul.bf16.gmra.mxu1 %v11102_v28  ;;  %6477 = vmatmul.msk.bf16.gmra.mxu2 %vm1706_vm0, %v11104_v58 }
 0x24d   :  { %v2316_v53 = vadd.f32 %v2315_v9, %v2227_v23  ;;  %2179 = vmatmul.bf16.gmra.mxu3 %v11103_v47  ;;  %v6059_v9 = vld [vmem:[%s10793_s3 + $0x8] sm:$0xf] }
 0x24f   :  { %v2405_v60 = vadd.f32 %v2404_v57, %v2316_v53  ;;  %v2407_v14 = vpop.f32.mrf.mxu2  ;;  %v6060_v57 = vor.u32 %v6982_v29, %v6059_v9 }
 0x250   :  { %v2140_v25 = vpop.f32.mrf.mxu3  ;;  %v2231_v8 = vpop.f32.mrf.mxu0 }
 0x251   :  { %v3208_v21 = vmax.f32 %v2405_v60, 0.0  ;;  %v2141_v11 = vadd.f32 %v2140_v25, %v8641_v54  ;;  %v2320_v27 = vpop.f32.mrf.mxu1  ;;  %2474 = vmatpush.bf16.msra.mxu3 %v6060_v57 }
 0x253   :  { %v8716_v2 = vpack.c.bf16 %v3208_v21, %v3204_v10  ;;  %v2230_v56 = vadd.f32 %v2229_v49, %v2141_v11  ;;  %v6187_v49 = vld [vmem:[%s10793_s3 + $0x108] sm:$0xf]  ;;  %v7014_v21 = vld [vmem:[%s10793_s3 + $0x114] sm:$0xf0] }
 0x254   :  { %v6188_v11 = vor.u32 %v7014_v21, %v6187_v49 }
 0x255   :  { %11105 = vst [vmem:[#allocation17_spill] sm:$0xff] %v8716_v2  ;;  %v2319_v23 = vadd.f32 %v2318_v4, %v2230_v56  ;;  %v6315_v4 = vld [vmem:[%s10793_s3 + $0x208] sm:$0xf] }
 0x256   :  { %2563 = vmatpush.bf16.msra.mxu0 %v6188_v11 }
 0x257   :  { %v2408_v50 = vadd.f32 %v2407_v14, %v2319_v23  ;;  %v2409_v60 = vpop.f32.mrf.mxu2  ;;  %v7046_v14 = vld [vmem:[%s10793_s3 + $0x214] sm:$0xf0] }
 0x258   :  { %v2142_v53 = vpop.f32.mrf.mxu3  ;;  %v2234_v24 = vpop.f32.mrf.mxu0  ;;  %v6316_v9 = vor.u32 %v7046_v14, %v6315_v4 }
 0x259   :  { %v2143_v25 = vadd.f32 %v2142_v53, %v8641_v54  ;;  %v2323_v10 = vpop.f32.mrf.mxu1  ;;  %v3212_v49 = vmax.f32 %v2408_v50, 0.0 }
 0x25a   :  { %2652 = vmatpush.bf16.msra.mxu1 %v6316_v9 }
 0x25b   :  { %v2232_v56 = vadd.f32 %v2231_v8, %v2143_v25  ;;  %2273 = vmatmul.bf16.gmra.mxu0 %v8381_v3 }
 0x25c   :  { %2362 = vmatmul.bf16.gmra.mxu1 %v8384_v42  ;;  %6478 = vmatmul.msk.bf16.gmra.mxu2 %vm1706_vm0, %v8386_v51 }
 0x25d   :  { %v2321_v29 = vadd.f32 %v2320_v27, %v2232_v56  ;;  %2184 = vmatmul.bf16.gmra.mxu3 %v8379_v6 }
 0x25f   :  { %v2410_v57 = vadd.f32 %v2409_v60, %v2321_v29  ;;  %v2412_v53 = vpop.f32.mrf.mxu2 }
 0x260   :  { %v2145_v23 = vpop.f32.mrf.mxu3  ;;  %v2236_v25 = vpop.f32.mrf.mxu0 }
 0x261   :  { %v3216_v21 = vmax.f32 %v2410_v57, 0.0  ;;  %v2146_v8 = vadd.f32 %v2145_v23, %v8641_v54  ;;  %v2325_v4 = vpop.f32.mrf.mxu1 }
 0x263   :  { %v8743_v14 = vpack.c.bf16 %v3216_v21, %v3212_v49  ;;  %v2235_v2 = vadd.f32 %v2234_v24, %v2146_v8  ;;  %v7008_v21 = vld [vmem:[%s10793_s3 + $0xec] sm:$0xf]  ;;  %v6173_v8 = vld [vmem:[%s10793_s3 + $0xf8] sm:$0xf0] }
 0x265   :  { %11106 = vst [vmem:[#allocation19_spill] sm:$0xff] %v8743_v14  ;;  %v2324_v27 = vadd.f32 %v2323_v10, %v2235_v2 }
 0x267   :  { %v2413_v56 = vadd.f32 %v2412_v53, %v2324_v27  ;;  %v2414_v42 = vpop.f32.mrf.mxu2 }
 0x268   :  { %v2147_v6 = vpop.f32.mrf.mxu3  ;;  %v2239_v11 = vpop.f32.mrf.mxu0 }
 0x269   :  { %v2148_v51 = vadd.f32 %v2147_v6, %v8641_v54  ;;  %v2328_v9 = vpop.f32.mrf.mxu1  ;;  %v3220_v29 = vmax.f32 %v2413_v56, 0.0 }
 0x26b   :  { %v2237_v60 = vadd.f32 %v2236_v25, %v2148_v51  ;;  %2278 = vmatmul.bf16.gmra.mxu0 %v8422_v62 }
 0x26c   :  { %2367 = vmatmul.bf16.gmra.mxu1 %v8425_v15  ;;  %6479 = vmatmul.msk.bf16.gmra.mxu2 %vm1706_vm0, %v8427_v63 }
 0x26d   :  { %v2326_v50 = vadd.f32 %v2325_v4, %v2237_v60  ;;  %2189 = vmatmul.bf16.gmra.mxu3 %v8420_v40 }
 0x26f   :  { %v2415_v24 = vadd.f32 %v2414_v42, %v2326_v50  ;;  %v2417_v10 = vpop.f32.mrf.mxu2  ;;  %v6176_v42 = vor.u32 %v7008_v21, %v6173_v8  ;;  %v6429_v21 = vld [vmem:[%s10793_s3 + $0x2f8] sm:$0xf0] }
 0x270   :  { %v2150_v2 = vpop.f32.mrf.mxu3  ;;  %v2241_v23 = vpop.f32.mrf.mxu0 }
 0x271   :  { %v3224_v57 = vmax.f32 %v2415_v24, 0.0  ;;  %v2151_v6 = vadd.f32 %v2150_v2, %v8641_v54  ;;  %v2330_v53 = vpop.f32.mrf.mxu1  ;;  %2823 = vmatpush.bf16.msrb.mxu3 %v6176_v42  ;;  %v6445_v2 = vld [vmem:[%s10793_s3 + $0x318] sm:$0xf0] }
 0x273   :  { %v8752_v51 = vpack.c.bf16 %v3224_v57, %v3220_v29  ;;  %v2240_v49 = vadd.f32 %v2239_v11, %v2151_v6  ;;  %v7076_v11 = vld [vmem:[%s10793_s3 + $0x30c] sm:$0xf] }
 0x274   :  { %v6448_v29 = vor.u32 %v7076_v11, %v6445_v2  ;;  %v7072_v57 = vld [vmem:[%s10793_s3 + $0x2ec] sm:$0xf] }
 0x275   :  { %11107 = vst [vmem:[#allocation20_spill] sm:$0xff] %v8752_v51  ;;  %v2329_v25 = vadd.f32 %v2328_v9, %v2240_v49  ;;  %v7040_v9 = vld [vmem:[%s10793_s3 + $0x1ec] sm:$0xf]  ;;  %v6432_v8 = vor.u32 %v7072_v57, %v6429_v21 }
 0x276   :  { %3097 = vmatpush.bf16.msrb.mxu2 %v6448_v29 }
 0x277   :  { %v2418_v4 = vadd.f32 %v2417_v10, %v2329_v25  ;;  %v2419_v56 = vpop.f32.mrf.mxu2  ;;  %v6301_v10 = vld [vmem:[%s10793_s3 + $0x1f8] sm:$0xf0]  ;;  %3001 = vmatpush.bf16.msrb.mxu1 %v6432_v8 }
 0x278   :  { %v2152_v27 = vpop.f32.mrf.mxu3  ;;  %v2244_v50 = vpop.f32.mrf.mxu0  ;;  %v6304_v49 = vor.u32 %v7040_v9, %v6301_v10 }
 0x279   :  { %v2153_v60 = vadd.f32 %v2152_v27, %v8641_v54  ;;  %v2333_v24 = vpop.f32.mrf.mxu1 }
 0x27a   :  { %2912 = vmatpush.bf16.msrb.mxu0 %v6304_v49 }
 0x27b   :  { %v2242_v6 = vadd.f32 %v2241_v23, %v2153_v60  ;;  %2283 = vmatmul.bf16.gmra.mxu0 %v8472_v39  ;;  %v3228_v60 = vmax.f32 %v2418_v4, 0.0 }
 0x27c   :  { %2372 = vmatmul.bf16.gmra.mxu1 %v8474_v30  ;;  %6480 = vmatmul.msk.bf16.gmra.mxu2 %vm1706_vm0, %v8476_v22 }
 0x27d   :  { %v2331_v42 = vadd.f32 %v2330_v53, %v2242_v6  ;;  %2194 = vmatmul.bf16.gmra.mxu3 %v8470_v12 }
 0x27f   :  { %v2420_v25 = vadd.f32 %v2419_v56, %v2331_v42  ;;  %v2422_v27 = vpop.f32.mrf.mxu2 }
 0x280   :  { %v2155_v23 = vpop.f32.mrf.mxu3  ;;  %v2246_v9 = vpop.f32.mrf.mxu0 }
 0x281   :  { %v3232_v11 = vmax.f32 %v2420_v25, 0.0  ;;  %v2156_v2 = vadd.f32 %v2155_v23, %v8641_v54  ;;  %v2335_v10 = vpop.f32.mrf.mxu1 }
 0x283   :  { %v8785_v51 = vpack.c.bf16 %v3232_v11, %v3228_v60  ;;  %v2245_v53 = vadd.f32 %v2244_v50, %v2156_v2 }
 0x285   :  { %11108 = vst [vmem:[#allocation18_spill] sm:$0xff] %v8785_v51  ;;  %v2334_v57 = vadd.f32 %v2333_v24, %v2245_v53  ;;  %v6157_v53 = vld [vmem:[%s10793_s3 + $0xd8] sm:$0xf0] }
 0x287   :  { %v2423_v6 = vadd.f32 %v2422_v27, %v2334_v57  ;;  %v2424_v14 = vpop.f32.mrf.mxu2 }
 0x288   :  { %v2157_v21 = vpop.f32.mrf.mxu3  ;;  %v2249_v49 = vpop.f32.mrf.mxu0 }
 0x289   :  { %v2158_v29 = vadd.f32 %v2157_v21, %v8641_v54  ;;  %v2338_v56 = vpop.f32.mrf.mxu1  ;;  %v3236_v25 = vmax.f32 %v2423_v6, 0.0 }
 0x28b   :  { %v2247_v8 = vadd.f32 %v2246_v9, %v2158_v29  ;;  %2564 = vmatmul.bf16.vlgmr.msra.gmra.mxu0 %v7660_v18 }
 0x28c   :  { %2653 = vmatmul.bf16.vlgmr.msra.gmra.mxu1 %v7662_v19  ;;  %6481 = vmatmul.msk.bf16.vlgmr.msra.gmra.mxu2 %vm1706_vm0, %v7664_v20 }
 0x28d   :  { %v2336_v4 = vadd.f32 %v2335_v10, %v2247_v8  ;;  %2475 = vmatmul.bf16.vlgmr.msra.gmra.mxu3 %v7658_v17  ;;  %v7004_v10 = vld [vmem:[%s10793_s3 + $0xcc] sm:$0xf] }
 0x28f   :  { %v2425_v50 = vadd.f32 %v2424_v14, %v2336_v4  ;;  %v2427_v42 = vpop.f32.mrf.mxu2  ;;  %v6160_v14 = vor.u32 %v7004_v10, %v6157_v53 }
 0x290   :  { %v2160_v24 = vpop.f32.mrf.mxu3  ;;  %v2251_v60 = vpop.f32.mrf.mxu0 }
 0x291   :  { %v3240_v23 = vmax.f32 %v2425_v50, 0.0  ;;  %v2161_v27 = vadd.f32 %v2160_v24, %v8641_v54  ;;  %v2340_v11 = vpop.f32.mrf.mxu1  ;;  %2824 = vmatpush.bf16.msrb.mxu3 %v6160_v14  ;;  %v6285_v24 = vld [vmem:[%s10793_s3 + $0x1d8] sm:$0xf0] }
 0x293   :  { %v8794_v2 = vpack.c.bf16 %v3240_v23, %v3236_v25  ;;  %v2250_v9 = vadd.f32 %v2249_v49, %v2161_v27  ;;  %v7036_v49 = vld [vmem:[%s10793_s3 + $0x1cc] sm:$0xf] }
 0x294   :  { %v6288_v25 = vor.u32 %v7036_v49, %v6285_v24 }
 0x295   :  { %11109 = vst [vmem:[#allocation21_spill] sm:$0xff] %v8794_v2  ;;  %v2339_v57 = vadd.f32 %v2338_v56, %v2250_v9  ;;  %v7068_v56 = vld [vmem:[%s10793_s3 + $0x2cc] sm:$0xf] }
 0x296   :  { %2913 = vmatpush.bf16.msrb.mxu0 %v6288_v25 }
 0x297   :  { %v2428_v6 = vadd.f32 %v2427_v42, %v2339_v57  ;;  %v2429_v29 = vpop.f32.mrf.mxu2  ;;  %v6413_v42 = vld [vmem:[%s10793_s3 + $0x2d8] sm:$0xf0] }
 0x298   :  { %v2162_v21 = vpop.f32.mrf.mxu3  ;;  %v2254_v4 = vpop.f32.mrf.mxu0  ;;  %v6416_v27 = vor.u32 %v7068_v56, %v6413_v42 }
 0x299   :  { %v2163_v8 = vadd.f32 %v2162_v21, %v8641_v54  ;;  %v2343_v50 = vpop.f32.mrf.mxu1  ;;  %v3244_v57 = vmax.f32 %v2428_v6, 0.0 }
 0x29a   :  { %3002 = vmatpush.bf16.msrb.mxu1 %v6416_v27 }
 0x29b   :  { %v2252_v23 = vadd.f32 %v2251_v60, %v2163_v8  ;;  %2569 = vmatmul.bf16.gmra.mxu0 %v7733_v32 }
 0x29c   :  { %2658 = vmatmul.bf16.gmra.mxu1 %v7736_v38  ;;  %6482 = vmatmul.msk.bf16.gmra.mxu2 %vm1706_vm0, %v7738_v7 }
 0x29d   :  { %v2341_v9 = vadd.f32 %v2340_v11, %v2252_v23  ;;  %2480 = vmatmul.bf16.gmra.mxu3 %v7731_v31 }
 0x29f   :  { %v2430_v10 = vadd.f32 %v2429_v29, %v2341_v9  ;;  %v2432_v14 = vpop.f32.mrf.mxu2 }
 0x2a0   :  { %v2165_v53 = vpop.f32.mrf.mxu3  ;;  %v2256_v8 = vpop.f32.mrf.mxu0 }
 0x2a1   :  { %v3248_v21 = vmax.f32 %v2430_v10, 0.0  ;;  %v2166_v60 = vadd.f32 %v2165_v53, %v8641_v54  ;;  %v2345_v49 = vpop.f32.mrf.mxu1 }
 0x2a3   :  { %v8821_v24 = vpack.c.bf16 %v3248_v21, %v3244_v57  ;;  %v2255_v56 = vadd.f32 %v2254_v4, %v2166_v60 }
 0x2a5   :  { %11110 = vst [vmem:[#allocation40_spill] sm:$0xff] %v8821_v24  ;;  %v2344_v11 = vadd.f32 %v2343_v50, %v2255_v56 }
 0x2a7   :  { %v2433_v42 = vadd.f32 %v2432_v14, %v2344_v11  ;;  %v2434_v2 = vpop.f32.mrf.mxu2 }
 0x2a8   :  { %v2167_v23 = vpop.f32.mrf.mxu3  ;;  %v2259_v25 = vpop.f32.mrf.mxu0 }
 0x2a9   :  { %v2168_v51 = vadd.f32 %v2167_v23, %v8641_v54  ;;  %v2348_v27 = vpop.f32.mrf.mxu1  ;;  %v3252_v10 = vmax.f32 %v2433_v42, 0.0 }
 0x2ab   :  { %v2257_v29 = vadd.f32 %v2256_v8, %v2168_v51  ;;  %2574 = vmatmul.bf16.gmra.mxu0 %v11053_v43  ;;  %v7000_v8 = vld [vmem:[%s10793_s3 + $0xac] sm:$0xf] }
 0x2ac   :  { %2663 = vmatmul.bf16.gmra.mxu1 %v11054_v55  ;;  %6483 = vmatmul.msk.bf16.gmra.mxu2 %vm1706_vm0, %v11056_v34 }
 0x2ad   :  { %v2346_v6 = vadd.f32 %v2345_v49, %v2257_v29  ;;  %2485 = vmatmul.bf16.gmra.mxu3 %v11055_v0  ;;  %v6141_v49 = vld [vmem:[%s10793_s3 + $0xb8] sm:$0xf0] }
 0x2af   :  { %v2435_v4 = vadd.f32 %v2434_v2, %v2346_v6  ;;  %v2437_v9 = vpop.f32.mrf.mxu2  ;;  %v6144_v2 = vor.u32 %v7000_v8, %v6141_v49 }
 0x2b0   :  { %v2170_v50 = vpop.f32.mrf.mxu3  ;;  %v2261_v57 = vpop.f32.mrf.mxu0 }
 0x2b1   :  { %v3256_v53 = vmax.f32 %v2435_v4, 0.0  ;;  %v2171_v14 = vadd.f32 %v2170_v50, %v8641_v54  ;;  %v2350_v21 = vpop.f32.mrf.mxu1  ;;  %2825 = vmatpush.bf16.msrb.mxu3 %v6144_v2  ;;  %v6269_v50 = vld [vmem:[%s10793_s3 + $0x1b8] sm:$0xf0] }
 0x2b3   :  { %v8830_v51 = vpack.c.bf16 %v3256_v53, %v3252_v10  ;;  %v2260_v60 = vadd.f32 %v2259_v25, %v2171_v14  ;;  %v7032_v25 = vld [vmem:[%s10793_s3 + $0x1ac] sm:$0xf] }
 0x2b4   :  { %v6272_v10 = vor.u32 %v7032_v25, %v6269_v50 }
 0x2b5   :  { %11111 = vst [vmem:[#allocation41_spill] sm:$0xff] %v8830_v51  ;;  %v2349_v56 = vadd.f32 %v2348_v27, %v2260_v60  ;;  %v7064_v27 = vld [vmem:[%s10793_s3 + $0x2ac] sm:$0xf] }
 0x2b6   :  { %2914 = vmatpush.bf16.msrb.mxu0 %v6272_v10 }
 0x2b7   :  { %v2438_v11 = vadd.f32 %v2437_v9, %v2349_v56  ;;  %v2439_v23 = vpop.f32.mrf.mxu2  ;;  %v6397_v9 = vld [vmem:[%s10793_s3 + $0x2b8] sm:$0xf0] }
 0x2b8   :  { %v2172_v42 = vpop.f32.mrf.mxu3  ;;  %v2264_v6 = vpop.f32.mrf.mxu0  ;;  %v6400_v14 = vor.u32 %v7064_v27, %v6397_v9 }
 0x2b9   :  { %v2173_v29 = vadd.f32 %v2172_v42, %v8641_v54  ;;  %v2353_v4 = vpop.f32.mrf.mxu1  ;;  %v3260_v56 = vmax.f32 %v2438_v11, 0.0 }
 0x2ba   :  { %3003 = vmatpush.bf16.msrb.mxu1 %v6400_v14 }
 0x2bb   :  { %v2262_v53 = vadd.f32 %v2261_v57, %v2173_v29  ;;  %2579 = vmatmul.bf16.gmra.mxu0 %v11058_v44 }
 0x2bc   :  { %2668 = vmatmul.bf16.gmra.mxu1 %v11059_v41  ;;  %6484 = vmatmul.msk.bf16.gmra.mxu2 %vm1706_vm0, %v11061_v33 }
 0x2bd   :  { %v2351_v60 = vadd.f32 %v2350_v21, %v2262_v53  ;;  %2490 = vmatmul.bf16.gmra.mxu3 %v11060_v5 }
 0x2bf   :  { %v2440_v8 = vadd.f32 %v2439_v23, %v2351_v60  ;;  %v2442_v2 = vpop.f32.mrf.mxu2 }
 0x2c0   :  { %v2175_v49 = vpop.f32.mrf.mxu3  ;;  %v2266_v29 = vpop.f32.mrf.mxu0 }
 0x2c1   :  { %v3264_v42 = vmax.f32 %v2440_v8, 0.0  ;;  %v2176_v57 = vadd.f32 %v2175_v49, %v8641_v54  ;;  %v2355_v25 = vpop.f32.mrf.mxu1 }
 0x2c3   :  { %v8857_v50 = vpack.c.bf16 %v3264_v42, %v3260_v56  ;;  %v2265_v27 = vadd.f32 %v2264_v6, %v2176_v57 }
 0x2c5   :  { %11112 = vst [vmem:[#allocation39_spill] sm:$0xff] %v8857_v50  ;;  %v2354_v21 = vadd.f32 %v2353_v4, %v2265_v27 }
 0x2c7   :  { %v2443_v9 = vadd.f32 %v2442_v2, %v2354_v21  ;;  %v2444_v51 = vpop.f32.mrf.mxu2 }
 0x2c8   :  { %v2177_v53 = vpop.f32.mrf.mxu3  ;;  %v2269_v10 = vpop.f32.mrf.mxu0 }
 0x2c9   :  { %v2178_v24 = vadd.f32 %v2177_v53, %v8641_v54  ;;  %v2358_v14 = vpop.f32.mrf.mxu1  ;;  %v3268_v8 = vmax.f32 %v2443_v9, 0.0 }
 0x2cb   :  { %v2267_v23 = vadd.f32 %v2266_v29, %v2178_v24  ;;  %2584 = vmatmul.bf16.gmra.mxu0 %v11063_v37  ;;  %v6996_v29 = vld [vmem:[%s10793_s3 + $0x8c] sm:$0xf] }
 0x2cc   :  { %2673 = vmatmul.bf16.gmra.mxu1 %v11064_v35  ;;  %6485 = vmatmul.msk.bf16.gmra.mxu2 %vm1706_vm0, %v11066_v16 }
 0x2cd   :  { %v2356_v11 = vadd.f32 %v2355_v25, %v2267_v23  ;;  %2495 = vmatmul.bf16.gmra.mxu3 %v11065_v48  ;;  %v6125_v25 = vld [vmem:[%s10793_s3 + $0x98] sm:$0xf0] }
 0x2cf   :  { %v2445_v6 = vadd.f32 %v2444_v51, %v2356_v11  ;;  %v2447_v60 = vpop.f32.mrf.mxu2  ;;  %v6128_v51 = vor.u32 %v6996_v29, %v6125_v25 }
 0x2d0   :  { %v2180_v4 = vpop.f32.mrf.mxu3  ;;  %v2271_v56 = vpop.f32.mrf.mxu0 }
 0x2d1   :  { %v3272_v49 = vmax.f32 %v2445_v6, 0.0  ;;  %v2181_v2 = vadd.f32 %v2180_v4, %v8641_v54  ;;  %v2360_v42 = vpop.f32.mrf.mxu1  ;;  %2826 = vmatpush.bf16.msrb.mxu3 %v6128_v51  ;;  %v6253_v4 = vld [vmem:[%s10793_s3 + $0x198] sm:$0xf0] }
 0x2d3   :  { %v8866_v24 = vpack.c.bf16 %v3272_v49, %v3268_v8  ;;  %v2270_v57 = vadd.f32 %v2269_v10, %v2181_v2  ;;  %v7028_v10 = vld [vmem:[%s10793_s3 + $0x18c] sm:$0xf] }
 0x2d4   :  { %v6256_v8 = vor.u32 %v7028_v10, %v6253_v4 }
 0x2d5   :  { %11113 = vst [vmem:[#allocation50_spill] sm:$0xff] %v8866_v24  ;;  %v2359_v27 = vadd.f32 %v2358_v14, %v2270_v57  ;;  %v7060_v14 = vld [vmem:[%s10793_s3 + $0x28c] sm:$0xf] }
 0x2d6   :  { %2915 = vmatpush.bf16.msrb.mxu0 %v6256_v8 }
 0x2d7   :  { %v2448_v21 = vadd.f32 %v2447_v60, %v2359_v27  ;;  %v2449_v53 = vpop.f32.mrf.mxu2  ;;  %v6381_v60 = vld [vmem:[%s10793_s3 + $0x298] sm:$0xf0] }
 0x2d8   :  { %v2182_v9 = vpop.f32.mrf.mxu3  ;;  %v2274_v11 = vpop.f32.mrf.mxu0  ;;  %v6384_v2 = vor.u32 %v7060_v14, %v6381_v60 }
 0x2d9   :  { %v2183_v23 = vadd.f32 %v2182_v9, %v8641_v54  ;;  %v2363_v6 = vpop.f32.mrf.mxu1  ;;  %v3276_v27 = vmax.f32 %v2448_v21, 0.0  ;;  %v11115_v21 = vld [vmem:[#allocation24_spill] sm:$0xff] }
 0x2da   :  { %3004 = vmatpush.bf16.msrb.mxu1 %v6384_v2 }
 0x2db   :  { %v2272_v49 = vadd.f32 %v2271_v56, %v2183_v23  ;;  %2589 = vmatmul.bf16.gmra.mxu0 %v11068_v26 }
 0x2dc   :  { %2678 = vmatmul.bf16.gmra.mxu1 %v11069_v46  ;;  %6486 = vmatmul.msk.bf16.gmra.mxu2 %vm1706_vm0, %v11071_v59 }
 0x2dd   :  { %v2361_v57 = vadd.f32 %v2360_v42, %v2272_v49  ;;  %2500 = vmatmul.bf16.gmra.mxu3 %v11070_v61 }
 0x2df   :  { %v2450_v29 = vadd.f32 %v2449_v53, %v2361_v57  ;;  %v2452_v51 = vpop.f32.mrf.mxu2 }
 0x2e0   :  { %v2185_v25 = vpop.f32.mrf.mxu3  ;;  %v2276_v23 = vpop.f32.mrf.mxu0 }
 0x2e1   :  { %v3280_v9 = vmax.f32 %v2450_v29, 0.0  ;;  %v2186_v56 = vadd.f32 %v2185_v25, %v8641_v54  ;;  %v2365_v10 = vpop.f32.mrf.mxu1  ;;  %v11116_v29 = vld [vmem:[#allocation22_spill] sm:$0xff]  ;;  %v11117_v25 = vld [vmem:[#allocation25_spill] sm:$0xff] }
 0x2e3   :  { %v8893_v4 = vpack.c.bf16 %v3280_v9, %v3276_v27  ;;  %v2275_v14 = vadd.f32 %v2274_v11, %v2186_v56 }
 0x2e5   :  { %11114 = vst [vmem:[#allocation51_spill] sm:$0xff] %v8893_v4  ;;  %v2364_v42 = vadd.f32 %v2363_v6, %v2275_v14 }
 0x2e7   :  { %v2453_v60 = vadd.f32 %v2452_v51, %v2364_v42  ;;  %v2454_v24 = vpop.f32.mrf.mxu2 }
 0x2e8   :  { %v2187_v49 = vpop.f32.mrf.mxu3  ;;  %v2279_v8 = vpop.f32.mrf.mxu0 }
 0x2e9   :  { %v2188_v50 = vadd.f32 %v2187_v49, %v8641_v54  ;;  %v2368_v2 = vpop.f32.mrf.mxu1  ;;  %v3284_v27 = vmax.f32 %v2453_v60, 0.0  ;;  %v6109_v49 = vld [vmem:[%s10793_s3 + $0x78] sm:$0xf0] }
 0x2eb   :  { %v2277_v53 = vadd.f32 %v2276_v23, %v2188_v50  ;;  %2594 = vmatmul.bf16.gmra.mxu0 %v11073_v45  ;;  %v11127_v45 = vld [vmem:[#allocation33_spill] sm:$0xff] }
 0x2ec   :  { %2683 = vmatmul.bf16.gmra.mxu1 %v11115_v21  ;;  %6487 = vmatmul.msk.bf16.gmra.mxu2 %vm1706_vm0, %v11117_v25 }
 0x2ed   :  { %v2366_v57 = vadd.f32 %v2365_v10, %v2277_v53  ;;  %2505 = vmatmul.bf16.gmra.mxu3 %v11116_v29  ;;  %v6992_v10 = vld [vmem:[%s10793_s3 + $0x6c] sm:$0xf] }
 0x2ef   :  { %v2455_v11 = vadd.f32 %v2454_v24, %v2366_v57  ;;  %v2457_v51 = vpop.f32.mrf.mxu2  ;;  %v6112_v24 = vor.u32 %v6992_v10, %v6109_v49  ;;  %v11119_v49 = vld [vmem:[#allocation27_spill] sm:$0xff] }
 0x2f0   :  { %v2190_v6 = vpop.f32.mrf.mxu3  ;;  %v2281_v14 = vpop.f32.mrf.mxu0 }
 0x2f1   :  { %v3288_v9 = vmax.f32 %v2455_v11, 0.0  ;;  %v2191_v56 = vadd.f32 %v2190_v6, %v8641_v54  ;;  %v2370_v42 = vpop.f32.mrf.mxu1  ;;  %2827 = vmatpush.bf16.msrb.mxu3 %v6112_v24  ;;  %v11120_v24 = vld [vmem:[#allocation28_spill] sm:$0xff] }
 0x2f3   :  { %v8902_v50 = vpack.c.bf16 %v3288_v9, %v3284_v27  ;;  %v2280_v23 = vadd.f32 %v2279_v8, %v2191_v56  ;;  %v7024_v8 = vld [vmem:[%s10793_s3 + $0x16c] sm:$0xf]  ;;  %v6237_v9 = vld [vmem:[%s10793_s3 + $0x178] sm:$0xf0] }
 0x2f4   :  { %v6240_v56 = vor.u32 %v7024_v8, %v6237_v9 }
 0x2f5   :  { %11118 = vst [vmem:[#allocation49_spill] sm:$0xff] %v8902_v50  ;;  %v2369_v53 = vadd.f32 %v2368_v2, %v2280_v23  ;;  %v7056_v2 = vld [vmem:[%s10793_s3 + $0x26c] sm:$0xf]  ;;  %v11122_v50 = vld [vmem:[#allocation29_spill] sm:$0xff] }
 0x2f6   :  { %2916 = vmatpush.bf16.msrb.mxu0 %v6240_v56 }
 0x2f7   :  { %v2458_v60 = vadd.f32 %v2457_v51, %v2369_v53  ;;  %v2459_v11 = vpop.f32.mrf.mxu2  ;;  %v6365_v51 = vld [vmem:[%s10793_s3 + $0x278] sm:$0xf0] }
 0x2f8   :  { %v2192_v57 = vpop.f32.mrf.mxu3  ;;  %v2284_v4 = vpop.f32.mrf.mxu0  ;;  %v6368_v10 = vor.u32 %v7056_v2, %v6365_v51 }
 0x2f9   :  { %v2193_v6 = vadd.f32 %v2192_v57, %v8641_v54  ;;  %v2373_v27 = vpop.f32.mrf.mxu1  ;;  %v11121_v57 = vld [vmem:[#allocation26_spill] sm:$0xff]  ;;  %v3292_v29 = vmax.f32 %v2458_v60, 0.0  ;;  %v11125_v60 = vld [vmem:[#allocation32_spill] sm:$0xff] }
 0x2fa   :  { %3005 = vmatpush.bf16.msrb.mxu1 %v6368_v10 }
 0x2fb   :  { %v2282_v23 = vadd.f32 %v2281_v14, %v2193_v6  ;;  %2599 = vmatmul.bf16.gmra.mxu0 %v11119_v49 }
 0x2fc   :  { %2688 = vmatmul.bf16.gmra.mxu1 %v11120_v24  ;;  %6488 = vmatmul.msk.bf16.gmra.mxu2 %vm1706_vm0, %v11122_v50 }
 0x2fd   :  { %v2371_v53 = vadd.f32 %v2370_v42, %v2282_v23  ;;  %2510 = vmatmul.bf16.gmra.mxu3 %v11121_v57 }
 0x2ff   :  { %v2460_v8 = vadd.f32 %v2459_v11, %v2371_v53  ;;  %v2462_v25 = vpop.f32.mrf.mxu2  ;;  %v11124_v53 = vld [vmem:[#allocation31_spill] sm:$0xff] }
 0x300   :  { %v2195_v9 = vpop.f32.mrf.mxu3  ;;  %v2286_v6 = vpop.f32.mrf.mxu0 }
 0x301   :  { %v3296_v21 = vmax.f32 %v2460_v8, 0.0  ;;  %v2196_v14 = vadd.f32 %v2195_v9, %v8641_v54  ;;  %v2375_v2 = vpop.f32.mrf.mxu1  ;;  %v11126_v9 = vld [vmem:[#allocation30_spill] sm:$0xff] }
 0x303   :  { %v8929_v51 = vpack.c.bf16 %v3296_v21, %v3292_v29  ;;  %v2285_v24 = vadd.f32 %v2284_v4, %v2196_v14  ;;  %v11128_v4 = vld [vmem:[#allocation10_spill] sm:$0xff] }
 0x304   :  { %v8938_v21 = vperm.slane %v11128_v4, 2 }
 0x305   :  { %11123 = vst [vmem:[#allocation52_spill] sm:$0xff] %v8929_v51  ;;  %v2374_v42 = vadd.f32 %v2373_v27, %v2285_v24 }
 0x307   :  { %v2463_v23 = vadd.f32 %v2462_v25, %v2374_v42  ;;  %v2464_v49 = vpop.f32.mrf.mxu2  ;;  %v6988_v42 = vld [vmem:[%s10793_s3 + $0x4c] sm:$0xf] }
 0x308   :  { %v2197_v57 = vpop.f32.mrf.mxu3  ;;  %v2565_v56 = vpop.f32.mrf.mxu0 }
 0x309   :  { %v2198_v50 = vadd.f32 %v2197_v57, %v8641_v54  ;;  %v2654_v10 = vpop.f32.mrf.mxu1  ;;  %v3300_v54 = vmax.f32 %v2463_v23, 0.0 }
 0x30b   :  { %v2287_v11 = vadd.f32 %v2286_v6, %v2198_v50  ;;  %2604 = vmatmul.bf16.gmra.mxu0 %v11124_v53 }
 0x30c   :  { %2693 = vmatmul.bf16.gmra.mxu1 %v11125_v60  ;;  %6489 = vmatmul.msk.bf16.gmra.mxu2 %vm1706_vm0, %v11127_v45 }
 0x30d   :  { %v2376_v8 = vadd.f32 %v2375_v2, %v2287_v11  ;;  %2515 = vmatmul.bf16.gmra.mxu3 %v11126_v9  ;;  %v6093_v11 = vld [vmem:[%s10793_s3 + $0x58] sm:$0xf0] }
 0x30f   :  { %v2465_v29 = vadd.f32 %v2464_v49, %v2376_v8  ;;  %v2743_v27 = vpop.f32.mrf.mxu2  ;;  %v6096_v49 = vor.u32 %v6988_v42, %v6093_v11  ;;  %v11130_v11 = vld [vmem:[#allocation35_spill] sm:$0xff] }
 0x310   :  { %v2476_v25 = vpop.f32.mrf.mxu3  ;;  %v2567_v57 = vpop.f32.mrf.mxu0 }
 0x311   :  { %v3304_v24 = vmax.f32 %v2465_v29, 0.0  ;;  %v2477_v50 = vadd.f32 %v2476_v25, %v8938_v21  ;;  %v2656_v14 = vpop.f32.mrf.mxu1  ;;  %2828 = vmatpush.bf16.msrb.mxu3 %v6096_v49  ;;  %v11131_v49 = vld [vmem:[#allocation36_spill] sm:$0xff] }
 0x313   :  { %v8941_v6 = vpack.c.bf16 %v3304_v24, %v3300_v54  ;;  %v2566_v2 = vadd.f32 %v2565_v56, %v2477_v50  ;;  %v7020_v56 = vld [vmem:[%s10793_s3 + $0x14c] sm:$0xf]  ;;  %v6221_v24 = vld [vmem:[%s10793_s3 + $0x158] sm:$0xf0] }
 0x314   :  { %v6224_v50 = vor.u32 %v7020_v56, %v6221_v24 }
 0x315   :  { %11129 = vst [vmem:[#allocation31_spill] sm:$0xff] %v8941_v6  ;;  %v2655_v8 = vadd.f32 %v2654_v10, %v2566_v2  ;;  %v7052_v10 = vld [vmem:[%s10793_s3 + $0x24c] sm:$0xf]  ;;  %v11133_v6 = vld [vmem:[#allocation37_spill] sm:$0xff] }
 0x316   :  { %2917 = vmatpush.bf16.msrb.mxu0 %v6224_v50 }
 0x317   :  { %v2744_v23 = vadd.f32 %v2743_v27, %v2655_v8  ;;  %v2745_v29 = vpop.f32.mrf.mxu2  ;;  %v6349_v27 = vld [vmem:[%s10793_s3 + $0x258] sm:$0xf0] }
 0x318   :  { %v2478_v4 = vpop.f32.mrf.mxu3  ;;  %v2570_v51 = vpop.f32.mrf.mxu0  ;;  %v6352_v42 = vor.u32 %v7052_v10, %v6349_v27 }
 0x319   :  { %v2479_v25 = vadd.f32 %v2478_v4, %v8938_v21  ;;  %v2659_v54 = vpop.f32.mrf.mxu1  ;;  %v11132_v4 = vld [vmem:[#allocation34_spill] sm:$0xff]  ;;  %v3181_v9 = vmax.f32 %v2744_v23, 0.0 }
 0x31a   :  { %3006 = vmatpush.bf16.msrb.mxu1 %v6352_v42 }
 0x31b   :  { %v2568_v2 = vadd.f32 %v2567_v57, %v2479_v25  ;;  %2609 = vmatmul.bf16.gmra.mxu0 %v11130_v11 }
 0x31c   :  { %2698 = vmatmul.bf16.gmra.mxu1 %v11131_v49  ;;  %6490 = vmatmul.msk.bf16.gmra.mxu2 %vm1706_vm0, %v11133_v6 }
 0x31d   :  { %v2657_v8 = vadd.f32 %v2656_v14, %v2568_v2  ;;  %2520 = vmatmul.bf16.gmra.mxu3 %v11132_v4 }
 0x31f   :  { %v2746_v56 = vadd.f32 %v2745_v29, %v2657_v8  ;;  %v2748_v45 = vpop.f32.mrf.mxu2  ;;  %v11135_v8 = vld [vmem:[#allocation42_spill] sm:$0xff] }
 0x320   :  { %v2481_v24 = vpop.f32.mrf.mxu3  ;;  %v2572_v25 = vpop.f32.mrf.mxu0 }
 0x321   :  { %v3185_v60 = vmax.f32 %v2746_v56, 0.0  ;;  %v2482_v57 = vadd.f32 %v2481_v24, %v8938_v21  ;;  %v2661_v10 = vpop.f32.mrf.mxu1 }
 0x323   :  { %v8968_v27 = vpack.c.bf16 %v3185_v60, %v3181_v9  ;;  %v2571_v49 = vadd.f32 %v2570_v51, %v2482_v57  ;;  %v6984_v57 = vld [vmem:[%s10793_s3 + $0x2c] sm:$0xf] }
 0x325   :  { %11134 = vst [vmem:[#allocation10_spill] sm:$0xff] %v8968_v27  ;;  %v2660_v14 = vadd.f32 %v2659_v54, %v2571_v49 }
 0x327   :  { %v2749_v2 = vadd.f32 %v2748_v45, %v2660_v14  ;;  %v2750_v11 = vpop.f32.mrf.mxu2 }
 0x328   :  { %v2483_v4 = vpop.f32.mrf.mxu3  ;;  %v2575_v50 = vpop.f32.mrf.mxu0 }
 0x329   :  { %v2484_v6 = vadd.f32 %v2483_v4, %v8938_v21  ;;  %v2664_v42 = vpop.f32.mrf.mxu1  ;;  %v3189_v9 = vmax.f32 %v2749_v2, 0.0 }
 0x32b   :  { %v2573_v29 = vadd.f32 %v2572_v25, %v2484_v6  ;;  %2614 = vmatmul.bf16.gmra.mxu0 %v11094_v52  ;;  %v6077_v25 = vld [vmem:[%s10793_s3 + $0x38] sm:$0xf0] }
 0x32c   :  { %2703 = vmatmul.bf16.gmra.mxu1 %v11095_v1  ;;  %6491 = vmatmul.msk.bf16.gmra.mxu2 %vm1706_vm0, %v11135_v8 }
 0x32d   :  { %v2662_v23 = vadd.f32 %v2661_v10, %v2573_v29  ;;  %2525 = vmatmul.bf16.gmra.mxu3 %v11096_v13 }
 0x32f   :  { %v2751_v51 = vadd.f32 %v2750_v11, %v2662_v23  ;;  %v2753_v45 = vpop.f32.mrf.mxu2  ;;  %v6080_v11 = vor.u32 %v6984_v57, %v6077_v25  ;;  %v11137_v57 = vld [vmem:[#allocation45_spill] sm:$0xff]  ;;  %v11138_v25 = vld [vmem:[#allocation46_spill] sm:$0xff] }
 0x330   :  { %v2486_v60 = vpop.f32.mrf.mxu3  ;;  %v2577_v4 = vpop.f32.mrf.mxu0 }
 0x331   :  { %v3193_v54 = vmax.f32 %v2751_v51, 0.0  ;;  %v2487_v49 = vadd.f32 %v2486_v60, %v8938_v21  ;;  %v2666_v56 = vpop.f32.mrf.mxu1  ;;  %2829 = vmatpush.bf16.msrb.mxu3 %v6080_v11 }
 0x333   :  { %v8977_v6 = vpack.c.bf16 %v3193_v54, %v3189_v9  ;;  %v2576_v24 = vadd.f32 %v2575_v50, %v2487_v49  ;;  %v7016_v50 = vld [vmem:[%s10793_s3 + $0x12c] sm:$0xf]  ;;  %v6205_v9 = vld [vmem:[%s10793_s3 + $0x138] sm:$0xf0] }
 0x334   :  { %v6208_v54 = vor.u32 %v7016_v50, %v6205_v9 }
 0x335   :  { %11136 = vst [vmem:[#allocation62_spill] sm:$0xff] %v8977_v6  ;;  %v2665_v10 = vadd.f32 %v2664_v42, %v2576_v24  ;;  %v7048_v42 = vld [vmem:[%s10793_s3 + $0x22c] sm:$0xf] }
 0x336   :  { %2918 = vmatpush.bf16.msrb.mxu0 %v6208_v54 }
 0x337   :  { %v2754_v14 = vadd.f32 %v2753_v45, %v2665_v10  ;;  %v2755_v29 = vpop.f32.mrf.mxu2  ;;  %v6333_v45 = vld [vmem:[%s10793_s3 + $0x238] sm:$0xf0]  ;;  %v11139_v10 = vld [vmem:[#allocation44_spill] sm:$0xff] }
 0x338   :  { %v2488_v2 = vpop.f32.mrf.mxu3  ;;  %v2580_v51 = vpop.f32.mrf.mxu0  ;;  %v6336_v24 = vor.u32 %v7048_v42, %v6333_v45 }
 0x339   :  { %v2489_v23 = vadd.f32 %v2488_v2, %v8938_v21  ;;  %v2669_v60 = vpop.f32.mrf.mxu1  ;;  %v11140_v2 = vld [vmem:[#allocation47_spill] sm:$0xff]  ;;  %v3197_v27 = vmax.f32 %v2754_v14, 0.0 }
 0x33a   :  { %3007 = vmatpush.bf16.msrb.mxu1 %v6336_v24 }
 0x33b   :  { %v2578_v49 = vadd.f32 %v2577_v4, %v2489_v23  ;;  %2619 = vmatmul.bf16.gmra.mxu0 %v11137_v57 }
 0x33c   :  { %2708 = vmatmul.bf16.gmra.mxu1 %v11138_v25  ;;  %6492 = vmatmul.msk.bf16.gmra.mxu2 %vm1706_vm0, %v11140_v2 }
 0x33d   :  { %v2667_v11 = vadd.f32 %v2666_v56, %v2578_v49  ;;  %2530 = vmatmul.bf16.gmra.mxu3 %v11139_v10 }
 0x33f   :  { %v2756_v50 = vadd.f32 %v2755_v29, %v2667_v11  ;;  %v2758_v6 = vpop.f32.mrf.mxu2 }
 0x340   :  { %v2491_v9 = vpop.f32.mrf.mxu3  ;;  %v2582_v23 = vpop.f32.mrf.mxu0 }
 0x341   :  { %v3201_v8 = vmax.f32 %v2756_v50, 0.0  ;;  %v2492_v4 = vadd.f32 %v2491_v9, %v8938_v21  ;;  %v2671_v42 = vpop.f32.mrf.mxu1  ;;  %v6980_v9 = vld [vmem:[%s10793_s3 + $0xc] sm:$0xf] }
 0x343   :  { %v9004_v45 = vpack.c.bf16 %v3201_v8, %v3197_v27  ;;  %v2581_v25 = vadd.f32 %v2580_v51, %v2492_v4  ;;  %v6061_v4 = vld [vmem:[%s10793_s3 + $0x18] sm:$0xf0] }
 0x345   :  { %11141 = vst [vmem:[#allocation63_spill] sm:$0xff] %v9004_v45  ;;  %v2670_v56 = vadd.f32 %v2669_v60, %v2581_v25 }
 0x347   :  { %v2759_v49 = vadd.f32 %v2758_v6, %v2670_v56  ;;  %v2760_v57 = vpop.f32.mrf.mxu2 }
 0x348   :  { %v2493_v10 = vpop.f32.mrf.mxu3  ;;  %v2585_v54 = vpop.f32.mrf.mxu0 }
 0x349   :  { %v2494_v2 = vadd.f32 %v2493_v10, %v8938_v21  ;;  %v2674_v24 = vpop.f32.mrf.mxu1  ;;  %v3205_v51 = vmax.f32 %v2759_v49, 0.0 }
 0x34b   :  { %v2583_v29 = vadd.f32 %v2582_v23, %v2494_v2  ;;  %2624 = vmatmul.bf16.gmra.mxu0 %v11101_v36 }
 0x34c   :  { %2713 = vmatmul.bf16.gmra.mxu1 %v11102_v28  ;;  %6493 = vmatmul.msk.bf16.gmra.mxu2 %vm1706_vm0, %v11104_v58 }
 0x34d   :  { %v2672_v14 = vadd.f32 %v2671_v42, %v2583_v29  ;;  %2535 = vmatmul.bf16.gmra.mxu3 %v11103_v47 }
 0x34f   :  { %v2761_v27 = vadd.f32 %v2760_v57, %v2672_v14  ;;  %v2763_v6 = vpop.f32.mrf.mxu2  ;;  %v6064_v57 = vor.u32 %v6980_v9, %v6061_v4  ;;  %v11144_v4 = vld [vmem:[#allocation54_spill] sm:$0xff] }
 0x350   :  { %v2496_v8 = vpop.f32.mrf.mxu3  ;;  %v2587_v11 = vpop.f32.mrf.mxu0 }
 0x351   :  { %v3209_v60 = vmax.f32 %v2761_v27, 0.0  ;;  %v2497_v25 = vadd.f32 %v2496_v8, %v8938_v21  ;;  %v2676_v10 = vpop.f32.mrf.mxu1  ;;  %2830 = vmatpush.bf16.msrb.mxu3 %v6064_v57  ;;  %v6189_v8 = vld [vmem:[%s10793_s3 + $0x118] sm:$0xf0]  ;;  %v11145_v57 = vld [vmem:[#allocation56_spill] sm:$0xff] }
 0x353   :  { %v9013_v2 = vpack.c.bf16 %v3209_v60, %v3205_v51  ;;  %v2586_v50 = vadd.f32 %v2585_v54, %v2497_v25  ;;  %v7012_v54 = vld [vmem:[%s10793_s3 + $0x10c] sm:$0xf] }
 0x354   :  { %v6192_v51 = vor.u32 %v7012_v54, %v6189_v8 }
 0x355   :  { %11142 = vst [vmem:[#allocation64_spill] sm:$0xff] %v9013_v2  ;;  %v2675_v23 = vadd.f32 %v2674_v24, %v2586_v50  ;;  %v7044_v24 = vld [vmem:[%s10793_s3 + $0x20c] sm:$0xf] }
 0x356   :  { %v11143_v50 = vld [vmem:[#allocation55_spill] sm:$0xff]  ;;  %2919 = vmatpush.bf16.msrb.mxu0 %v6192_v51 }
 0x357   :  { %v2764_v42 = vadd.f32 %v2763_v6, %v2675_v23  ;;  %v2765_v49 = vpop.f32.mrf.mxu2  ;;  %v6317_v6 = vld [vmem:[%s10793_s3 + $0x218] sm:$0xf0] }
 0x358   :  { %v2498_v56 = vpop.f32.mrf.mxu3  ;;  %v2590_v14 = vpop.f32.mrf.mxu0  ;;  %v6320_v25 = vor.u32 %v7044_v24, %v6317_v6 }
 0x359   :  { %v2499_v29 = vadd.f32 %v2498_v56, %v8938_v21  ;;  %v2679_v27 = vpop.f32.mrf.mxu1  ;;  %v3213_v8 = vmax.f32 %v2764_v42, 0.0 }
 0x35a   :  { %3008 = vmatpush.bf16.msrb.mxu1 %v6320_v25 }
 0x35b   :  { %v2588_v60 = vadd.f32 %v2587_v11, %v2499_v29  ;;  %2629 = vmatmul.bf16.gmra.mxu0 %v8381_v3 }
 0x35c   :  { %2718 = vmatmul.bf16.gmra.mxu1 %v11143_v50  ;;  %6494 = vmatmul.msk.bf16.gmra.mxu2 %vm1706_vm0, %v11145_v57 }
 0x35d   :  { %v2677_v9 = vadd.f32 %v2676_v10, %v2588_v60  ;;  %2540 = vmatmul.bf16.gmra.mxu3 %v11144_v4 }
 0x35f   :  { %v2766_v23 = vadd.f32 %v2765_v49, %v2677_v9  ;;  %v2768_v54 = vpop.f32.mrf.mxu2 }
 0x360   :  { %v2501_v56 = vpop.f32.mrf.mxu3  ;;  %v2592_v29 = vpop.f32.mrf.mxu0 }
 0x361   :  { %v3217_v2 = vmax.f32 %v2766_v23, 0.0  ;;  %v2502_v11 = vadd.f32 %v2501_v56, %v8938_v21  ;;  %v2681_v24 = vpop.f32.mrf.mxu1 }
 0x363   :  { %v9040_v6 = vpack.c.bf16 %v3217_v2, %v3213_v8  ;;  %v2591_v45 = vadd.f32 %v2590_v14, %v2502_v11  ;;  %v6627_v8 = vld [vmem:[%s10795_s5 + $0xe0] sm:$0xf]  ;;  %v7109_v11 = vld [vmem:[%s10795_s5 + $0xec] sm:$0xf0] }
 0x365   :  { %11146 = vst [vmem:[#allocation65_spill] sm:$0xff] %v9040_v6  ;;  %v2680_v10 = vadd.f32 %v2679_v27, %v2591_v45 }
 0x367   :  { %v2769_v60 = vadd.f32 %v2768_v54, %v2680_v10  ;;  %v2770_v50 = vpop.f32.mrf.mxu2 }
 0x368   :  { %v2503_v4 = vpop.f32.mrf.mxu3  ;;  %v2595_v51 = vpop.f32.mrf.mxu0 }
 0x369   :  { %v2504_v57 = vadd.f32 %v2503_v4, %v8938_v21  ;;  %v2684_v25 = vpop.f32.mrf.mxu1  ;;  %v3221_v27 = vmax.f32 %v2769_v60, 0.0 }
 0x36b   :  { %v2593_v49 = vadd.f32 %v2592_v29, %v2504_v57  ;;  %2634 = vmatmul.bf16.gmra.mxu0 %v8422_v62 }
 0x36c   :  { %2723 = vmatmul.bf16.gmra.mxu1 %v8425_v15  ;;  %6495 = vmatmul.msk.bf16.gmra.mxu2 %vm1706_vm0, %v8427_v63 }
 0x36d   :  { %v2682_v42 = vadd.f32 %v2681_v24, %v2593_v49  ;;  %2545 = vmatmul.bf16.gmra.mxu3 %v8420_v40 }
 0x36f   :  { %v2771_v2 = vadd.f32 %v2770_v50, %v2682_v42  ;;  %v2773_v14 = vpop.f32.mrf.mxu2  ;;  %v6628_v50 = vor.u32 %v7109_v11, %v6627_v8  ;;  %v7173_v8 = vld [vmem:[%s10795_s5 + $0x2ec] sm:$0xf0] }
 0x370   :  { %v2506_v45 = vpop.f32.mrf.mxu3  ;;  %v2597_v23 = vpop.f32.mrf.mxu0 }
 0x371   :  { %v3225_v9 = vmax.f32 %v2771_v2, 0.0  ;;  %v2507_v4 = vadd.f32 %v2506_v45, %v8938_v21  ;;  %v2686_v56 = vpop.f32.mrf.mxu1  ;;  %4029 = vmatpush.bf16.msra.mxu3 %v6628_v50  ;;  %v7177_v45 = vld [vmem:[%s10795_s5 + $0x30c] sm:$0xf0] }
 0x373   :  { %v9049_v57 = vpack.c.bf16 %v3225_v9, %v3221_v27  ;;  %v2596_v54 = vadd.f32 %v2595_v51, %v2507_v4  ;;  %v6899_v51 = vld [vmem:[%s10795_s5 + $0x300] sm:$0xf] }
 0x374   :  { %v6900_v27 = vor.u32 %v7177_v45, %v6899_v51  ;;  %v6883_v9 = vld [vmem:[%s10795_s5 + $0x2e0] sm:$0xf] }
 0x375   :  { %11147 = vst [vmem:[#allocation66_spill] sm:$0xff] %v9049_v57  ;;  %v2685_v29 = vadd.f32 %v2684_v25, %v2596_v54  ;;  %v6755_v25 = vld [vmem:[%s10795_s5 + $0x1e0] sm:$0xf]  ;;  %v6884_v11 = vor.u32 %v7173_v8, %v6883_v9 }
 0x376   :  { %4303 = vmatpush.bf16.msra.mxu2 %v6900_v27 }
 0x377   :  { %v2774_v24 = vadd.f32 %v2773_v14, %v2685_v29  ;;  %v2775_v60 = vpop.f32.mrf.mxu2  ;;  %v7141_v14 = vld [vmem:[%s10795_s5 + $0x1ec] sm:$0xf0]  ;;  %4207 = vmatpush.bf16.msra.mxu1 %v6884_v11 }
 0x378   :  { %v2508_v10 = vpop.f32.mrf.mxu3  ;;  %v2600_v42 = vpop.f32.mrf.mxu0  ;;  %v6756_v54 = vor.u32 %v7141_v14, %v6755_v25 }
 0x379   :  { %v2509_v49 = vadd.f32 %v2508_v10, %v8938_v21  ;;  %v2689_v2 = vpop.f32.mrf.mxu1 }
 0x37a   :  { %4118 = vmatpush.bf16.msra.mxu0 %v6756_v54 }
 0x37b   :  { %v2598_v4 = vadd.f32 %v2597_v23, %v2509_v49  ;;  %2639 = vmatmul.bf16.gmra.mxu0 %v8472_v39  ;;  %v3229_v49 = vmax.f32 %v2774_v24, 0.0 }
 0x37c   :  { %2728 = vmatmul.bf16.gmra.mxu1 %v8474_v30  ;;  %6496 = vmatmul.msk.bf16.gmra.mxu2 %vm1706_vm0, %v8476_v22 }
 0x37d   :  { %v2687_v50 = vadd.f32 %v2686_v56, %v2598_v4  ;;  %2550 = vmatmul.bf16.gmra.mxu3 %v8470_v12 }
 0x37f   :  { %v2776_v29 = vadd.f32 %v2775_v60, %v2687_v50  ;;  %v2778_v10 = vpop.f32.mrf.mxu2 }
 0x380   :  { %v2511_v23 = vpop.f32.mrf.mxu3  ;;  %v2602_v25 = vpop.f32.mrf.mxu0 }
 0x381   :  { %v3233_v51 = vmax.f32 %v2776_v29, 0.0  ;;  %v2512_v45 = vadd.f32 %v2511_v23, %v8938_v21  ;;  %v2691_v14 = vpop.f32.mrf.mxu1 }
 0x383   :  { %v9082_v57 = vpack.c.bf16 %v3233_v51, %v3229_v49  ;;  %v2601_v56 = vadd.f32 %v2600_v42, %v2512_v45 }
 0x385   :  { %11148 = vst [vmem:[#allocation67_spill] sm:$0xff] %v9082_v57  ;;  %v2690_v9 = vadd.f32 %v2689_v2, %v2601_v56 }
 0x387   :  { %v2779_v4 = vadd.f32 %v2778_v10, %v2690_v9  ;;  %v2780_v6 = vpop.f32.mrf.mxu2 }
 0x388   :  { %v2513_v8 = vpop.f32.mrf.mxu3  ;;  %v2605_v54 = vpop.f32.mrf.mxu0 }
 0x389   :  { %v2514_v27 = vadd.f32 %v2513_v8, %v8938_v21  ;;  %v2694_v60 = vpop.f32.mrf.mxu1  ;;  %v3237_v29 = vmax.f32 %v2779_v4, 0.0 }
 0x38b   :  { %v2603_v11 = vadd.f32 %v2602_v25, %v2514_v27  ;;  %2920 = vmatmul.bf16.vlgmr.msrb.gmra.mxu0 %v7660_v18  ;;  %v6739_v27 = vld [vmem:[%s10795_s5 + $0x1c0] sm:$0xf] }
 0x38c   :  { %3009 = vmatmul.bf16.vlgmr.msrb.gmra.mxu1 %v7662_v19  ;;  %6497 = vmatmul.msk.bf16.vlgmr.msrb.gmra.mxu2 %vm1706_vm0, %v7664_v20  ;;  %v6611_v19 = vld [vmem:[%s10795_s5 + $0xc0] sm:$0xf] }
 0x38d   :  { %v2692_v24 = vadd.f32 %v2691_v14, %v2603_v11  ;;  %2831 = vmatmul.bf16.vlgmr.msrb.gmra.mxu3 %v7658_v17  ;;  %v7105_v17 = vld [vmem:[%s10795_s5 + $0xcc] sm:$0xf0] }
 0x38e   :  { %v6612_v20 = vor.u32 %v7105_v17, %v6611_v19 }
 0x38f   :  { %v2781_v42 = vadd.f32 %v2780_v6, %v2692_v24  ;;  %v2783_v50 = vpop.f32.mrf.mxu2  ;;  %v7169_v24 = vld [vmem:[%s10795_s5 + $0x2cc] sm:$0xf0] }
 0x390   :  { %v2516_v2 = vpop.f32.mrf.mxu3  ;;  %v2607_v49 = vpop.f32.mrf.mxu0  ;;  %4030 = vmatpush.bf16.msra.mxu3 %v6612_v20 }
 0x391   :  { %v3241_v23 = vmax.f32 %v2781_v42, 0.0  ;;  %v2517_v10 = vadd.f32 %v2516_v2, %v8938_v21  ;;  %v2696_v51 = vpop.f32.mrf.mxu1 }
 0x393   :  { %v9091_v45 = vpack.c.bf16 %v3241_v23, %v3237_v29  ;;  %v2606_v18 = vadd.f32 %v2605_v54, %v2517_v10  ;;  %v7137_v54 = vld [vmem:[%s10795_s5 + $0x1cc] sm:$0xf0] }
 0x394   :  { %v6740_v11 = vor.u32 %v7137_v54, %v6739_v27 }
 0x395   :  { %11149 = vst [vmem:[#allocation68_spill] sm:$0xff] %v9091_v45  ;;  %v2695_v6 = vadd.f32 %v2694_v60, %v2606_v18  ;;  %v6867_v60 = vld [vmem:[%s10795_s5 + $0x2c0] sm:$0xf] }
 0x396   :  { %v6868_v2 = vor.u32 %v7169_v24, %v6867_v60  ;;  %4119 = vmatpush.bf16.msra.mxu0 %v6740_v11 }
 0x397   :  { %v2784_v25 = vadd.f32 %v2783_v50, %v2695_v6  ;;  %v2785_v56 = vpop.f32.mrf.mxu2 }
 0x398   :  { %v2518_v14 = vpop.f32.mrf.mxu3  ;;  %v2610_v4 = vpop.f32.mrf.mxu0  ;;  %4208 = vmatpush.bf16.msra.mxu1 %v6868_v2 }
 0x399   :  { %v2519_v9 = vadd.f32 %v2518_v14, %v8938_v21  ;;  %v2699_v8 = vpop.f32.mrf.mxu1  ;;  %v3245_v18 = vmax.f32 %v2784_v25, 0.0 }
 0x39b   :  { %v2608_v42 = vadd.f32 %v2607_v49, %v2519_v9  ;;  %2925 = vmatmul.bf16.gmra.mxu0 %v7733_v32 }
 0x39c   :  { %3014 = vmatmul.bf16.gmra.mxu1 %v7736_v38  ;;  %6498 = vmatmul.msk.bf16.gmra.mxu2 %vm1706_vm0, %v7738_v7 }
 0x39d   :  { %v2697_v50 = vadd.f32 %v2696_v51, %v2608_v42  ;;  %2836 = vmatmul.bf16.gmra.mxu3 %v7731_v31 }
 0x39f   :  { %v2786_v29 = vadd.f32 %v2785_v56, %v2697_v50  ;;  %v2788_v10 = vpop.f32.mrf.mxu2 }
 0x3a0   :  { %v2521_v23 = vpop.f32.mrf.mxu3  ;;  %v2612_v17 = vpop.f32.mrf.mxu0 }
 0x3a1   :  { %v3249_v19 = vmax.f32 %v2786_v29, 0.0  ;;  %v2522_v49 = vadd.f32 %v2521_v23, %v8938_v21  ;;  %v2701_v20 = vpop.f32.mrf.mxu1 }
 0x3a3   :  { %v9118_v32 = vpack.c.bf16 %v3249_v19, %v3245_v18  ;;  %v2611_v38 = vadd.f32 %v2610_v4, %v2522_v49 }
 0x3a5   :  { %11150 = vst [vmem:[#allocation69_spill] sm:$0xff] %v9118_v32  ;;  %v2700_v51 = vadd.f32 %v2699_v8, %v2611_v38  ;;  %v7133_v38 = vld [vmem:[%s10795_s5 + $0x1ac] sm:$0xf0] }
 0x3a7   :  { %v2789_v6 = vadd.f32 %v2788_v10, %v2700_v51  ;;  %v2790_v14 = vpop.f32.mrf.mxu2 }
 0x3a8   :  { %v2523_v31 = vpop.f32.mrf.mxu3  ;;  %v2615_v9 = vpop.f32.mrf.mxu0 }
 0x3a9   :  { %v2524_v7 = vadd.f32 %v2523_v31, %v8938_v21  ;;  %v2704_v27 = vpop.f32.mrf.mxu1  ;;  %v3253_v11 = vmax.f32 %v2789_v6, 0.0  ;;  %v6851_v6 = vld [vmem:[%s10795_s5 + $0x2a0] sm:$0xf]  ;;  %v7165_v31 = vld [vmem:[%s10795_s5 + $0x2ac] sm:$0xf0] }
 0x3ab   :  { %v2613_v56 = vadd.f32 %v2612_v17, %v2524_v7  ;;  %2930 = vmatmul.bf16.gmra.mxu0 %v11053_v43  ;;  %v6852_v7 = vor.u32 %v7165_v31, %v6851_v6 }
 0x3ac   :  { %3019 = vmatmul.bf16.gmra.mxu1 %v11054_v55  ;;  %6499 = vmatmul.msk.bf16.gmra.mxu2 %vm1706_vm0, %v11056_v34  ;;  %v6595_v55 = vld [vmem:[%s10795_s5 + $0xa0] sm:$0xf] }
 0x3ad   :  { %v2702_v25 = vadd.f32 %v2701_v20, %v2613_v56  ;;  %2841 = vmatmul.bf16.gmra.mxu3 %v11055_v0  ;;  %v7101_v0 = vld [vmem:[%s10795_s5 + $0xac] sm:$0xf0]  ;;  %v6723_v20 = vld [vmem:[%s10795_s5 + $0x1a0] sm:$0xf]  ;;  %4209 = vmatpush.bf16.msra.mxu1 %v6852_v7 }
 0x3ae   :  { %v6596_v34 = vor.u32 %v7101_v0, %v6595_v55  ;;  %v6724_v51 = vor.u32 %v7133_v38, %v6723_v20 }
 0x3af   :  { %v2791_v4 = vadd.f32 %v2790_v14, %v2702_v25  ;;  %v2793_v54 = vpop.f32.mrf.mxu2 }
 0x3b0   :  { %v2526_v8 = vpop.f32.mrf.mxu3  ;;  %v2617_v42 = vpop.f32.mrf.mxu0  ;;  %4031 = vmatpush.bf16.msra.mxu3 %v6596_v34  ;;  %4120 = vmatpush.bf16.msra.mxu0 %v6724_v51 }
 0x3b1   :  { %v3257_v60 = vmax.f32 %v2791_v4, 0.0  ;;  %v2527_v24 = vadd.f32 %v2526_v8, %v8938_v21  ;;  %v2706_v2 = vpop.f32.mrf.mxu1 }
 0x3b3   :  { %v9127_v50 = vpack.c.bf16 %v3257_v60, %v3253_v11  ;;  %v2616_v43 = vadd.f32 %v2615_v9, %v2527_v24 }
 0x3b5   :  { %11151 = vst [vmem:[#allocation70_spill] sm:$0xff] %v9127_v50  ;;  %v2705_v29 = vadd.f32 %v2704_v27, %v2616_v43 }
 0x3b7   :  { %v2794_v23 = vadd.f32 %v2793_v54, %v2705_v29  ;;  %v2795_v18 = vpop.f32.mrf.mxu2 }
 0x3b8   :  { %v2528_v10 = vpop.f32.mrf.mxu3  ;;  %v2620_v49 = vpop.f32.mrf.mxu0 }
 0x3b9   :  { %v2529_v19 = vadd.f32 %v2528_v10, %v8938_v21  ;;  %v2709_v17 = vpop.f32.mrf.mxu1  ;;  %v3261_v4 = vmax.f32 %v2794_v23, 0.0 }
 0x3bb   :  { %v2618_v14 = vadd.f32 %v2617_v42, %v2529_v19  ;;  %2935 = vmatmul.bf16.gmra.mxu0 %v11058_v44 }
 0x3bc   :  { %3024 = vmatmul.bf16.gmra.mxu1 %v11059_v41  ;;  %6500 = vmatmul.msk.bf16.gmra.mxu2 %vm1706_vm0, %v11061_v33 }
 0x3bd   :  { %v2707_v9 = vadd.f32 %v2706_v2, %v2618_v14  ;;  %2846 = vmatmul.bf16.gmra.mxu3 %v11060_v5 }
 0x3bf   :  { %v2796_v27 = vadd.f32 %v2795_v18, %v2707_v9  ;;  %v2798_v25 = vpop.f32.mrf.mxu2 }
 0x3c0   :  { %v2531_v56 = vpop.f32.mrf.mxu3  ;;  %v2622_v11 = vpop.f32.mrf.mxu0 }
 0x3c1   :  { %v3265_v8 = vmax.f32 %v2796_v27, 0.0  ;;  %v2532_v54 = vadd.f32 %v2531_v56, %v8938_v21  ;;  %v2711_v60 = vpop.f32.mrf.mxu1  ;;  %v6707_v56 = vld [vmem:[%s10795_s5 + $0x180] sm:$0xf] }
 0x3c3   :  { %v9154_v44 = vpack.c.bf16 %v3265_v8, %v3261_v4  ;;  %v2621_v41 = vadd.f32 %v2620_v49, %v2532_v54  ;;  %v6835_v8 = vld [vmem:[%s10795_s5 + $0x280] sm:$0xf]  ;;  %v7161_v54 = vld [vmem:[%s10795_s5 + $0x28c] sm:$0xf0] }
 0x3c5   :  { %11152 = vst [vmem:[#allocation71_spill] sm:$0xff] %v9154_v44  ;;  %v2710_v24 = vadd.f32 %v2709_v17, %v2621_v41 }
 0x3c7   :  { %v2799_v42 = vadd.f32 %v2798_v25, %v2710_v24  ;;  %v2800_v2 = vpop.f32.mrf.mxu2  ;;  %v7129_v25 = vld [vmem:[%s10795_s5 + $0x18c] sm:$0xf0] }
 0x3c8   :  { %v2533_v5 = vpop.f32.mrf.mxu3  ;;  %v2625_v43 = vpop.f32.mrf.mxu0  ;;  %v6708_v4 = vor.u32 %v7129_v25, %v6707_v56  ;;  %v6563_v25 = vld [vmem:[%s10795_s5 + $0x60] sm:$0xf] }
 0x3c9   :  { %v2534_v33 = vadd.f32 %v2533_v5, %v8938_v21  ;;  %v2714_v55 = vpop.f32.mrf.mxu1  ;;  %v3269_v18 = vmax.f32 %v2799_v42, 0.0 }
 0x3ca   :  { %4121 = vmatpush.bf16.msra.mxu0 %v6708_v4  ;;  %v7093_v4 = vld [vmem:[%s10795_s5 + $0x6c] sm:$0xf0] }
 0x3cb   :  { %v2623_v0 = vadd.f32 %v2622_v11, %v2534_v33  ;;  %2940 = vmatmul.bf16.gmra.mxu0 %v11063_v37 }
 0x3cc   :  { %3029 = vmatmul.bf16.gmra.mxu1 %v11064_v35  ;;  %6501 = vmatmul.msk.bf16.gmra.mxu2 %vm1706_vm0, %v11066_v16  ;;  %v6579_v35 = vld [vmem:[%s10795_s5 + $0x80] sm:$0xf] }
 0x3cd   :  { %v2712_v34 = vadd.f32 %v2711_v60, %v2623_v0  ;;  %2851 = vmatmul.bf16.gmra.mxu3 %v11065_v48  ;;  %v7097_v48 = vld [vmem:[%s10795_s5 + $0x8c] sm:$0xf0]  ;;  %v6836_v60 = vor.u32 %v7161_v54, %v6835_v8  ;;  %v6564_v8 = vor.u32 %v7093_v4, %v6563_v25 }
 0x3ce   :  { %v6580_v16 = vor.u32 %v7097_v48, %v6579_v35  ;;  %v11158_v35 = vld [vmem:[#allocation25_spill] sm:$0xff] }
 0x3cf   :  { %v2801_v29 = vadd.f32 %v2800_v2, %v2712_v34  ;;  %v2803_v10 = vpop.f32.mrf.mxu2  ;;  %4210 = vmatpush.bf16.msra.mxu1 %v6836_v60 }
 0x3d0   :  { %v2536_v23 = vpop.f32.mrf.mxu3  ;;  %v2627_v17 = vpop.f32.mrf.mxu0  ;;  %4032 = vmatpush.bf16.msra.mxu3 %v6580_v16 }
 0x3d1   :  { %v3273_v19 = vmax.f32 %v2801_v29, 0.0  ;;  %v2537_v49 = vadd.f32 %v2536_v23, %v8938_v21  ;;  %v2716_v20 = vpop.f32.mrf.mxu1 }
 0x3d3   :  { %v9163_v38 = vpack.c.bf16 %v3273_v19, %v3269_v18  ;;  %v2626_v37 = vadd.f32 %v2625_v43, %v2537_v49  ;;  %v11155_v49 = vld [vmem:[#allocation23_spill] sm:$0xff] }
 0x3d4   :  { %4033 = vmatpush.bf16.msra.mxu3 %v6564_v8  ;;  %v11165_v8 = vld [vmem:[#allocation32_spill] sm:$0xff] }
 0x3d5   :  { %11153 = vst [vmem:[#allocation72_spill] sm:$0xff] %v9163_v38  ;;  %v2715_v51 = vadd.f32 %v2714_v55, %v2626_v37  ;;  %v11157_v37 = vld [vmem:[#allocation22_spill] sm:$0xff] }
 0x3d7   :  { %v2804_v6 = vadd.f32 %v2803_v10, %v2715_v51  ;;  %v2805_v14 = vpop.f32.mrf.mxu2 }
 0x3d8   :  { %v2538_v31 = vpop.f32.mrf.mxu3  ;;  %v2630_v9 = vpop.f32.mrf.mxu0 }
 0x3d9   :  { %v2539_v7 = vadd.f32 %v2538_v31, %v8938_v21  ;;  %v2719_v27 = vpop.f32.mrf.mxu1  ;;  %v3277_v2 = vmax.f32 %v2804_v6, 0.0 }
 0x3db   :  { %v2628_v11 = vadd.f32 %v2627_v17, %v2539_v7  ;;  %2945 = vmatmul.bf16.gmra.mxu0 %v11068_v26  ;;  %v11156_v17 = vld [vmem:[#allocation24_spill] sm:$0xff] }
 0x3dc   :  { %3034 = vmatmul.bf16.gmra.mxu1 %v11069_v46  ;;  %6502 = vmatmul.msk.bf16.gmra.mxu2 %vm1706_vm0, %v11071_v59 }
 0x3dd   :  { %v2717_v41 = vadd.f32 %v2716_v20, %v2628_v11  ;;  %2856 = vmatmul.bf16.gmra.mxu3 %v11070_v61 }
 0x3df   :  { %v2806_v24 = vadd.f32 %v2805_v14, %v2717_v41  ;;  %v2808_v5 = vpop.f32.mrf.mxu2 }
 0x3e0   :  { %v2541_v42 = vpop.f32.mrf.mxu3  ;;  %v2632_v55 = vpop.f32.mrf.mxu0 }
 0x3e1   :  { %v3281_v33 = vmax.f32 %v2806_v24, 0.0  ;;  %v2542_v43 = vadd.f32 %v2541_v42, %v8938_v21  ;;  %v2721_v0 = vpop.f32.mrf.mxu1 }
 0x3e3   :  { %v9190_v26 = vpack.c.bf16 %v3281_v33, %v3277_v2  ;;  %v2631_v46 = vadd.f32 %v2630_v9, %v2542_v43  ;;  %v6691_v2 = vld [vmem:[%s10795_s5 + $0x160] sm:$0xf]  ;;  %v7125_v33 = vld [vmem:[%s10795_s5 + $0x16c] sm:$0xf0] }
 0x3e4   :  { %v6692_v43 = vor.u32 %v7125_v33, %v6691_v2 }
 0x3e5   :  { %11154 = vst [vmem:[#allocation73_spill] sm:$0xff] %v9190_v26  ;;  %v2720_v34 = vadd.f32 %v2719_v27, %v2631_v46 }
 0x3e6   :  { %4122 = vmatpush.bf16.msra.mxu0 %v6692_v43 }
 0x3e7   :  { %v2809_v29 = vadd.f32 %v2808_v5, %v2720_v34  ;;  %v2810_v23 = vpop.f32.mrf.mxu2 }
 0x3e8   :  { %v2543_v61 = vpop.f32.mrf.mxu3  ;;  %v2635_v10 = vpop.f32.mrf.mxu0 }
 0x3e9   :  { %v2544_v59 = vadd.f32 %v2543_v61, %v8938_v21  ;;  %v2724_v18 = vpop.f32.mrf.mxu1  ;;  %v3285_v6 = vmax.f32 %v2809_v29, 0.0  ;;  %v11160_v29 = vld [vmem:[#allocation27_spill] sm:$0xff]  ;;  %v11161_v61 = vld [vmem:[#allocation28_spill] sm:$0xff] }
 0x3eb   :  { %v2633_v19 = vadd.f32 %v2632_v55, %v2544_v59  ;;  %2950 = vmatmul.bf16.gmra.mxu0 %v11155_v49  ;;  %v6819_v55 = vld [vmem:[%s10795_s5 + $0x260] sm:$0xf] }
 0x3ec   :  { %3039 = vmatmul.bf16.gmra.mxu1 %v11156_v17  ;;  %6503 = vmatmul.msk.bf16.gmra.mxu2 %vm1706_vm0, %v11158_v35  ;;  %v11162_v59 = vld [vmem:[#allocation26_spill] sm:$0xff] }
 0x3ed   :  { %v2722_v20 = vadd.f32 %v2721_v0, %v2633_v19  ;;  %2861 = vmatmul.bf16.gmra.mxu3 %v11157_v37  ;;  %v7157_v0 = vld [vmem:[%s10795_s5 + $0x26c] sm:$0xf0] }
 0x3ee   :  { %v6820_v34 = vor.u32 %v7157_v0, %v6819_v55 }
 0x3ef   :  { %v2811_v48 = vadd.f32 %v2810_v23, %v2722_v20  ;;  %v2813_v51 = vpop.f32.mrf.mxu2 }
 0x3f0   :  { %v2546_v16 = vpop.f32.mrf.mxu3  ;;  %v2637_v7 = vpop.f32.mrf.mxu0  ;;  %4211 = vmatpush.bf16.msra.mxu1 %v6820_v34  ;;  %v6547_v34 = vld [vmem:[%s10795_s5 + $0x40] sm:$0xf] }
 0x3f1   :  { %v3289_v31 = vmax.f32 %v2811_v48, 0.0  ;;  %v2547_v14 = vadd.f32 %v2546_v16, %v8938_v21  ;;  %v2726_v9 = vpop.f32.mrf.mxu1 }
 0x3f3   :  { %v9199_v27 = vpack.c.bf16 %v3289_v31, %v3285_v6  ;;  %v2636_v56 = vadd.f32 %v2635_v10, %v2547_v14  ;;  %v11163_v10 = vld [vmem:[#allocation29_spill] sm:$0xff] }
 0x3f5   :  { %11159 = vst [vmem:[#allocation23_spill] sm:$0xff] %v9199_v27  ;;  %v2725_v54 = vadd.f32 %v2724_v18, %v2636_v56 }
 0x3f7   :  { %v2814_v11 = vadd.f32 %v2813_v51, %v2725_v54  ;;  %v2815_v41 = vpop.f32.mrf.mxu2 }
 0x3f8   :  { %v2548_v60 = vpop.f32.mrf.mxu3  ;;  %v2640_v42 = vpop.f32.mrf.mxu0 }
 0x3f9   :  { %v2549_v24 = vadd.f32 %v2548_v60, %v8938_v21  ;;  %v2729_v5 = vpop.f32.mrf.mxu1  ;;  %v3293_v17 = vmax.f32 %v2814_v11, 0.0  ;;  %v11166_v11 = vld [vmem:[#allocation30_spill] sm:$0xff]  ;;  %v11167_v60 = vld [vmem:[#allocation33_spill] sm:$0xff] }
 0x3fb   :  { %v2638_v46 = vadd.f32 %v2637_v7, %v2549_v24  ;;  %2955 = vmatmul.bf16.gmra.mxu0 %v11160_v29  ;;  %v7089_v29 = vld [vmem:[%s10795_s5 + $0x4c] sm:$0xf0] }
 0x3fc   :  { %3044 = vmatmul.bf16.gmra.mxu1 %v11161_v61  ;;  %6504 = vmatmul.msk.bf16.gmra.mxu2 %vm1706_vm0, %v11163_v10  ;;  %v6548_v61 = vor.u32 %v7089_v29, %v6547_v34 }
 0x3fd   :  { %v2727_v23 = vadd.f32 %v2726_v9, %v2638_v46  ;;  %2866 = vmatmul.bf16.gmra.mxu3 %v11162_v59 }
 0x3fe   :  { %4034 = vmatpush.bf16.msra.mxu3 %v6548_v61 }
 0x3ff   :  { %v2816_v18 = vadd.f32 %v2815_v41, %v2727_v23  ;;  %v2818_v49 = vpop.f32.mrf.mxu2  ;;  %v7230_v41 = vld [vmem:[%s10794_s4] sm:$0xf] }
 0x400   :  { %v2551_v19 = vpop.f32.mrf.mxu3  ;;  %v2642_v35 = vpop.f32.mrf.mxu0  ;;  %v9237_v24 = vperm.slane %v7230_v41, 3 }
 0x401   :  { %v3297_v20 = vmax.f32 %v2816_v18, 0.0  ;;  %v2552_v37 = vadd.f32 %v2551_v19, %v8938_v21  ;;  %v2731_v48 = vpop.f32.mrf.mxu1 }
 0x403   :  { %v9226_v16 = vpack.c.bf16 %v3297_v20, %v3293_v17  ;;  %v2641_v51 = vadd.f32 %v2640_v42, %v2552_v37  ;;  %v6675_v20 = vld [vmem:[%s10795_s5 + $0x140] sm:$0xf]  ;;  %v7121_v37 = vld [vmem:[%s10795_s5 + $0x14c] sm:$0xf0] }
 0x405   :  { %11164 = vst [vmem:[#allocation24_spill] sm:$0xff] %v9226_v16  ;;  %v2730_v6 = vadd.f32 %v2729_v5, %v2641_v51  ;;  %v7153_v51 = vld [vmem:[%s10795_s5 + $0x24c] sm:$0xf0] }
 0x407   :  { %v2819_v31 = vadd.f32 %v2818_v49, %v2730_v6  ;;  %v2820_v7 = vpop.f32.mrf.mxu2 }
 0x408   :  { %v2553_v14 = vpop.f32.mrf.mxu3  ;;  %v2921_v56 = vpop.f32.mrf.mxu0 }
 0x409   :  { %v2554_v9 = vadd.f32 %v2553_v14, %v8938_v21  ;;  %v3010_v25 = vpop.f32.mrf.mxu1  ;;  %v3301_v2 = vmax.f32 %v2819_v31, 0.0  ;;  %v11169_v14 = vld [vmem:[#allocation35_spill] sm:$0xff] }
 0x40b   :  { %v2643_v4 = vadd.f32 %v2642_v35, %v2554_v9  ;;  %2960 = vmatmul.bf16.gmra.mxu0 %v11124_v53  ;;  %v6676_v35 = vor.u32 %v7121_v37, %v6675_v20 }
 0x40c   :  { %3049 = vmatmul.bf16.gmra.mxu1 %v11165_v8  ;;  %6505 = vmatmul.msk.bf16.gmra.mxu2 %vm1706_vm0, %v11167_v60 }
 0x40d   :  { %v2732_v54 = vadd.f32 %v2731_v48, %v2643_v4  ;;  %2871 = vmatmul.bf16.gmra.mxu3 %v11166_v11  ;;  %v6803_v48 = vld [vmem:[%s10795_s5 + $0x240] sm:$0xf]  ;;  %4123 = vmatpush.bf16.msra.mxu0 %v6676_v35 }
 0x40e   :  { %v6804_v31 = vor.u32 %v7153_v51, %v6803_v48 }
 0x40f   :  { %v2821_v21 = vadd.f32 %v2820_v7, %v2732_v54  ;;  %v3099_v5 = vpop.f32.mrf.mxu2  ;;  %v11170_v7 = vld [vmem:[#allocation36_spill] sm:$0xff] }
 0x410   :  { %v2832_v42 = vpop.f32.mrf.mxu3  ;;  %v2923_v43 = vpop.f32.mrf.mxu0  ;;  %4212 = vmatpush.bf16.msra.mxu1 %v6804_v31 }
 0x411   :  { %v3305_v33 = vmax.f32 %v2821_v21, 0.0  ;;  %v2833_v53 = vadd.f32 %v2832_v42, %v9237_v24  ;;  %v3012_v55 = vpop.f32.mrf.mxu1 }
 0x413   :  { %v9240_v0 = vpack.c.bf16 %v3305_v33, %v3301_v2  ;;  %v2922_v46 = vadd.f32 %v2921_v56, %v2833_v53  ;;  %v11171_v56 = vld [vmem:[#allocation34_spill] sm:$0xff] }
 0x415   :  { %11168 = vst [vmem:[#allocation22_spill] sm:$0xff] %v9240_v0  ;;  %v3011_v23 = vadd.f32 %v3010_v25, %v2922_v46  ;;  %v11172_v25 = vld [vmem:[#allocation37_spill] sm:$0xff] }
 0x417   :  { %v3100_v59 = vadd.f32 %v3099_v5, %v3011_v23  ;;  %v3101_v18 = vpop.f32.mrf.mxu2 }
 0x418   :  { %v2834_v10 = vpop.f32.mrf.mxu3  ;;  %v2926_v49 = vpop.f32.mrf.mxu0 }
 0x419   :  { %v2835_v19 = vadd.f32 %v2834_v10, %v9237_v24  ;;  %v3015_v17 = vpop.f32.mrf.mxu1  ;;  %v3182_v11 = vmax.f32 %v3100_v59, 0.0  ;;  %v11173_v59 = vld [vmem:[#allocation42_spill] sm:$0xff] }
 0x41b   :  { %v2924_v6 = vadd.f32 %v2923_v43, %v2835_v19  ;;  %2965 = vmatmul.bf16.gmra.mxu0 %v11169_v14 }
 0x41c   :  { %3054 = vmatmul.bf16.gmra.mxu1 %v11170_v7  ;;  %6506 = vmatmul.msk.bf16.gmra.mxu2 %vm1706_vm0, %v11172_v25 }
 0x41d   :  { %v3013_v9 = vadd.f32 %v3012_v55, %v2924_v6  ;;  %2876 = vmatmul.bf16.gmra.mxu3 %v11171_v56 }
 0x41f   :  { %v3102_v4 = vadd.f32 %v3101_v18, %v3013_v9  ;;  %v3104_v54 = vpop.f32.mrf.mxu2 }
 0x420   :  { %v2837_v8 = vpop.f32.mrf.mxu3  ;;  %v2928_v21 = vpop.f32.mrf.mxu0 }
 0x421   :  { %v3186_v60 = vmax.f32 %v3102_v4, 0.0  ;;  %v2838_v41 = vadd.f32 %v2837_v8, %v9237_v24  ;;  %v3017_v42 = vpop.f32.mrf.mxu1  ;;  %v6659_v4 = vld [vmem:[%s10795_s5 + $0x120] sm:$0xf]  ;;  %v7117_v8 = vld [vmem:[%s10795_s5 + $0x12c] sm:$0xf0] }
 0x423   :  { %v9267_v5 = vpack.c.bf16 %v3186_v60, %v3182_v11  ;;  %v2927_v2 = vadd.f32 %v2926_v49, %v2838_v41  ;;  %v6787_v11 = vld [vmem:[%s10795_s5 + $0x220] sm:$0xf]  ;;  %v7149_v60 = vld [vmem:[%s10795_s5 + $0x22c] sm:$0xf0] }
 0x425   :  { %v3016_v33 = vadd.f32 %v3015_v17, %v2927_v2  ;;  %v11176_v2 = vld [vmem:[#allocation46_spill] sm:$0xff] }
 0x427   :  { %v3105_v53 = vadd.f32 %v3104_v54, %v3016_v33  ;;  %v3106_v55 = vpop.f32.mrf.mxu2  ;;  %v6660_v54 = vor.u32 %v7117_v8, %v6659_v4 }
 0x428   :  { %v2839_v43 = vpop.f32.mrf.mxu3  ;;  %v2931_v34 = vpop.f32.mrf.mxu0 }
 0x429   :  { %v2840_v46 = vadd.f32 %v2839_v43, %v9237_v24  ;;  %v3020_v29 = vpop.f32.mrf.mxu1  ;;  %v3190_v49 = vmax.f32 %v3105_v53, 0.0  ;;  %v11177_v53 = vld [vmem:[#allocation44_spill] sm:$0xff]  ;;  %v11178_v43 = vld [vmem:[#allocation47_spill] sm:$0xff]  ;;  %4124 = vmatpush.bf16.msra.mxu0 %v6660_v54 }
 0x42b   :  { %v2929_v61 = vadd.f32 %v2928_v21, %v2840_v46  ;;  %2970 = vmatmul.bf16.gmra.mxu0 %v11094_v52  ;;  %v6788_v21 = vor.u32 %v7149_v60, %v6787_v11 }
 0x42c   :  { %3059 = vmatmul.bf16.gmra.mxu1 %v11095_v1  ;;  %6507 = vmatmul.msk.bf16.gmra.mxu2 %vm1706_vm0, %v11173_v59  ;;  %v6531_v1 = vld [vmem:[%s10795_s5 + $0x20] sm:$0xf] }
 0x42d   :  { %v3018_v23 = vadd.f32 %v3017_v42, %v2929_v61  ;;  %2881 = vmatmul.bf16.gmra.mxu3 %v11096_v13  ;;  %v7085_v13 = vld [vmem:[%s10795_s5 + $0x2c] sm:$0xf0]  ;;  %v11175_v42 = vld [vmem:[#allocation45_spill] sm:$0xff]  ;;  %4213 = vmatpush.bf16.msra.mxu1 %v6788_v21 }
 0x42e   :  { %v6532_v51 = vor.u32 %v7085_v13, %v6531_v1 }
 0x42f   :  { %v3107_v10 = vadd.f32 %v3106_v55, %v3018_v23  ;;  %v3109_v19 = vpop.f32.mrf.mxu2 }
 0x430   :  { %v2842_v18 = vpop.f32.mrf.mxu3  ;;  %v2933_v37 = vpop.f32.mrf.mxu0  ;;  %4035 = vmatpush.bf16.msra.mxu3 %v6532_v51 }
 0x431   :  { %v3194_v17 = vmax.f32 %v3107_v10, 0.0  ;;  %v2843_v20 = vadd.f32 %v2842_v18, %v9237_v24  ;;  %v3022_v35 = vpop.f32.mrf.mxu1 }
 0x433   :  { %v9276_v48 = vpack.c.bf16 %v3194_v17, %v3190_v49  ;;  %v2932_v52 = vadd.f32 %v2931_v34, %v2843_v20 }
 0x435   :  { %11174 = vst [vmem:[#allocation25_spill] sm:$0xff] %v9276_v48  ;;  %v3021_v6 = vadd.f32 %v3020_v29, %v2932_v52 }
 0x437   :  { %v3110_v31 = vadd.f32 %v3109_v19, %v3021_v6  ;;  %v3111_v7 = vpop.f32.mrf.mxu2 }
 0x438   :  { %v2844_v14 = vpop.f32.mrf.mxu3  ;;  %v2936_v56 = vpop.f32.mrf.mxu0 }
 0x439   :  { %v2845_v9 = vadd.f32 %v2844_v14, %v9237_v24  ;;  %v3025_v25 = vpop.f32.mrf.mxu1  ;;  %v3198_v29 = vmax.f32 %v3110_v31, 0.0 }
 0x43b   :  { %v2934_v41 = vadd.f32 %v2933_v37, %v2845_v9  ;;  %2975 = vmatmul.bf16.gmra.mxu0 %v11175_v42 }
 0x43c   :  { %3064 = vmatmul.bf16.gmra.mxu1 %v11176_v2  ;;  %6508 = vmatmul.msk.bf16.gmra.mxu2 %vm1706_vm0, %v11178_v43 }
 0x43d   :  { %v3023_v33 = vadd.f32 %v3022_v35, %v2934_v41  ;;  %2886 = vmatmul.bf16.gmra.mxu3 %v11177_v53  ;;  %v7113_v53 = vld [vmem:[%s10795_s5 + $0x10c] sm:$0xf0] }
 0x43f   :  { %v3112_v55 = vadd.f32 %v3111_v7, %v3023_v33  ;;  %v3114_v34 = vpop.f32.mrf.mxu2  ;;  %v6643_v33 = vld [vmem:[%s10795_s5 + $0x100] sm:$0xf] }
 0x440   :  { %v2847_v46 = vpop.f32.mrf.mxu3  ;;  %v2938_v59 = vpop.f32.mrf.mxu0  ;;  %v6644_v43 = vor.u32 %v7113_v53, %v6643_v33 }
 0x441   :  { %v3202_v61 = vmax.f32 %v3112_v55, 0.0  ;;  %v2848_v23 = vadd.f32 %v2847_v46, %v9237_v24  ;;  %v3027_v10 = vpop.f32.mrf.mxu1  ;;  %v6771_v55 = vld [vmem:[%s10795_s5 + $0x200] sm:$0xf]  ;;  %v7145_v46 = vld [vmem:[%s10795_s5 + $0x20c] sm:$0xf0] }
 0x442   :  { %4125 = vmatpush.bf16.msra.mxu0 %v6644_v43 }
 0x443   :  { %v9303_v18 = vpack.c.bf16 %v3202_v61, %v3198_v29  ;;  %v2937_v19 = vadd.f32 %v2936_v56, %v2848_v23  ;;  %v6772_v29 = vor.u32 %v7145_v46, %v6771_v55  ;;  %v11180_v61 = vld [vmem:[#allocation55_spill] sm:$0xff] }
 0x445   :  { %v3026_v49 = vadd.f32 %v3025_v25, %v2937_v19  ;;  %4214 = vmatpush.bf16.msra.mxu1 %v6772_v29  ;;  %v6901_v29 = vld [vmem:[%s10795_s5 + $0x310] sm:$0xf0] }
 0x447   :  { %v3115_v17 = vadd.f32 %v3114_v34, %v3026_v49  ;;  %v3116_v37 = vpop.f32.mrf.mxu2 }
 0x448   :  { %v2849_v20 = vpop.f32.mrf.mxu3  ;;  %v2941_v52 = vpop.f32.mrf.mxu0 }
 0x449   :  { %v2850_v35 = vadd.f32 %v2849_v20, %v9237_v24  ;;  %v3030_v1 = vpop.f32.mrf.mxu1  ;;  %v3206_v7 = vmax.f32 %v3115_v17, 0.0 }
 0x44b   :  { %v2939_v13 = vadd.f32 %v2938_v59, %v2850_v35  ;;  %2980 = vmatmul.bf16.gmra.mxu0 %v11101_v36  ;;  %v11181_v59 = vld [vmem:[#allocation54_spill] sm:$0xff] }
 0x44c   :  { %3069 = vmatmul.bf16.gmra.mxu1 %v11102_v28  ;;  %6509 = vmatmul.msk.bf16.gmra.mxu2 %vm1706_vm0, %v11104_v58  ;;  %v6515_v28 = vld [vmem:[%s10795_s5] sm:$0xf]  ;;  %v7081_v58 = vld [vmem:[%s10795_s5 + $0xc] sm:$0xf0] }
 0x44d   :  { %v3028_v51 = vadd.f32 %v3027_v10, %v2939_v13  ;;  %2891 = vmatmul.bf16.gmra.mxu3 %v11103_v47  ;;  %v6516_v47 = vor.u32 %v7081_v58, %v6515_v28  ;;  %v11182_v10 = vld [vmem:[#allocation56_spill] sm:$0xff] }
 0x44f   :  { %v3117_v6 = vadd.f32 %v3116_v37, %v3028_v51  ;;  %v3119_v14 = vpop.f32.mrf.mxu2  ;;  %4036 = vmatpush.bf16.msra.mxu3 %v6516_v47 }
 0x450   :  { %v2852_v31 = vpop.f32.mrf.mxu3  ;;  %v2943_v25 = vpop.f32.mrf.mxu0 }
 0x451   :  { %v3210_v9 = vmax.f32 %v3117_v6, 0.0  ;;  %v2853_v56 = vadd.f32 %v2852_v31, %v9237_v24  ;;  %v3032_v4 = vpop.f32.mrf.mxu1 }
 0x453   :  { %v9312_v8 = vpack.c.bf16 %v3210_v9, %v3206_v7  ;;  %v2942_v36 = vadd.f32 %v2941_v52, %v2853_v56 }
 0x455   :  { %11179 = vst [vmem:[#allocation27_spill] sm:$0xff] %v9312_v8  ;;  %v3031_v54 = vadd.f32 %v3030_v1, %v2942_v36 }
 0x457   :  { %v3120_v11 = vadd.f32 %v3119_v14, %v3031_v54  ;;  %v3121_v41 = vpop.f32.mrf.mxu2 }
 0x458   :  { %v2854_v60 = vpop.f32.mrf.mxu3  ;;  %v2946_v42 = vpop.f32.mrf.mxu0 }
 0x459   :  { %v2855_v21 = vadd.f32 %v2854_v60, %v9237_v24  ;;  %v3035_v2 = vpop.f32.mrf.mxu1  ;;  %v3214_v20 = vmax.f32 %v3120_v11, 0.0 }
 0x45b   :  { %v2944_v34 = vadd.f32 %v2943_v25, %v2855_v21  ;;  %2985 = vmatmul.bf16.gmra.mxu0 %v8381_v3 }
 0x45c   :  { %3074 = vmatmul.bf16.gmra.mxu1 %v11180_v61  ;;  %6510 = vmatmul.msk.bf16.gmra.mxu2 %vm1706_vm0, %v11182_v10  ;;  %v7171_v10 = vld [vmem:[%s10795_s5 + $0x2e4] sm:$0xf] }
 0x45d   :  { %v3033_v23 = vadd.f32 %v3032_v4, %v2944_v34  ;;  %2896 = vmatmul.bf16.gmra.mxu3 %v11181_v59  ;;  %v7175_v34 = vld [vmem:[%s10795_s5 + $0x304] sm:$0xf]  ;;  %v6757_v59 = vld [vmem:[%s10795_s5 + $0x1f0] sm:$0xf0] }
 0x45e   :  { %v6904_v61 = vor.u32 %v7175_v34, %v6901_v29 }
 0x45f   :  { %v3122_v19 = vadd.f32 %v3121_v41, %v3033_v23  ;;  %v3124_v17 = vpop.f32.mrf.mxu2  ;;  %v7139_v23 = vld [vmem:[%s10795_s5 + $0x1e4] sm:$0xf] }
 0x460   :  { %v2857_v49 = vpop.f32.mrf.mxu3  ;;  %v2948_v52 = vpop.f32.mrf.mxu0  ;;  %4659 = vmatpush.bf16.msrb.mxu2 %v6904_v61 }
 0x461   :  { %v3218_v37 = vmax.f32 %v3122_v19, 0.0  ;;  %v2858_v35 = vadd.f32 %v2857_v49, %v9237_v24  ;;  %v3037_v1 = vpop.f32.mrf.mxu1  ;;  %v6760_v49 = vor.u32 %v7139_v23, %v6757_v59 }
 0x463   :  { %v9339_v3 = vpack.c.bf16 %v3218_v37, %v3214_v20  ;;  %v2947_v13 = vadd.f32 %v2946_v42, %v2858_v35  ;;  %4474 = vmatpush.bf16.msrb.mxu0 %v6760_v49  ;;  %v6741_v49 = vld [vmem:[%s10795_s5 + $0x1d0] sm:$0xf0] }
 0x465   :  { %v3036_v51 = vadd.f32 %v3035_v2, %v2947_v13 }
 0x467   :  { %v3125_v6 = vadd.f32 %v3124_v17, %v3036_v51  ;;  %v3126_v14 = vpop.f32.mrf.mxu2  ;;  %v6885_v17 = vld [vmem:[%s10795_s5 + $0x2f0] sm:$0xf0] }
 0x468   :  { %v2859_v31 = vpop.f32.mrf.mxu3  ;;  %v2951_v9 = vpop.f32.mrf.mxu0  ;;  %v6888_v20 = vor.u32 %v7171_v10, %v6885_v17 }
 0x469   :  { %v2860_v7 = vadd.f32 %v2859_v31, %v9237_v24  ;;  %v3040_v56 = vpop.f32.mrf.mxu1  ;;  %v3222_v47 = vmax.f32 %v3125_v6, 0.0 }
 0x46a   :  { %4563 = vmatpush.bf16.msrb.mxu1 %v6888_v20  ;;  %v7167_v20 = vld [vmem:[%s10795_s5 + $0x2c4] sm:$0xf] }
 0x46b   :  { %v2949_v25 = vadd.f32 %v2948_v52, %v2860_v7  ;;  %2990 = vmatmul.bf16.gmra.mxu0 %v8422_v62 }
 0x46c   :  { %3079 = vmatmul.bf16.gmra.mxu1 %v8425_v15  ;;  %6511 = vmatmul.msk.bf16.gmra.mxu2 %vm1706_vm0, %v8427_v63  ;;  %v7107_v15 = vld [vmem:[%s10795_s5 + $0xe4] sm:$0xf] }
 0x46d   :  { %v3038_v4 = vadd.f32 %v3037_v1, %v2949_v25  ;;  %2901 = vmatmul.bf16.gmra.mxu3 %v8420_v40  ;;  %v6629_v40 = vld [vmem:[%s10795_s5 + $0xf0] sm:$0xf0] }
 0x46e   :  { %v6632_v63 = vor.u32 %v7107_v15, %v6629_v40 }
 0x46f   :  { %v3127_v36 = vadd.f32 %v3126_v14, %v3038_v4  ;;  %v3129_v58 = vpop.f32.mrf.mxu2 }
 0x470   :  { %v2862_v28 = vpop.f32.mrf.mxu3  ;;  %v2953_v60 = vpop.f32.mrf.mxu0  ;;  %4385 = vmatpush.bf16.msrb.mxu3 %v6632_v63 }
 0x471   :  { %v3226_v54 = vmax.f32 %v3127_v36, 0.0  ;;  %v2863_v11 = vadd.f32 %v2862_v28, %v9237_v24  ;;  %v3042_v41 = vpop.f32.mrf.mxu1  ;;  %v11185_v28 = vld [vmem:[#allocation15_spill] sm:$0xff] }
 0x473   :  { %v9348_v21 = vpack.c.bf16 %v3226_v54, %v3222_v47  ;;  %v2952_v62 = vadd.f32 %v2951_v9, %v2863_v11  ;;  %v11187_v54 = vld [vmem:[#allocation38_spill] sm:$0xff] }
 0x475   :  { %11183 = vst [vmem:[#allocation28_spill] sm:$0xff] %v9348_v21  ;;  %v3041_v42 = vadd.f32 %v3040_v56, %v2952_v62 }
 0x477   :  { %v3130_v2 = vadd.f32 %v3129_v58, %v3041_v42  ;;  %v3131_v53 = vpop.f32.mrf.mxu2  ;;  %v11186_v58 = vld [vmem:[#allocation10_spill] sm:$0xff] }
 0x478   :  { %v2864_v33 = vpop.f32.mrf.mxu3  ;;  %v2956_v55 = vpop.f32.mrf.mxu0 }
 0x479   :  { %v2865_v43 = vadd.f32 %v2864_v33, %v9237_v24  ;;  %v3045_v46 = vpop.f32.mrf.mxu1  ;;  %v3230_v13 = vmax.f32 %v3130_v2, 0.0 }
 0x47b   :  { %v2954_v19 = vadd.f32 %v2953_v60, %v2865_v43  ;;  %2995 = vmatmul.bf16.gmra.mxu0 %v8472_v39  ;;  %v6613_v43 = vld [vmem:[%s10795_s5 + $0xd0] sm:$0xf0] }
 0x47c   :  { %3084 = vmatmul.bf16.gmra.mxu1 %v8474_v30  ;;  %6512 = vmatmul.msk.bf16.gmra.mxu2 %vm1706_vm0, %v8476_v22 }
 0x47d   :  { %v3043_v37 = vadd.f32 %v3042_v41, %v2954_v19  ;;  %2906 = vmatmul.bf16.gmra.mxu3 %v8470_v12  ;;  %v7135_v19 = vld [vmem:[%s10795_s5 + $0x1c4] sm:$0xf] }
 0x47e   :  { %v6744_v17 = vor.u32 %v7135_v19, %v6741_v49  ;;  %v7099_v49 = vld [vmem:[%s10795_s5 + $0xa4] sm:$0xf] }
 0x47f   :  { %v3132_v35 = vadd.f32 %v3131_v53, %v3043_v37  ;;  %v3134_v1 = vpop.f32.mrf.mxu2  ;;  %v7103_v53 = vld [vmem:[%s10795_s5 + $0xc4] sm:$0xf]  ;;  %v6869_v37 = vld [vmem:[%s10795_s5 + $0x2d0] sm:$0xf0] }
 0x480   :  { %v2867_v52 = vpop.f32.mrf.mxu3  ;;  %v2958_v39 = vpop.f32.mrf.mxu0  ;;  %4475 = vmatpush.bf16.msrb.mxu0 %v6744_v17  ;;  %v6597_v17 = vld [vmem:[%s10795_s5 + $0xb0] sm:$0xf0] }
 0x481   :  { %v3234_v51 = vmax.f32 %v3132_v35, 0.0  ;;  %v2868_v6 = vadd.f32 %v2867_v52, %v9237_v24  ;;  %v3047_v31 = vpop.f32.mrf.mxu1  ;;  %v6872_v52 = vor.u32 %v7167_v20, %v6869_v37  ;;  %v6600_v20 = vor.u32 %v7099_v49, %v6597_v17 }
 0x483   :  { %v9381_v30 = vpack.c.bf16 %v3234_v51, %v3230_v13  ;;  %v2957_v14 = vadd.f32 %v2956_v55, %v2868_v6  ;;  %v6616_v55 = vor.u32 %v7103_v53, %v6613_v43  ;;  %v11190_v13 = vld [vmem:[#allocation62_spill] sm:$0xff]  ;;  %v11191_v6 = vld [vmem:[#allocation43_spill] sm:$0xff]  ;;  %4564 = vmatpush.bf16.msrb.mxu1 %v6872_v52  ;;  %v11195_v53 = vld [vmem:[#allocation48_spill] sm:$0xff] }
 0x485   :  { %11184 = vst [vmem:[#allocation26_spill] sm:$0xff] %v9381_v30  ;;  %v3046_v7 = vadd.f32 %v3045_v46, %v2957_v14  ;;  %4386 = vmatpush.bf16.msrb.mxu3 %v6616_v55 }
 0x487   :  { %v3135_v12 = vadd.f32 %v3134_v1, %v3046_v7  ;;  %v3136_v56 = vpop.f32.mrf.mxu2  ;;  %v11189_v1 = vld [vmem:[#allocation16_spill] sm:$0xff] }
 0x488   :  { %v2869_v9 = vpop.f32.mrf.mxu3  ;;  %v2961_v25 = vpop.f32.mrf.mxu0 }
 0x489   :  { %v2870_v22 = vadd.f32 %v2869_v9, %v9237_v24  ;;  %v3050_v4 = vpop.f32.mrf.mxu1  ;;  %v3238_v62 = vmax.f32 %v3135_v12, 0.0  ;;  %4387 = vmatpush.bf16.msrb.mxu3 %v6600_v20 }
 0x48b   :  { %v2959_v36 = vadd.f32 %v2958_v39, %v2870_v22  ;;  %4126 = vmatmul.bf16.vlgmr.msra.gmra.mxu0 %v11185_v28 }
 0x48c   :  { %4215 = vmatmul.bf16.vlgmr.msra.gmra.mxu1 %v11186_v58  ;;  %6913 = vmatmul.msk.bf16.vlgmr.msra.gmra.mxu2 %vm1706_vm0, %v9267_v5 }
 0x48d   :  { %v3048_v47 = vadd.f32 %v3047_v31, %v2959_v36  ;;  %4037 = vmatmul.bf16.vlgmr.msra.gmra.mxu3 %v11187_v54 }
 0x48f   :  { %v3137_v11 = vadd.f32 %v3136_v56, %v3048_v47  ;;  %v3139_v41 = vpop.f32.mrf.mxu2 }
 0x490   :  { %v2872_v60 = vpop.f32.mrf.mxu3  ;;  %v2963_v63 = vpop.f32.mrf.mxu0 }
 0x491   :  { %v3242_v15 = vmax.f32 %v3137_v11, 0.0  ;;  %v2873_v40 = vadd.f32 %v2872_v60, %v9237_v24  ;;  %v3052_v42 = vpop.f32.mrf.mxu1 }
 0x493   :  { %v9390_v2 = vpack.c.bf16 %v3242_v15, %v3238_v62  ;;  %v2962_v33 = vadd.f32 %v2961_v25, %v2873_v40 }
 0x495   :  { %11188 = vst [vmem:[#allocation29_spill] sm:$0xff] %v9390_v2  ;;  %v3051_v46 = vadd.f32 %v3050_v4, %v2962_v33 }
 0x497   :  { %v3140_v34 = vadd.f32 %v3139_v41, %v3051_v46  ;;  %v3141_v61 = vpop.f32.mrf.mxu2 }
 0x498   :  { %v2874_v29 = vpop.f32.mrf.mxu3  ;;  %v2966_v59 = vpop.f32.mrf.mxu0 }
 0x499   :  { %v2875_v23 = vadd.f32 %v2874_v29, %v9237_v24  ;;  %v3055_v10 = vpop.f32.mrf.mxu1  ;;  %v3246_v7 = vmax.f32 %v3140_v34, 0.0 }
 0x49b   :  { %v2964_v35 = vadd.f32 %v2963_v63, %v2875_v23  ;;  %4131 = vmatmul.bf16.gmra.mxu0 %v11189_v1  ;;  %v11193_v63 = vld [vmem:[#allocation14_spill] sm:$0xff] }
 0x49c   :  { %4220 = vmatmul.bf16.gmra.mxu1 %v11190_v13  ;;  %6914 = vmatmul.msk.bf16.gmra.mxu2 %vm1706_vm0, %v9276_v48 }
 0x49d   :  { %v3053_v51 = vadd.f32 %v3052_v42, %v2964_v35  ;;  %4042 = vmatmul.bf16.gmra.mxu3 %v11191_v6  ;;  %v11194_v42 = vld [vmem:[#allocation63_spill] sm:$0xff] }
 0x49f   :  { %v3142_v39 = vadd.f32 %v3141_v61, %v3053_v51  ;;  %v3144_v14 = vpop.f32.mrf.mxu2 }
 0x4a0   :  { %v2877_v31 = vpop.f32.mrf.mxu3  ;;  %v2968_v56 = vpop.f32.mrf.mxu0 }
 0x4a1   :  { %v3250_v12 = vmax.f32 %v3142_v39, 0.0  ;;  %v2878_v9 = vadd.f32 %v2877_v31, %v9237_v24  ;;  %v3057_v22 = vpop.f32.mrf.mxu1 }
 0x4a3   :  { %v9417_v25 = vpack.c.bf16 %v3250_v12, %v3246_v7  ;;  %v2967_v4 = vadd.f32 %v2966_v59, %v2878_v9  ;;  %v7131_v7 = vld [vmem:[%s10795_s5 + $0x1a4] sm:$0xf]  ;;  %v6725_v12 = vld [vmem:[%s10795_s5 + $0x1b0] sm:$0xf0] }
 0x4a4   :  { %v6728_v9 = vor.u32 %v7131_v7, %v6725_v12  ;;  %v11203_v7 = vld [vmem:[#allocation57_spill] sm:$0xff] }
 0x4a5   :  { %11192 = vst [vmem:[#allocation32_spill] sm:$0xff] %v9417_v25  ;;  %v3056_v36 = vadd.f32 %v3055_v10, %v2967_v4 }
 0x4a6   :  { %4476 = vmatpush.bf16.msrb.mxu0 %v6728_v9 }
 0x4a7   :  { %v3145_v47 = vadd.f32 %v3144_v14, %v3056_v36  ;;  %v3146_v60 = vpop.f32.mrf.mxu2 }
 0x4a8   :  { %v2879_v11 = vpop.f32.mrf.mxu3  ;;  %v2971_v62 = vpop.f32.mrf.mxu0 }
 0x4a9   :  { %v2880_v41 = vadd.f32 %v2879_v11, %v9237_v24  ;;  %v3060_v15 = vpop.f32.mrf.mxu1  ;;  %v3254_v34 = vmax.f32 %v3145_v47, 0.0  ;;  %v11197_v47 = vld [vmem:[#allocation17_spill] sm:$0xff]  ;;  %v11198_v11 = vld [vmem:[#allocation64_spill] sm:$0xff] }
 0x4ab   :  { %v2969_v40 = vadd.f32 %v2968_v56, %v2880_v41  ;;  %4136 = vmatmul.bf16.gmra.mxu0 %v11193_v63  ;;  %v7163_v56 = vld [vmem:[%s10795_s5 + $0x2a4] sm:$0xf]  ;;  %v11199_v41 = vld [vmem:[#allocation53_spill] sm:$0xff] }
 0x4ac   :  { %4225 = vmatmul.bf16.gmra.mxu1 %v11194_v42  ;;  %6915 = vmatmul.msk.bf16.gmra.mxu2 %vm1706_vm0, %v9303_v18 }
 0x4ad   :  { %v3058_v33 = vadd.f32 %v3057_v22, %v2969_v40  ;;  %4047 = vmatmul.bf16.gmra.mxu3 %v11195_v53  ;;  %v6853_v22 = vld [vmem:[%s10795_s5 + $0x2b0] sm:$0xf0] }
 0x4ae   :  { %v6856_v36 = vor.u32 %v7163_v56, %v6853_v22 }
 0x4af   :  { %v3147_v43 = vadd.f32 %v3146_v60, %v3058_v33  ;;  %v3149_v46 = vpop.f32.mrf.mxu2 }
 0x4b0   :  { %v2882_v55 = vpop.f32.mrf.mxu3  ;;  %v2973_v23 = vpop.f32.mrf.mxu0  ;;  %4565 = vmatpush.bf16.msrb.mxu1 %v6856_v36 }
 0x4b1   :  { %v3258_v29 = vmax.f32 %v3147_v43, 0.0  ;;  %v2883_v61 = vadd.f32 %v2882_v55, %v9237_v24  ;;  %v3062_v59 = vpop.f32.mrf.mxu1 }
 0x4b3   :  { %v9426_v10 = vpack.c.bf16 %v3258_v29, %v3254_v34  ;;  %v2972_v19 = vadd.f32 %v2971_v62, %v2883_v61 }
 0x4b5   :  { %11196 = vst [vmem:[#allocation30_spill] sm:$0xff] %v9426_v10  ;;  %v3061_v37 = vadd.f32 %v3060_v15, %v2972_v19 }
 0x4b7   :  { %v3150_v35 = vadd.f32 %v3149_v46, %v3061_v37  ;;  %v3151_v51 = vpop.f32.mrf.mxu2 }
 0x4b8   :  { %v2884_v52 = vpop.f32.mrf.mxu3  ;;  %v2976_v31 = vpop.f32.mrf.mxu0 }
 0x4b9   :  { %v2885_v39 = vadd.f32 %v2884_v52, %v9237_v24  ;;  %v3065_v14 = vpop.f32.mrf.mxu1  ;;  %v3262_v33 = vmax.f32 %v3150_v35, 0.0  ;;  %v11202_v35 = vld [vmem:[#allocation65_spill] sm:$0xff] }
 0x4bb   :  { %v2974_v4 = vadd.f32 %v2973_v23, %v2885_v39  ;;  %4141 = vmatmul.bf16.gmra.mxu0 %v11197_v47 }
 0x4bc   :  { %4230 = vmatmul.bf16.gmra.mxu1 %v11198_v11  ;;  %6916 = vmatmul.msk.bf16.gmra.mxu2 %vm1706_vm0, %v9312_v8 }
 0x4bd   :  { %v3063_v60 = vadd.f32 %v3062_v59, %v2974_v4  ;;  %4052 = vmatmul.bf16.gmra.mxu3 %v11199_v41 }
 0x4bf   :  { %v3152_v62 = vadd.f32 %v3151_v51, %v3063_v60  ;;  %v3154_v40 = vpop.f32.mrf.mxu2  ;;  %v11201_v51 = vld [vmem:[#allocation19_spill] sm:$0xff] }
 0x4c0   :  { %v2887_v15 = vpop.f32.mrf.mxu3  ;;  %v2978_v46 = vpop.f32.mrf.mxu0 }
 0x4c1   :  { %v3266_v43 = vmax.f32 %v3152_v62, 0.0  ;;  %v2888_v55 = vadd.f32 %v2887_v15, %v9237_v24  ;;  %v3067_v34 = vpop.f32.mrf.mxu1  ;;  %v7095_v15 = vld [vmem:[%s10795_s5 + $0x84] sm:$0xf] }
 0x4c3   :  { %v9453_v29 = vpack.c.bf16 %v3266_v43, %v3262_v33  ;;  %v2977_v61 = vadd.f32 %v2976_v31, %v2888_v55 }
 0x4c5   :  { %11200 = vst [vmem:[#allocation33_spill] sm:$0xff] %v9453_v29  ;;  %v3066_v23 = vadd.f32 %v3065_v14, %v2977_v61 }
 0x4c7   :  { %v3155_v59 = vadd.f32 %v3154_v40, %v3066_v23  ;;  %v3156_v49 = vpop.f32.mrf.mxu2  ;;  %v6581_v40 = vld [vmem:[%s10795_s5 + $0x90] sm:$0xf0] }
 0x4c8   :  { %v2889_v19 = vpop.f32.mrf.mxu3  ;;  %v2981_v20 = vpop.f32.mrf.mxu0  ;;  %v6584_v33 = vor.u32 %v7095_v15, %v6581_v40 }
 0x4c9   :  { %v2890_v17 = vadd.f32 %v2889_v19, %v9237_v24  ;;  %v3070_v37 = vpop.f32.mrf.mxu1  ;;  %v3270_v9 = vmax.f32 %v3155_v59, 0.0  ;;  %v7127_v19 = vld [vmem:[%s10795_s5 + $0x184] sm:$0xf] }
 0x4ca   :  { %4388 = vmatpush.bf16.msrb.mxu3 %v6584_v33 }
 0x4cb   :  { %v2979_v52 = vadd.f32 %v2978_v46, %v2890_v17  ;;  %4146 = vmatmul.bf16.gmra.mxu0 %v11201_v51 }
 0x4cc   :  { %4235 = vmatmul.bf16.gmra.mxu1 %v11202_v35  ;;  %6917 = vmatmul.msk.bf16.gmra.mxu2 %vm1706_vm0, %v9339_v3 }
 0x4cd   :  { %v3068_v39 = vadd.f32 %v3067_v34, %v2979_v52  ;;  %4057 = vmatmul.bf16.gmra.mxu3 %v11203_v7 }
 0x4cf   :  { %v3157_v31 = vadd.f32 %v3156_v49, %v3068_v39  ;;  %v3159_v12 = vpop.f32.mrf.mxu2  ;;  %v6709_v49 = vld [vmem:[%s10795_s5 + $0x190] sm:$0xf0] }
 0x4d0   :  { %v2892_v14 = vpop.f32.mrf.mxu3  ;;  %v2983_v4 = vpop.f32.mrf.mxu0  ;;  %v6712_v17 = vor.u32 %v7127_v19, %v6709_v49 }
 0x4d1   :  { %v3274_v56 = vmax.f32 %v3157_v31, 0.0  ;;  %v2893_v22 = vadd.f32 %v2892_v14, %v9237_v24  ;;  %v3072_v36 = vpop.f32.mrf.mxu1  ;;  %v11205_v31 = vld [vmem:[#allocation20_spill] sm:$0xff]  ;;  %v11206_v14 = vld [vmem:[#allocation66_spill] sm:$0xff] }
 0x4d2   :  { %4477 = vmatpush.bf16.msrb.mxu0 %v6712_v17 }
 0x4d3   :  { %v9462_v60 = vpack.c.bf16 %v3274_v56, %v3270_v9  ;;  %v2982_v62 = vadd.f32 %v2981_v20, %v2893_v22  ;;  %v7159_v20 = vld [vmem:[%s10795_s5 + $0x284] sm:$0xf] }
 0x4d4   :  { %v11207_v9 = vld [vmem:[#allocation58_spill] sm:$0xff] }
 0x4d5   :  { %11204 = vst [vmem:[#allocation35_spill] sm:$0xff] %v9462_v60  ;;  %v3071_v43 = vadd.f32 %v3070_v37, %v2982_v62  ;;  %v6837_v37 = vld [vmem:[%s10795_s5 + $0x290] sm:$0xf0] }
 0x4d6   :  { %v6840_v39 = vor.u32 %v7159_v20, %v6837_v37 }
 0x4d7   :  { %v3160_v55 = vadd.f32 %v3159_v12, %v3071_v43  ;;  %v3161_v34 = vpop.f32.mrf.mxu2 }
 0x4d8   :  { %v2894_v46 = vpop.f32.mrf.mxu3  ;;  %v2986_v23 = vpop.f32.mrf.mxu0  ;;  %4566 = vmatpush.bf16.msrb.mxu1 %v6840_v39  ;;  %v11209_v39 = vld [vmem:[#allocation18_spill] sm:$0xff] }
 0x4d9   :  { %v2895_v61 = vadd.f32 %v2894_v46, %v9237_v24  ;;  %v3075_v59 = vpop.f32.mrf.mxu1  ;;  %v3278_v15 = vmax.f32 %v3160_v55, 0.0 }
 0x4db   :  { %v2984_v52 = vadd.f32 %v2983_v4, %v2895_v61  ;;  %4151 = vmatmul.bf16.gmra.mxu0 %v11205_v31 }
 0x4dc   :  { %4240 = vmatmul.bf16.gmra.mxu1 %v11206_v14  ;;  %6918 = vmatmul.msk.bf16.gmra.mxu2 %vm1706_vm0, %v9348_v21 }
 0x4dd   :  { %v3073_v12 = vadd.f32 %v3072_v36, %v2984_v52  ;;  %4062 = vmatmul.bf16.gmra.mxu3 %v11207_v9 }
 0x4df   :  { %v3162_v56 = vadd.f32 %v3161_v34, %v3073_v12  ;;  %v3164_v62 = vpop.f32.mrf.mxu2  ;;  %v11210_v12 = vld [vmem:[#allocation59_spill] sm:$0xff] }
 0x4e0   :  { %v2897_v22 = vpop.f32.mrf.mxu3  ;;  %v2988_v33 = vpop.f32.mrf.mxu0 }
 0x4e1   :  { %v3282_v40 = vmax.f32 %v3162_v56, 0.0  ;;  %v2898_v4 = vadd.f32 %v2897_v22, %v9237_v24  ;;  %v3077_v43 = vpop.f32.mrf.mxu1 }
 0x4e3   :  { %v9489_v46 = vpack.c.bf16 %v3282_v40, %v3278_v15  ;;  %v2987_v61 = vadd.f32 %v2986_v23, %v2898_v4 }
 0x4e5   :  { %11208 = vst [vmem:[#allocation36_spill] sm:$0xff] %v9489_v46  ;;  %v3076_v36 = vadd.f32 %v3075_v59, %v2987_v61 }
 0x4e7   :  { %v3165_v19 = vadd.f32 %v3164_v62, %v3076_v36  ;;  %v3166_v20 = vpop.f32.mrf.mxu2  ;;  %v6565_v36 = vld [vmem:[%s10795_s5 + $0x70] sm:$0xf0] }
 0x4e8   :  { %v2899_v49 = vpop.f32.mrf.mxu3  ;;  %v2991_v17 = vpop.f32.mrf.mxu0 }
 0x4e9   :  { %v2900_v37 = vadd.f32 %v2899_v49, %v9237_v24  ;;  %v3080_v52 = vpop.f32.mrf.mxu1  ;;  %v3286_v22 = vmax.f32 %v3165_v19, 0.0 }
 0x4eb   :  { %v2989_v34 = vadd.f32 %v2988_v33, %v2900_v37  ;;  %4156 = vmatmul.bf16.gmra.mxu0 %v11209_v39 }
 0x4ec   :  { %4245 = vmatmul.bf16.gmra.mxu1 %v9082_v57  ;;  %6919 = vmatmul.msk.bf16.gmra.mxu2 %vm1706_vm0, %v9381_v30 }
 0x4ed   :  { %v3078_v55 = vadd.f32 %v3077_v43, %v2989_v34  ;;  %4067 = vmatmul.bf16.gmra.mxu3 %v11210_v12  ;;  %v7091_v43 = vld [vmem:[%s10795_s5 + $0x64] sm:$0xf] }
 0x4ee   :  { %v6568_v49 = vor.u32 %v7091_v43, %v6565_v36  ;;  %v11213_v43 = vld [vmem:[#allocation60_spill] sm:$0xff] }
 0x4ef   :  { %v3167_v23 = vadd.f32 %v3166_v20, %v3078_v55  ;;  %v3169_v56 = vpop.f32.mrf.mxu2 }
 0x4f0   :  { %v2902_v59 = vpop.f32.mrf.mxu3  ;;  %v2993_v40 = vpop.f32.mrf.mxu0  ;;  %4389 = vmatpush.bf16.msrb.mxu3 %v6568_v49 }
 0x4f1   :  { %v3290_v62 = vmax.f32 %v3167_v23, 0.0  ;;  %v2903_v15 = vadd.f32 %v2902_v59, %v9237_v24  ;;  %v3082_v4 = vpop.f32.mrf.mxu1 }
 0x4f3   :  { %v9498_v33 = vpack.c.bf16 %v3290_v62, %v3286_v22  ;;  %v2992_v61 = vadd.f32 %v2991_v17, %v2903_v15  ;;  %v7123_v17 = vld [vmem:[%s10795_s5 + $0x164] sm:$0xf]  ;;  %v6693_v62 = vld [vmem:[%s10795_s5 + $0x170] sm:$0xf0] }
 0x4f4   :  { %v6696_v15 = vor.u32 %v7123_v17, %v6693_v62 }
 0x4f5   :  { %11211 = vst [vmem:[#allocation34_spill] sm:$0xff] %v9498_v33  ;;  %v3081_v20 = vadd.f32 %v3080_v52, %v2992_v61  ;;  %v7155_v52 = vld [vmem:[%s10795_s5 + $0x264] sm:$0xf] }
 0x4f6   :  { %4478 = vmatpush.bf16.msrb.mxu0 %v6696_v15 }
 0x4f7   :  { %v3170_v19 = vadd.f32 %v3169_v56, %v3081_v20  ;;  %v3171_v34 = vpop.f32.mrf.mxu2  ;;  %v11212_v56 = vld [vmem:[#allocation21_spill] sm:$0xff] }
 0x4f8   :  { %v2904_v37 = vpop.f32.mrf.mxu3  ;;  %v2996_v23 = vpop.f32.mrf.mxu0 }
 0x4f9   :  { %v2905_v55 = vadd.f32 %v2904_v37, %v9237_v24  ;;  %v3085_v59 = vpop.f32.mrf.mxu1 }
 0x4fb   :  { %v2994_v22 = vadd.f32 %v2993_v40, %v2905_v55  ;;  %4161 = vmatmul.bf16.gmra.mxu0 %v11212_v56  ;;  %v6821_v40 = vld [vmem:[%s10795_s5 + $0x270] sm:$0xf0]  ;;  %v3294_v55 = vmax.f32 %v3170_v19, 0.0  ;;  %v9531_v19 = vld [vmem:[%s10796_s6] sm:$0xf] }
 0x4fc   :  { %4250 = vmatmul.bf16.gmra.mxu1 %v9091_v45  ;;  %6920 = vmatmul.msk.bf16.gmra.mxu2 %vm1706_vm0, %v9390_v2  ;;  %v6824_v36 = vor.u32 %v7155_v52, %v6821_v40  ;;  %11215 = vst [vmem:[#allocation42_spill] sm:$0xff] %v9531_v19 }
 0x4fd   :  { %v3083_v61 = vadd.f32 %v3082_v4, %v2994_v22  ;;  %4072 = vmatmul.bf16.gmra.mxu3 %v11213_v43 }
 0x4fe   :  { %4567 = vmatpush.bf16.msrb.mxu1 %v6824_v36 }
 0x4ff   :  { %v3172_v49 = vadd.f32 %v3171_v34, %v3083_v61  ;;  %v3174_v37 = vpop.f32.mrf.mxu2  ;;  %v11216_v61 = vld [vmem:[#allocation40_spill] sm:$0xff] }
 0x500   :  { %v2907_v20 = vpop.f32.mrf.mxu3  ;;  %v2998_v62 = vpop.f32.mrf.mxu0 }
 0x501   :  { %v3298_v56 = vmax.f32 %v3172_v49, 0.0  ;;  %v2908_v17 = vadd.f32 %v2907_v20, %v9237_v24  ;;  %v3087_v45 = vpop.f32.mrf.mxu1 }
 0x503   :  { %v9525_v30 = vpack.c.bf16 %v3298_v56, %v3294_v55  ;;  %v2997_v4 = vadd.f32 %v2996_v23, %v2908_v17  ;;  %v11217_v23 = vld [vmem:[#allocation61_spill] sm:$0xff] }
 0x505   :  { %11214 = vst [vmem:[#allocation37_spill] sm:$0xff] %v9525_v30  ;;  %v3086_v22 = vadd.f32 %v3085_v59, %v2997_v4  ;;  %v7087_v4 = vld [vmem:[%s10795_s5 + $0x44] sm:$0xf] }
 0x507   :  { %v3175_v43 = vadd.f32 %v3174_v37, %v3086_v22  ;;  %v3176_v57 = vpop.f32.mrf.mxu2  ;;  %v6549_v22 = vld [vmem:[%s10795_s5 + $0x50] sm:$0xf0] }
 0x508   :  { %v2909_v12 = vpop.f32.mrf.mxu3  ;;  %v4127_v15 = vpop.f32.mrf.mxu0 }
 0x509   :  { %v2910_v52 = vadd.f32 %v2909_v12, %v9237_v24  ;;  %v4216_v34 = vpop.f32.mrf.mxu1  ;;  %v9539_v24 = vperm.slane %v9531_v19, 0  ;;  %v3302_v49 = vmax.f32 %v3175_v43, 0.0 }
 0x50b   :  { %v2999_v40 = vadd.f32 %v2998_v62, %v2910_v52  ;;  %4166 = vmatmul.bf16.gmra.mxu0 %v11216_v61 }
 0x50c   :  { %4255 = vmatmul.bf16.gmra.mxu1 %v9118_v32  ;;  %6921 = vmatmul.msk.bf16.gmra.mxu2 %vm1706_vm0, %v9417_v25 }
 0x50d   :  { %v3088_v56 = vadd.f32 %v3087_v45, %v2999_v40  ;;  %4077 = vmatmul.bf16.gmra.mxu3 %v11217_v23 }
 0x50f   :  { %v3177_v12 = vadd.f32 %v3176_v57, %v3088_v56  ;;  %v4305_v36 = vpop.f32.mrf.mxu2  ;;  %v6552_v57 = vor.u32 %v7087_v4, %v6549_v22  ;;  %v11221_v22 = vld [vmem:[#allocation7_spill] sm:$0xff] }
 0x510   :  { %v4038_v59 = vpop.f32.mrf.mxu3  ;;  %v4129_v55 = vpop.f32.mrf.mxu0 }
 0x511   :  { %v3306_v20 = vmax.f32 %v3177_v12, 0.0  ;;  %v4039_v37 = vadd.f32 %v4038_v59, %v9539_v24  ;;  %v4218_v17 = vpop.f32.mrf.mxu1  ;;  %4390 = vmatpush.bf16.msrb.mxu3 %v6552_v57 }
 0x513   :  { %v9542_v62 = vpack.c.bf16 %v3306_v20, %v3302_v49  ;;  %v4128_v45 = vadd.f32 %v4127_v15, %v4039_v37  ;;  %v7119_v20 = vld [vmem:[%s10795_s5 + $0x144] sm:$0xf]  ;;  %v6677_v37 = vld [vmem:[%s10795_s5 + $0x150] sm:$0xf0] }
 0x515   :  { %11218 = vst [vmem:[#allocation45_spill] sm:$0xff] %v9542_v62  ;;  %v4217_v52 = vadd.f32 %v4216_v34, %v4128_v45  ;;  %v7151_v34 = vld [vmem:[%s10795_s5 + $0x244] sm:$0xf]  ;;  %v6680_v45 = vor.u32 %v7119_v20, %v6677_v37 }
 0x517   :  { %v9550_v43 = vadd.f32 %v4305_v36, %v4217_v52  ;;  %v4307_v56 = vpop.f32.mrf.mxu2  ;;  %v11220_v36 = vld [vmem:[#allocation41_spill] sm:$0xff]  ;;  %4479 = vmatpush.bf16.msrb.mxu0 %v6680_v45 }
 0x518   :  { %v4040_v40 = vpop.f32.mrf.mxu3  ;;  %v4132_v59 = vpop.f32.mrf.mxu0 }
 0x519   :  { %11219 = vst [vmem:[#allocation46_spill] sm:$0xff] %v9550_v43  ;;  %v4041_v12 = vadd.f32 %v4040_v40, %v9539_v24  ;;  %v4221_v49 = vpop.f32.mrf.mxu1 }
 0x51b   :  { %v4130_v15 = vadd.f32 %v4129_v55, %v4041_v12  ;;  %4171 = vmatmul.bf16.gmra.mxu0 %v11220_v36  ;;  %v6805_v55 = vld [vmem:[%s10795_s5 + $0x250] sm:$0xf0] }
 0x51c   :  { %4260 = vmatmul.bf16.gmra.mxu1 %v9127_v50  ;;  %6922 = vmatmul.msk.bf16.gmra.mxu2 %vm1706_vm0, %v9426_v10  ;;  %v6808_v57 = vor.u32 %v7151_v34, %v6805_v55 }
 0x51d   :  { %v4219_v4 = vadd.f32 %v4218_v17, %v4130_v15  ;;  %4082 = vmatmul.bf16.gmra.mxu3 %v11221_v22 }
 0x51e   :  { %4568 = vmatpush.bf16.msrb.mxu1 %v6808_v57 }
 0x51f   :  { %v9570_v52 = vadd.f32 %v4307_v56, %v4219_v4  ;;  %v4310_v12 = vpop.f32.mrf.mxu2  ;;  %v11222_v56 = vld [vmem:[#allocation39_spill] sm:$0xff]  ;;  %v11223_v4 = vld [vmem:[#allocation8_spill] sm:$0xff] }
 0x520   :  { %v4043_v40 = vpop.f32.mrf.mxu3  ;;  %v4134_v20 = vpop.f32.mrf.mxu0 }
 0x521   :  { %v4044_v50 = vadd.f32 %v4043_v40, %v9539_v24  ;;  %v4223_v37 = vpop.f32.mrf.mxu1 }
 0x523   :  { %v4133_v36 = vadd.f32 %v4132_v59, %v4044_v50 }
 0x525   :  { %v4222_v43 = vadd.f32 %v4221_v49, %v4133_v36 }
 0x527   :  { %v9573_v19 = vadd.f32 %v4310_v12, %v4222_v43  ;;  %v4312_v15 = vpop.f32.mrf.mxu2  ;;  %v6533_v12 = vld [vmem:[%s10795_s5 + $0x30] sm:$0xf0] }
 0x528   :  { %v4045_v17 = vpop.f32.mrf.mxu3  ;;  %v4137_v10 = vpop.f32.mrf.mxu0 }
 0x529   :  { %v4046_v22 = vadd.f32 %v4045_v17, %v9539_v24  ;;  %v4226_v34 = vpop.f32.mrf.mxu1 }
 0x52b   :  { %v4135_v45 = vadd.f32 %v4134_v20, %v4046_v22  ;;  %4176 = vmatmul.bf16.gmra.mxu0 %v11222_v56  ;;  %v7083_v22 = vld [vmem:[%s10795_s5 + $0x24] sm:$0xf] }
 0x52c   :  { %4265 = vmatmul.bf16.gmra.mxu1 %v9154_v44  ;;  %6923 = vmatmul.msk.bf16.gmra.mxu2 %vm1706_vm0, %v9453_v29  ;;  %v6536_v20 = vor.u32 %v7083_v22, %v6533_v12  ;;  %v6661_v29 = vld [vmem:[%s10795_s5 + $0x130] sm:$0xf0]  ;;  %v11227_v12 = vld [vmem:[#allocation6_spill] sm:$0xff] }
 0x52d   :  { %v4224_v55 = vadd.f32 %v4223_v37, %v4135_v45  ;;  %4087 = vmatmul.bf16.gmra.mxu3 %v11223_v4 }
 0x52e   :  { %4391 = vmatpush.bf16.msrb.mxu3 %v6536_v20 }
 0x52f   :  { %v9581_v50 = vadd.f32 %v4312_v15, %v4224_v55  ;;  %v4315_v59 = vpop.f32.mrf.mxu2 }
 0x530   :  { %v4048_v43 = vpop.f32.mrf.mxu3  ;;  %v4139_v36 = vpop.f32.mrf.mxu0 }
 0x531   :  { %11224 = vst [vmem:[#allocation44_spill] sm:$0xff] %v9581_v50  ;;  %v4049_v49 = vadd.f32 %v4048_v43, %v9539_v24  ;;  %v4228_v57 = vpop.f32.mrf.mxu1 }
 0x533   :  { %v4138_v40 = vadd.f32 %v4137_v10, %v4049_v49  ;;  %v7115_v49 = vld [vmem:[%s10795_s5 + $0x124] sm:$0xf] }
 0x535   :  { %v4227_v37 = vadd.f32 %v4226_v34, %v4138_v40  ;;  %v7147_v34 = vld [vmem:[%s10795_s5 + $0x224] sm:$0xf]  ;;  %v6664_v40 = vor.u32 %v7115_v49, %v6661_v29 }
 0x537   :  { %v9590_v17 = vadd.f32 %v4315_v59, %v4227_v37  ;;  %v4317_v45 = vpop.f32.mrf.mxu2  ;;  %v11226_v59 = vld [vmem:[#allocation50_spill] sm:$0xff]  ;;  %4480 = vmatpush.bf16.msrb.mxu0 %v6664_v40 }
 0x538   :  { %v4050_v15 = vpop.f32.mrf.mxu3  ;;  %v4142_v43 = vpop.f32.mrf.mxu0 }
 0x539   :  { %11225 = vst [vmem:[#allocation47_spill] sm:$0xff] %v9590_v17  ;;  %v4051_v55 = vadd.f32 %v4050_v15, %v9539_v24  ;;  %v4231_v50 = vpop.f32.mrf.mxu1 }
 0x53b   :  { %v4140_v10 = vadd.f32 %v4139_v36, %v4051_v55  ;;  %4181 = vmatmul.bf16.gmra.mxu0 %v11226_v59  ;;  %v6789_v36 = vld [vmem:[%s10795_s5 + $0x230] sm:$0xf0] }
 0x53c   :  { %4270 = vmatmul.bf16.gmra.mxu1 %v9163_v38  ;;  %6924 = vmatmul.msk.bf16.gmra.mxu2 %vm1706_vm0, %v9462_v60  ;;  %v6792_v20 = vor.u32 %v7147_v34, %v6789_v36 }
 0x53d   :  { %v4229_v22 = vadd.f32 %v4228_v57, %v4140_v10  ;;  %4092 = vmatmul.bf16.gmra.mxu3 %v11227_v12 }
 0x53e   :  { %4569 = vmatpush.bf16.msrb.mxu1 %v6792_v20 }
 0x53f   :  { %v9610_v37 = vadd.f32 %v4317_v45, %v4229_v22  ;;  %v4320_v55 = vpop.f32.mrf.mxu2  ;;  %v11228_v45 = vld [vmem:[#allocation51_spill] sm:$0xff]  ;;  %v11229_v22 = vld [vmem:[#allocation9_spill] sm:$0xff] }
 0x540   :  { %v4053_v15 = vpop.f32.mrf.mxu3  ;;  %v4144_v29 = vpop.f32.mrf.mxu0 }
 0x541   :  { %v4054_v38 = vadd.f32 %v4053_v15, %v9539_v24  ;;  %v4233_v49 = vpop.f32.mrf.mxu1 }
 0x543   :  { %v4143_v59 = vadd.f32 %v4142_v43, %v4054_v38 }
 0x545   :  { %v4232_v17 = vadd.f32 %v4231_v50, %v4143_v59 }
 0x547   :  { %v9613_v4 = vadd.f32 %v4320_v55, %v4232_v17  ;;  %v4322_v10 = vpop.f32.mrf.mxu2  ;;  %v6517_v55 = vld [vmem:[%s10795_s5 + $0x10] sm:$0xf0] }
 0x548   :  { %v4055_v57 = vpop.f32.mrf.mxu3  ;;  %v4147_v60 = vpop.f32.mrf.mxu0 }
 0x549   :  { %v4056_v12 = vadd.f32 %v4055_v57, %v9539_v24  ;;  %v4236_v34 = vpop.f32.mrf.mxu1 }
 0x54b   :  { %v4145_v40 = vadd.f32 %v4144_v29, %v4056_v12  ;;  %4186 = vmatmul.bf16.gmra.mxu0 %v11228_v45  ;;  %v7079_v12 = vld [vmem:[%s10795_s5 + $0x4] sm:$0xf] }
 0x54c   :  { %4275 = vmatmul.bf16.gmra.mxu1 %v9190_v26  ;;  %6925 = vmatmul.msk.bf16.gmra.mxu2 %vm1706_vm0, %v9489_v46  ;;  %v6520_v29 = vor.u32 %v7079_v12, %v6517_v55  ;;  %v6645_v46 = vld [vmem:[%s10795_s5 + $0x110] sm:$0xf0]  ;;  %v11233_v55 = vld [vmem:[#allocation11_spill] sm:$0xff] }
 0x54d   :  { %v4234_v36 = vadd.f32 %v4233_v49, %v4145_v40  ;;  %4097 = vmatmul.bf16.gmra.mxu3 %v11229_v22 }
 0x54e   :  { %4392 = vmatpush.bf16.msrb.mxu3 %v6520_v29 }
 0x54f   :  { %v9621_v38 = vadd.f32 %v4322_v10, %v4234_v36  ;;  %v4325_v17 = vpop.f32.mrf.mxu2 }
 0x550   :  { %v4058_v50 = vpop.f32.mrf.mxu3  ;;  %v4149_v59 = vpop.f32.mrf.mxu0 }
 0x551   :  { %11230 = vst [vmem:[#allocation55_spill] sm:$0xff] %v9621_v38  ;;  %v4059_v43 = vadd.f32 %v4058_v50, %v9539_v24  ;;  %v4238_v20 = vpop.f32.mrf.mxu1 }
 0x553   :  { %v4148_v15 = vadd.f32 %v4147_v60, %v4059_v43  ;;  %v7111_v43 = vld [vmem:[%s10795_s5 + $0x104] sm:$0xf] }
 0x555   :  { %v4237_v49 = vadd.f32 %v4236_v34, %v4148_v15  ;;  %v7143_v34 = vld [vmem:[%s10795_s5 + $0x204] sm:$0xf]  ;;  %v6648_v15 = vor.u32 %v7111_v43, %v6645_v46 }
 0x557   :  { %v9630_v57 = vadd.f32 %v4325_v17, %v4237_v49  ;;  %v4327_v40 = vpop.f32.mrf.mxu2  ;;  %v11232_v17 = vld [vmem:[#allocation49_spill] sm:$0xff]  ;;  %4481 = vmatpush.bf16.msrb.mxu0 %v6648_v15 }
 0x558   :  { %v4060_v10 = vpop.f32.mrf.mxu3  ;;  %v4152_v50 = vpop.f32.mrf.mxu0 }
 0x559   :  { %11231 = vst [vmem:[#allocation54_spill] sm:$0xff] %v9630_v57  ;;  %v4061_v36 = vadd.f32 %v4060_v10, %v9539_v24  ;;  %v4241_v38 = vpop.f32.mrf.mxu1 }
 0x55b   :  { %v4150_v60 = vadd.f32 %v4149_v59, %v4061_v36  ;;  %4191 = vmatmul.bf16.gmra.mxu0 %v11232_v17  ;;  %v6773_v59 = vld [vmem:[%s10795_s5 + $0x210] sm:$0xf0] }
 0x55c   :  { %4280 = vmatmul.bf16.gmra.mxu1 %v9199_v27  ;;  %6926 = vmatmul.msk.bf16.gmra.mxu2 %vm1706_vm0, %v9498_v33  ;;  %v6776_v29 = vor.u32 %v7143_v34, %v6773_v59 }
 0x55d   :  { %v4239_v12 = vadd.f32 %v4238_v20, %v4150_v60  ;;  %4102 = vmatmul.bf16.gmra.mxu3 %v11233_v55 }
 0x55e   :  { %4570 = vmatpush.bf16.msrb.mxu1 %v6776_v29 }
 0x55f   :  { %v9650_v49 = vadd.f32 %v4327_v40, %v4239_v12  ;;  %v4330_v36 = vpop.f32.mrf.mxu2  ;;  %v11234_v40 = vld [vmem:[#allocation52_spill] sm:$0xff] }
 0x560   :  { %v4063_v10 = vpop.f32.mrf.mxu3  ;;  %v4154_v46 = vpop.f32.mrf.mxu0  ;;  %v11235_v12 = vld [vmem:[#allocation12_spill] sm:$0xff] }
 0x561   :  { %v4064_v27 = vadd.f32 %v4063_v10, %v9539_v24  ;;  %v4243_v43 = vpop.f32.mrf.mxu1 }
 0x563   :  { %v4153_v17 = vadd.f32 %v4152_v50, %v4064_v27 }
 0x565   :  { %v4242_v57 = vadd.f32 %v4241_v38, %v4153_v17 }
 0x567   :  { %v9653_v22 = vadd.f32 %v4330_v36, %v4242_v57  ;;  %v4332_v60 = vpop.f32.mrf.mxu2  ;;  %v7110_v36 = vld [vmem:[%s10795_s5 + $0xf4] sm:$0xf0] }
 0x568   :  { %v4065_v20 = vpop.f32.mrf.mxu3  ;;  %v4157_v33 = vpop.f32.mrf.mxu0 }
 0x569   :  { %v4066_v55 = vadd.f32 %v4065_v20, %v9539_v24  ;;  %v4246_v34 = vpop.f32.mrf.mxu1 }
 0x56b   :  { %v4155_v15 = vadd.f32 %v4154_v46, %v4066_v55  ;;  %4196 = vmatmul.bf16.gmra.mxu0 %v11234_v40  ;;  %v6635_v55 = vld [vmem:[%s10795_s5 + $0xe8] sm:$0xf] }
 0x56c   :  { %4285 = vmatmul.bf16.gmra.mxu1 %v9226_v16  ;;  %6927 = vmatmul.msk.bf16.gmra.mxu2 %vm1706_vm0, %v9525_v30  ;;  %v6636_v46 = vor.u32 %v7110_v36, %v6635_v55  ;;  %v7178_v30 = vld [vmem:[%s10795_s5 + $0x314] sm:$0xf0]  ;;  %v6891_v55 = vld [vmem:[%s10795_s5 + $0x2e8] sm:$0xf] }
 0x56d   :  { %v4244_v59 = vadd.f32 %v4243_v43, %v4155_v15  ;;  %4107 = vmatmul.bf16.gmra.mxu3 %v11235_v12  ;;  %v7174_v36 = vld [vmem:[%s10795_s5 + $0x2f4] sm:$0xf0] }
 0x56e   :  { %4741 = vmatpush.bf16.msra.mxu3 %v6636_v46 }
 0x56f   :  { %v9661_v27 = vadd.f32 %v4332_v60, %v4244_v59  ;;  %v4335_v57 = vpop.f32.mrf.mxu2 }
 0x570   :  { %v4068_v38 = vpop.f32.mrf.mxu3  ;;  %v4159_v17 = vpop.f32.mrf.mxu0 }
 0x571   :  { %11236 = vst [vmem:[#allocation56_spill] sm:$0xff] %v9661_v27  ;;  %v4069_v50 = vadd.f32 %v4068_v38, %v9539_v24  ;;  %v4248_v29 = vpop.f32.mrf.mxu1 }
 0x573   :  { %v4158_v10 = vadd.f32 %v4157_v33, %v4069_v50  ;;  %v6907_v50 = vld [vmem:[%s10795_s5 + $0x308] sm:$0xf] }
 0x575   :  { %v4247_v43 = vadd.f32 %v4246_v34, %v4158_v10  ;;  %v6763_v34 = vld [vmem:[%s10795_s5 + $0x1e8] sm:$0xf]  ;;  %v6908_v10 = vor.u32 %v7178_v30, %v6907_v50  ;;  %v6892_v30 = vor.u32 %v7174_v36, %v6891_v55 }
 0x577   :  { %v9670_v20 = vadd.f32 %v4335_v57, %v4247_v43  ;;  %v4337_v15 = vpop.f32.mrf.mxu2  ;;  %v11238_v57 = vld [vmem:[#allocation31_spill] sm:$0xff]  ;;  %v11239_v43 = vld [vmem:[#allocation13_spill] sm:$0xff]  ;;  %5015 = vmatpush.bf16.msra.mxu2 %v6908_v10  ;;  %4919 = vmatpush.bf16.msra.mxu1 %v6892_v30 }
 0x578   :  { %v4070_v60 = vpop.f32.mrf.mxu3  ;;  %v4162_v38 = vpop.f32.mrf.mxu0 }
 0x579   :  { %11237 = vst [vmem:[#allocation15_spill] sm:$0xff] %v9670_v20  ;;  %v4071_v59 = vadd.f32 %v4070_v60, %v9539_v24  ;;  %v4251_v27 = vpop.f32.mrf.mxu1 }
 0x57b   :  { %v4160_v33 = vadd.f32 %v4159_v17, %v4071_v59  ;;  %4201 = vmatmul.bf16.gmra.mxu0 %v11238_v57  ;;  %v7142_v17 = vld [vmem:[%s10795_s5 + $0x1f4] sm:$0xf0] }
 0x57c   :  { %4290 = vmatmul.bf16.gmra.mxu1 %v9240_v0  ;;  %6928 = vmatmul.msk.bf16.gmra.mxu2 %vm1706_vm0, %v9542_v62  ;;  %v6764_v60 = vor.u32 %v7142_v17, %v6763_v34 }
 0x57d   :  { %v4249_v46 = vadd.f32 %v4248_v29, %v4160_v33  ;;  %4112 = vmatmul.bf16.gmra.mxu3 %v11239_v43 }
 0x57e   :  { %4830 = vmatpush.bf16.msra.mxu0 %v6764_v60 }
 0x57f   :  { %v9696_v59 = vadd.f32 %v4337_v15, %v4249_v46  ;;  %v4340_v0 = vpop.f32.mrf.mxu2 }
 0x580   :  { %v4073_v50 = vpop.f32.mrf.mxu3  ;;  %v4164_v20 = vpop.f32.mrf.mxu0 }
 0x581   :  { %v4074_v57 = vadd.f32 %v4073_v50, %v9539_v24  ;;  %v4253_v12 = vpop.f32.mrf.mxu1 }
 0x583   :  { %v4163_v16 = vadd.f32 %v4162_v38, %v4074_v57 }
 0x585   :  { %v4252_v29 = vadd.f32 %v4251_v27, %v4163_v16 }
 0x587   :  { %v9699_v33 = vadd.f32 %v4340_v0, %v4252_v29  ;;  %v4342_v40 = vpop.f32.mrf.mxu2 }
 0x588   :  { %v4075_v43 = vpop.f32.mrf.mxu3  ;;  %v4167_v17 = vpop.f32.mrf.mxu0 }
 0x589   :  { %v4076_v34 = vadd.f32 %v4075_v43, %v9539_v24  ;;  %v4256_v10 = vpop.f32.mrf.mxu1 }
 0x58b   :  { %v4165_v15 = vadd.f32 %v4164_v20, %v4076_v34  ;;  %4482 = vmatmul.bf16.vlgmr.msrb.gmra.mxu0 %v11185_v28  ;;  %v6619_v20 = vld [vmem:[%s10795_s5 + $0xc8] sm:$0xf] }
 0x58c   :  { %4571 = vmatmul.bf16.vlgmr.msrb.gmra.mxu1 %v11186_v58  ;;  %6929 = vmatmul.msk.bf16.vlgmr.msrb.gmra.mxu2 %vm1706_vm0, %v9267_v5 }
 0x58d   :  { %v4254_v55 = vadd.f32 %v4253_v12, %v4165_v15  ;;  %4393 = vmatmul.bf16.vlgmr.msrb.gmra.mxu3 %v11187_v54  ;;  %v7106_v12 = vld [vmem:[%s10795_s5 + $0xd4] sm:$0xf0] }
 0x58e   :  { %v6620_v43 = vor.u32 %v7106_v12, %v6619_v20 }
 0x58f   :  { %v9707_v16 = vadd.f32 %v4342_v40, %v4254_v55  ;;  %v4345_v27 = vpop.f32.mrf.mxu2  ;;  %v6747_v55 = vld [vmem:[%s10795_s5 + $0x1c8] sm:$0xf] }
 0x590   :  { %v4078_v0 = vpop.f32.mrf.mxu3  ;;  %v4169_v57 = vpop.f32.mrf.mxu0  ;;  %4742 = vmatpush.bf16.msra.mxu3 %v6620_v43 }
 0x591   :  { %v4079_v38 = vadd.f32 %v4078_v0, %v9539_v24  ;;  %v4258_v36 = vpop.f32.mrf.mxu1  ;;  %v7138_v0 = vld [vmem:[%s10795_s5 + $0x1d4] sm:$0xf0] }
 0x593   :  { %v4168_v46 = vadd.f32 %v4167_v17, %v4079_v38  ;;  %v7170_v38 = vld [vmem:[%s10795_s5 + $0x2d4] sm:$0xf0] }
 0x595   :  { %v4257_v60 = vadd.f32 %v4256_v10, %v4168_v46  ;;  %v6875_v10 = vld [vmem:[%s10795_s5 + $0x2c8] sm:$0xf] }
 0x596   :  { %v6876_v46 = vor.u32 %v7170_v38, %v6875_v10 }
 0x597   :  { %v9716_v40 = vadd.f32 %v4345_v27, %v4257_v60  ;;  %v4347_v50 = vpop.f32.mrf.mxu2  ;;  %v6748_v27 = vor.u32 %v7138_v0, %v6747_v55 }
 0x598   :  { %v4080_v30 = vpop.f32.mrf.mxu3  ;;  %v4172_v34 = vpop.f32.mrf.mxu0  ;;  %4920 = vmatpush.bf16.msra.mxu1 %v6876_v46 }
 0x599   :  { %v4081_v29 = vadd.f32 %v4080_v30, %v9539_v24  ;;  %v4261_v15 = vpop.f32.mrf.mxu1  ;;  %4831 = vmatpush.bf16.msra.mxu0 %v6748_v27 }
 0x59b   :  { %v4170_v17 = vadd.f32 %v4169_v57, %v4081_v29  ;;  %4487 = vmatmul.bf16.gmra.mxu0 %v11189_v1 }
 0x59c   :  { %4576 = vmatmul.bf16.gmra.mxu1 %v11190_v13  ;;  %6930 = vmatmul.msk.bf16.gmra.mxu2 %vm1706_vm0, %v9276_v48 }
 0x59d   :  { %v4259_v57 = vadd.f32 %v4258_v36, %v4170_v17  ;;  %4398 = vmatmul.bf16.gmra.mxu3 %v11191_v6 }
 0x59f   :  { %v9736_v20 = vadd.f32 %v4347_v50, %v4259_v57  ;;  %v4350_v43 = vpop.f32.mrf.mxu2 }
 0x5a0   :  { %v4083_v12 = vpop.f32.mrf.mxu3  ;;  %v4174_v30 = vpop.f32.mrf.mxu0 }
 0x5a1   :  { %v4084_v60 = vadd.f32 %v4083_v12, %v9539_v24  ;;  %v4263_v29 = vpop.f32.mrf.mxu1 }
 0x5a3   :  { %v4173_v55 = vadd.f32 %v4172_v34, %v4084_v60  ;;  %v7102_v60 = vld [vmem:[%s10795_s5 + $0xb4] sm:$0xf0] }
 0x5a5   :  { %v4262_v0 = vadd.f32 %v4261_v15, %v4173_v55 }
 0x5a7   :  { %v9739_v13 = vadd.f32 %v4350_v43, %v4262_v0  ;;  %v4352_v17 = vpop.f32.mrf.mxu2 }
 0x5a8   :  { %v4085_v36 = vpop.f32.mrf.mxu3  ;;  %v4177_v48 = vpop.f32.mrf.mxu0 }
 0x5a9   :  { %v4086_v6 = vadd.f32 %v4085_v36, %v9539_v24  ;;  %v4266_v10 = vpop.f32.mrf.mxu1 }
 0x5ab   :  { %v4175_v27 = vadd.f32 %v4174_v30, %v4086_v6  ;;  %4492 = vmatmul.bf16.gmra.mxu0 %v11193_v63  ;;  %v6603_v6 = vld [vmem:[%s10795_s5 + $0xa8] sm:$0xf] }
 0x5ac   :  { %4581 = vmatmul.bf16.gmra.mxu1 %v11194_v42  ;;  %6931 = vmatmul.msk.bf16.gmra.mxu2 %vm1706_vm0, %v9303_v18  ;;  %v6604_v30 = vor.u32 %v7102_v60, %v6603_v6 }
 0x5ad   :  { %v4264_v50 = vadd.f32 %v4263_v29, %v4175_v27  ;;  %4403 = vmatmul.bf16.gmra.mxu3 %v11195_v53 }
 0x5ae   :  { %4743 = vmatpush.bf16.msra.mxu3 %v6604_v30 }
 0x5af   :  { %v9747_v34 = vadd.f32 %v4352_v17, %v4264_v50  ;;  %v4355_v38 = vpop.f32.mrf.mxu2 }
 0x5b0   :  { %v4088_v15 = vpop.f32.mrf.mxu3  ;;  %v4179_v46 = vpop.f32.mrf.mxu0 }
 0x5b1   :  { %v4089_v57 = vadd.f32 %v4088_v15, %v9539_v24  ;;  %v4268_v12 = vpop.f32.mrf.mxu1  ;;  %v6731_v15 = vld [vmem:[%s10795_s5 + $0x1a8] sm:$0xf] }
 0x5b3   :  { %v4178_v43 = vadd.f32 %v4177_v48, %v4089_v57  ;;  %v7134_v57 = vld [vmem:[%s10795_s5 + $0x1b4] sm:$0xf0] }
 0x5b5   :  { %v4267_v29 = vadd.f32 %v4266_v10, %v4178_v43  ;;  %v6859_v10 = vld [vmem:[%s10795_s5 + $0x2a8] sm:$0xf] }
 0x5b7   :  { %v9756_v55 = vadd.f32 %v4355_v38, %v4267_v29  ;;  %v4357_v36 = vpop.f32.mrf.mxu2  ;;  %v6732_v38 = vor.u32 %v7134_v57, %v6731_v15 }
 0x5b8   :  { %v4090_v0 = vpop.f32.mrf.mxu3  ;;  %v4182_v27 = vpop.f32.mrf.mxu0 }
 0x5b9   :  { %v4091_v17 = vadd.f32 %v4090_v0, %v9539_v24  ;;  %v4271_v50 = vpop.f32.mrf.mxu1  ;;  %4832 = vmatpush.bf16.msra.mxu0 %v6732_v38 }
 0x5bb   :  { %v4180_v48 = vadd.f32 %v4179_v46, %v4091_v17  ;;  %4497 = vmatmul.bf16.gmra.mxu0 %v11197_v47  ;;  %v7166_v46 = vld [vmem:[%s10795_s5 + $0x2b4] sm:$0xf0] }
 0x5bc   :  { %4586 = vmatmul.bf16.gmra.mxu1 %v11198_v11  ;;  %6932 = vmatmul.msk.bf16.gmra.mxu2 %vm1706_vm0, %v9312_v8  ;;  %v6860_v6 = vor.u32 %v7166_v46, %v6859_v10 }
 0x5bd   :  { %v4269_v43 = vadd.f32 %v4268_v12, %v4180_v48  ;;  %4408 = vmatmul.bf16.gmra.mxu3 %v11199_v41 }
 0x5be   :  { %4921 = vmatpush.bf16.msra.mxu1 %v6860_v6 }
 0x5bf   :  { %v9776_v60 = vadd.f32 %v4357_v36, %v4269_v43  ;;  %v4360_v29 = vpop.f32.mrf.mxu2 }
 0x5c0   :  { %v4093_v30 = vpop.f32.mrf.mxu3  ;;  %v4184_v17 = vpop.f32.mrf.mxu0 }
 0x5c1   :  { %v4094_v0 = vadd.f32 %v4093_v30, %v9539_v24  ;;  %v4273_v15 = vpop.f32.mrf.mxu1 }
 0x5c3   :  { %v4183_v57 = vadd.f32 %v4182_v27, %v4094_v0 }
 0x5c5   :  { %v4272_v11 = vadd.f32 %v4271_v50, %v4183_v57 }
 0x5c7   :  { %v9779_v47 = vadd.f32 %v4360_v29, %v4272_v11  ;;  %v4362_v48 = vpop.f32.mrf.mxu2  ;;  %v7098_v29 = vld [vmem:[%s10795_s5 + $0x94] sm:$0xf0] }
 0x5c8   :  { %v4095_v12 = vpop.f32.mrf.mxu3  ;;  %v4187_v8 = vpop.f32.mrf.mxu0 }
 0x5c9   :  { %v4096_v41 = vadd.f32 %v4095_v12, %v9539_v24  ;;  %v4276_v10 = vpop.f32.mrf.mxu1 }
 0x5cb   :  { %v4185_v38 = vadd.f32 %v4184_v17, %v4096_v41  ;;  %4502 = vmatmul.bf16.gmra.mxu0 %v11201_v51  ;;  %v6587_v41 = vld [vmem:[%s10795_s5 + $0x88] sm:$0xf] }
 0x5cc   :  { %4591 = vmatmul.bf16.gmra.mxu1 %v11202_v35  ;;  %6933 = vmatmul.msk.bf16.gmra.mxu2 %vm1706_vm0, %v9339_v3  ;;  %v6588_v0 = vor.u32 %v7098_v29, %v6587_v41 }
 0x5cd   :  { %v4274_v36 = vadd.f32 %v4273_v15, %v4185_v38  ;;  %4413 = vmatmul.bf16.gmra.mxu3 %v11203_v7 }
 0x5ce   :  { %4744 = vmatpush.bf16.msra.mxu3 %v6588_v0 }
 0x5cf   :  { %v9787_v27 = vadd.f32 %v4362_v48, %v4274_v36  ;;  %v4365_v50 = vpop.f32.mrf.mxu2 }
 0x5d0   :  { %v4098_v11 = vpop.f32.mrf.mxu3  ;;  %v4189_v43 = vpop.f32.mrf.mxu0 }
 0x5d1   :  { %v4099_v46 = vadd.f32 %v4098_v11, %v9539_v24  ;;  %v4278_v6 = vpop.f32.mrf.mxu1  ;;  %v6715_v11 = vld [vmem:[%s10795_s5 + $0x188] sm:$0xf] }
 0x5d3   :  { %v4188_v30 = vadd.f32 %v4187_v8, %v4099_v46  ;;  %v7130_v46 = vld [vmem:[%s10795_s5 + $0x194] sm:$0xf0] }
 0x5d5   :  { %v4277_v17 = vadd.f32 %v4276_v10, %v4188_v30  ;;  %v6843_v10 = vld [vmem:[%s10795_s5 + $0x288] sm:$0xf] }
 0x5d7   :  { %v9796_v15 = vadd.f32 %v4365_v50, %v4277_v17  ;;  %v4367_v12 = vpop.f32.mrf.mxu2  ;;  %v6716_v50 = vor.u32 %v7130_v46, %v6715_v11 }
 0x5d8   :  { %v4100_v57 = vpop.f32.mrf.mxu3  ;;  %v4192_v38 = vpop.f32.mrf.mxu0 }
 0x5d9   :  { %v4101_v48 = vadd.f32 %v4100_v57, %v9539_v24  ;;  %v4281_v36 = vpop.f32.mrf.mxu1  ;;  %4833 = vmatpush.bf16.msra.mxu0 %v6716_v50 }
 0x5db   :  { %v4190_v8 = vadd.f32 %v4189_v43, %v4101_v48  ;;  %4507 = vmatmul.bf16.gmra.mxu0 %v11205_v31  ;;  %v7162_v43 = vld [vmem:[%s10795_s5 + $0x294] sm:$0xf0] }
 0x5dc   :  { %4596 = vmatmul.bf16.gmra.mxu1 %v11206_v14  ;;  %6934 = vmatmul.msk.bf16.gmra.mxu2 %vm1706_vm0, %v9348_v21  ;;  %v6844_v41 = vor.u32 %v7162_v43, %v6843_v10 }
 0x5dd   :  { %v4279_v30 = vadd.f32 %v4278_v6, %v4190_v8  ;;  %4418 = vmatmul.bf16.gmra.mxu3 %v11207_v9 }
 0x5de   :  { %4922 = vmatpush.bf16.msra.mxu1 %v6844_v41  ;;  %v11242_v41 = vld [vmem:[#allocation26_spill] sm:$0xff] }
 0x5df   :  { %v9816_v29 = vadd.f32 %v4367_v12, %v4279_v30  ;;  %v4370_v17 = vpop.f32.mrf.mxu2  ;;  %v11240_v12 = vld [vmem:[#allocation67_spill] sm:$0xff] }
 0x5e0   :  { %v4103_v0 = vpop.f32.mrf.mxu3  ;;  %v4194_v48 = vpop.f32.mrf.mxu0  ;;  %v11241_v30 = vld [vmem:[#allocation59_spill] sm:$0xff] }
 0x5e1   :  { %v4104_v57 = vadd.f32 %v4103_v0, %v9539_v24  ;;  %v4283_v11 = vpop.f32.mrf.mxu1 }
 0x5e3   :  { %v4193_v46 = vadd.f32 %v4192_v38, %v4104_v57 }
 0x5e5   :  { %v4282_v14 = vadd.f32 %v4281_v36, %v4193_v46 }
 0x5e7   :  { %v9819_v31 = vadd.f32 %v4370_v17, %v4282_v14  ;;  %v4372_v8 = vpop.f32.mrf.mxu2 }
 0x5e8   :  { %v4105_v6 = vpop.f32.mrf.mxu3  ;;  %v4197_v21 = vpop.f32.mrf.mxu0 }
 0x5e9   :  { %v4106_v9 = vadd.f32 %v4105_v6, %v9539_v24  ;;  %v4286_v10 = vpop.f32.mrf.mxu1 }
 0x5eb   :  { %v4195_v50 = vadd.f32 %v4194_v48, %v4106_v9  ;;  %4512 = vmatmul.bf16.gmra.mxu0 %v11209_v39  ;;  %v6571_v9 = vld [vmem:[%s10795_s5 + $0x68] sm:$0xf]  ;;  %v7094_v48 = vld [vmem:[%s10795_s5 + $0x74] sm:$0xf0] }
 0x5ec   :  { %4601 = vmatmul.bf16.gmra.mxu1 %v11240_v12  ;;  %6935 = vmatmul.msk.bf16.gmra.mxu2 %vm1706_vm0, %v11242_v41  ;;  %v11247_v39 = vld [vmem:[#allocation60_spill] sm:$0xff] }
 0x5ed   :  { %v4284_v43 = vadd.f32 %v4283_v11, %v4195_v50  ;;  %4423 = vmatmul.bf16.gmra.mxu3 %v11241_v30  ;;  %v6572_v11 = vor.u32 %v7094_v48, %v6571_v9  ;;  %v11246_v30 = vld [vmem:[#allocation68_spill] sm:$0xff] }
 0x5ef   :  { %v9827_v38 = vadd.f32 %v4372_v8, %v4284_v43  ;;  %v4375_v36 = vpop.f32.mrf.mxu2  ;;  %4745 = vmatpush.bf16.msra.mxu3 %v6572_v11 }
 0x5f0   :  { %v4108_v14 = vpop.f32.mrf.mxu3  ;;  %v4199_v17 = vpop.f32.mrf.mxu0 }
 0x5f1   :  { %11243 = vst [vmem:[#allocation10_spill] sm:$0xff] %v9827_v38  ;;  %v4109_v0 = vadd.f32 %v4108_v14, %v9539_v24  ;;  %v4288_v57 = vpop.f32.mrf.mxu1 }
 0x5f3   :  { %v4198_v46 = vadd.f32 %v4197_v21, %v4109_v0  ;;  %v11245_v0 = vld [vmem:[#allocation21_spill] sm:$0xff] }
 0x5f5   :  { %v4287_v6 = vadd.f32 %v4286_v10, %v4198_v46  ;;  %v6699_v10 = vld [vmem:[%s10795_s5 + $0x168] sm:$0xf] }
 0x5f7   :  { %v9836_v8 = vadd.f32 %v4375_v36, %v4287_v6  ;;  %v4377_v43 = vpop.f32.mrf.mxu2  ;;  %v7126_v36 = vld [vmem:[%s10795_s5 + $0x174] sm:$0xf0] }
 0x5f8   :  { %v4110_v50 = vpop.f32.mrf.mxu3  ;;  %v4202_v38 = vpop.f32.mrf.mxu0  ;;  %v6700_v46 = vor.u32 %v7126_v36, %v6699_v10 }
 0x5f9   :  { %11244 = vst [vmem:[#allocation38_spill] sm:$0xff] %v9836_v8  ;;  %v4111_v14 = vadd.f32 %v4110_v50, %v9539_v24  ;;  %v4291_v41 = vpop.f32.mrf.mxu1 }
 0x5fa   :  { %4834 = vmatpush.bf16.msra.mxu0 %v6700_v46 }
 0x5fb   :  { %v4200_v21 = vadd.f32 %v4199_v17, %v4111_v14  ;;  %4517 = vmatmul.bf16.gmra.mxu0 %v11245_v0  ;;  %v6827_v17 = vld [vmem:[%s10795_s5 + $0x268] sm:$0xf] }
 0x5fc   :  { %4606 = vmatmul.bf16.gmra.mxu1 %v11246_v30  ;;  %6936 = vmatmul.msk.bf16.gmra.mxu2 %vm1706_vm0, %v9390_v2 }
 0x5fd   :  { %v4289_v12 = vadd.f32 %v4288_v57, %v4200_v21  ;;  %4428 = vmatmul.bf16.gmra.mxu3 %v11247_v39  ;;  %v7158_v57 = vld [vmem:[%s10795_s5 + $0x274] sm:$0xf0] }
 0x5fe   :  { %v6828_v48 = vor.u32 %v7158_v57, %v6827_v17 }
 0x5ff   :  { %v9856_v9 = vadd.f32 %v4377_v43, %v4289_v12  ;;  %v4380_v6 = vpop.f32.mrf.mxu2 }
 0x600   :  { %v4113_v11 = vpop.f32.mrf.mxu3  ;;  %v4204_v14 = vpop.f32.mrf.mxu0  ;;  %4923 = vmatpush.bf16.msra.mxu1 %v6828_v48 }
 0x601   :  { %v4114_v50 = vadd.f32 %v4113_v11, %v9539_v24  ;;  %v4293_v21 = vpop.f32.mrf.mxu1  ;;  %v6555_v11 = vld [vmem:[%s10795_s5 + $0x48] sm:$0xf] }
 0x603   :  { %v4203_v2 = vadd.f32 %v4202_v38, %v4114_v50  ;;  %v5581_v50 = vld [vmem:[%s10797_s7] sm:$0xf] }
 0x605   :  { %v4292_v39 = vadd.f32 %v4291_v41, %v4203_v2  ;;  %v11249_v2 = vld [vmem:[#allocation42_spill] sm:$0xff] }
 0x607   :  { %v9859_v30 = vadd.f32 %v4380_v6, %v4292_v39  ;;  %v4382_v36 = vpop.f32.mrf.mxu2  ;;  %v9868_v39 = vperm.slane %v11249_v2, 1  ;;  %v7090_v6 = vld [vmem:[%s10795_s5 + $0x54] sm:$0xf0] }
 0x608   :  { %v4115_v10 = vpop.f32.mrf.mxu3  ;;  %v4483_v8 = vpop.f32.mrf.mxu0 }
 0x609   :  { %11248 = vst [vmem:[#allocation16_spill] sm:$0xff] %v9859_v30  ;;  %v4116_v0 = vadd.f32 %v4115_v10, %v9539_v24  ;;  %v4572_v12 = vpop.f32.mrf.mxu1  ;;  %v11251_v10 = vld [vmem:[#allocation46_spill] sm:$0xff] }
 0x60b   :  { %v4205_v43 = vadd.f32 %v4204_v14, %v4116_v0  ;;  %4522 = vmatmul.bf16.gmra.mxu0 %v11216_v61  ;;  %v6556_v14 = vor.u32 %v7090_v6, %v6555_v11  ;;  %v11253_v6 = vld [vmem:[#allocation70_spill] sm:$0xff] }
 0x60c   :  { %4611 = vmatmul.bf16.gmra.mxu1 %v9118_v32  ;;  %6937 = vmatmul.msk.bf16.gmra.mxu2 %vm1706_vm0, %v9417_v25 }
 0x60d   :  { %v4294_v17 = vadd.f32 %v4293_v21, %v4205_v43  ;;  %4433 = vmatmul.bf16.gmra.mxu3 %v11217_v23  ;;  %v9883_v43 = vperm.slane %v5581_v50, 0 }
 0x60e   :  { %4746 = vmatpush.bf16.msra.mxu3 %v6556_v14 }
 0x60f   :  { %v9870_v41 = vadd.f32 %v4382_v36, %v4294_v17  ;;  %v4661_v24 = vpop.f32.mrf.mxu2  ;;  %v5453_v36 = vmax.f32 %v11251_v10, 0.0  ;;  %v9885_v17 = vperm.slane %v5581_v50, 1  ;;  %v11255_v50 = vld [vmem:[#allocation7_spill] sm:$0xff] }
 0x610   :  { %v4394_v38 = vpop.f32.mrf.mxu3  ;;  %v4485_v0 = vpop.f32.mrf.mxu0  ;;  %v6683_v10 = vld [vmem:[%s10795_s5 + $0x148] sm:$0xf] }
 0x611   :  { %11250 = vst [vmem:[#allocation14_spill] sm:$0xff] %v9870_v41  ;;  %v4395_v46 = vadd.f32 %v4394_v38, %v9868_v39  ;;  %v4574_v57 = vpop.f32.mrf.mxu1  ;;  %v5591_v32 = vmul.f32 %v9883_v43, %v5453_v36  ;;  %v5457_v36 = vmax.f32 %v9570_v52, 0.0  ;;  %v5461_v52 = vmax.f32 %v9573_v19, 0.0 }
 0x613   :  { %v4484_v48 = vadd.f32 %v4483_v8, %v4395_v46 }
 0x615   :  { %v4573_v21 = vadd.f32 %v4572_v12, %v4484_v48  ;;  %v11252_v48 = vld [vmem:[#allocation41_spill] sm:$0xff] }
 0x617   :  { %v4662_v8 = vadd.f32 %v4661_v24, %v4573_v21  ;;  %v4663_v38 = vpop.f32.mrf.mxu2  ;;  %v11256_v21 = vld [vmem:[#allocation30_spill] sm:$0xff] }
 0x618   :  { %v4396_v2 = vpop.f32.mrf.mxu3  ;;  %v4488_v25 = vpop.f32.mrf.mxu0 }
 0x619   :  { %v5454_v46 = vmax.f32 %v4662_v8, 0.0  ;;  %v4397_v41 = vadd.f32 %v4396_v2, %v9868_v39  ;;  %v4577_v23 = vpop.f32.mrf.mxu1 }
 0x61b   :  { %v5592_v11 = vmul.f32 %v9885_v17, %v5454_v46  ;;  %v4486_v12 = vadd.f32 %v4485_v0, %v4397_v41  ;;  %4527 = vmatmul.bf16.gmra.mxu0 %v11252_v48  ;;  %v7122_v41 = vld [vmem:[%s10795_s5 + $0x154] sm:$0xf0]  ;;  %v6811_v0 = vld [vmem:[%s10795_s5 + $0x248] sm:$0xf] }
 0x61c   :  { %4616 = vmatmul.bf16.gmra.mxu1 %v11253_v6  ;;  %6938 = vmatmul.msk.bf16.gmra.mxu2 %vm1706_vm0, %v11256_v21  ;;  %v5595_v6 = vmul.f32 %v9883_v43, %v5457_v36 }
 0x61d   :  { %v9892_v14 = vadd.f32 %v5592_v11, %v5591_v32  ;;  %v4575_v24 = vadd.f32 %v4574_v57, %v4486_v12  ;;  %4438 = vmatmul.bf16.gmra.mxu3 %v11255_v50  ;;  %v6684_v32 = vor.u32 %v7122_v41, %v6683_v10  ;;  %v7154_v57 = vld [vmem:[%s10795_s5 + $0x254] sm:$0xf0] }
 0x61e   :  { %v6812_v2 = vor.u32 %v7154_v57, %v6811_v0 }
 0x61f   :  { %11254 = vst [vmem:[#allocation63_spill] sm:$0xff] %v9892_v14  ;;  %v4664_v8 = vadd.f32 %v4663_v38, %v4575_v24  ;;  %v4666_v11 = vpop.f32.mrf.mxu2  ;;  %4835 = vmatpush.bf16.msra.mxu0 %v6684_v32 }
 0x620   :  { %v4399_v46 = vpop.f32.mrf.mxu3  ;;  %v4490_v21 = vpop.f32.mrf.mxu0  ;;  %4924 = vmatpush.bf16.msra.mxu1 %v6812_v2  ;;  %v5599_v2 = vmul.f32 %v9883_v43, %v5461_v52 }
 0x621   :  { %v5458_v12 = vmax.f32 %v4664_v8, 0.0  ;;  %v4400_v14 = vadd.f32 %v4399_v46, %v9868_v39  ;;  %v4579_v50 = vpop.f32.mrf.mxu1 }
 0x623   :  { %v5596_v10 = vmul.f32 %v9885_v17, %v5458_v12  ;;  %v4489_v41 = vadd.f32 %v4488_v25, %v4400_v14 }
 0x625   :  { %v4578_v48 = vadd.f32 %v4577_v23, %v4489_v41  ;;  %v9913_v61 = vadd.f32 %v5596_v10, %v5595_v6  ;;  %v11258_v23 = vld [vmem:[#allocation8_spill] sm:$0xff] }
 0x626   :  { %v11260_v6 = vld [vmem:[#allocation44_spill] sm:$0xff] }
 0x627   :  { %v4667_v38 = vadd.f32 %v4666_v11, %v4578_v48  ;;  %v4668_v0 = vpop.f32.mrf.mxu2  ;;  %v11259_v48 = vld [vmem:[#allocation33_spill] sm:$0xff]  ;;  %v5465_v14 = vmax.f32 %v11260_v6, 0.0 }
 0x628   :  { %v4401_v24 = vpop.f32.mrf.mxu3  ;;  %v4493_v8 = vpop.f32.mrf.mxu0 }
 0x629   :  { %v5462_v32 = vmax.f32 %v4667_v38, 0.0  ;;  %v4402_v57 = vadd.f32 %v4401_v24, %v9868_v39  ;;  %v4582_v46 = vpop.f32.mrf.mxu1  ;;  %v5603_v24 = vmul.f32 %v9883_v43, %v5465_v14 }
 0x62b   :  { %v5600_v36 = vmul.f32 %v9885_v17, %v5462_v32  ;;  %v4491_v30 = vadd.f32 %v4490_v21, %v4402_v57  ;;  %4532 = vmatmul.bf16.gmra.mxu0 %v11222_v56 }
 0x62c   :  { %4621 = vmatmul.bf16.gmra.mxu1 %v9154_v44  ;;  %6939 = vmatmul.msk.bf16.gmra.mxu2 %vm1706_vm0, %v11259_v48 }
 0x62d   :  { %v9921_v25 = vadd.f32 %v5600_v36, %v5599_v2  ;;  %v4580_v19 = vadd.f32 %v4579_v50, %v4491_v30  ;;  %4443 = vmatmul.bf16.gmra.mxu3 %v11258_v23  ;;  %v6539_v50 = vld [vmem:[%s10795_s5 + $0x28] sm:$0xf] }
 0x62f   :  { %11257 = vst [vmem:[#allocation48_spill] sm:$0xff] %v9921_v25  ;;  %v4669_v11 = vadd.f32 %v4668_v0, %v4580_v19  ;;  %v4671_v10 = vpop.f32.mrf.mxu2  ;;  %v7086_v0 = vld [vmem:[%s10795_s5 + $0x34] sm:$0xf0]  ;;  %v11261_v19 = vld [vmem:[#allocation47_spill] sm:$0xff] }
 0x630   :  { %v4404_v12 = vpop.f32.mrf.mxu3  ;;  %v4495_v52 = vpop.f32.mrf.mxu0  ;;  %v6540_v57 = vor.u32 %v7086_v0, %v6539_v50  ;;  %v5469_v6 = vmax.f32 %v11261_v19, 0.0  ;;  %v11262_v50 = vld [vmem:[#allocation50_spill] sm:$0xff] }
 0x631   :  { %v5466_v41 = vmax.f32 %v4669_v11, 0.0  ;;  %v4405_v21 = vadd.f32 %v4404_v12, %v9868_v39  ;;  %v4584_v38 = vpop.f32.mrf.mxu1  ;;  %v6667_v0 = vld [vmem:[%s10795_s5 + $0x128] sm:$0xf] }
 0x632   :  { %4747 = vmatpush.bf16.msra.mxu3 %v6540_v57  ;;  %v5607_v48 = vmul.f32 %v9883_v43, %v5469_v6  ;;  %v6795_v57 = vld [vmem:[%s10795_s5 + $0x228] sm:$0xf] }
 0x633   :  { %v5604_v32 = vmul.f32 %v9885_v17, %v5466_v41  ;;  %v4494_v30 = vadd.f32 %v4493_v8, %v4405_v21 }
 0x635   :  { %v4583_v2 = vadd.f32 %v4582_v46, %v4494_v30  ;;  %v9936_v36 = vadd.f32 %v5604_v32, %v5603_v24  ;;  %v11263_v46 = vld [vmem:[#allocation72_spill] sm:$0xff]  ;;  %v11266_v30 = vld [vmem:[#allocation35_spill] sm:$0xff] }
 0x637   :  { %v4672_v11 = vadd.f32 %v4671_v10, %v4583_v2  ;;  %v4673_v12 = vpop.f32.mrf.mxu2  ;;  %v11265_v10 = vld [vmem:[#allocation6_spill] sm:$0xff] }
 0x638   :  { %v4406_v14 = vpop.f32.mrf.mxu3  ;;  %v4498_v21 = vpop.f32.mrf.mxu0 }
 0x639   :  { %v5470_v41 = vmax.f32 %v4672_v11, 0.0  ;;  %v4407_v8 = vadd.f32 %v4406_v14, %v9868_v39  ;;  %v4587_v25 = vpop.f32.mrf.mxu1 }
 0x63b   :  { %v5608_v23 = vmul.f32 %v9885_v17, %v5470_v41  ;;  %v4496_v44 = vadd.f32 %v4495_v52, %v4407_v8  ;;  %4537 = vmatmul.bf16.gmra.mxu0 %v11262_v50  ;;  %v7118_v52 = vld [vmem:[%s10795_s5 + $0x134] sm:$0xf0] }
 0x63c   :  { %4626 = vmatmul.bf16.gmra.mxu1 %v11263_v46  ;;  %6940 = vmatmul.msk.bf16.gmra.mxu2 %vm1706_vm0, %v11266_v30 }
 0x63d   :  { %v9944_v24 = vadd.f32 %v5608_v23, %v5607_v48  ;;  %v4585_v32 = vadd.f32 %v4584_v38, %v4496_v44  ;;  %4448 = vmatmul.bf16.gmra.mxu3 %v11265_v10  ;;  %v6668_v23 = vor.u32 %v7118_v52, %v6667_v0  ;;  %v7150_v44 = vld [vmem:[%s10795_s5 + $0x234] sm:$0xf0]  ;;  %v5473_v48 = vmax.f32 %v9610_v37, 0.0 }
 0x63e   :  { %v6796_v2 = vor.u32 %v7150_v44, %v6795_v57  ;;  %v5477_v37 = vmax.f32 %v9613_v4, 0.0 }
 0x63f   :  { %11264 = vst [vmem:[#allocation19_spill] sm:$0xff] %v9944_v24  ;;  %v4674_v38 = vadd.f32 %v4673_v12, %v4585_v32  ;;  %v4676_v6 = vpop.f32.mrf.mxu2  ;;  %4836 = vmatpush.bf16.msra.mxu0 %v6668_v23  ;;  %v5611_v24 = vmul.f32 %v9883_v43, %v5473_v48 }
 0x640   :  { %v4409_v19 = vpop.f32.mrf.mxu3  ;;  %v4500_v41 = vpop.f32.mrf.mxu0  ;;  %4925 = vmatpush.bf16.msra.mxu1 %v6796_v2  ;;  %v5615_v2 = vmul.f32 %v9883_v43, %v5477_v37 }
 0x641   :  { %v5474_v11 = vmax.f32 %v4674_v38, 0.0  ;;  %v4410_v14 = vadd.f32 %v4409_v19, %v9868_v39  ;;  %v4589_v8 = vpop.f32.mrf.mxu1 }
 0x643   :  { %v5612_v0 = vmul.f32 %v9885_v17, %v5474_v11  ;;  %v4499_v52 = vadd.f32 %v4498_v21, %v4410_v14  ;;  %v11268_v21 = vld [vmem:[#allocation9_spill] sm:$0xff] }
 0x645   :  { %v4588_v30 = vadd.f32 %v4587_v25, %v4499_v52  ;;  %v9965_v10 = vadd.f32 %v5612_v0, %v5611_v24  ;;  %v11269_v24 = vld [vmem:[#allocation36_spill] sm:$0xff] }
 0x647   :  { %v4677_v12 = vadd.f32 %v4676_v6, %v4588_v30  ;;  %v4678_v57 = vpop.f32.mrf.mxu2  ;;  %v11270_v30 = vld [vmem:[#allocation55_spill] sm:$0xff] }
 0x648   :  { %v4411_v32 = vpop.f32.mrf.mxu3  ;;  %v4503_v38 = vpop.f32.mrf.mxu0  ;;  %v5481_v6 = vmax.f32 %v11270_v30, 0.0 }
 0x649   :  { %v5478_v23 = vmax.f32 %v4677_v12, 0.0  ;;  %v4412_v44 = vadd.f32 %v4411_v32, %v9868_v39  ;;  %v4592_v19 = vpop.f32.mrf.mxu1 }
 0x64a   :  { %v5619_v32 = vmul.f32 %v9883_v43, %v5481_v6 }
 0x64b   :  { %v5616_v48 = vmul.f32 %v9885_v17, %v5478_v23  ;;  %v4501_v46 = vadd.f32 %v4500_v41, %v4412_v44  ;;  %4542 = vmatmul.bf16.gmra.mxu0 %v11228_v45 }
 0x64c   :  { %4631 = vmatmul.bf16.gmra.mxu1 %v9190_v26  ;;  %6941 = vmatmul.msk.bf16.gmra.mxu2 %vm1706_vm0, %v11269_v24 }
 0x64d   :  { %v9973_v25 = vadd.f32 %v5616_v48, %v5615_v2  ;;  %v4590_v4 = vadd.f32 %v4589_v8, %v4501_v46  ;;  %4453 = vmatmul.bf16.gmra.mxu3 %v11268_v21  ;;  %v6523_v8 = vld [vmem:[%s10795_s5 + $0x8] sm:$0xf] }
 0x64f   :  { %11267 = vst [vmem:[#allocation65_spill] sm:$0xff] %v9973_v25  ;;  %v4679_v11 = vadd.f32 %v4678_v57, %v4590_v4  ;;  %v4681_v0 = vpop.f32.mrf.mxu2  ;;  %v7082_v57 = vld [vmem:[%s10795_s5 + $0x14] sm:$0xf0]  ;;  %v11271_v4 = vld [vmem:[#allocation54_spill] sm:$0xff] }
 0x650   :  { %v4414_v14 = vpop.f32.mrf.mxu3  ;;  %v4505_v37 = vpop.f32.mrf.mxu0  ;;  %v6524_v44 = vor.u32 %v7082_v57, %v6523_v8  ;;  %v5485_v30 = vmax.f32 %v11271_v4, 0.0  ;;  %v11272_v8 = vld [vmem:[#allocation49_spill] sm:$0xff]  ;;  %v6651_v57 = vld [vmem:[%s10795_s5 + $0x108] sm:$0xf] }
 0x651   :  { %v5482_v52 = vmax.f32 %v4679_v11, 0.0  ;;  %v4415_v41 = vadd.f32 %v4414_v14, %v9868_v39  ;;  %v4594_v12 = vpop.f32.mrf.mxu1 }
 0x652   :  { %4748 = vmatpush.bf16.msra.mxu3 %v6524_v44  ;;  %v5623_v24 = vmul.f32 %v9883_v43, %v5485_v30  ;;  %v6779_v44 = vld [vmem:[%s10795_s5 + $0x208] sm:$0xf] }
 0x653   :  { %v5620_v23 = vmul.f32 %v9885_v17, %v5482_v52  ;;  %v4504_v46 = vadd.f32 %v4503_v38, %v4415_v41 }
 0x655   :  { %v4593_v2 = vadd.f32 %v4592_v19, %v4504_v46  ;;  %v9988_v48 = vadd.f32 %v5620_v23, %v5619_v32  ;;  %v11273_v19 = vld [vmem:[#allocation23_spill] sm:$0xff]  ;;  %v11276_v46 = vld [vmem:[#allocation34_spill] sm:$0xff] }
 0x657   :  { %v4682_v11 = vadd.f32 %v4681_v0, %v4593_v2  ;;  %v4683_v14 = vpop.f32.mrf.mxu2  ;;  %v11275_v0 = vld [vmem:[#allocation11_spill] sm:$0xff] }
 0x658   :  { %v4416_v6 = vpop.f32.mrf.mxu3  ;;  %v4508_v41 = vpop.f32.mrf.mxu0 }
 0x659   :  { %v5486_v52 = vmax.f32 %v4682_v11, 0.0  ;;  %v4417_v38 = vadd.f32 %v4416_v6, %v9868_v39  ;;  %v4597_v25 = vpop.f32.mrf.mxu1 }
 0x65b   :  { %v5624_v21 = vmul.f32 %v9885_v17, %v5486_v52  ;;  %v4506_v26 = vadd.f32 %v4505_v37, %v4417_v38  ;;  %4547 = vmatmul.bf16.gmra.mxu0 %v11272_v8  ;;  %v7114_v37 = vld [vmem:[%s10795_s5 + $0x114] sm:$0xf0] }
 0x65c   :  { %4636 = vmatmul.bf16.gmra.mxu1 %v11273_v19  ;;  %6942 = vmatmul.msk.bf16.gmra.mxu2 %vm1706_vm0, %v11276_v46 }
 0x65d   :  { %v9996_v32 = vadd.f32 %v5624_v21, %v5623_v24  ;;  %v4595_v23 = vadd.f32 %v4594_v12, %v4506_v26  ;;  %4458 = vmatmul.bf16.gmra.mxu3 %v11275_v0  ;;  %v6652_v21 = vor.u32 %v7114_v37, %v6651_v57  ;;  %v7146_v26 = vld [vmem:[%s10795_s5 + $0x214] sm:$0xf0]  ;;  %v5489_v24 = vmax.f32 %v9650_v49, 0.0 }
 0x65e   :  { %v6780_v2 = vor.u32 %v7146_v26, %v6779_v44  ;;  %v5493_v49 = vmax.f32 %v9653_v22, 0.0 }
 0x65f   :  { %11274 = vst [vmem:[#allocation57_spill] sm:$0xff] %v9996_v32  ;;  %v4684_v12 = vadd.f32 %v4683_v14, %v4595_v23  ;;  %v4686_v30 = vpop.f32.mrf.mxu2  ;;  %4837 = vmatpush.bf16.msra.mxu0 %v6652_v21  ;;  %v5627_v32 = vmul.f32 %v9883_v43, %v5489_v24 }
 0x660   :  { %v4419_v4 = vpop.f32.mrf.mxu3  ;;  %v4510_v52 = vpop.f32.mrf.mxu0  ;;  %4926 = vmatpush.bf16.msra.mxu1 %v6780_v2  ;;  %v5631_v2 = vmul.f32 %v9883_v43, %v5493_v49 }
 0x661   :  { %v5490_v11 = vmax.f32 %v4684_v12, 0.0  ;;  %v4420_v6 = vadd.f32 %v4419_v4, %v9868_v39  ;;  %v4599_v38 = vpop.f32.mrf.mxu1 }
 0x663   :  { %v5628_v57 = vmul.f32 %v9885_v17, %v5490_v11  ;;  %v4509_v37 = vadd.f32 %v4508_v41, %v4420_v6  ;;  %v11278_v11 = vld [vmem:[#allocation52_spill] sm:$0xff] }
 0x665   :  { %v4598_v46 = vadd.f32 %v4597_v25, %v4509_v37  ;;  %v10017_v0 = vadd.f32 %v5628_v57, %v5627_v32  ;;  %v11279_v25 = vld [vmem:[#allocation24_spill] sm:$0xff] }
 0x666   :  { %v11281_v32 = vld [vmem:[#allocation12_spill] sm:$0xff] }
 0x667   :  { %11277 = vst [vmem:[#allocation39_spill] sm:$0xff] %v10017_v0  ;;  %v4687_v14 = vadd.f32 %v4686_v30, %v4598_v46  ;;  %v4688_v44 = vpop.f32.mrf.mxu2  ;;  %v11282_v46 = vld [vmem:[#allocation37_spill] sm:$0xff]  ;;  %v11283_v30 = vld [vmem:[#allocation56_spill] sm:$0xff] }
 0x668   :  { %v4421_v23 = vpop.f32.mrf.mxu3  ;;  %v4513_v12 = vpop.f32.mrf.mxu0  ;;  %v5497_v6 = vmax.f32 %v11283_v30, 0.0 }
 0x669   :  { %v5494_v21 = vmax.f32 %v4687_v14, 0.0  ;;  %v4422_v26 = vadd.f32 %v4421_v23, %v9868_v39  ;;  %v4602_v4 = vpop.f32.mrf.mxu1 }
 0x66b   :  { %v5632_v24 = vmul.f32 %v9885_v17, %v5494_v21  ;;  %v4511_v19 = vadd.f32 %v4510_v52, %v4422_v26  ;;  %4552 = vmatmul.bf16.gmra.mxu0 %v11278_v11  ;;  %v5635_v26 = vmul.f32 %v9883_v43, %v5497_v6 }
 0x66c   :  { %4641 = vmatmul.bf16.gmra.mxu1 %v11279_v25  ;;  %6943 = vmatmul.msk.bf16.gmra.mxu2 %vm1706_vm0, %v11282_v46 }
 0x66d   :  { %v10025_v41 = vadd.f32 %v5632_v24, %v5631_v2  ;;  %v4600_v22 = vadd.f32 %v4599_v38, %v4511_v19  ;;  %4463 = vmatmul.bf16.gmra.mxu3 %v11281_v32  ;;  %v7108_v38 = vld [vmem:[%s10795_s5 + $0xec] sm:$0xf] }
 0x66f   :  { %11280 = vst [vmem:[#allocation51_spill] sm:$0xff] %v10025_v41  ;;  %v4689_v57 = vadd.f32 %v4688_v44, %v4600_v22  ;;  %v4691_v49 = vpop.f32.mrf.mxu2  ;;  %v6637_v44 = vld [vmem:[%s10795_s5 + $0xf8] sm:$0xf0] }
 0x670   :  { %v4424_v37 = vpop.f32.mrf.mxu3  ;;  %v4515_v23 = vpop.f32.mrf.mxu0  ;;  %v6640_v24 = vor.u32 %v7108_v38, %v6637_v44  ;;  %v11285_v38 = vld [vmem:[#allocation31_spill] sm:$0xff]  ;;  %v5505_v44 = vmax.f32 %v9696_v59, 0.0 }
 0x671   :  { %v5498_v14 = vmax.f32 %v4689_v57, 0.0  ;;  %v4425_v52 = vadd.f32 %v4424_v37, %v9868_v39  ;;  %v4604_v21 = vpop.f32.mrf.mxu1  ;;  %v11284_v57 = vld [vmem:[#allocation15_spill] sm:$0xff] }
 0x672   :  { %5097 = vmatpush.bf16.msrb.mxu3 %v6640_v24  ;;  %v5501_v37 = vmax.f32 %v11284_v57, 0.0 }
 0x673   :  { %v5636_v2 = vmul.f32 %v9885_v17, %v5498_v14  ;;  %v4514_v19 = vadd.f32 %v4513_v12, %v4425_v52 }
 0x674   :  { %v5639_v25 = vmul.f32 %v9883_v43, %v5501_v37 }
 0x675   :  { %v4603_v22 = vadd.f32 %v4602_v4, %v4514_v19  ;;  %v10040_v30 = vadd.f32 %v5636_v2, %v5635_v26  ;;  %v11286_v4 = vld [vmem:[#allocation22_spill] sm:$0xff]  ;;  %v7140_v19 = vld [vmem:[%s10795_s5 + $0x1ec] sm:$0xf] }
 0x677   :  { %v4692_v41 = vadd.f32 %v4691_v49, %v4603_v22  ;;  %v4693_v46 = vpop.f32.mrf.mxu2  ;;  %v11288_v49 = vld [vmem:[#allocation13_spill] sm:$0xff] }
 0x678   :  { %v4426_v6 = vpop.f32.mrf.mxu3  ;;  %v4518_v52 = vpop.f32.mrf.mxu0 }
 0x679   :  { %v5502_v14 = vmax.f32 %v4692_v41, 0.0  ;;  %v4427_v12 = vadd.f32 %v4426_v6, %v9868_v39  ;;  %v4607_v32 = vpop.f32.mrf.mxu1  ;;  %v7176_v41 = vld [vmem:[%s10795_s5 + $0x30c] sm:$0xf] }
 0x67b   :  { %v5640_v11 = vmul.f32 %v9885_v17, %v5502_v14  ;;  %v4516_v0 = vadd.f32 %v4515_v23, %v4427_v12  ;;  %4557 = vmatmul.bf16.gmra.mxu0 %v11285_v38  ;;  %v6909_v23 = vld [vmem:[%s10795_s5 + $0x318] sm:$0xf0] }
 0x67c   :  { %4646 = vmatmul.bf16.gmra.mxu1 %v11286_v4  ;;  %6944 = vmatmul.msk.bf16.gmra.mxu2 %vm1706_vm0, %v9542_v62 }
 0x67d   :  { %v10048_v26 = vadd.f32 %v5640_v11, %v5639_v25  ;;  %v4605_v2 = vadd.f32 %v4604_v21, %v4516_v0  ;;  %4468 = vmatmul.bf16.gmra.mxu3 %v11288_v49  ;;  %v6912_v11 = vor.u32 %v7176_v41, %v6909_v23  ;;  %v6765_v0 = vld [vmem:[%s10795_s5 + $0x1f8] sm:$0xf0]  ;;  %v7172_v25 = vld [vmem:[%s10795_s5 + $0x2ec] sm:$0xf] }
 0x67e   :  { %v6893_v21 = vld [vmem:[%s10795_s5 + $0x2f8] sm:$0xf0]  ;;  %v6768_v22 = vor.u32 %v7140_v19, %v6765_v0 }
 0x67f   :  { %11287 = vst [vmem:[#allocation42_spill] sm:$0xff] %v10048_v26  ;;  %v4694_v24 = vadd.f32 %v4693_v46, %v4605_v2  ;;  %v6896_v57 = vor.u32 %v7172_v25, %v6893_v21  ;;  %v4696_v6 = vpop.f32.mrf.mxu2  ;;  %5371 = vmatpush.bf16.msrb.mxu2 %v6912_v11  ;;  %v5643_v26 = vmul.f32 %v9883_v43, %v5505_v44  ;;  %v5509_v46 = vmax.f32 %v9699_v33, 0.0 }
 0x680   :  { %v4429_v37 = vpop.f32.mrf.mxu3  ;;  %v4520_v41 = vpop.f32.mrf.mxu0  ;;  %5186 = vmatpush.bf16.msrb.mxu0 %v6768_v22 }
 0x681   :  { %v5506_v14 = vmax.f32 %v4694_v24, 0.0  ;;  %v4430_v12 = vadd.f32 %v4429_v37, %v9868_v39  ;;  %v4609_v23 = vpop.f32.mrf.mxu1  ;;  %5275 = vmatpush.bf16.msrb.mxu1 %v6896_v57  ;;  %v5647_v22 = vmul.f32 %v9883_v43, %v5509_v46  ;;  %v7104_v46 = vld [vmem:[%s10795_s5 + $0xcc] sm:$0xf] }
 0x683   :  { %v5644_v62 = vmul.f32 %v9885_v17, %v5506_v14  ;;  %v4519_v49 = vadd.f32 %v4518_v52, %v4430_v12 }
 0x685   :  { %v4608_v4 = vadd.f32 %v4607_v32, %v4519_v49  ;;  %v10075_v59 = vadd.f32 %v5644_v62, %v5643_v26  ;;  %v5513_v32 = vmax.f32 %v9707_v16, 0.0  ;;  %v6621_v16 = vld [vmem:[%s10795_s5 + $0xd8] sm:$0xf0] }
 0x687   :  { %v4697_v2 = vadd.f32 %v4696_v6, %v4608_v4  ;;  %v4698_v11 = vpop.f32.mrf.mxu2  ;;  %v5651_v12 = vmul.f32 %v9883_v43, %v5513_v32 }
 0x688   :  { %v4431_v19 = vpop.f32.mrf.mxu3  ;;  %v4523_v21 = vpop.f32.mrf.mxu0 }
 0x689   :  { %v5510_v0 = vmax.f32 %v4697_v2, 0.0  ;;  %v4432_v25 = vadd.f32 %v4431_v19, %v9868_v39  ;;  %v4612_v24 = vpop.f32.mrf.mxu1  ;;  %v6624_v2 = vor.u32 %v7104_v46, %v6621_v16  ;;  %v5521_v16 = vmax.f32 %v9736_v20, 0.0 }
 0x68a   :  { %v5525_v20 = vmax.f32 %v9739_v13, 0.0 }
 0x68b   :  { %v5648_v44 = vmul.f32 %v9885_v17, %v5510_v0  ;;  %v4521_v57 = vadd.f32 %v4520_v41, %v4432_v25  ;;  %4838 = vmatmul.bf16.vlgmr.msra.gmra.mxu0 %v11185_v28  ;;  %5098 = vmatpush.bf16.msrb.mxu3 %v6624_v2  ;;  %v5517_v0 = vmax.f32 %v9716_v40, 0.0 }
 0x68c   :  { %4927 = vmatmul.bf16.vlgmr.msra.gmra.mxu1 %v11186_v58  ;;  %6945 = vmatmul.msk.bf16.vlgmr.msra.gmra.mxu2 %vm1706_vm0, %v9267_v5 }
 0x68d   :  { %v10083_v62 = vadd.f32 %v5648_v44, %v5647_v22  ;;  %v4610_v33 = vadd.f32 %v4609_v23, %v4521_v57  ;;  %4749 = vmatmul.bf16.vlgmr.msra.gmra.mxu3 %v11187_v54 }
 0x68f   :  { %v4699_v52 = vadd.f32 %v4698_v11, %v4610_v33  ;;  %v4701_v26 = vpop.f32.mrf.mxu2 }
 0x690   :  { %v4434_v4 = vpop.f32.mrf.mxu3  ;;  %v4525_v6 = vpop.f32.mrf.mxu0 }
 0x691   :  { %v5514_v49 = vmax.f32 %v4699_v52, 0.0  ;;  %v4435_v37 = vadd.f32 %v4434_v4, %v9868_v39  ;;  %v4614_v14 = vpop.f32.mrf.mxu1  ;;  %v5655_v52 = vmul.f32 %v9883_v43, %v5517_v0 }
 0x693   :  { %v5652_v41 = vmul.f32 %v9885_v17, %v5514_v49  ;;  %v4524_v23 = vadd.f32 %v4523_v21, %v4435_v37 }
 0x695   :  { %v4613_v19 = vadd.f32 %v4612_v24, %v4524_v23  ;;  %v10098_v11 = vadd.f32 %v5652_v41, %v5651_v12  ;;  %v11289_v24 = vld [vmem:[#allocation62_spill] sm:$0xff]  ;;  %v11292_v12 = vld [vmem:[#allocation25_spill] sm:$0xff]  ;;  %v7136_v41 = vld [vmem:[%s10795_s5 + $0x1cc] sm:$0xf] }
 0x696   :  { %v7168_v23 = vld [vmem:[%s10795_s5 + $0x2cc] sm:$0xf] }
 0x697   :  { %v4702_v25 = vadd.f32 %v4701_v26, %v4613_v19  ;;  %v4703_v44 = vpop.f32.mrf.mxu2  ;;  %v11291_v26 = vld [vmem:[#allocation43_spill] sm:$0xff] }
 0x698   :  { %v4436_v22 = vpop.f32.mrf.mxu3  ;;  %v4528_v33 = vpop.f32.mrf.mxu0 }
 0x699   :  { %v5518_v57 = vmax.f32 %v4702_v25, 0.0  ;;  %v4437_v21 = vadd.f32 %v4436_v22, %v9868_v39  ;;  %v4617_v32 = vpop.f32.mrf.mxu1 }
 0x69b   :  { %v5656_v4 = vmul.f32 %v9885_v17, %v5518_v57  ;;  %v4526_v49 = vadd.f32 %v4525_v6, %v4437_v21  ;;  %4843 = vmatmul.bf16.gmra.mxu0 %v11189_v1  ;;  %v6749_v6 = vld [vmem:[%s10795_s5 + $0x1d8] sm:$0xf0] }
 0x69c   :  { %4932 = vmatmul.bf16.gmra.mxu1 %v11289_v24  ;;  %6946 = vmatmul.msk.bf16.gmra.mxu2 %vm1706_vm0, %v11292_v12  ;;  %v6752_v46 = vor.u32 %v7136_v41, %v6749_v6 }
 0x69d   :  { %v10106_v37 = vadd.f32 %v5656_v4, %v5655_v52  ;;  %v4615_v40 = vadd.f32 %v4614_v14, %v4526_v49  ;;  %4754 = vmatmul.bf16.gmra.mxu3 %v11291_v26  ;;  %v6877_v14 = vld [vmem:[%s10795_s5 + $0x2d8] sm:$0xf0]  ;;  %v5659_v4 = vmul.f32 %v9883_v43, %v5521_v16 }
 0x69e   :  { %v6880_v19 = vor.u32 %v7168_v23, %v6877_v14  ;;  %5187 = vmatpush.bf16.msrb.mxu0 %v6752_v46 }
 0x69f   :  { %11290 = vst [vmem:[#allocation46_spill] sm:$0xff] %v10106_v37  ;;  %v4704_v2 = vadd.f32 %v4703_v44, %v4615_v40  ;;  %v4706_v25 = vpop.f32.mrf.mxu2 }
 0x6a0   :  { %v4439_v0 = vpop.f32.mrf.mxu3  ;;  %v4530_v21 = vpop.f32.mrf.mxu0  ;;  %5276 = vmatpush.bf16.msrb.mxu1 %v6880_v19  ;;  %v5663_v19 = vmul.f32 %v9883_v43, %v5525_v20 }
 0x6a1   :  { %v5522_v22 = vmax.f32 %v4704_v2, 0.0  ;;  %v4440_v57 = vadd.f32 %v4439_v0, %v9868_v39  ;;  %v4619_v52 = vpop.f32.mrf.mxu1 }
 0x6a3   :  { %v5660_v49 = vmul.f32 %v9885_v17, %v5522_v22  ;;  %v4529_v41 = vadd.f32 %v4528_v33, %v4440_v57 }
 0x6a5   :  { %v4618_v6 = vadd.f32 %v4617_v32, %v4529_v41  ;;  %v10127_v37 = vadd.f32 %v5660_v49, %v5659_v4  ;;  %v5529_v32 = vmax.f32 %v9747_v34, 0.0  ;;  %v6605_v34 = vld [vmem:[%s10795_s5 + $0xb8] sm:$0xf0] }
 0x6a7   :  { %v4707_v44 = vadd.f32 %v4706_v25, %v4618_v6  ;;  %v4708_v23 = vpop.f32.mrf.mxu2  ;;  %v5667_v6 = vmul.f32 %v9883_v43, %v5529_v32 }
 0x6a8   :  { %v4441_v40 = vpop.f32.mrf.mxu3  ;;  %v4533_v2 = vpop.f32.mrf.mxu0 }
 0x6a9   :  { %v5526_v46 = vmax.f32 %v4707_v44, 0.0  ;;  %v4442_v14 = vadd.f32 %v4441_v40, %v9868_v39  ;;  %v4622_v0 = vpop.f32.mrf.mxu1 }
 0x6ab   :  { %v5664_v16 = vmul.f32 %v9885_v17, %v5526_v46  ;;  %v4531_v12 = vadd.f32 %v4530_v21, %v4442_v14  ;;  %4848 = vmatmul.bf16.gmra.mxu0 %v11193_v63  ;;  %v5533_v46 = vmax.f32 %v9756_v55, 0.0 }
 0x6ac   :  { %4937 = vmatmul.bf16.gmra.mxu1 %v11194_v42  ;;  %6947 = vmatmul.msk.bf16.gmra.mxu2 %vm1706_vm0, %v9303_v18 }
 0x6ad   :  { %v10135_v33 = vadd.f32 %v5664_v16, %v5663_v19  ;;  %v4620_v13 = vadd.f32 %v4619_v52, %v4531_v12  ;;  %4759 = vmatmul.bf16.gmra.mxu3 %v11195_v53  ;;  %v7100_v52 = vld [vmem:[%s10795_s5 + $0xac] sm:$0xf] }
 0x6ae   :  { %v6608_v44 = vor.u32 %v7100_v52, %v6605_v34  ;;  %v11293_v52 = vld [vmem:[#allocation17_spill] sm:$0xff]  ;;  %v7164_v34 = vld [vmem:[%s10795_s5 + $0x2ac] sm:$0xf] }
 0x6af   :  { %v4709_v25 = vadd.f32 %v4708_v23, %v4620_v13  ;;  %v4711_v57 = vpop.f32.mrf.mxu2 }
 0x6b0   :  { %v4444_v22 = vpop.f32.mrf.mxu3  ;;  %v4535_v49 = vpop.f32.mrf.mxu0  ;;  %5099 = vmatpush.bf16.msrb.mxu3 %v6608_v44 }
 0x6b1   :  { %v5530_v4 = vmax.f32 %v4709_v25, 0.0  ;;  %v4445_v21 = vadd.f32 %v4444_v22, %v9868_v39  ;;  %v4624_v41 = vpop.f32.mrf.mxu1  ;;  %v5671_v22 = vmul.f32 %v9883_v43, %v5533_v46 }
 0x6b3   :  { %v5668_v20 = vmul.f32 %v9885_v17, %v5530_v4  ;;  %v4534_v12 = vadd.f32 %v4533_v2, %v4445_v21 }
 0x6b5   :  { %v4623_v40 = vadd.f32 %v4622_v0, %v4534_v12  ;;  %v10150_v23 = vadd.f32 %v5668_v20, %v5667_v6  ;;  %v11294_v0 = vld [vmem:[#allocation64_spill] sm:$0xff]  ;;  %v11297_v20 = vld [vmem:[#allocation27_spill] sm:$0xff] }
 0x6b6   :  { %v7132_v12 = vld [vmem:[%s10795_s5 + $0x1ac] sm:$0xf] }
 0x6b7   :  { %v4712_v14 = vadd.f32 %v4711_v57, %v4623_v40  ;;  %v4713_v16 = vpop.f32.mrf.mxu2  ;;  %v11296_v57 = vld [vmem:[#allocation53_spill] sm:$0xff]  ;;  %v5537_v40 = vmax.f32 %v9776_v60, 0.0  ;;  %v5541_v60 = vmax.f32 %v9779_v47, 0.0 }
 0x6b8   :  { %v4446_v19 = vpop.f32.mrf.mxu3  ;;  %v4538_v32 = vpop.f32.mrf.mxu0 }
 0x6b9   :  { %v5534_v13 = vmax.f32 %v4712_v14, 0.0  ;;  %v4447_v2 = vadd.f32 %v4446_v19, %v9868_v39  ;;  %v4627_v25 = vpop.f32.mrf.mxu1 }
 0x6bb   :  { %v5672_v4 = vmul.f32 %v9885_v17, %v5534_v13  ;;  %v4536_v21 = vadd.f32 %v4535_v49, %v4447_v2  ;;  %4853 = vmatmul.bf16.gmra.mxu0 %v11293_v52  ;;  %v6733_v49 = vld [vmem:[%s10795_s5 + $0x1b8] sm:$0xf0] }
 0x6bc   :  { %4942 = vmatmul.bf16.gmra.mxu1 %v11294_v0  ;;  %6948 = vmatmul.msk.bf16.gmra.mxu2 %vm1706_vm0, %v11297_v20  ;;  %v6736_v44 = vor.u32 %v7132_v12, %v6733_v49 }
 0x6bd   :  { %v10158_v6 = vadd.f32 %v5672_v4, %v5671_v22  ;;  %v4625_v55 = vadd.f32 %v4624_v41, %v4536_v21  ;;  %4764 = vmatmul.bf16.gmra.mxu3 %v11296_v57  ;;  %v6861_v41 = vld [vmem:[%s10795_s5 + $0x2b8] sm:$0xf0] }
 0x6be   :  { %v6864_v14 = vor.u32 %v7164_v34, %v6861_v41  ;;  %5188 = vmatpush.bf16.msrb.mxu0 %v6736_v44 }
 0x6bf   :  { %11295 = vst [vmem:[#allocation44_spill] sm:$0xff] %v10158_v6  ;;  %v4714_v46 = vadd.f32 %v4713_v16, %v4625_v55  ;;  %v4716_v13 = vpop.f32.mrf.mxu2  ;;  %v5675_v6 = vmul.f32 %v9883_v43, %v5537_v40 }
 0x6c0   :  { %v4449_v19 = vpop.f32.mrf.mxu3  ;;  %v4540_v4 = vpop.f32.mrf.mxu0  ;;  %5277 = vmatpush.bf16.msrb.mxu1 %v6864_v14  ;;  %v5679_v14 = vmul.f32 %v9883_v43, %v5541_v60 }
 0x6c1   :  { %v5538_v2 = vmax.f32 %v4714_v46, 0.0  ;;  %v4450_v22 = vadd.f32 %v4449_v19, %v9868_v39  ;;  %v4629_v21 = vpop.f32.mrf.mxu1 }
 0x6c3   :  { %v5676_v12 = vmul.f32 %v9885_v17, %v5538_v2  ;;  %v4539_v49 = vadd.f32 %v4538_v32, %v4450_v22 }
 0x6c5   :  { %v4628_v20 = vadd.f32 %v4627_v25, %v4539_v49  ;;  %v10179_v57 = vadd.f32 %v5676_v12, %v5675_v6  ;;  %v5545_v25 = vmax.f32 %v9787_v27, 0.0  ;;  %v6589_v27 = vld [vmem:[%s10795_s5 + $0x98] sm:$0xf0] }
 0x6c7   :  { %v4717_v16 = vadd.f32 %v4716_v13, %v4628_v20  ;;  %v4718_v34 = vpop.f32.mrf.mxu2  ;;  %v5683_v49 = vmul.f32 %v9883_v43, %v5545_v25 }
 0x6c8   :  { %v4451_v55 = vpop.f32.mrf.mxu3  ;;  %v4543_v46 = vpop.f32.mrf.mxu0 }
 0x6c9   :  { %v5542_v44 = vmax.f32 %v4717_v16, 0.0  ;;  %v4452_v41 = vadd.f32 %v4451_v55, %v9868_v39  ;;  %v4632_v19 = vpop.f32.mrf.mxu1 }
 0x6cb   :  { %v5680_v40 = vmul.f32 %v9885_v17, %v5542_v44  ;;  %v4541_v0 = vadd.f32 %v4540_v4, %v4452_v41  ;;  %4858 = vmatmul.bf16.gmra.mxu0 %v11201_v51  ;;  %v5549_v44 = vmax.f32 %v9796_v15, 0.0 }
 0x6cc   :  { %4947 = vmatmul.bf16.gmra.mxu1 %v11202_v35  ;;  %6949 = vmatmul.msk.bf16.gmra.mxu2 %vm1706_vm0, %v9339_v3 }
 0x6cd   :  { %v10187_v32 = vadd.f32 %v5680_v40, %v5679_v14  ;;  %v4630_v47 = vadd.f32 %v4629_v21, %v4541_v0  ;;  %4769 = vmatmul.bf16.gmra.mxu3 %v11203_v7  ;;  %v7096_v21 = vld [vmem:[%s10795_s5 + $0x8c] sm:$0xf] }
 0x6ce   :  { %v6592_v16 = vor.u32 %v7096_v21, %v6589_v27  ;;  %v11298_v21 = vld [vmem:[#allocation20_spill] sm:$0xff]  ;;  %v7160_v27 = vld [vmem:[%s10795_s5 + $0x28c] sm:$0xf] }
 0x6cf   :  { %v4719_v6 = vadd.f32 %v4718_v34, %v4630_v47  ;;  %v4721_v13 = vpop.f32.mrf.mxu2 }
 0x6d0   :  { %v4454_v20 = vpop.f32.mrf.mxu3  ;;  %v4545_v4 = vpop.f32.mrf.mxu0  ;;  %5100 = vmatpush.bf16.msrb.mxu3 %v6592_v16 }
 0x6d1   :  { %v5546_v2 = vmax.f32 %v4719_v6, 0.0  ;;  %v4455_v22 = vadd.f32 %v4454_v20, %v9868_v39  ;;  %v4634_v12 = vpop.f32.mrf.mxu1  ;;  %v5687_v20 = vmul.f32 %v9883_v43, %v5549_v44 }
 0x6d3   :  { %v5684_v60 = vmul.f32 %v9885_v17, %v5546_v2  ;;  %v4544_v0 = vadd.f32 %v4543_v46, %v4455_v22 }
 0x6d5   :  { %v4633_v55 = vadd.f32 %v4632_v19, %v4544_v0  ;;  %v10202_v34 = vadd.f32 %v5684_v60, %v5683_v49  ;;  %v11299_v19 = vld [vmem:[#allocation66_spill] sm:$0xff]  ;;  %v11302_v60 = vld [vmem:[#allocation28_spill] sm:$0xff]  ;;  %v7128_v0 = vld [vmem:[%s10795_s5 + $0x18c] sm:$0xf] }
 0x6d7   :  { %v4722_v41 = vadd.f32 %v4721_v13, %v4633_v55  ;;  %v4723_v40 = vpop.f32.mrf.mxu2  ;;  %v11301_v13 = vld [vmem:[#allocation58_spill] sm:$0xff]  ;;  %v5553_v55 = vmax.f32 %v9816_v29, 0.0  ;;  %v5557_v29 = vmax.f32 %v9819_v31, 0.0 }
 0x6d8   :  { %v4456_v14 = vpop.f32.mrf.mxu3  ;;  %v4548_v25 = vpop.f32.mrf.mxu0 }
 0x6d9   :  { %v5550_v47 = vmax.f32 %v4722_v41, 0.0  ;;  %v4457_v46 = vadd.f32 %v4456_v14, %v9868_v39  ;;  %v4637_v6 = vpop.f32.mrf.mxu1 }
 0x6db   :  { %v5688_v2 = vmul.f32 %v9885_v17, %v5550_v47  ;;  %v4546_v22 = vadd.f32 %v4545_v4, %v4457_v46  ;;  %4863 = vmatmul.bf16.gmra.mxu0 %v11298_v21  ;;  %v6717_v4 = vld [vmem:[%s10795_s5 + $0x198] sm:$0xf0] }
 0x6dc   :  { %4952 = vmatmul.bf16.gmra.mxu1 %v11299_v19  ;;  %6950 = vmatmul.msk.bf16.gmra.mxu2 %vm1706_vm0, %v11302_v60  ;;  %v6720_v16 = vor.u32 %v7128_v0, %v6717_v4 }
 0x6dd   :  { %v10210_v49 = vadd.f32 %v5688_v2, %v5687_v20  ;;  %v4635_v15 = vadd.f32 %v4634_v12, %v4546_v22  ;;  %4774 = vmatmul.bf16.gmra.mxu3 %v11301_v13  ;;  %v6845_v12 = vld [vmem:[%s10795_s5 + $0x298] sm:$0xf0] }
 0x6de   :  { %v6848_v41 = vor.u32 %v7160_v27, %v6845_v12  ;;  %5189 = vmatpush.bf16.msrb.mxu0 %v6720_v16 }
 0x6df   :  { %11300 = vst [vmem:[#allocation47_spill] sm:$0xff] %v10210_v49  ;;  %v4724_v44 = vadd.f32 %v4723_v40, %v4635_v15  ;;  %v4726_v47 = vpop.f32.mrf.mxu2  ;;  %v5691_v49 = vmul.f32 %v9883_v43, %v5553_v55 }
 0x6e0   :  { %v4459_v14 = vpop.f32.mrf.mxu3  ;;  %v4550_v2 = vpop.f32.mrf.mxu0  ;;  %5278 = vmatpush.bf16.msrb.mxu1 %v6848_v41  ;;  %v5695_v41 = vmul.f32 %v9883_v43, %v5557_v29 }
 0x6e1   :  { %v5554_v46 = vmax.f32 %v4724_v44, 0.0  ;;  %v4460_v20 = vadd.f32 %v4459_v14, %v9868_v39  ;;  %v4639_v22 = vpop.f32.mrf.mxu1 }
 0x6e3   :  { %v5692_v0 = vmul.f32 %v9885_v17, %v5554_v46  ;;  %v4549_v4 = vadd.f32 %v4548_v25, %v4460_v20  ;;  %v11304_v46 = vld [vmem:[#allocation18_spill] sm:$0xff]  ;;  %v11305_v25 = vld [vmem:[#allocation67_spill] sm:$0xff] }
 0x6e5   :  { %v4638_v60 = vadd.f32 %v4637_v6, %v4549_v4  ;;  %v10231_v13 = vadd.f32 %v5692_v0, %v5691_v49  ;;  %v11307_v49 = vld [vmem:[#allocation59_spill] sm:$0xff] }
 0x6e7   :  { %11303 = vst [vmem:[#allocation55_spill] sm:$0xff] %v10231_v13  ;;  %v4727_v40 = vadd.f32 %v4726_v47, %v4638_v60  ;;  %v4728_v27 = vpop.f32.mrf.mxu2  ;;  %v11308_v60 = vld [vmem:[#allocation26_spill] sm:$0xff] }
 0x6e8   :  { %v4461_v15 = vpop.f32.mrf.mxu3  ;;  %v4553_v44 = vpop.f32.mrf.mxu0  ;;  %v11309_v47 = vld [vmem:[#allocation10_spill] sm:$0xff] }
 0x6e9   :  { %v5558_v16 = vmax.f32 %v4727_v40, 0.0  ;;  %v4462_v12 = vadd.f32 %v4461_v15, %v9868_v39  ;;  %v4642_v14 = vpop.f32.mrf.mxu1  ;;  %v5561_v20 = vmax.f32 %v11309_v47, 0.0 }
 0x6eb   :  { %v5696_v55 = vmul.f32 %v9885_v17, %v5558_v16  ;;  %v4551_v19 = vadd.f32 %v4550_v2, %v4462_v12  ;;  %4868 = vmatmul.bf16.gmra.mxu0 %v11304_v46  ;;  %v5699_v12 = vmul.f32 %v9883_v43, %v5561_v20 }
 0x6ec   :  { %4957 = vmatmul.bf16.gmra.mxu1 %v11305_v25  ;;  %6951 = vmatmul.msk.bf16.gmra.mxu2 %vm1706_vm0, %v11308_v60 }
 0x6ed   :  { %v10239_v6 = vadd.f32 %v5696_v55, %v5695_v41  ;;  %v4640_v31 = vadd.f32 %v4639_v22, %v4551_v19  ;;  %4779 = vmatmul.bf16.gmra.mxu3 %v11307_v49  ;;  %v7092_v22 = vld [vmem:[%s10795_s5 + $0x6c] sm:$0xf] }
 0x6ef   :  { %11306 = vst [vmem:[#allocation54_spill] sm:$0xff] %v10239_v6  ;;  %v4729_v0 = vadd.f32 %v4728_v27, %v4640_v31  ;;  %v4731_v29 = vpop.f32.mrf.mxu2  ;;  %v6573_v27 = vld [vmem:[%s10795_s5 + $0x78] sm:$0xf0] }
 0x6f0   :  { %v4464_v4 = vpop.f32.mrf.mxu3  ;;  %v4555_v15 = vpop.f32.mrf.mxu0  ;;  %v6576_v55 = vor.u32 %v7092_v22, %v6573_v27 }
 0x6f1   :  { %v5562_v40 = vmax.f32 %v4729_v0, 0.0  ;;  %v4465_v2 = vadd.f32 %v4464_v4, %v9868_v39  ;;  %v4644_v16 = vpop.f32.mrf.mxu1  ;;  %v11310_v0 = vld [vmem:[#allocation38_spill] sm:$0xff] }
 0x6f2   :  { %5101 = vmatpush.bf16.msrb.mxu3 %v6576_v55  ;;  %v5565_v4 = vmax.f32 %v11310_v0, 0.0  ;;  %v11314_v55 = vld [vmem:[#allocation60_spill] sm:$0xff] }
 0x6f3   :  { %v5700_v41 = vmul.f32 %v9885_v17, %v5562_v40  ;;  %v4554_v19 = vadd.f32 %v4553_v44, %v4465_v2 }
 0x6f4   :  { %v5703_v25 = vmul.f32 %v9883_v43, %v5565_v4  ;;  %v5569_v4 = vmax.f32 %v9856_v9, 0.0 }
 0x6f5   :  { %v4643_v31 = vadd.f32 %v4642_v14, %v4554_v19  ;;  %v10254_v47 = vadd.f32 %v5700_v41, %v5699_v12  ;;  %v7124_v14 = vld [vmem:[%s10795_s5 + $0x16c] sm:$0xf]  ;;  %v11311_v12 = vld [vmem:[#allocation21_spill] sm:$0xff]  ;;  %v11312_v41 = vld [vmem:[#allocation68_spill] sm:$0xff] }
 0x6f7   :  { %v4732_v6 = vadd.f32 %v4731_v29, %v4643_v31  ;;  %v4733_v60 = vpop.f32.mrf.mxu2  ;;  %v6701_v29 = vld [vmem:[%s10795_s5 + $0x178] sm:$0xf0] }
 0x6f8   :  { %v4466_v20 = vpop.f32.mrf.mxu3  ;;  %v4558_v2 = vpop.f32.mrf.mxu0  ;;  %v6704_v19 = vor.u32 %v7124_v14, %v6701_v29  ;;  %v11315_v31 = vld [vmem:[#allocation29_spill] sm:$0xff] }
 0x6f9   :  { %v5566_v40 = vmax.f32 %v4732_v6, 0.0  ;;  %v4467_v44 = vadd.f32 %v4466_v20, %v9868_v39  ;;  %v4647_v49 = vpop.f32.mrf.mxu1  ;;  %v7156_v6 = vld [vmem:[%s10795_s5 + $0x26c] sm:$0xf] }
 0x6fa   :  { %5190 = vmatpush.bf16.msrb.mxu0 %v6704_v19 }
 0x6fb   :  { %v5704_v46 = vmul.f32 %v9885_v17, %v5566_v40  ;;  %v4556_v13 = vadd.f32 %v4555_v15, %v4467_v44  ;;  %4873 = vmatmul.bf16.gmra.mxu0 %v11311_v12  ;;  %v6829_v15 = vld [vmem:[%s10795_s5 + $0x278] sm:$0xf0] }
 0x6fc   :  { %4962 = vmatmul.bf16.gmra.mxu1 %v11312_v41  ;;  %6952 = vmatmul.msk.bf16.gmra.mxu2 %vm1706_vm0, %v11315_v31  ;;  %v6832_v0 = vor.u32 %v7156_v6, %v6829_v15  ;;  %v11316_v6 = vld [vmem:[#allocation16_spill] sm:$0xff] }
 0x6fd   :  { %v10274_v22 = vadd.f32 %v5704_v46, %v5703_v25  ;;  %v4645_v27 = vadd.f32 %v4644_v16, %v4556_v13  ;;  %4784 = vmatmul.bf16.gmra.mxu3 %v11314_v55  ;;  %v5707_v13 = vmul.f32 %v9883_v43, %v5569_v4  ;;  %v5573_v19 = vmax.f32 %v11316_v6, 0.0 }
 0x6fe   :  { %5279 = vmatpush.bf16.msrb.mxu1 %v6832_v0 }
 0x6ff   :  { %11313 = vst [vmem:[#allocation56_spill] sm:$0xff] %v10274_v22  ;;  %v4734_v20 = vadd.f32 %v4733_v60, %v4645_v27  ;;  %v4736_v44 = vpop.f32.mrf.mxu2  ;;  %v5711_v55 = vmul.f32 %v9883_v43, %v5573_v19 }
 0x700   :  { %v4469_v40 = vpop.f32.mrf.mxu3  ;;  %v4560_v41 = vpop.f32.mrf.mxu0 }
 0x701   :  { %v5570_v14 = vmax.f32 %v4734_v20, 0.0  ;;  %v4470_v29 = vadd.f32 %v4469_v40, %v9868_v39  ;;  %v4649_v46 = vpop.f32.mrf.mxu1 }
 0x703   :  { %v5708_v25 = vmul.f32 %v9885_v17, %v5570_v14  ;;  %v4559_v16 = vadd.f32 %v4558_v2, %v4470_v29  ;;  %v11317_v14 = vld [vmem:[#allocation40_spill] sm:$0xff] }
 0x705   :  { %v4648_v22 = vadd.f32 %v4647_v49, %v4559_v16  ;;  %v10283_v31 = vadd.f32 %v5708_v25, %v5707_v13  ;;  %v11318_v49 = vld [vmem:[#allocation69_spill] sm:$0xff] }
 0x707   :  { %v4737_v9 = vadd.f32 %v4736_v44, %v4648_v22  ;;  %v4738_v15 = vpop.f32.mrf.mxu2  ;;  %v11320_v22 = vld [vmem:[#allocation61_spill] sm:$0xff]  ;;  %v11321_v44 = vld [vmem:[#allocation32_spill] sm:$0xff] }
 0x708   :  { %v4471_v60 = vpop.f32.mrf.mxu3  ;;  %v4839_v20 = vpop.f32.mrf.mxu0 }
 0x709   :  { %v5574_v27 = vmax.f32 %v4737_v9, 0.0  ;;  %v4472_v0 = vadd.f32 %v4471_v60, %v9868_v39  ;;  %v4928_v40 = vpop.f32.mrf.mxu1  ;;  %v10299_v39 = vld [vmem:[%s10796_s6] sm:$0xf] }
 0x70a   :  { %11322 = vst [vmem:[#allocation31_spill] sm:$0xff] %v10299_v39  ;;  %v10302_v13 = vperm.slane %v10299_v39, 2 }
 0x70b   :  { %v5712_v4 = vmul.f32 %v9885_v17, %v5574_v27  ;;  %v4561_v12 = vadd.f32 %v4560_v41, %v4472_v0  ;;  %4878 = vmatmul.bf16.gmra.mxu0 %v11317_v14  ;;  %v11323_v41 = vld [vmem:[#allocation14_spill] sm:$0xff] }
 0x70c   :  { %4967 = vmatmul.bf16.gmra.mxu1 %v11318_v49  ;;  %6953 = vmatmul.msk.bf16.gmra.mxu2 %vm1706_vm0, %v11321_v44  ;;  %v5577_v25 = vmax.f32 %v11323_v41, 0.0 }
 0x70d   :  { %v10291_v2 = vadd.f32 %v5712_v4, %v5711_v55  ;;  %v4650_v29 = vadd.f32 %v4649_v46, %v4561_v12  ;;  %4789 = vmatmul.bf16.gmra.mxu3 %v11320_v22  ;;  %v7088_v4 = vld [vmem:[%s10795_s5 + $0x4c] sm:$0xf] }
 0x70e   :  { %v5715_v60 = vmul.f32 %v9883_v43, %v5577_v25  ;;  %v10319_v43 = vld [vmem:[%s10797_s7] sm:$0xf] }
 0x70f   :  { %11319 = vst [vmem:[#allocation15_spill] sm:$0xff] %v10291_v2  ;;  %v4739_v16 = vadd.f32 %v4738_v15, %v4650_v29  ;;  %v5017_v55 = vpop.f32.mrf.mxu2  ;;  %v6557_v15 = vld [vmem:[%s10795_s5 + $0x58] sm:$0xf0] }
 0x710   :  { %v4750_v6 = vpop.f32.mrf.mxu3  ;;  %v4841_v46 = vpop.f32.mrf.mxu0  ;;  %v6560_v29 = vor.u32 %v7088_v4, %v6557_v15  ;;  %11325 = vst [vmem:[#allocation43_spill] sm:$0xff] %v10319_v43  ;;  %v11326_v15 = vld [vmem:[#allocation41_spill] sm:$0xff] }
 0x711   :  { %v5578_v19 = vmax.f32 %v4739_v16, 0.0  ;;  %v4751_v12 = vadd.f32 %v4750_v6, %v10302_v13  ;;  %v4930_v9 = vpop.f32.mrf.mxu1 }
 0x712   :  { %5102 = vmatpush.bf16.msrb.mxu3 %v6560_v29  ;;  %v11327_v29 = vld [vmem:[#allocation70_spill] sm:$0xff] }
 0x713   :  { %v5716_v27 = vmul.f32 %v9885_v17, %v5578_v19  ;;  %v4840_v0 = vadd.f32 %v4839_v20, %v4751_v12  ;;  %v10322_v17 = vperm.slane %v10319_v43, 2  ;;  %v11330_v43 = vld [vmem:[#allocation63_spill] sm:$0xff] }
 0x715   :  { %v4929_v41 = vadd.f32 %v4928_v40, %v4840_v0  ;;  %v10314_v16 = vadd.f32 %v5716_v27, %v5715_v60  ;;  %v6685_v27 = vld [vmem:[%s10795_s5 + $0x158] sm:$0xf0]  ;;  %v7152_v0 = vld [vmem:[%s10795_s5 + $0x24c] sm:$0xf] }
 0x717   :  { %11324 = vst [vmem:[#allocation62_spill] sm:$0xff] %v10314_v16  ;;  %v5018_v6 = vadd.f32 %v5017_v55, %v4929_v41  ;;  %v5019_v25 = vpop.f32.mrf.mxu2  ;;  %v7120_v55 = vld [vmem:[%s10795_s5 + $0x14c] sm:$0xf] }
 0x718   :  { %v4752_v20 = vpop.f32.mrf.mxu3  ;;  %v4844_v2 = vpop.f32.mrf.mxu0  ;;  %v6688_v41 = vor.u32 %v7120_v55, %v6685_v27 }
 0x719   :  { %v5455_v19 = vmax.f32 %v5018_v6, 0.0  ;;  %v4753_v12 = vadd.f32 %v4752_v20, %v10302_v13  ;;  %v4933_v4 = vpop.f32.mrf.mxu1  ;;  %v11328_v20 = vld [vmem:[#allocation7_spill] sm:$0xff] }
 0x71a   :  { %5191 = vmatpush.bf16.msrb.mxu0 %v6688_v41 }
 0x71b   :  { %v5593_v40 = vmul.f32 %v10322_v17, %v5455_v19  ;;  %v4842_v60 = vadd.f32 %v4841_v46, %v4753_v12  ;;  %4883 = vmatmul.bf16.gmra.mxu0 %v11326_v15  ;;  %v6813_v46 = vld [vmem:[%s10795_s5 + $0x258] sm:$0xf0]  ;;  %v11329_v19 = vld [vmem:[#allocation30_spill] sm:$0xff] }
 0x71c   :  { %4972 = vmatmul.bf16.gmra.mxu1 %v11327_v29  ;;  %6954 = vmatmul.msk.bf16.gmra.mxu2 %vm1706_vm0, %v11329_v19  ;;  %v6816_v12 = vor.u32 %v7152_v0, %v6813_v46 }
 0x71d   :  { %v4931_v6 = vadd.f32 %v4930_v9, %v4842_v60  ;;  %4794 = vmatmul.bf16.gmra.mxu3 %v11328_v20  ;;  %v10344_v16 = vadd.f32 %v11330_v43, %v5593_v40 }
 0x71e   :  { %5280 = vmatpush.bf16.msrb.mxu1 %v6816_v12  ;;  %v11331_v12 = vld [vmem:[#allocation71_spill] sm:$0xff] }
 0x71f   :  { %v5020_v39 = vadd.f32 %v5019_v25, %v4931_v6  ;;  %v5022_v29 = vpop.f32.mrf.mxu2 }
 0x720   :  { %v4755_v15 = vpop.f32.mrf.mxu3  ;;  %v4846_v44 = vpop.f32.mrf.mxu0 }
 0x721   :  { %v5459_v55 = vmax.f32 %v5020_v39, 0.0  ;;  %v4756_v27 = vadd.f32 %v4755_v15, %v10302_v13  ;;  %v4935_v22 = vpop.f32.mrf.mxu1 }
 0x723   :  { %v5597_v9 = vmul.f32 %v10322_v17, %v5459_v55  ;;  %v4845_v60 = vadd.f32 %v4844_v2, %v4756_v27 }
 0x725   :  { %v4934_v20 = vadd.f32 %v4933_v4, %v4845_v60  ;;  %v10349_v19 = vadd.f32 %v9913_v61, %v5597_v9  ;;  %v11332_v4 = vld [vmem:[#allocation8_spill] sm:$0xff]  ;;  %v11333_v61 = vld [vmem:[#allocation33_spill] sm:$0xff] }
 0x727   :  { %v5023_v0 = vadd.f32 %v5022_v29, %v4934_v20  ;;  %v5024_v40 = vpop.f32.mrf.mxu2  ;;  %v11334_v29 = vld [vmem:[#allocation48_spill] sm:$0xff] }
 0x728   :  { %v4757_v43 = vpop.f32.mrf.mxu3  ;;  %v4849_v46 = vpop.f32.mrf.mxu0 }
 0x729   :  { %v5463_v41 = vmax.f32 %v5023_v0, 0.0  ;;  %v4758_v25 = vadd.f32 %v4757_v43, %v10302_v13  ;;  %v4938_v6 = vpop.f32.mrf.mxu1 }
 0x72b   :  { %v5601_v39 = vmul.f32 %v10322_v17, %v5463_v41  ;;  %v4847_v15 = vadd.f32 %v4846_v44, %v4758_v25  ;;  %4888 = vmatmul.bf16.gmra.mxu0 %v11222_v56 }
 0x72c   :  { %4977 = vmatmul.bf16.gmra.mxu1 %v11331_v12  ;;  %6955 = vmatmul.msk.bf16.gmra.mxu2 %vm1706_vm0, %v11333_v61 }
 0x72d   :  { %v4936_v2 = vadd.f32 %v4935_v22, %v4847_v15  ;;  %4799 = vmatmul.bf16.gmra.mxu3 %v11332_v4  ;;  %v10359_v20 = vadd.f32 %v11334_v29, %v5601_v39  ;;  %v7084_v22 = vld [vmem:[%s10795_s5 + $0x2c] sm:$0xf]  ;;  %v6541_v39 = vld [vmem:[%s10795_s5 + $0x38] sm:$0xf0] }
 0x72e   :  { %v6544_v15 = vor.u32 %v7084_v22, %v6541_v39  ;;  %v7116_v22 = vld [vmem:[%s10795_s5 + $0x12c] sm:$0xf] }
 0x72f   :  { %11335 = vst [vmem:[#allocation17_spill] sm:$0xff] %v10359_v20  ;;  %v5025_v55 = vadd.f32 %v5024_v40, %v4936_v2  ;;  %v5027_v9 = vpop.f32.mrf.mxu2  ;;  %v11339_v39 = vld [vmem:[#allocation35_spill] sm:$0xff] }
 0x730   :  { %v4760_v27 = vpop.f32.mrf.mxu3  ;;  %v4851_v44 = vpop.f32.mrf.mxu0  ;;  %5103 = vmatpush.bf16.msrb.mxu3 %v6544_v15 }
 0x731   :  { %v5467_v60 = vmax.f32 %v5025_v55, 0.0  ;;  %v4761_v0 = vadd.f32 %v4760_v27, %v10302_v13  ;;  %v4940_v43 = vpop.f32.mrf.mxu1 }
 0x733   :  { %v5605_v41 = vmul.f32 %v10322_v17, %v5467_v60  ;;  %v4850_v25 = vadd.f32 %v4849_v46, %v4761_v0 }
 0x735   :  { %v4939_v40 = vadd.f32 %v4938_v6, %v4850_v25  ;;  %v10370_v2 = vadd.f32 %v9936_v36, %v5605_v41  ;;  %v6669_v36 = vld [vmem:[%s10795_s5 + $0x138] sm:$0xf0]  ;;  %v7148_v6 = vld [vmem:[%s10795_s5 + $0x22c] sm:$0xf]  ;;  %v11338_v25 = vld [vmem:[#allocation6_spill] sm:$0xff] }
 0x736   :  { %v6672_v41 = vor.u32 %v7116_v22, %v6669_v36 }
 0x737   :  { %11336 = vst [vmem:[#allocation20_spill] sm:$0xff] %v10370_v2  ;;  %v5028_v29 = vadd.f32 %v5027_v9, %v4939_v40  ;;  %v5029_v27 = vpop.f32.mrf.mxu2  ;;  %v11337_v9 = vld [vmem:[#allocation72_spill] sm:$0xff]  ;;  %v11340_v40 = vld [vmem:[#allocation19_spill] sm:$0xff] }
 0x738   :  { %v4762_v55 = vpop.f32.mrf.mxu3  ;;  %v4854_v60 = vpop.f32.mrf.mxu0  ;;  %5192 = vmatpush.bf16.msrb.mxu0 %v6672_v41 }
 0x739   :  { %v5471_v20 = vmax.f32 %v5028_v29, 0.0  ;;  %v4763_v46 = vadd.f32 %v4762_v55, %v10302_v13  ;;  %v4943_v0 = vpop.f32.mrf.mxu1 }
 0x73b   :  { %v5609_v61 = vmul.f32 %v10322_v17, %v5471_v20  ;;  %v4852_v4 = vadd.f32 %v4851_v44, %v4763_v46  ;;  %4893 = vmatmul.bf16.gmra.mxu0 %v11262_v50  ;;  %v6797_v20 = vld [vmem:[%s10795_s5 + $0x238] sm:$0xf0] }
 0x73c   :  { %4982 = vmatmul.bf16.gmra.mxu1 %v11337_v9  ;;  %6956 = vmatmul.msk.bf16.gmra.mxu2 %vm1706_vm0, %v11339_v39  ;;  %v6800_v15 = vor.u32 %v7148_v6, %v6797_v20 }
 0x73d   :  { %v4941_v44 = vadd.f32 %v4940_v43, %v4852_v4  ;;  %4804 = vmatmul.bf16.gmra.mxu3 %v11338_v25  ;;  %v10392_v29 = vadd.f32 %v11340_v40, %v5609_v61 }
 0x73e   :  { %5281 = vmatpush.bf16.msrb.mxu1 %v6800_v15 }
 0x73f   :  { %v5030_v55 = vadd.f32 %v5029_v27, %v4941_v44  ;;  %v5032_v9 = vpop.f32.mrf.mxu2 }
 0x740   :  { %v4765_v46 = vpop.f32.mrf.mxu3  ;;  %v4856_v50 = vpop.f32.mrf.mxu0 }
 0x741   :  { %v5475_v22 = vmax.f32 %v5030_v55, 0.0  ;;  %v4766_v36 = vadd.f32 %v4765_v46, %v10302_v13  ;;  %v4945_v2 = vpop.f32.mrf.mxu1  ;;  %v11341_v46 = vld [vmem:[#allocation73_spill] sm:$0xff] }
 0x743   :  { %v5613_v4 = vmul.f32 %v10322_v17, %v5475_v22  ;;  %v4855_v43 = vadd.f32 %v4854_v60, %v4766_v36 }
 0x745   :  { %v4944_v25 = vadd.f32 %v4943_v0, %v4855_v43  ;;  %v10397_v39 = vadd.f32 %v9965_v10, %v5613_v4  ;;  %v11342_v0 = vld [vmem:[#allocation9_spill] sm:$0xff]  ;;  %v11343_v10 = vld [vmem:[#allocation36_spill] sm:$0xff] }
 0x747   :  { %v5033_v6 = vadd.f32 %v5032_v9, %v4944_v25  ;;  %v5034_v20 = vpop.f32.mrf.mxu2  ;;  %v11344_v9 = vld [vmem:[#allocation65_spill] sm:$0xff] }
 0x748   :  { %v4767_v61 = vpop.f32.mrf.mxu3  ;;  %v4859_v44 = vpop.f32.mrf.mxu0 }
 0x749   :  { %v5479_v41 = vmax.f32 %v5033_v6, 0.0  ;;  %v4768_v27 = vadd.f32 %v4767_v61, %v10302_v13  ;;  %v4948_v15 = vpop.f32.mrf.mxu1 }
 0x74b   :  { %v5617_v40 = vmul.f32 %v10322_v17, %v5479_v41  ;;  %v4857_v55 = vadd.f32 %v4856_v50, %v4768_v27  ;;  %4898 = vmatmul.bf16.gmra.mxu0 %v11228_v45 }
 0x74c   :  { %4987 = vmatmul.bf16.gmra.mxu1 %v11341_v46  ;;  %6957 = vmatmul.msk.bf16.gmra.mxu2 %vm1706_vm0, %v11343_v10  ;;  %v11352_v46 = vld [vmem:[#allocation39_spill] sm:$0xff] }
 0x74d   :  { %v4946_v60 = vadd.f32 %v4945_v2, %v4857_v55  ;;  %4809 = vmatmul.bf16.gmra.mxu3 %v11342_v0  ;;  %v10407_v25 = vadd.f32 %v11344_v9, %v5617_v40  ;;  %v7080_v2 = vld [vmem:[%s10795_s5 + $0xc] sm:$0xf]  ;;  %v6525_v40 = vld [vmem:[%s10795_s5 + $0x18] sm:$0xf0] }
 0x74e   :  { %v6528_v55 = vor.u32 %v7080_v2, %v6525_v40  ;;  %v7112_v2 = vld [vmem:[%s10795_s5 + $0x10c] sm:$0xf]  ;;  %v11349_v40 = vld [vmem:[#allocation34_spill] sm:$0xff] }
 0x74f   :  { %11345 = vst [vmem:[#allocation10_spill] sm:$0xff] %v10407_v25  ;;  %v5035_v22 = vadd.f32 %v5034_v20, %v4946_v60  ;;  %v5037_v4 = vpop.f32.mrf.mxu2 }
 0x750   :  { %v4770_v36 = vpop.f32.mrf.mxu3  ;;  %v4861_v50 = vpop.f32.mrf.mxu0  ;;  %5104 = vmatpush.bf16.msrb.mxu3 %v6528_v55 }
 0x751   :  { %v5483_v43 = vmax.f32 %v5035_v22, 0.0  ;;  %v4771_v6 = vadd.f32 %v4770_v36, %v10302_v13  ;;  %v4950_v61 = vpop.f32.mrf.mxu1 }
 0x753   :  { %v5621_v41 = vmul.f32 %v10322_v17, %v5483_v43  ;;  %v4860_v27 = vadd.f32 %v4859_v44, %v4771_v6 }
 0x755   :  { %v4949_v20 = vadd.f32 %v4948_v15, %v4860_v27  ;;  %v10418_v60 = vadd.f32 %v9988_v48, %v5621_v41  ;;  %v6653_v48 = vld [vmem:[%s10795_s5 + $0x118] sm:$0xf0]  ;;  %v7144_v15 = vld [vmem:[%s10795_s5 + $0x20c] sm:$0xf] }
 0x756   :  { %v6656_v41 = vor.u32 %v7112_v2, %v6653_v48  ;;  %v11348_v27 = vld [vmem:[#allocation11_spill] sm:$0xff] }
 0x757   :  { %11346 = vst [vmem:[#allocation38_spill] sm:$0xff] %v10418_v60  ;;  %v5038_v9 = vadd.f32 %v5037_v4, %v4949_v20  ;;  %v5039_v36 = vpop.f32.mrf.mxu2  ;;  %v11347_v4 = vld [vmem:[#allocation23_spill] sm:$0xff]  ;;  %v11350_v20 = vld [vmem:[#allocation57_spill] sm:$0xff] }
 0x758   :  { %v4772_v22 = vpop.f32.mrf.mxu3  ;;  %v4864_v43 = vpop.f32.mrf.mxu0  ;;  %5193 = vmatpush.bf16.msrb.mxu0 %v6656_v41 }
 0x759   :  { %v5487_v25 = vmax.f32 %v5038_v9, 0.0  ;;  %v4773_v44 = vadd.f32 %v4772_v22, %v10302_v13  ;;  %v4953_v6 = vpop.f32.mrf.mxu1 }
 0x75b   :  { %v5625_v10 = vmul.f32 %v10322_v17, %v5487_v25  ;;  %v4862_v0 = vadd.f32 %v4861_v50, %v4773_v44  ;;  %4903 = vmatmul.bf16.gmra.mxu0 %v11272_v8  ;;  %v6781_v25 = vld [vmem:[%s10795_s5 + $0x218] sm:$0xf0]  ;;  %s7261_s5 = smov [#allocation3]  }
 0x75c   :  { %4992 = vmatmul.bf16.gmra.mxu1 %v11347_v4  ;;  %6958 = vmatmul.msk.bf16.gmra.mxu2 %vm1706_vm0, %v11349_v40  ;;  %v6784_v55 = vor.u32 %v7144_v15, %v6781_v25  ;;  %s6038_s7 = sshll.u32 %s7261_s5, 4  ;;  %s6039_s7 = int_to_ptr.vmem [resolvable:$true] %s6038_s7 }
 0x75d   :  { %v4951_v50 = vadd.f32 %v4950_v61, %v4862_v0  ;;  %4814 = vmatmul.bf16.gmra.mxu3 %v11348_v27  ;;  %v10440_v9 = vadd.f32 %v11350_v20, %v5625_v10 }
 0x75e   :  { %5282 = vmatpush.bf16.msrb.mxu1 %v6784_v55 }
 0x75f   :  { %11351 = vst [vmem:[#allocation16_spill] sm:$0xff] %v10440_v9  ;;  %v5040_v22 = vadd.f32 %v5039_v36, %v4951_v50  ;;  %v5042_v4 = vpop.f32.mrf.mxu2  ;;  %v11354_v9 = vld [vmem:[#allocation24_spill] sm:$0xff] }
 0x760   :  { %v4775_v44 = vpop.f32.mrf.mxu3  ;;  %v4866_v8 = vpop.f32.mrf.mxu0 }
 0x761   :  { %v5491_v2 = vmax.f32 %v5040_v22, 0.0  ;;  %v4776_v48 = vadd.f32 %v4775_v44, %v10302_v13  ;;  %v4955_v60 = vpop.f32.mrf.mxu1  ;;  %v11353_v44 = vld [vmem:[#allocation52_spill] sm:$0xff] }
 0x763   :  { %v5629_v0 = vmul.f32 %v10322_v17, %v5491_v2  ;;  %v4865_v61 = vadd.f32 %v4864_v43, %v4776_v48 }
 0x765   :  { %v4954_v27 = vadd.f32 %v4953_v6, %v4865_v61  ;;  %v10445_v40 = vadd.f32 %v11352_v46, %v5629_v0  ;;  %v11355_v6 = vld [vmem:[#allocation12_spill] sm:$0xff]  ;;  %v11356_v46 = vld [vmem:[#allocation37_spill] sm:$0xff] }
 0x767   :  { %v5043_v15 = vadd.f32 %v5042_v4, %v4954_v27  ;;  %v5044_v25 = vpop.f32.mrf.mxu2  ;;  %v11357_v4 = vld [vmem:[#allocation51_spill] sm:$0xff] }
 0x768   :  { %v4777_v10 = vpop.f32.mrf.mxu3  ;;  %v4869_v50 = vpop.f32.mrf.mxu0 }
 0x769   :  { %v5495_v41 = vmax.f32 %v5043_v15, 0.0  ;;  %v4778_v36 = vadd.f32 %v4777_v10, %v10302_v13  ;;  %v4958_v55 = vpop.f32.mrf.mxu1 }
 0x76b   :  { %v5633_v20 = vmul.f32 %v10322_v17, %v5495_v41  ;;  %v4867_v22 = vadd.f32 %v4866_v8, %v4778_v36  ;;  %4908 = vmatmul.bf16.gmra.mxu0 %v11353_v44 }
 0x76c   :  { %4997 = vmatmul.bf16.gmra.mxu1 %v11354_v9  ;;  %6959 = vmatmul.msk.bf16.gmra.mxu2 %vm1706_vm0, %v11356_v46 }
 0x76d   :  { %v4956_v43 = vadd.f32 %v4955_v60, %v4867_v22  ;;  %4819 = vmatmul.bf16.gmra.mxu3 %v11355_v6  ;;  %v10455_v27 = vadd.f32 %v11357_v4, %v5633_v20 }
 0x76f   :  { %11358 = vst [vmem:[#allocation40_spill] sm:$0xff] %v10455_v27  ;;  %v5045_v2 = vadd.f32 %v5044_v25, %v4956_v43  ;;  %v5047_v0 = vpop.f32.mrf.mxu2  ;;  %v11359_v27 = vld [vmem:[#allocation22_spill] sm:$0xff] }
 0x770   :  { %v4780_v48 = vpop.f32.mrf.mxu3  ;;  %v4871_v8 = vpop.f32.mrf.mxu0 }
 0x771   :  { %v5499_v61 = vmax.f32 %v5045_v2, 0.0  ;;  %v4781_v15 = vadd.f32 %v4780_v48, %v10302_v13  ;;  %v4960_v10 = vpop.f32.mrf.mxu1 }
 0x773   :  { %v5637_v41 = vmul.f32 %v10322_v17, %v5499_v61  ;;  %v4870_v36 = vadd.f32 %v4869_v50, %v4781_v15 }
 0x775   :  { %v4959_v60 = vadd.f32 %v4958_v55, %v4870_v36  ;;  %v10460_v22 = vadd.f32 %v10040_v30, %v5637_v41  ;;  %v11360_v55 = vld [vmem:[#allocation13_spill] sm:$0xff] }
 0x776   :  { %v11361_v30 = vld [vmem:[#allocation45_spill] sm:$0xff] }
 0x777   :  { %v5048_v6 = vadd.f32 %v5047_v0, %v4959_v60  ;;  %v5049_v9 = vpop.f32.mrf.mxu2  ;;  %v11362_v0 = vld [vmem:[#allocation42_spill] sm:$0xff] }
 0x778   :  { %v4782_v46 = vpop.f32.mrf.mxu3  ;;  %v4874_v43 = vpop.f32.mrf.mxu0 }
 0x779   :  { %v5503_v20 = vmax.f32 %v5048_v6, 0.0  ;;  %v4783_v25 = vadd.f32 %v4782_v46, %v10302_v13  ;;  %v4963_v4 = vpop.f32.mrf.mxu1 }
 0x77b   :  { %v5641_v2 = vmul.f32 %v10322_v17, %v5503_v20  ;;  %v4872_v48 = vadd.f32 %v4871_v8, %v4783_v25  ;;  %4913 = vmatmul.bf16.gmra.mxu0 %v11285_v38 }
 0x77c   :  { %5002 = vmatmul.bf16.gmra.mxu1 %v11359_v27  ;;  %6960 = vmatmul.msk.bf16.gmra.mxu2 %vm1706_vm0, %v11361_v30 }
 0x77d   :  { %v4961_v50 = vadd.f32 %v4960_v10, %v4872_v48  ;;  %4824 = vmatmul.bf16.gmra.mxu3 %v11360_v55  ;;  %v10470_v61 = vadd.f32 %v11362_v0, %v5641_v2 }
 0x77f   :  { %v5050_v6 = vadd.f32 %v5049_v9, %v4961_v50  ;;  %v5052_v15 = vpop.f32.mrf.mxu2 }
 0x780   :  { %v4785_v46 = vpop.f32.mrf.mxu3  ;;  %v4876_v8 = vpop.f32.mrf.mxu0 }
 0x781   :  { %v5507_v41 = vmax.f32 %v5050_v6, 0.0  ;;  %v4786_v36 = vadd.f32 %v4785_v46, %v10302_v13  ;;  %v4965_v60 = vpop.f32.mrf.mxu1 }
 0x783   :  { %v5645_v20 = vmul.f32 %v10322_v17, %v5507_v41  ;;  %v4875_v25 = vadd.f32 %v4874_v43, %v4786_v36 }
 0x785   :  { %v4964_v10 = vadd.f32 %v4963_v4, %v4875_v25  ;;  %v10475_v48 = vadd.f32 %v10075_v59, %v5645_v20 }
 0x787   :  { %v5053_v55 = vadd.f32 %v5052_v15, %v4964_v10  ;;  %v5054_v27 = vpop.f32.mrf.mxu2 }
 0x788   :  { %v4787_v30 = vpop.f32.mrf.mxu3  ;;  %v4879_v50 = vpop.f32.mrf.mxu0 }
 0x789   :  { %v5511_v2 = vmax.f32 %v5053_v55, 0.0  ;;  %v4788_v9 = vadd.f32 %v4787_v30, %v10302_v13  ;;  %v4968_v0 = vpop.f32.mrf.mxu1 }
 0x78b   :  { %v5649_v6 = vmul.f32 %v10322_v17, %v5511_v2  ;;  %v4877_v46 = vadd.f32 %v4876_v8, %v4788_v9  ;;  %5194 = vmatmul.bf16.vlgmr.msrb.gmra.mxu0 %v11185_v28 }
 0x78c   :  { %5283 = vmatmul.bf16.vlgmr.msrb.gmra.mxu1 %v11186_v58  ;;  %6961 = vmatmul.msk.bf16.vlgmr.msrb.gmra.mxu2 %vm1706_vm0, %v9267_v5 }
 0x78d   :  { %v4966_v43 = vadd.f32 %v4965_v60, %v4877_v46  ;;  %5105 = vmatmul.bf16.vlgmr.msrb.gmra.mxu3 %v11187_v54  ;;  %v10485_v59 = vadd.f32 %v10083_v62, %v5649_v6 }
 0x78f   :  { %v5055_v4 = vadd.f32 %v5054_v27, %v4966_v43  ;;  %v5057_v30 = vpop.f32.mrf.mxu2 }
 0x790   :  { %v4790_v55 = vpop.f32.mrf.mxu3  ;;  %v4881_v36 = vpop.f32.mrf.mxu0 }
 0x791   :  { %v5515_v15 = vmax.f32 %v5055_v4, 0.0  ;;  %v4791_v41 = vadd.f32 %v4790_v55, %v10302_v13  ;;  %v4970_v8 = vpop.f32.mrf.mxu1 }
 0x793   :  { %v5653_v28 = vmul.f32 %v10322_v17, %v5515_v15  ;;  %v4880_v58 = vadd.f32 %v4879_v50, %v4791_v41 }
 0x795   :  { %v4969_v60 = vadd.f32 %v4968_v0, %v4880_v58  ;;  %v10490_v54 = vadd.f32 %v10098_v11, %v5653_v28  ;;  %v11363_v11 = vld [vmem:[#allocation25_spill] sm:$0xff]  ;;  %v11364_v0 = vld [vmem:[#allocation46_spill] sm:$0xff] }
 0x797   :  { %v5058_v20 = vadd.f32 %v5057_v30, %v4969_v60  ;;  %v5059_v25 = vpop.f32.mrf.mxu2 }
 0x798   :  { %v4792_v5 = vpop.f32.mrf.mxu3  ;;  %v4884_v10 = vpop.f32.mrf.mxu0 }
 0x799   :  { %v5519_v62 = vmax.f32 %v5058_v20, 0.0  ;;  %v4793_v27 = vadd.f32 %v4792_v5, %v10302_v13  ;;  %v4973_v2 = vpop.f32.mrf.mxu1 }
 0x79b   :  { %v5657_v9 = vmul.f32 %v10322_v17, %v5519_v62  ;;  %v4882_v6 = vadd.f32 %v4881_v36, %v4793_v27  ;;  %5199 = vmatmul.bf16.gmra.mxu0 %v11189_v1 }
 0x79c   :  { %5288 = vmatmul.bf16.gmra.mxu1 %v11289_v24  ;;  %6962 = vmatmul.msk.bf16.gmra.mxu2 %vm1706_vm0, %v11363_v11 }
 0x79d   :  { %v4971_v50 = vadd.f32 %v4970_v8, %v4882_v6  ;;  %5110 = vmatmul.bf16.gmra.mxu3 %v11291_v26  ;;  %v10500_v46 = vadd.f32 %v11364_v0, %v5657_v9 }
 0x79f   :  { %v5060_v43 = vadd.f32 %v5059_v25, %v4971_v50  ;;  %v5062_v55 = vpop.f32.mrf.mxu2 }
 0x7a0   :  { %v4795_v4 = vpop.f32.mrf.mxu3  ;;  %v4886_v41 = vpop.f32.mrf.mxu0 }
 0x7a1   :  { %v5523_v30 = vmax.f32 %v5060_v43, 0.0  ;;  %v4796_v15 = vadd.f32 %v4795_v4, %v10302_v13  ;;  %v4975_v36 = vpop.f32.mrf.mxu1 }
 0x7a3   :  { %v5661_v1 = vmul.f32 %v10322_v17, %v5523_v30  ;;  %v4885_v24 = vadd.f32 %v4884_v10, %v4796_v15 }
 0x7a5   :  { %v4974_v8 = vadd.f32 %v4973_v2, %v4885_v24  ;;  %v10505_v26 = vadd.f32 %v10127_v37, %v5661_v1 }
 0x7a7   :  { %v5063_v28 = vadd.f32 %v5062_v55, %v4974_v8  ;;  %v5064_v60 = vpop.f32.mrf.mxu2 }
 0x7a8   :  { %v4797_v58 = vpop.f32.mrf.mxu3  ;;  %v4889_v25 = vpop.f32.mrf.mxu0 }
 0x7a9   :  { %v5527_v20 = vmax.f32 %v5063_v28, 0.0  ;;  %v4798_v5 = vadd.f32 %v4797_v58, %v10302_v13  ;;  %v4978_v62 = vpop.f32.mrf.mxu1  ;;  %v11365_v28 = vld [vmem:[#allocation64_spill] sm:$0xff] }
 0x7ab   :  { %v5665_v27 = vmul.f32 %v10322_v17, %v5527_v20  ;;  %v4887_v9 = vadd.f32 %v4886_v41, %v4798_v5  ;;  %5204 = vmatmul.bf16.gmra.mxu0 %v11193_v63  ;;  %v11368_v20 = vld [vmem:[#allocation44_spill] sm:$0xff] }
 0x7ac   :  { %5293 = vmatmul.bf16.gmra.mxu1 %v11194_v42  ;;  %6963 = vmatmul.msk.bf16.gmra.mxu2 %vm1706_vm0, %v9303_v18 }
 0x7ad   :  { %v4976_v10 = vadd.f32 %v4975_v36, %v4887_v9  ;;  %5115 = vmatmul.bf16.gmra.mxu3 %v11195_v53  ;;  %v10515_v37 = vadd.f32 %v10135_v33, %v5665_v27 }
 0x7af   :  { %v5065_v2 = vadd.f32 %v5064_v60, %v4976_v10  ;;  %v5067_v50 = vpop.f32.mrf.mxu2  ;;  %v11366_v60 = vld [vmem:[#allocation53_spill] sm:$0xff] }
 0x7b0   :  { %v4800_v6 = vpop.f32.mrf.mxu3  ;;  %v4891_v43 = vpop.f32.mrf.mxu0 }
 0x7b1   :  { %v5531_v11 = vmax.f32 %v5065_v2, 0.0  ;;  %v4801_v0 = vadd.f32 %v4800_v6, %v10302_v13  ;;  %v4980_v4 = vpop.f32.mrf.mxu1 }
 0x7b3   :  { %v5669_v63 = vmul.f32 %v10322_v17, %v5531_v11  ;;  %v4890_v42 = vadd.f32 %v4889_v25, %v4801_v0 }
 0x7b5   :  { %v4979_v55 = vadd.f32 %v4978_v62, %v4890_v42  ;;  %v10520_v53 = vadd.f32 %v10150_v23, %v5669_v63  ;;  %v11367_v23 = vld [vmem:[#allocation27_spill] sm:$0xff] }
 0x7b7   :  { %v5068_v30 = vadd.f32 %v5067_v50, %v4979_v55  ;;  %v5069_v15 = vpop.f32.mrf.mxu2 }
 0x7b8   :  { %v4802_v18 = vpop.f32.mrf.mxu3  ;;  %v4894_v36 = vpop.f32.mrf.mxu0 }
 0x7b9   :  { %v5535_v33 = vmax.f32 %v5068_v30, 0.0  ;;  %v4803_v41 = vadd.f32 %v4802_v18, %v10302_v13  ;;  %v4983_v1 = vpop.f32.mrf.mxu1 }
 0x7bb   :  { %v5673_v24 = vmul.f32 %v10322_v17, %v5535_v33  ;;  %v4892_v8 = vadd.f32 %v4891_v43, %v4803_v41  ;;  %5209 = vmatmul.bf16.gmra.mxu0 %v11293_v52 }
 0x7bc   :  { %5298 = vmatmul.bf16.gmra.mxu1 %v11365_v28  ;;  %6964 = vmatmul.msk.bf16.gmra.mxu2 %vm1706_vm0, %v11367_v23 }
 0x7bd   :  { %v4981_v58 = vadd.f32 %v4980_v4, %v4892_v8  ;;  %5120 = vmatmul.bf16.gmra.mxu3 %v11366_v60  ;;  %v10530_v5 = vadd.f32 %v11368_v20, %v5673_v24 }
 0x7bf   :  { %v5070_v25 = vadd.f32 %v5069_v15, %v4981_v58  ;;  %v5072_v27 = vpop.f32.mrf.mxu2 }
 0x7c0   :  { %v4805_v62 = vpop.f32.mrf.mxu3  ;;  %v4896_v2 = vpop.f32.mrf.mxu0 }
 0x7c1   :  { %v5539_v9 = vmax.f32 %v5070_v25, 0.0  ;;  %v4806_v10 = vadd.f32 %v4805_v62, %v10302_v13  ;;  %v4985_v6 = vpop.f32.mrf.mxu1 }
 0x7c3   :  { %v5677_v52 = vmul.f32 %v10322_v17, %v5539_v9  ;;  %v4895_v50 = vadd.f32 %v4894_v36, %v4806_v10 }
 0x7c5   :  { %v4984_v11 = vadd.f32 %v4983_v1, %v4895_v50  ;;  %v10535_v0 = vadd.f32 %v10179_v57, %v5677_v52  ;;  %v11370_v50 = vld [vmem:[#allocation58_spill] sm:$0xff] }
 0x7c7   :  { %v5073_v43 = vadd.f32 %v5072_v27, %v4984_v11  ;;  %v5074_v63 = vpop.f32.mrf.mxu2  ;;  %v11372_v11 = vld [vmem:[#allocation47_spill] sm:$0xff] }
 0x7c8   :  { %v4807_v4 = vpop.f32.mrf.mxu3  ;;  %v4899_v30 = vpop.f32.mrf.mxu0 }
 0x7c9   :  { %v5543_v42 = vmax.f32 %v5073_v43, 0.0  ;;  %v4808_v55 = vadd.f32 %v4807_v4, %v10302_v13  ;;  %v4988_v18 = vpop.f32.mrf.mxu1 }
 0x7cb   :  { %v5681_v15 = vmul.f32 %v10322_v17, %v5543_v42  ;;  %v4897_v33 = vadd.f32 %v4896_v2, %v4808_v55  ;;  %5214 = vmatmul.bf16.gmra.mxu0 %v11201_v51 }
 0x7cc   :  { %5303 = vmatmul.bf16.gmra.mxu1 %v11202_v35  ;;  %6965 = vmatmul.msk.bf16.gmra.mxu2 %vm1706_vm0, %v9339_v3 }
 0x7cd   :  { %v4986_v41 = vadd.f32 %v4985_v6, %v4897_v33  ;;  %5125 = vmatmul.bf16.gmra.mxu3 %v11203_v7  ;;  %v10545_v57 = vadd.f32 %v10187_v32, %v5681_v15  ;;  %v11369_v6 = vld [vmem:[#allocation66_spill] sm:$0xff] }
 0x7cf   :  { %v5075_v36 = vadd.f32 %v5074_v63, %v4986_v41  ;;  %v5077_v24 = vpop.f32.mrf.mxu2 }
 0x7d0   :  { %v4810_v1 = vpop.f32.mrf.mxu3  ;;  %v4901_v58 = vpop.f32.mrf.mxu0 }
 0x7d1   :  { %v5547_v8 = vmax.f32 %v5075_v36, 0.0  ;;  %v4811_v28 = vadd.f32 %v4810_v1, %v10302_v13  ;;  %v4990_v60 = vpop.f32.mrf.mxu1  ;;  %v11373_v36 = vld [vmem:[#allocation55_spill] sm:$0xff] }
 0x7d3   :  { %v5685_v51 = vmul.f32 %v10322_v17, %v5547_v8  ;;  %v4900_v35 = vadd.f32 %v4899_v30, %v4811_v28 }
 0x7d5   :  { %v4989_v23 = vadd.f32 %v4988_v18, %v4900_v35  ;;  %v10550_v7 = vadd.f32 %v10202_v34, %v5685_v51  ;;  %v11371_v34 = vld [vmem:[#allocation28_spill] sm:$0xff] }
 0x7d7   :  { %v5078_v20 = vadd.f32 %v5077_v24, %v4989_v23  ;;  %v5079_v25 = vpop.f32.mrf.mxu2 }
 0x7d8   :  { %v4812_v3 = vpop.f32.mrf.mxu3  ;;  %v4904_v27 = vpop.f32.mrf.mxu0 }
 0x7d9   :  { %v5551_v32 = vmax.f32 %v5078_v20, 0.0  ;;  %v4813_v62 = vadd.f32 %v4812_v3, %v10302_v13  ;;  %v4993_v9 = vpop.f32.mrf.mxu1  ;;  %v11374_v3 = vld [vmem:[#allocation18_spill] sm:$0xff] }
 0x7db   :  { %v5689_v10 = vmul.f32 %v10322_v17, %v5551_v32  ;;  %v4902_v2 = vadd.f32 %v4901_v58, %v4813_v62  ;;  %5219 = vmatmul.bf16.gmra.mxu0 %v11298_v21  ;;  %v11376_v62 = vld [vmem:[#allocation59_spill] sm:$0xff] }
 0x7dc   :  { %5308 = vmatmul.bf16.gmra.mxu1 %v11369_v6  ;;  %6966 = vmatmul.msk.bf16.gmra.mxu2 %vm1706_vm0, %v11371_v34 }
 0x7dd   :  { %v4991_v52 = vadd.f32 %v4990_v60, %v4902_v2  ;;  %5130 = vmatmul.bf16.gmra.mxu3 %v11370_v50  ;;  %v10560_v43 = vadd.f32 %v11372_v11, %v5689_v10 }
 0x7df   :  { %v5080_v4 = vadd.f32 %v5079_v25, %v4991_v52  ;;  %v5082_v42 = vpop.f32.mrf.mxu2  ;;  %v11375_v25 = vld [vmem:[#allocation67_spill] sm:$0xff] }
 0x7e0   :  { %v4815_v63 = vpop.f32.mrf.mxu3  ;;  %v4906_v18 = vpop.f32.mrf.mxu0 }
 0x7e1   :  { %v5555_v55 = vmax.f32 %v5080_v4, 0.0  ;;  %v4816_v30 = vadd.f32 %v4815_v63, %v10302_v13  ;;  %v4995_v15 = vpop.f32.mrf.mxu1 }
 0x7e3   :  { %v5693_v21 = vmul.f32 %v10322_v17, %v5555_v55  ;;  %v4905_v33 = vadd.f32 %v4904_v27, %v4816_v30  ;;  %v11377_v27 = vld [vmem:[#allocation26_spill] sm:$0xff] }
 0x7e5   :  { %v4994_v41 = vadd.f32 %v4993_v9, %v4905_v33  ;;  %v10565_v1 = vadd.f32 %v11373_v36, %v5693_v21  ;;  %v11378_v9 = vld [vmem:[#allocation54_spill] sm:$0xff] }
 0x7e7   :  { %v5083_v24 = vadd.f32 %v5082_v42, %v4994_v41  ;;  %v5084_v28 = vpop.f32.mrf.mxu2 }
 0x7e8   :  { %v4817_v8 = vpop.f32.mrf.mxu3  ;;  %v4909_v51 = vpop.f32.mrf.mxu0 }
 0x7e9   :  { %v5559_v58 = vmax.f32 %v5083_v24, 0.0  ;;  %v4818_v60 = vadd.f32 %v4817_v8, %v10302_v13  ;;  %v4998_v35 = vpop.f32.mrf.mxu1 }
 0x7eb   :  { %v5697_v23 = vmul.f32 %v10322_v17, %v5559_v58  ;;  %v4907_v20 = vadd.f32 %v4906_v18, %v4818_v60  ;;  %5224 = vmatmul.bf16.gmra.mxu0 %v11374_v3  ;;  %v11379_v58 = vld [vmem:[#allocation21_spill] sm:$0xff]  ;;  %v11380_v60 = vld [vmem:[#allocation68_spill] sm:$0xff] }
 0x7ec   :  { %5313 = vmatmul.bf16.gmra.mxu1 %v11375_v25  ;;  %6967 = vmatmul.msk.bf16.gmra.mxu2 %vm1706_vm0, %v11377_v27 }
 0x7ed   :  { %v4996_v32 = vadd.f32 %v4995_v15, %v4907_v20  ;;  %5135 = vmatmul.bf16.gmra.mxu3 %v11376_v62  ;;  %v10575_v10 = vadd.f32 %v11378_v9, %v5697_v23  ;;  %v11383_v23 = vld [vmem:[#allocation56_spill] sm:$0xff] }
 0x7ef   :  { %v5085_v2 = vadd.f32 %v5084_v28, %v4996_v32  ;;  %v5087_v52 = vpop.f32.mrf.mxu2 }
 0x7f0   :  { %v4820_v6 = vpop.f32.mrf.mxu3  ;;  %v4911_v11 = vpop.f32.mrf.mxu0 }
 0x7f1   :  { %v5563_v50 = vmax.f32 %v5085_v2, 0.0  ;;  %v4821_v34 = vadd.f32 %v4820_v6, %v10302_v13  ;;  %v5000_v4 = vpop.f32.mrf.mxu1 }
 0x7f3   :  { %v5701_v63 = vmul.f32 %v10322_v17, %v5563_v50  ;;  %v4910_v42 = vadd.f32 %v4909_v51, %v4821_v34 }
 0x7f5   :  { %v4999_v55 = vadd.f32 %v4998_v35, %v4910_v42  ;;  %v10580_v30 = vadd.f32 %v10254_v47, %v5701_v63  ;;  %v11381_v35 = vld [vmem:[#allocation60_spill] sm:$0xff]  ;;  %v11382_v47 = vld [vmem:[#allocation29_spill] sm:$0xff] }
 0x7f7   :  { %v5088_v18 = vadd.f32 %v5087_v52, %v4999_v55  ;;  %v5089_v21 = vpop.f32.mrf.mxu2 }
 0x7f8   :  { %v4822_v15 = vpop.f32.mrf.mxu3  ;;  %v4914_v36 = vpop.f32.mrf.mxu0 }
 0x7f9   :  { %v5567_v33 = vmax.f32 %v5088_v18, 0.0  ;;  %v4823_v41 = vadd.f32 %v4822_v15, %v10302_v13  ;;  %v5003_v24 = vpop.f32.mrf.mxu1 }
 0x7fb   :  { %v5705_v8 = vmul.f32 %v10322_v17, %v5567_v33  ;;  %v4912_v28 = vadd.f32 %v4911_v11, %v4823_v41  ;;  %5229 = vmatmul.bf16.gmra.mxu0 %v11379_v58 }
 0x7fc   :  { %5318 = vmatmul.bf16.gmra.mxu1 %v11380_v60  ;;  %6968 = vmatmul.msk.bf16.gmra.mxu2 %vm1706_vm0, %v11382_v47 }
 0x7fd   :  { %v5001_v51 = vadd.f32 %v5000_v4, %v4912_v28  ;;  %5140 = vmatmul.bf16.gmra.mxu3 %v11381_v35  ;;  %v10590_v20 = vadd.f32 %v11383_v23, %v5705_v8  ;;  %v11387_v28 = vld [vmem:[#allocation15_spill] sm:$0xff] }
 0x7ff   :  { %v5090_v3 = vadd.f32 %v5089_v21, %v5001_v51  ;;  %v5092_v32 = vpop.f32.mrf.mxu2 }
 0x800   :  { %v4825_v25 = vpop.f32.mrf.mxu3  ;;  %v4916_v9 = vpop.f32.mrf.mxu0 }
 0x801   :  { %v5571_v62 = vmax.f32 %v5090_v3, 0.0  ;;  %v4826_v27 = vadd.f32 %v4825_v25, %v10302_v13  ;;  %v5005_v2 = vpop.f32.mrf.mxu1 }
 0x803   :  { %v5709_v6 = vmul.f32 %v10322_v17, %v5571_v62  ;;  %v4915_v52 = vadd.f32 %v4914_v36, %v4826_v27  ;;  %v11384_v36 = vld [vmem:[#allocation61_spill] sm:$0xff] }
 0x805   :  { %v5004_v50 = vadd.f32 %v5003_v24, %v4915_v52  ;;  %v10595_v34 = vadd.f32 %v10283_v31, %v5709_v6  ;;  %v11385_v31 = vld [vmem:[#allocation32_spill] sm:$0xff]  ;;  %v11386_v24 = vld [vmem:[#allocation31_spill] sm:$0xff] }
 0x806   :  { %v10605_v8 = vperm.slane %v11386_v24, 3 }
 0x807   :  { %v5093_v11 = vadd.f32 %v5092_v32, %v5004_v50  ;;  %v5094_v63 = vpop.f32.mrf.mxu2  ;;  %v11388_v32 = vld [vmem:[#allocation62_spill] sm:$0xff] }
 0x808   :  { %v4827_v4 = vpop.f32.mrf.mxu3  ;;  %v5195_v18 = vpop.f32.mrf.mxu0 }
 0x809   :  { %v5575_v42 = vmax.f32 %v5093_v11, 0.0  ;;  %v4828_v55 = vadd.f32 %v4827_v4, %v10302_v13  ;;  %v5284_v15 = vpop.f32.mrf.mxu1 }
 0x80b   :  { %v5713_v21 = vmul.f32 %v10322_v17, %v5575_v42  ;;  %v4917_v33 = vadd.f32 %v4916_v9, %v4828_v55  ;;  %5234 = vmatmul.bf16.gmra.mxu0 %v11317_v14  ;;  %v11389_v9 = vld [vmem:[#allocation43_spill] sm:$0xff] }
 0x80c   :  { %5323 = vmatmul.bf16.gmra.mxu1 %v11318_v49  ;;  %6969 = vmatmul.msk.bf16.gmra.mxu2 %vm1706_vm0, %v11385_v31 }
 0x80d   :  { %v5006_v41 = vadd.f32 %v5005_v2, %v4917_v33  ;;  %5145 = vmatmul.bf16.gmra.mxu3 %v11384_v36  ;;  %v10608_v13 = vadd.f32 %v11387_v28, %v5713_v21  ;;  %v10616_v2 = vperm.slane %v11389_v9, 3  ;;  %v11392_v21 = vld [vmem:[#allocation7_spill] sm:$0xff]  ;;  %v11393_v33 = vld [vmem:[#allocation30_spill] sm:$0xff] }
 0x80f   :  { %v5095_v58 = vadd.f32 %v5094_v63, %v5006_v41  ;;  %v5373_v51 = vpop.f32.mrf.mxu2 }
 0x810   :  { %v5106_v60 = vpop.f32.mrf.mxu3  ;;  %v5197_v47 = vpop.f32.mrf.mxu0 }
 0x811   :  { %v5579_v35 = vmax.f32 %v5095_v58, 0.0  ;;  %v5107_v14 = vadd.f32 %v5106_v60, %v10605_v8  ;;  %v5286_v49 = vpop.f32.mrf.mxu1 }
 0x813   :  { %v5717_v23 = vmul.f32 %v10322_v17, %v5579_v35  ;;  %v5196_v3 = vadd.f32 %v5195_v18, %v5107_v14  ;;  %v11390_v17 = vld [vmem:[#allocation41_spill] sm:$0xff]  ;;  %v11391_v18 = vld [vmem:[#allocation70_spill] sm:$0xff] }
 0x815   :  { %v5285_v25 = vadd.f32 %v5284_v15, %v5196_v3  ;;  %v10613_v62 = vadd.f32 %v11388_v32, %v5717_v23 }
 0x817   :  { %v5374_v27 = vadd.f32 %v5373_v51, %v5285_v25  ;;  %v5375_v52 = vpop.f32.mrf.mxu2 }
 0x818   :  { %v5108_v6 = vpop.f32.mrf.mxu3  ;;  %v5200_v4 = vpop.f32.mrf.mxu0 }
 0x819   :  { %v5456_v50 = vmax.f32 %v5374_v27, 0.0  ;;  %v5109_v11 = vadd.f32 %v5108_v6, %v10605_v8  ;;  %v5289_v63 = vpop.f32.mrf.mxu1 }
 0x81b   :  { %v5594_v42 = vmul.f32 %v10616_v2, %v5456_v50  ;;  %v5198_v55 = vadd.f32 %v5197_v47, %v5109_v11  ;;  %5239 = vmatmul.bf16.gmra.mxu0 %v11390_v17 }
 0x81c   :  { %5328 = vmatmul.bf16.gmra.mxu1 %v11391_v18  ;;  %6970 = vmatmul.msk.bf16.gmra.mxu2 %vm1706_vm0, %v11393_v33 }
 0x81d   :  { %v5287_v15 = vadd.f32 %v5286_v49, %v5198_v55  ;;  %5150 = vmatmul.bf16.gmra.mxu3 %v11392_v21  ;;  %v5721_v41 = vsel %vm1706_vm0, %v5594_v42, 0.0  ;;  %v11396_v55 = vld [vmem:[#allocation17_spill] sm:$0xff] }
 0x81e   :  { %v5722_v36 = vadd.f32 %v5721_v41, %v10344_v16 }
 0x81f   :  { %v5376_v31 = vadd.f32 %v5375_v52, %v5287_v15  ;;  %v5378_v28 = vpop.f32.mrf.mxu2 }
 0x820   :  { %v5111_v24 = vpop.f32.mrf.mxu3  ;;  %5723 = vadd.xlane.f32.xlu2 %v5722_v36  ;;  %v5202_v51 = vpop.f32.mrf.mxu0 }
 0x821   :  { %v5460_v58 = vmax.f32 %v5376_v31, 0.0  ;;  %v5112_v60 = vadd.f32 %v5111_v24, %v10605_v8  ;;  %v5291_v35 = vpop.f32.mrf.mxu1 }
 0x823   :  { %v5598_v14 = vmul.f32 %v10616_v2, %v5460_v58  ;;  %v5201_v47 = vadd.f32 %v5200_v4, %v5112_v60  ;;  %v11397_v58 = vld [vmem:[#allocation20_spill] sm:$0xff] }
 0x825   :  { %v5290_v49 = vadd.f32 %v5289_v63, %v5201_v47  ;;  %v5727_v23 = vsel %vm1706_vm0, %v5598_v14, 0.0  ;;  %v11394_v63 = vld [vmem:[#allocation8_spill] sm:$0xff] }
 0x826   :  { %v5728_v3 = vadd.f32 %v5727_v23, %v10349_v19  ;;  %v11395_v19 = vld [vmem:[#allocation33_spill] sm:$0xff] }
 0x827   :  { %v5379_v25 = vadd.f32 %v5378_v28, %v5290_v49  ;;  %v5380_v16 = vpop.f32.mrf.mxu2 }
 0x828   :  { %v5113_v32 = vpop.f32.mrf.mxu3  ;;  %5729 = vadd.xlane.f32.xlu0 %v5728_v3  ;;  %v5205_v6 = vpop.f32.mrf.mxu0 }
 0x829   :  { %v5464_v27 = vmax.f32 %v5379_v25, 0.0  ;;  %v5114_v9 = vadd.f32 %v5113_v32, %v10605_v8  ;;  %v5294_v52 = vpop.f32.mrf.mxu1 }
 0x82b   :  { %v5602_v50 = vmul.f32 %v10616_v2, %v5464_v27  ;;  %v5203_v11 = vadd.f32 %v5202_v51, %v5114_v9  ;;  %5244 = vmatmul.bf16.gmra.mxu0 %v11222_v56  ;;  %v11399_v27 = vld [vmem:[#allocation72_spill] sm:$0xff] }
 0x82c   :  { %5333 = vmatmul.bf16.gmra.mxu1 %v11331_v12  ;;  %6971 = vmatmul.msk.bf16.gmra.mxu2 %vm1706_vm0, %v11395_v19 }
 0x82d   :  { %v5292_v4 = vadd.f32 %v5291_v35, %v5203_v11  ;;  %5155 = vmatmul.bf16.gmra.mxu3 %v11394_v63  ;;  %v5733_v42 = vsel %vm1706_vm0, %v5602_v50, 0.0 }
 0x82e   :  { %v5734_v17 = vadd.f32 %v5733_v42, %v11396_v55 }
 0x82f   :  { %v5381_v18 = vadd.f32 %v5380_v16, %v5292_v4  ;;  %v5383_v21 = vpop.f32.mrf.mxu2  ;;  %v11398_v16 = vld [vmem:[#allocation50_spill] sm:$0xff] }
 0x830   :  { %v5116_v15 = vpop.f32.mrf.mxu3  ;;  %5735 = vadd.xlane.f32.xlu1 %v5734_v17  ;;  %v5207_v56 = vpop.f32.mrf.mxu0 }
 0x831   :  { %v5468_v33 = vmax.f32 %v5381_v18, 0.0  ;;  %v5117_v41 = vadd.f32 %v5116_v15, %v10605_v8  ;;  %v5296_v36 = vpop.f32.mrf.mxu1 }
 0x833   :  { %v5606_v12 = vmul.f32 %v10616_v2, %v5468_v33  ;;  %v5206_v31 = vadd.f32 %v5205_v6, %v5117_v41  ;;  %v11400_v6 = vld [vmem:[#allocation6_spill] sm:$0xff] }
 0x835   :  { %v5295_v24 = vadd.f32 %v5294_v52, %v5206_v31  ;;  %v5739_v28 = vsel %vm1706_vm0, %v5606_v12, 0.0  ;;  %v11401_v52 = vld [vmem:[#allocation35_spill] sm:$0xff] }
 0x836   :  { %v5740_v60 = vadd.f32 %v5739_v28, %v11397_v58 }
 0x837   :  { %v5384_v51 = vadd.f32 %v5383_v21, %v5295_v24  ;;  %v5385_v14 = vpop.f32.mrf.mxu2 }
 0x838   :  { %v5118_v35 = vpop.f32.mrf.mxu3  ;;  %5741 = vadd.xlane.f32.xlu2 %v5740_v60  ;;  %v5210_v23 = vpop.f32.mrf.mxu0 }
 0x839   :  { %v5472_v47 = vmax.f32 %v5384_v51, 0.0  ;;  %v5119_v49 = vadd.f32 %v5118_v35, %v10605_v8  ;;  %v5299_v3 = vpop.f32.mrf.mxu1  ;;  %v11402_v35 = vld [vmem:[#allocation73_spill] sm:$0xff] }
 0x83b   :  { %v5610_v25 = vmul.f32 %v10616_v2, %v5472_v47  ;;  %v5208_v32 = vadd.f32 %v5207_v56, %v5119_v49  ;;  %5249 = vmatmul.bf16.gmra.mxu0 %v11398_v16  ;;  %v11403_v47 = vld [vmem:[#allocation9_spill] sm:$0xff] }
 0x83c   :  { %5338 = vmatmul.bf16.gmra.mxu1 %v11399_v27  ;;  %6972 = vmatmul.msk.bf16.gmra.mxu2 %vm1706_vm0, %v11401_v52 }
 0x83d   :  { %v5297_v9 = vadd.f32 %v5296_v36, %v5208_v32  ;;  %5160 = vmatmul.bf16.gmra.mxu3 %v11400_v6  ;;  %v5745_v50 = vsel %vm1706_vm0, %v5610_v25, 0.0 }
 0x83e   :  { %v5746_v11 = vadd.f32 %v5745_v50, %v10392_v29 }
 0x83f   :  { %v5386_v4 = vadd.f32 %v5385_v14, %v5297_v9  ;;  %v5388_v19 = vpop.f32.mrf.mxu2 }
 0x840   :  { %v5121_v63 = vpop.f32.mrf.mxu3  ;;  %5747 = vadd.xlane.f32.xlu2 %v5746_v11  ;;  %v5212_v17 = vpop.f32.mrf.mxu0 }
 0x841   :  { %v5476_v42 = vmax.f32 %v5386_v4, 0.0  ;;  %v5122_v55 = vadd.f32 %v5121_v63, %v10605_v8  ;;  %v5301_v18 = vpop.f32.mrf.mxu1  ;;  %v11406_v63 = vld [vmem:[#allocation38_spill] sm:$0xff] }
 0x843   :  { %v5614_v15 = vmul.f32 %v10616_v2, %v5476_v42  ;;  %v5211_v21 = vadd.f32 %v5210_v23, %v5122_v55  ;;  %v11405_v23 = vld [vmem:[#allocation10_spill] sm:$0xff] }
 0x845   :  { %v5300_v33 = vadd.f32 %v5299_v3, %v5211_v21  ;;  %v5751_v41 = vsel %vm1706_vm0, %v5614_v15, 0.0 }
 0x846   :  { %v5752_v56 = vadd.f32 %v5751_v41, %v10397_v39  ;;  %v11404_v39 = vld [vmem:[#allocation36_spill] sm:$0xff] }
 0x847   :  { %v5389_v36 = vadd.f32 %v5388_v19, %v5300_v33  ;;  %v5390_v29 = vpop.f32.mrf.mxu2 }
 0x848   :  { %v5123_v12 = vpop.f32.mrf.mxu3  ;;  %5753 = vadd.xlane.f32.xlu0 %v5752_v56  ;;  %v5215_v28 = vpop.f32.mrf.mxu0 }
 0x849   :  { %v5480_v31 = vmax.f32 %v5389_v36, 0.0  ;;  %v5124_v24 = vadd.f32 %v5123_v12, %v10605_v8  ;;  %v5304_v58 = vpop.f32.mrf.mxu1  ;;  %v11407_v36 = vld [vmem:[#allocation49_spill] sm:$0xff]  ;;  %v11408_v12 = vld [vmem:[#allocation23_spill] sm:$0xff] }
 0x84b   :  { %v5618_v60 = vmul.f32 %v10616_v2, %v5480_v31  ;;  %v5213_v51 = vadd.f32 %v5212_v17, %v5124_v24  ;;  %5254 = vmatmul.bf16.gmra.mxu0 %v11228_v45  ;;  %v11409_v31 = vld [vmem:[#allocation11_spill] sm:$0xff]  ;;  %v11410_v24 = vld [vmem:[#allocation34_spill] sm:$0xff] }
 0x84c   :  { %5343 = vmatmul.bf16.gmra.mxu1 %v11402_v35  ;;  %6973 = vmatmul.msk.bf16.gmra.mxu2 %vm1706_vm0, %v11404_v39 }
 0x84d   :  { %v5302_v14 = vadd.f32 %v5301_v18, %v5213_v51  ;;  %5165 = vmatmul.bf16.gmra.mxu3 %v11403_v47  ;;  %v5757_v49 = vsel %vm1706_vm0, %v5618_v60, 0.0 }
 0x84e   :  { %v5758_v3 = vadd.f32 %v5757_v49, %v11405_v23 }
 0x84f   :  { %v5391_v25 = vadd.f32 %v5390_v29, %v5302_v14  ;;  %v5393_v16 = vpop.f32.mrf.mxu2 }
 0x850   :  { %v5126_v32 = vpop.f32.mrf.mxu3  ;;  %5759 = vadd.xlane.f32.xlu1 %v5758_v3  ;;  %v5217_v45 = vpop.f32.mrf.mxu0 }
 0x851   :  { %v5484_v27 = vmax.f32 %v5391_v25, 0.0  ;;  %v5127_v9 = vadd.f32 %v5126_v32, %v10605_v8  ;;  %v5306_v6 = vpop.f32.mrf.mxu1 }
 0x853   :  { %v5622_v52 = vmul.f32 %v10616_v2, %v5484_v27  ;;  %v5216_v50 = vadd.f32 %v5215_v28, %v5127_v9 }
 0x855   :  { %v5305_v11 = vadd.f32 %v5304_v58, %v5216_v50  ;;  %v5763_v4 = vsel %vm1706_vm0, %v5622_v52, 0.0  ;;  %v11411_v58 = vld [vmem:[#allocation16_spill] sm:$0xff] }
 0x856   :  { %v5764_v19 = vadd.f32 %v5763_v4, %v11406_v63 }
 0x857   :  { %v5394_v42 = vadd.f32 %v5393_v16, %v5305_v11  ;;  %v5395_v17 = vpop.f32.mrf.mxu2 }
 0x858   :  { %v5128_v55 = vpop.f32.mrf.mxu3  ;;  %5765 = vadd.xlane.f32.xlu2 %v5764_v19  ;;  %v5220_v21 = vpop.f32.mrf.mxu0 }
 0x859   :  { %v5488_v18 = vmax.f32 %v5394_v42, 0.0  ;;  %v5129_v15 = vadd.f32 %v5128_v55, %v10605_v8  ;;  %v5309_v33 = vpop.f32.mrf.mxu1  ;;  %v11412_v42 = vld [vmem:[#allocation24_spill] sm:$0xff] }
 0x85b   :  { %v5626_v41 = vmul.f32 %v10616_v2, %v5488_v18  ;;  %v5218_v56 = vadd.f32 %v5217_v45, %v5129_v15  ;;  %5259 = vmatmul.bf16.gmra.mxu0 %v11407_v36  ;;  %v11415_v15 = vld [vmem:[#allocation40_spill] sm:$0xff] }
 0x85c   :  { %5348 = vmatmul.bf16.gmra.mxu1 %v11408_v12  ;;  %6974 = vmatmul.msk.bf16.gmra.mxu2 %vm1706_vm0, %v11410_v24 }
 0x85d   :  { %v5307_v29 = vadd.f32 %v5306_v6, %v5218_v56  ;;  %5170 = vmatmul.bf16.gmra.mxu3 %v11409_v31  ;;  %v5769_v28 = vsel %vm1706_vm0, %v5626_v41, 0.0 }
 0x85e   :  { %v5770_v60 = vadd.f32 %v5769_v28, %v11411_v58 }
 0x85f   :  { %v5396_v51 = vadd.f32 %v5395_v17, %v5307_v29  ;;  %v5398_v14 = vpop.f32.mrf.mxu2  ;;  %v11413_v17 = vld [vmem:[#allocation12_spill] sm:$0xff] }
 0x860   :  { %v5131_v35 = vpop.f32.mrf.mxu3  ;;  %5771 = vadd.xlane.f32.xlu0 %v5770_v60  ;;  %v5222_v49 = vpop.f32.mrf.mxu0 }
 0x861   :  { %v5492_v47 = vmax.f32 %v5396_v51, 0.0  ;;  %v5132_v39 = vadd.f32 %v5131_v35, %v10605_v8  ;;  %v5311_v23 = vpop.f32.mrf.mxu1 }
 0x863   :  { %v5630_v3 = vmul.f32 %v10616_v2, %v5492_v47  ;;  %v5221_v25 = vadd.f32 %v5220_v21, %v5132_v39 }
 0x865   :  { %v5310_v32 = vadd.f32 %v5309_v33, %v5221_v25  ;;  %v5775_v16 = vsel %vm1706_vm0, %v5630_v3, 0.0 }
 0x866   :  { %v5776_v27 = vadd.f32 %v5775_v16, %v10445_v40  ;;  %v11414_v40 = vld [vmem:[#allocation37_spill] sm:$0xff] }
 0x867   :  { %v5399_v9 = vadd.f32 %v5398_v14, %v5310_v32  ;;  %v5400_v6 = vpop.f32.mrf.mxu2  ;;  %v11416_v32 = vld [vmem:[#allocation22_spill] sm:$0xff] }
 0x868   :  { %v5133_v45 = vpop.f32.mrf.mxu3  ;;  %5777 = vadd.xlane.f32.xlu1 %v5776_v27  ;;  %v5225_v11 = vpop.f32.mrf.mxu0  ;;  %v11417_v27 = vld [vmem:[#allocation13_spill] sm:$0xff] }
 0x869   :  { %v5496_v52 = vmax.f32 %v5399_v9, 0.0  ;;  %v5134_v50 = vadd.f32 %v5133_v45, %v10605_v8  ;;  %v5314_v4 = vpop.f32.mrf.mxu1 }
 0x86b   :  { %v5634_v63 = vmul.f32 %v10616_v2, %v5496_v52  ;;  %v5223_v19 = vadd.f32 %v5222_v49, %v5134_v50  ;;  %5264 = vmatmul.bf16.gmra.mxu0 %v11353_v44 }
 0x86c   :  { %5353 = vmatmul.bf16.gmra.mxu1 %v11412_v42  ;;  %6975 = vmatmul.msk.bf16.gmra.mxu2 %vm1706_vm0, %v11414_v40 }
 0x86d   :  { %v5312_v55 = vadd.f32 %v5311_v23, %v5223_v19  ;;  %5175 = vmatmul.bf16.gmra.mxu3 %v11413_v17  ;;  %v5781_v18 = vsel %vm1706_vm0, %v5634_v63, 0.0 }
 0x86e   :  { %v5782_v21 = vadd.f32 %v5781_v18, %v11415_v15 }
 0x86f   :  { %v5401_v33 = vadd.f32 %v5400_v6, %v5312_v55  ;;  %v5403_v56 = vpop.f32.mrf.mxu2 }
 0x870   :  { %v5136_v41 = vpop.f32.mrf.mxu3  ;;  %5783 = vadd.xlane.f32.xlu2 %v5782_v21  ;;  %v5227_v44 = vpop.f32.mrf.mxu0 }
 0x871   :  { %v5500_v36 = vmax.f32 %v5401_v33, 0.0  ;;  %v5137_v12 = vadd.f32 %v5136_v41, %v10605_v8  ;;  %v5316_v29 = vpop.f32.mrf.mxu1 }
 0x873   :  { %v5638_v31 = vmul.f32 %v10616_v2, %v5500_v36  ;;  %v5226_v24 = vadd.f32 %v5225_v11, %v5137_v12 }
 0x875   :  { %v5315_v28 = vadd.f32 %v5314_v4, %v5226_v24  ;;  %v5787_v58 = vsel %vm1706_vm0, %v5638_v31, 0.0 }
 0x876   :  { %v5788_v60 = vadd.f32 %v5787_v58, %v10460_v22  ;;  %v11418_v22 = vld [vmem:[#allocation45_spill] sm:$0xff] }
 0x877   :  { %v5404_v51 = vadd.f32 %v5403_v56, %v5315_v28  ;;  %v5405_v14 = vpop.f32.mrf.mxu2 }
 0x878   :  { %v5138_v35 = vpop.f32.mrf.mxu3  ;;  %5789 = vadd.xlane.f32.xlu0 %v5788_v60  ;;  %v5230_v49 = vpop.f32.mrf.mxu0 }
 0x879   :  { %v5504_v47 = vmax.f32 %v5404_v51, 0.0  ;;  %v5139_v39 = vadd.f32 %v5138_v35, %v10605_v8  ;;  %v5319_v23 = vpop.f32.mrf.mxu1 }
 0x87b   :  { %v5642_v3 = vmul.f32 %v10616_v2, %v5504_v47  ;;  %v5228_v25 = vadd.f32 %v5227_v44, %v5139_v39  ;;  %5269 = vmatmul.bf16.gmra.mxu0 %v11285_v38 }
 0x87c   :  { %5358 = vmatmul.bf16.gmra.mxu1 %v11416_v32  ;;  %6976 = vmatmul.msk.bf16.gmra.mxu2 %vm1706_vm0, %v11418_v22 }
 0x87d   :  { %v5317_v16 = vadd.f32 %v5316_v29, %v5228_v25  ;;  %5180 = vmatmul.bf16.gmra.mxu3 %v11417_v27  ;;  %v5793_v9 = vsel %vm1706_vm0, %v5642_v3, 0.0 }
 0x87e   :  { %v5794_v45 = vadd.f32 %v5793_v9, %v10470_v61 }
 0x87f   :  { %v5406_v6 = vadd.f32 %v5405_v14, %v5317_v16  ;;  %v5408_v50 = vpop.f32.mrf.mxu2 }
 0x880   :  { %v5141_v52 = vpop.f32.mrf.mxu3  ;;  %5795 = vadd.xlane.f32.xlu1 %v5794_v45  ;;  %v5232_v38 = vpop.f32.mrf.mxu0 }
 0x881   :  { %v5508_v11 = vmax.f32 %v5406_v6, 0.0  ;;  %v5142_v4 = vadd.f32 %v5141_v52, %v10605_v8  ;;  %v5321_v63 = vpop.f32.mrf.mxu1 }
 0x883   :  { %v5646_v19 = vmul.f32 %v10616_v2, %v5508_v11  ;;  %v5231_v42 = vadd.f32 %v5230_v49, %v5142_v4 }
 0x885   :  { %v5320_v55 = vadd.f32 %v5319_v23, %v5231_v42  ;;  %v5799_v17 = vsel %vm1706_vm0, %v5646_v19, 0.0 }
 0x886   :  { %v5800_v40 = vadd.f32 %v5799_v17, %v10475_v48 }
 0x887   :  { %v5409_v18 = vadd.f32 %v5408_v50, %v5320_v55  ;;  %v5410_v61 = vpop.f32.mrf.mxu2 }
 0x888   :  { %v5143_v15 = vpop.f32.mrf.mxu3  ;;  %5801 = vadd.xlane.f32.xlu2 %v5800_v40  ;;  %v5235_v41 = vpop.f32.mrf.mxu0 }
 0x889   :  { %v5512_v21 = vmax.f32 %v5409_v18, 0.0  ;;  %v5144_v33 = vadd.f32 %v5143_v15, %v10605_v8  ;;  %v5324_v56 = vpop.f32.mrf.mxu1 }
 0x88b   :  { %v5650_v36 = vmul.f32 %v10616_v2, %v5512_v21  ;;  %v5233_v12 = vadd.f32 %v5232_v38, %v5144_v33 }
 0x88d   :  { %v5322_v44 = vadd.f32 %v5321_v63, %v5233_v12  ;;  %v5805_v29 = vsel %vm1706_vm0, %v5650_v36, 0.0 }
 0x88e   :  { %v5806_v31 = vadd.f32 %v5805_v29, %v10485_v59 }
 0x88f   :  { %v5411_v24 = vadd.f32 %v5410_v61, %v5322_v44  ;;  %v5413_v48 = vpop.f32.mrf.mxu2 }
 0x890   :  { %v5146_v28 = vpop.f32.mrf.mxu3  ;;  %5807 = vadd.xlane.f32.xlu0 %v5806_v31  ;;  %v5237_v51 = vpop.f32.mrf.mxu0 }
 0x891   :  { %v5516_v58 = vmax.f32 %v5411_v24, 0.0  ;;  %v5147_v60 = vadd.f32 %v5146_v28, %v10605_v8  ;;  %v5326_v35 = vpop.f32.mrf.mxu1 }
 0x893   :  { %v5654_v14 = vmul.f32 %v10616_v2, %v5516_v58  ;;  %v5236_v47 = vadd.f32 %v5235_v41, %v5147_v60 }
 0x895   :  { %v5325_v39 = vadd.f32 %v5324_v56, %v5236_v47  ;;  %v5811_v49 = vsel %vm1706_vm0, %v5654_v14, 0.0 }
 0x896   :  { %v5812_v23 = vadd.f32 %v5811_v49, %v10490_v54 }
 0x897   :  { %v5414_v3 = vadd.f32 %v5413_v48, %v5325_v39  ;;  %v5415_v59 = vpop.f32.mrf.mxu2 }
 0x898   :  { %v5148_v25 = vpop.f32.mrf.mxu3  ;;  %5813 = vadd.xlane.f32.xlu1 %v5812_v23  ;;  %v5240_v27 = vpop.f32.mrf.mxu0 }
 0x899   :  { %v5520_v32 = vmax.f32 %v5414_v3, 0.0  ;;  %v5149_v16 = vadd.f32 %v5148_v25, %v10605_v8  ;;  %v5329_v22 = vpop.f32.mrf.mxu1 }
 0x89b   :  { %v5658_v9 = vmul.f32 %v10616_v2, %v5520_v32  ;;  %v5238_v45 = vadd.f32 %v5237_v51, %v5149_v16 }
 0x89d   :  { %v5327_v6 = vadd.f32 %v5326_v35, %v5238_v45  ;;  %v5817_v52 = vsel %vm1706_vm0, %v5658_v9, 0.0 }
 0x89e   :  { %v5818_v50 = vadd.f32 %v5817_v52, %v10500_v46 }
 0x89f   :  { %v5416_v11 = vadd.f32 %v5415_v59, %v5327_v6  ;;  %v5418_v54 = vpop.f32.mrf.mxu2 }
 0x8a0   :  { %v5151_v4 = vpop.f32.mrf.mxu3  ;;  %5819 = vadd.xlane.f32.xlu2 %v5818_v50  ;;  %v5242_v19 = vpop.f32.mrf.mxu0 }
 0x8a1   :  { %v5524_v38 = vmax.f32 %v5416_v11, 0.0  ;;  %v5152_v63 = vadd.f32 %v5151_v4, %v10605_v8  ;;  %v5331_v42 = vpop.f32.mrf.mxu1 }
 0x8a3   :  { %v5662_v55 = vmul.f32 %v10616_v2, %v5524_v38  ;;  %v5241_v17 = vadd.f32 %v5240_v27, %v5152_v63 }
 0x8a5   :  { %v5330_v40 = vadd.f32 %v5329_v22, %v5241_v17  ;;  %v5823_v18 = vsel %vm1706_vm0, %v5662_v55, 0.0 }
 0x8a6   :  { %v5824_v15 = vadd.f32 %v5823_v18, %v10505_v26 }
 0x8a7   :  { %v5419_v61 = vadd.f32 %v5418_v54, %v5330_v40  ;;  %v5420_v46 = vpop.f32.mrf.mxu2 }
 0x8a8   :  { %v5153_v21 = vpop.f32.mrf.mxu3  ;;  %5825 = vadd.xlane.f32.xlu0 %v5824_v15  ;;  %v5245_v56 = vpop.f32.mrf.mxu0 }
 0x8a9   :  { %v5528_v33 = vmax.f32 %v5419_v61, 0.0  ;;  %v5154_v41 = vadd.f32 %v5153_v21, %v10605_v8  ;;  %v5334_v36 = vpop.f32.mrf.mxu1 }
 0x8ab   :  { %v5666_v12 = vmul.f32 %v10616_v2, %v5528_v33  ;;  %v5243_v44 = vadd.f32 %v5242_v19, %v5154_v41 }
 0x8ad   :  { %v5332_v29 = vadd.f32 %v5331_v42, %v5243_v44  ;;  %v5829_v31 = vsel %vm1706_vm0, %v5666_v12, 0.0 }
 0x8ae   :  { %v5830_v24 = vadd.f32 %v5829_v31, %v10515_v37 }
 0x8af   :  { %v5421_v28 = vadd.f32 %v5420_v46, %v5332_v29  ;;  %v5423_v26 = vpop.f32.mrf.mxu2 }
 0x8b0   :  { %v5156_v48 = vpop.f32.mrf.mxu3  ;;  %5831 = vadd.xlane.f32.xlu1 %v5830_v24  ;;  %v5247_v51 = vpop.f32.mrf.mxu0 }
 0x8b1   :  { %v5532_v58 = vmax.f32 %v5421_v28, 0.0  ;;  %v5157_v60 = vadd.f32 %v5156_v48, %v10605_v8  ;;  %v5336_v35 = vpop.f32.mrf.mxu1 }
 0x8b3   :  { %v5670_v14 = vmul.f32 %v10616_v2, %v5532_v58  ;;  %v5246_v47 = vadd.f32 %v5245_v56, %v5157_v60 }
 0x8b5   :  { %v5335_v39 = vadd.f32 %v5334_v36, %v5246_v47  ;;  %v5835_v49 = vsel %vm1706_vm0, %v5670_v14, 0.0 }
 0x8b6   :  { %v5836_v23 = vadd.f32 %v5835_v49, %v10520_v53 }
 0x8b7   :  { %v5424_v3 = vadd.f32 %v5423_v26, %v5335_v39  ;;  %v5425_v37 = vpop.f32.mrf.mxu2 }
 0x8b8   :  { %v5158_v25 = vpop.f32.mrf.mxu3  ;;  %5837 = vadd.xlane.f32.xlu2 %v5836_v23  ;;  %v5250_v16 = vpop.f32.mrf.mxu0 }
 0x8b9   :  { %v5536_v59 = vmax.f32 %v5424_v3, 0.0  ;;  %v5159_v32 = vadd.f32 %v5158_v25, %v10605_v8  ;;  %v5339_v27 = vpop.f32.mrf.mxu1 }
 0x8bb   :  { %v5674_v22 = vmul.f32 %v10616_v2, %v5536_v59  ;;  %v5248_v9 = vadd.f32 %v5247_v51, %v5159_v32 }
 0x8bd   :  { %v5337_v45 = vadd.f32 %v5336_v35, %v5248_v9  ;;  %v5841_v6 = vsel %vm1706_vm0, %v5674_v22, 0.0 }
 0x8be   :  { %v5842_v52 = vadd.f32 %v5841_v6, %v10530_v5 }
 0x8bf   :  { %v5426_v50 = vadd.f32 %v5425_v37, %v5337_v45  ;;  %v5428_v53 = vpop.f32.mrf.mxu2 }
 0x8c0   :  { %v5161_v11 = vpop.f32.mrf.mxu3  ;;  %5843 = vadd.xlane.f32.xlu0 %v5842_v52  ;;  %v5252_v38 = vpop.f32.mrf.mxu0 }
 0x8c1   :  { %v5540_v4 = vmax.f32 %v5426_v50, 0.0  ;;  %v5162_v54 = vadd.f32 %v5161_v11, %v10605_v8  ;;  %v5341_v63 = vpop.f32.mrf.mxu1 }
 0x8c3   :  { %v5678_v19 = vmul.f32 %v10616_v2, %v5540_v4  ;;  %v5251_v42 = vadd.f32 %v5250_v16, %v5162_v54 }
 0x8c5   :  { %v5340_v55 = vadd.f32 %v5339_v27, %v5251_v42  ;;  %v5847_v17 = vsel %vm1706_vm0, %v5678_v19, 0.0 }
 0x8c6   :  { %v5848_v40 = vadd.f32 %v5847_v17, %v10535_v0 }
 0x8c7   :  { %v5429_v18 = vadd.f32 %v5428_v53, %v5340_v55  ;;  %v5430_v5 = vpop.f32.mrf.mxu2 }
 0x8c8   :  { %v5163_v15 = vpop.f32.mrf.mxu3  ;;  %5849 = vadd.xlane.f32.xlu1 %v5848_v40  ;;  %v5255_v46 = vpop.f32.mrf.mxu0 }
 0x8c9   :  { %v5544_v61 = vmax.f32 %v5429_v18, 0.0  ;;  %v5164_v21 = vadd.f32 %v5163_v15, %v10605_v8  ;;  %v5344_v33 = vpop.f32.mrf.mxu1 }
 0x8cb   :  { %v5682_v41 = vmul.f32 %v10616_v2, %v5544_v61  ;;  %v5253_v56 = vadd.f32 %v5252_v38, %v5164_v21 }
 0x8cd   :  { %v5342_v36 = vadd.f32 %v5341_v63, %v5253_v56  ;;  %v5853_v12 = vsel %vm1706_vm0, %v5682_v41, 0.0 }
 0x8ce   :  { %v5854_v44 = vadd.f32 %v5853_v12, %v10545_v57 }
 0x8cf   :  { %v5431_v29 = vadd.f32 %v5430_v5, %v5342_v36  ;;  %v5433_v0 = vpop.f32.mrf.mxu2 }
 0x8d0   :  { %v5166_v31 = vpop.f32.mrf.mxu3  ;;  %5855 = vadd.xlane.f32.xlu2 %v5854_v44  ;;  %v5257_v48 = vpop.f32.mrf.mxu0 }
 0x8d1   :  { %v5548_v24 = vmax.f32 %v5431_v29, 0.0  ;;  %v5167_v28 = vadd.f32 %v5166_v31, %v10605_v8  ;;  %v5346_v26 = vpop.f32.mrf.mxu1 }
 0x8d3   :  { %v5686_v58 = vmul.f32 %v10616_v2, %v5548_v24  ;;  %v5256_v60 = vadd.f32 %v5255_v46, %v5167_v28 }
 0x8d5   :  { %v5345_v51 = vadd.f32 %v5344_v33, %v5256_v60  ;;  %v5859_v35 = vsel %vm1706_vm0, %v5686_v58, 0.0 }
 0x8d6   :  { %v5860_v14 = vadd.f32 %v5859_v35, %v10550_v7 }
 0x8d7   :  { %v5434_v47 = vadd.f32 %v5433_v0, %v5345_v51  ;;  %v5435_v57 = vpop.f32.mrf.mxu2 }
 0x8d8   :  { %v5168_v39 = vpop.f32.mrf.mxu3  ;;  %5861 = vadd.xlane.f32.xlu0 %v5860_v14  ;;  %v5260_v3 = vpop.f32.mrf.mxu0 }
 0x8d9   :  { %v5552_v49 = vmax.f32 %v5434_v47, 0.0  ;;  %v5169_v23 = vadd.f32 %v5168_v39, %v10605_v8  ;;  %v5349_v25 = vpop.f32.mrf.mxu1 }
 0x8db   :  { %v5690_v37 = vmul.f32 %v10616_v2, %v5552_v49  ;;  %v5258_v59 = vadd.f32 %v5257_v48, %v5169_v23 }
 0x8dd   :  { %v5347_v32 = vadd.f32 %v5346_v26, %v5258_v59  ;;  %v5865_v16 = vsel %vm1706_vm0, %v5690_v37, 0.0 }
 0x8de   :  { %v5866_v27 = vadd.f32 %v5865_v16, %v10560_v43 }
 0x8df   :  { %v5436_v22 = vadd.f32 %v5435_v57, %v5347_v32  ;;  %v5438_v7 = vpop.f32.mrf.mxu2 }
 0x8e0   :  { %v5171_v9 = vpop.f32.mrf.mxu3  ;;  %5867 = vadd.xlane.f32.xlu1 %v5866_v27  ;;  %v5262_v52 = vpop.f32.mrf.mxu0 }
 0x8e1   :  { %v5556_v45 = vmax.f32 %v5436_v22, 0.0  ;;  %v5172_v6 = vadd.f32 %v5171_v9, %v10605_v8  ;;  %v5351_v53 = vpop.f32.mrf.mxu1 }
 0x8e3   :  { %v5694_v50 = vmul.f32 %v10616_v2, %v5556_v45  ;;  %v5261_v11 = vadd.f32 %v5260_v3, %v5172_v6 }
 0x8e5   :  { %v5350_v4 = vadd.f32 %v5349_v25, %v5261_v11  ;;  %v5871_v54 = vsel %vm1706_vm0, %v5694_v50, 0.0 }
 0x8e6   :  { %v5872_v38 = vadd.f32 %v5871_v54, %v10565_v1 }
 0x8e7   :  { %v5439_v63 = vadd.f32 %v5438_v7, %v5350_v4  ;;  %v5440_v43 = vpop.f32.mrf.mxu2 }
 0x8e8   :  { %v5173_v19 = vpop.f32.mrf.mxu3  ;;  %5873 = vadd.xlane.f32.xlu2 %v5872_v38  ;;  %v5265_v18 = vpop.f32.mrf.mxu0 }
 0x8e9   :  { %v5560_v42 = vmax.f32 %v5439_v63, 0.0  ;;  %v5174_v55 = vadd.f32 %v5173_v19, %v10605_v8  ;;  %v5354_v61 = vpop.f32.mrf.mxu1 }
 0x8eb   :  { %v5698_v17 = vmul.f32 %v10616_v2, %v5560_v42  ;;  %v5263_v40 = vadd.f32 %v5262_v52, %v5174_v55  ;;  %v5730_v55 = vpop.xlane.xlu0 %5729 }
 0x8ed   :  { %v5352_v15 = vadd.f32 %v5351_v53, %v5263_v40  ;;  %v5877_v5 = vsel %vm1706_vm0, %v5698_v17, 0.0  ;;  %v5975_v40 = vld [vmem:[#allocation2] sm:$0x1] }
 0x8ee   :  { %v5878_v21 = vadd.f32 %v5877_v5, %v10575_v10 }
 0x8ef   :  { %v5441_v46 = vadd.f32 %v5440_v43, %v5352_v15  ;;  %v5443_v1 = vpop.f32.mrf.mxu2  ;;  %v5724_v43 = vpop.xlane.xlu2 %5723 }
 0x8f0   :  { %v5176_v33 = vpop.f32.mrf.mxu3  ;;  %5879 = vadd.xlane.f32.xlu0 %v5878_v21  ;;  %v5267_v31 = vpop.f32.mrf.mxu0 }
 0x8f1   :  { %v5564_v41 = vmax.f32 %v5441_v46, 0.0  ;;  %v5177_v56 = vadd.f32 %v5176_v33, %v10605_v8  ;;  %v5356_v28 = vpop.f32.mrf.mxu1 }
 0x8f3   :  { %v5702_v36 = vmul.f32 %v10616_v2, %v5564_v41  ;;  %v5266_v12 = vadd.f32 %v5265_v18, %v5177_v56  ;;  %v5736_v18 = vpop.xlane.xlu1 %5735  ;;  %v5754_v15 = vpop.xlane.xlu0 %5753 }
 0x8f5   :  { %v5355_v44 = vadd.f32 %v5354_v61, %v5266_v12  ;;  %v5883_v29 = vsel %vm1706_vm0, %v5702_v36, 0.0 }
 0x8f6   :  { %v5884_v0 = vadd.f32 %v5883_v29, %v10580_v30 }
 0x8f7   :  { %v5444_v24 = vadd.f32 %v5443_v1, %v5355_v44  ;;  %v5445_v58 = vpop.f32.mrf.mxu2  ;;  %v5742_v42 = vpop.xlane.xlu2 %5741 }
 0x8f8   :  { %v5178_v48 = vpop.f32.mrf.mxu3  ;;  %5885 = vadd.xlane.f32.xlu1 %v5884_v0  ;;  %v5270_v57 = vpop.f32.mrf.mxu0 }
 0x8f9   :  { %v5568_v10 = vmax.f32 %v5444_v24, 0.0  ;;  %v5179_v26 = vadd.f32 %v5178_v48, %v10605_v8  ;;  %v5359_v3 = vpop.f32.mrf.mxu1 }
 0x8fb   :  { %v5706_v60 = vmul.f32 %v10616_v2, %v5568_v10  ;;  %v5268_v51 = vadd.f32 %v5267_v31, %v5179_v26  ;;  %v5772_v61 = vpop.xlane.xlu0 %5771 }
 0x8fd   :  { %v5357_v35 = vadd.f32 %v5356_v28, %v5268_v51  ;;  %v5889_v14 = vsel %vm1706_vm0, %v5706_v60, 0.0 }
 0x8fe   :  { %v5890_v47 = vadd.f32 %v5889_v14, %v10590_v20 }
 0x8ff   :  { %v5446_v39 = vadd.f32 %v5445_v58, %v5357_v35  ;;  %v5448_v59 = vpop.f32.mrf.mxu2  ;;  %v5748_v17 = vpop.xlane.xlu2 %5747 }
 0x900   :  { %v5181_v49 = vpop.f32.mrf.mxu3  ;;  %5891 = vadd.xlane.f32.xlu2 %v5890_v47  ;;  %v5272_v45 = vpop.f32.mrf.mxu0 }
 0x901   :  { %v5572_v30 = vmax.f32 %v5446_v39, 0.0  ;;  %v5182_v23 = vadd.f32 %v5181_v49, %v10605_v8  ;;  %v5361_v50 = vpop.f32.mrf.mxu1 }
 0x903   :  { %v5710_v25 = vmul.f32 %v10616_v2, %v5572_v30  ;;  %v5271_v37 = vadd.f32 %v5270_v57, %v5182_v23  ;;  %v5790_v46 = vpop.xlane.xlu0 %5789 }
 0x905   :  { %v5360_v32 = vadd.f32 %v5359_v3, %v5271_v37  ;;  %v5895_v16 = vsel %vm1706_vm0, %v5710_v25, 0.0 }
 0x906   :  { %v5896_v27 = vadd.f32 %v5895_v16, %v10595_v34 }
 0x907   :  { %v5449_v22 = vadd.f32 %v5448_v59, %v5360_v32  ;;  %v5450_v4 = vpop.f32.mrf.mxu2  ;;  %v5766_v5 = vpop.xlane.xlu2 %5765 }
 0x908   :  { %v5183_v9 = vpop.f32.mrf.mxu3  ;;  %5897 = vadd.xlane.f32.xlu0 %v5896_v27 }
 0x909   :  { %v5576_v20 = vmax.f32 %v5449_v22, 0.0  ;;  %v5184_v7 = vadd.f32 %v5183_v9, %v10605_v8 }
 0x90b   :  { %v5714_v6 = vmul.f32 %v10616_v2, %v5576_v20  ;;  %v5273_v52 = vadd.f32 %v5272_v45, %v5184_v7  ;;  %v5808_v1 = vpop.xlane.xlu0 %5807 }
 0x90d   :  { %v5362_v11 = vadd.f32 %v5361_v50, %v5273_v52  ;;  %v5901_v53 = vsel %vm1706_vm0, %v5714_v6, 0.0 }
 0x90e   :  { %v5902_v54 = vadd.f32 %v5901_v53, %v10608_v13  ;;  %v5760_v13 = vpop.xlane.xlu1 %5759 }
 0x90f   :  { %v5451_v38 = vadd.f32 %v5450_v4, %v5362_v11  ;;  %v5784_v21 = vpop.xlane.xlu2 %5783 }
 0x910   :  { %5903 = vadd.xlane.f32.xlu1 %v5902_v54 }
 0x911   :  { %v5580_v34 = vmax.f32 %v5451_v38, 0.0 }
 0x913   :  { %v5718_v63 = vmul.f32 %v10616_v2, %v5580_v34  ;;  %v6028_v34 = vlaneseq }
 0x915   :  { %v5907_v19 = vsel %vm1706_vm0, %v5718_v63, 0.0  ;;  %vm6030_vm10 = vcmp.lt.s32.totalorder %v6028_v34, 256 }
 0x916   :  { %v5908_v8 = vadd.f32 %v5907_v19, %v10613_v62  ;;  %v5778_v2 = vpop.xlane.xlu1 %5777 }
 0x917   :  { %v5802_v33 = vpop.xlane.xlu2 %5801 }
 0x918   :  { %5909 = vadd.xlane.f32.xlu2 %v5908_v8 }
 0x91b   :  { %v5826_v36 = vpop.xlane.xlu0 %5825 }
 0x91e   :  { %v5796_v62 = vpop.xlane.xlu1 %5795 }
 0x91f   :  { %v5820_v41 = vpop.xlane.xlu2 %5819 }
 0x926   :  { %v5814_v56 = vpop.xlane.xlu1 %5813 }
 0x92b   :  { %v5838_v44 = vpop.xlane.xlu2 %5837 }
 0x92e   :  { %v5832_v12 = vpop.xlane.xlu1 %5831 }
 0x930   :  { %5978 = vperm.xlu2 %7218, %v5975_v40  }
 0x931   :  { %5911 = vxpose.xlu0.b32.start [1/16] (narrow) %v5724_v43, 8 }
 0x933   :  { %v5844_v29 = vpop.xlane.xlu0 %5843 }
 0x939   :  { %5912 = vxpose.xlu0.b32.cont [2/16] (narrow) %v5730_v55, 8 }
 0x93b   :  { %v5850_v31 = vpop.xlane.xlu1 %5849 }
 0x941   :  { %5913 = vxpose.xlu0.b32.cont [3/16] (narrow) %v5736_v18, 8  ;;  %v11421_v18 = vmov 0  }
 0x943   :  { %v5856_v0 = vpop.xlane.xlu2 %5855 }
 0x949   :  { %5914 = vxpose.xlu0.b32.cont [4/16] (narrow) %v5742_v42, 8 }
 0x94a   :  { %5943 = vxpose.xlu1.b32.start [1/16] (narrow) %v5820_v41, 8 }
 0x94b   :  { %v5862_v24 = vpop.xlane.xlu0 %5861 }
 0x951   :  { %5915 = vxpose.xlu0.b32.cont [5/16] (narrow) %v5748_v17, 8 }
 0x952   :  { %5944 = vxpose.xlu1.b32.cont [2/16] (narrow) %v5826_v36, 8 }
 0x953   :  { %v5868_v28 = vpop.xlane.xlu1 %5867 }
 0x959   :  { %5916 = vxpose.xlu0.b32.cont [6/16] (narrow) %v5754_v15, 8 }
 0x95a   :  { %5945 = vxpose.xlu1.b32.cont [3/16] (narrow) %v5832_v12, 8 }
 0x95b   :  { %v5874_v48 = vpop.xlane.xlu2 %5873 }
 0x961   :  { %5917 = vxpose.xlu0.b32.cont [7/16] (narrow) %v5760_v13, 8 }
 0x962   :  { %5946 = vxpose.xlu1.b32.cont [4/16] (narrow) %v5838_v44, 8 }
 0x963   :  { %v5880_v10 = vpop.xlane.xlu0 %5879 }
 0x969   :  { %5918 = vxpose.xlu0.b32.cont [8/16] (narrow) %v5766_v5, 8 }
 0x96a   :  { %5947 = vxpose.xlu1.b32.cont [5/16] (narrow) %v5844_v29, 8 }
 0x96b   :  { %v5886_v26 = vpop.xlane.xlu1 %5885 }
 0x971   :  { %5919 = vxpose.xlu0.b32.cont [9/16] (narrow) %v5772_v61, 8 }
 0x972   :  { %5948 = vxpose.xlu1.b32.cont [6/16] (narrow) %v5850_v31, 8 }
 0x973   :  { %v5892_v58 = vpop.xlane.xlu2 %5891 }
 0x979   :  { %5920 = vxpose.xlu0.b32.cont [10/16] (narrow) %v5778_v2, 8 }
 0x97a   :  { %5949 = vxpose.xlu1.b32.cont [7/16] (narrow) %v5856_v0, 8 }
 0x97b   :  { %v5898_v60 = vpop.xlane.xlu0 %5897 }
 0x981   :  { %5921 = vxpose.xlu0.b32.cont [11/16] (narrow) %v5784_v21, 8 }
 0x982   :  { %5950 = vxpose.xlu1.b32.cont [8/16] (narrow) %v5862_v24, 8 }
 0x983   :  { %v5904_v51 = vpop.xlane.xlu1 %5903 }
 0x989   :  { %5922 = vxpose.xlu0.b32.cont [12/16] (narrow) %v5790_v46, 8 }
 0x98a   :  { %5951 = vxpose.xlu1.b32.cont [9/16] (narrow) %v5868_v28, 8 }
 0x98b   :  { %v5910_v35 = vpop.xlane.xlu2 %5909 }
 0x991   :  { %5923 = vxpose.xlu0.b32.cont [13/16] (narrow) %v5796_v62, 8 }
 0x992   :  { %5952 = vxpose.xlu1.b32.cont [10/16] (narrow) %v5874_v48, 8 }
 0x993   :  { %v5979_v14 = vpop.permute.xlu2 %5978 }
 0x994   :  { %v5981_v39 = vperm.slane %v5979_v14, 0 }
 0x999   :  { %5924 = vxpose.xlu0.b32.cont [14/16] (narrow) %v5802_v33, 8 }
 0x99a   :  { %5953 = vxpose.xlu1.b32.cont [11/16] (narrow) %v5880_v10, 8 }
 0x9a1   :  { %5925 = vxpose.xlu0.b32.cont [15/16] (narrow) %v5808_v1, 8 }
 0x9a2   :  { %5954 = vxpose.xlu1.b32.cont [12/16] (narrow) %v5886_v26, 8 }
 0x9a9   :  { %5926 = vxpose.xlu0.b32.end [16/16] (narrow) %v5814_v56, 8 }
 0x9aa   :  { %5955 = vxpose.xlu1.b32.cont [13/16] (narrow) %v5892_v58, 8 }
 0x9b2   :  { %5956 = vxpose.xlu1.b32.cont [14/16] (narrow) %v5898_v60, 8 }
 0x9ba   :  { %5957 = vxpose.xlu1.b32.cont [15/16] (narrow) %v5904_v51, 8 }
 0x9c2   :  { %5958 = vxpose.xlu1.b32.end [16/16] (narrow) %v5910_v35, 8 }
 0x9d5   :  { %v5927_v47 = vpop.trf.xlu0 }
 0x9d6   :  { %v5982_v57 = vadd.f32 %v5981_v39, %v5927_v47 }
 0x9d8   :  { %v6977_v49 = vmul.f32 -1.442695, %v5982_v57 }
 0x9da   :  { %7221 = vpow2.f32 %v6977_v49 }
 0x9e0   :  { %v7222_v30 = vpop.eup %7221 }
 0x9e1   :  { %v5990_v23 = vadd.f32 1.0, %v7222_v30 }
 0x9e3   :  { %7223 = vrcp.f32 %v5990_v23  ;;  %vm5997_vm3 = vweird.f32 %v5990_v23  ;;  %v6003_v53 = vand.u32 2147483648, %v5990_v23  ;;  %v6001_v54 = vand.u32 2147483647, %v5990_v23 }
 0x9e5   :  { %v6004_v43 = vor.u32 1.1754944e-38, %v6003_v53  ;;  %vm6002_vm9 = vcmp.eq.f32.partialorder %v6001_v54, 8.507059e+37 }
 0x9e9   :  { %v7224_v59 = vpop.eup %7223 }
 0x9ea   :  { %v5993_v27 = vmul.f32 %v7224_v59, %v5990_v23  ;;  %vm5998_vm1 = vweird.f32 %v7224_v59 }
 0x9eb   :  { %vm10780_vm4 = vmor %vm5997_vm3, %vm5998_vm1 }
 0x9ec   :  { %v5994_v22 = vsub.f32 1.0, %v5993_v27 }
 0x9ee   :  { %v5959_v3 = vpop.trf.xlu1  ;;  %v5995_v7 = vmul.f32 %v7224_v59, %v5994_v22 }
 0x9ef   :  { %v5983_v25 = vadd.f32 %v5981_v39, %v5959_v3 }
 0x9f0   :  { %v5996_v52 = vadd.f32 %v7224_v59, %v5995_v7 }
 0x9f1   :  { %v6978_v37 = vmul.f32 -1.442695, %v5983_v25 }
 0x9f2   :  { %v6000_v19 = vsel %vm10780_vm4, %v7224_v59, %v5996_v52 }
 0x9f3   :  { %7225 = vpow2.f32 %v6978_v37  ;;  %v6005_v17 = vsel %vm6002_vm9, %v6004_v43, %v6000_v19 }
 0x9f9   :  { %v7226_v32 = vpop.eup %7225 }
 0x9fa   :  { %v5991_v16 = vadd.f32 1.0, %v7226_v32 }
 0x9fc   :  { %7227 = vrcp.f32 %v5991_v16  ;;  %v6018_v6 = vand.u32 2147483648, %v5991_v16  ;;  %v6016_v11 = vand.u32 2147483647, %v5991_v16  ;;  %vm6012_vm5 = vweird.f32 %v5991_v16 }
 0x9fe   :  { %v6019_v63 = vor.u32 1.1754944e-38, %v6018_v6  ;;  %vm6017_vm7 = vcmp.eq.f32.partialorder %v6016_v11, 8.507059e+37 }
 0xa02   :  { %v7228_v9 = vpop.eup %7227 }
 0xa03   :  { %v6008_v20 = vmul.f32 %v7228_v9, %v5991_v16  ;;  %vm6013_vm2 = vweird.f32 %v7228_v9 }
 0xa04   :  { %vm6014_vm6 = vmor %vm6012_vm5, %vm6013_vm2 }
 0xa05   :  { %v6009_v45 = vsub.f32 1.0, %v6008_v20 }
 0xa07   :  { %v6010_v50 = vmul.f32 %v7228_v9, %v6009_v45 }
 0xa09   :  { %v6011_v38 = vadd.f32 %v7228_v9, %v6010_v50 }
 0xa0b   :  { %v6015_v8 = vsel %vm6014_vm6, %v7228_v9, %v6011_v38 }
 0xa0c   :  { %v6020_v42 = vsel %vm6017_vm7, %v6019_v63, %v6015_v8 }
 0xa0d   :  { %v6024_v55 = vrot.slane %v6020_v42, 7 }
 0xa0f   :  { %v6026_v40 = vsel %vm6025_vm8, %v6005_v17, %v6024_v55 }
 0xa10   :  { %7220 = vset.pattern.permute.xlu0 %v11421_v18  ;;  %6032 = vst.msk [vmem:[#allocation3] sm:$0x3] %vm6030_vm10, %v6026_v40 }
 0xa11   :  { %6043 = dma.vmem_to_hbm [thread:$0]  %s6039_s7, 32, %s6041_s10, [#allocation4]  }
 0xa12   :  { %7257 = dma.done.wait [#allocation4], 32  }
 0xa13   :  { %7258 = vsyncadd [#allocation4], 4294967264 }
 0xa14   :  { %6048 = vsyncpa [#allocation4], 1 }

</bundles_post_ra>
